<compile_context>
chip_gen: v5e
topology: v5e:2x2
jax: 0.10.0
libtpu: 0.0.40
codegen_flags: <defaults>
</compile_context>

<pallas_src>
import functools

import jax
import jax.numpy as jnp
from jax.experimental import pallas as pl
from jax.experimental.pallas import tpu as pltpu


def _nce_loss_kernel(*refs, alpha, beta, n_rows, tile_rows, fast_diag, precision):
    if fast_diag:
        (scale_ref, vis_ref, txt_ref, proxy_ref, pos_ref,
         txtpair_ref, pdiag_ref, qdiag_ref,
         loss_ref, rowacc_ref, colmax_ref, colsum_ref) = refs
    else:
        (scale_ref, vis_ref, txt_ref, proxy_ref, pos_ref,
         loss_ref, rowacc_ref, colmax_ref, colsum_ref) = refs

    i = pl.program_id(0)
    last = pl.num_programs(0) - 1
    tr = tile_rows

    @pl.when(i == 0)
    def _init():
        for k in range(3):
            rowacc_ref[k] = jnp.float32(0.0)
        colmax_ref[...] = jnp.full(colmax_ref.shape, -jnp.inf, colmax_ref.dtype)
        colsum_ref[...] = jnp.zeros(colsum_ref.shape, colsum_ref.dtype)

    scale = scale_ref[0]  # exp(temp), precomputed f32 scalar in SMEM.

    # ---- t2v logits for this row tile: single-pass MXU contraction; RHS
    # transpose folded into the contraction dims (no materialized text.T).
    vis = vis_ref[...]                                     # (TR, D) input dtype
    txt = txt_ref[...]                                     # (N,  D) input dtype
    logits = jax.lax.dot_general(
        vis, txt, dimension_numbers=(((1,), (1,)), ((), ())),
        precision=precision,
        preferred_element_type=jnp.float32) * scale        # (TR, N) f32

    # ---- proxy / pos tiles, scaled in-flight (no full-matrix scaled copies).
    proxy = proxy_ref[...].astype(jnp.float32) * scale     # (TR, N) f32
    pos = pos_ref[...].astype(jnp.float32) * scale         # (TR, N) f32

    # ---- diagonals -------------------------------------------------------
    if fast_diag:
        # Small (TR, TR) identity mask only (no (TR, N) iota/compare work).
        eye = (jax.lax.broadcasted_iota(jnp.int32, (tr, tr), 0)
               == jax.lax.broadcasted_iota(jnp.int32, (tr, tr), 1))

        def blk_diag(blk):
            return jnp.sum(jnp.where(eye, blk, 0.0), axis=1, keepdims=True)

        # t2v diagonal: tiny MXU matmul against the paired text rows with the
        # same dot_general config => bit-identical to the `logits` entries.
        diag_blk = jax.lax.dot_general(
            vis, txtpair_ref[...], dimension_numbers=(((1,), (1,)), ((), ())),
            precision=precision,
            preferred_element_type=jnp.float32) * scale    # (TR, TR) f32
        t2v_diag = blk_diag(diag_blk)
        p_diag = blk_diag(pdiag_ref[...].astype(jnp.float32) * scale)
        q_diag = blk_diag(qdiag_ref[...].astype(jnp.float32) * scale)
    else:
        # Fallback for tiles that are not 128-aligned: (TR, N) mask + f32 dot.
        n_cols = proxy_ref.shape[1]
        row_ids = jax.lax.broadcasted_iota(jnp.int32, (tr, n_cols), 0) + i * tr
        col_ids = jax.lax.broadcasted_iota(jnp.int32, (tr, n_cols), 1)
        dmask = row_ids == col_ids

        def tile_diag(m):
            return jnp.sum(jnp.where(dmask, m, 0.0), axis=1, keepdims=True)

        row0 = pl.multiple_of(i * tr, tr)
        txt_pair = txt_ref[pl.ds(row0, tr), :]             # (TR, D)
        t2v_diag = jnp.sum(
            vis.astype(jnp.float32) * txt_pair.astype(jnp.float32),
            axis=1, keepdims=True) * scale
        p_diag = tile_diag(proxy)
        q_diag = tile_diag(pos)

    def process(k, m, diag):
        # (ce_row + ce_col) * n = sum(lse_row) + sum(lse_col) - 2 * diag_sum.
        # Row direction: finalized per tile, reduced to a scalar accumulator.
        m_r = jnp.max(m, axis=1, keepdims=True)                        # (TR, 1)
        lse_r = jnp.log(jnp.sum(jnp.exp(m - m_r), axis=1, keepdims=True)) + m_r
        rowacc_ref[k] = rowacc_ref[k] + jnp.sum(lse_r - 2.0 * diag)

        # Column direction: tile-local max / sum-exp first (the big exp does
        # not serialize behind the running-accumulator read-modify-write),
        # then merge only (1, N) vectors into the online accumulators.
        c_max = jnp.max(m, axis=0, keepdims=True)                      # (1, N)
        c_sum = jnp.sum(jnp.exp(m - c_max), axis=0, keepdims=True)     # (1, N)
        old_max = colmax_ref[k]
        new_max = jnp.maximum(old_max, c_max)
        colsum_ref[k] = (colsum_ref[k] * jnp.exp(old_max - new_max)
                         + c_sum * jnp.exp(c_max - new_max))
        colmax_ref[k] = new_max

    process(0, logits, t2v_diag)
    process(1, proxy, p_diag)
    process(2, pos, q_diag)

    @pl.when(i == last)
    def _finalize():
        inv_n = 1.0 / float(n_rows)

        def matrix_total(k):
            col_lse = jnp.log(colsum_ref[k]) + colmax_ref[k]           # (1, N)
            return (rowacc_ref[k] + jnp.sum(col_lse)) * inv_n

        loss_ref[0] = (matrix_total(0)
                       + alpha * matrix_total(1)
                       + beta * matrix_total(2))


def _vmem_budget_bytes():
    """~82% of the physical VMEM (≈52 MiB on v7x, ≈105 MiB on v5e/v6e)."""
    cap = 64 * 1024 * 1024
    try:
        info = pltpu.get_tpu_info()
        cap = int(getattr(info, "vmem_capacity_bytes", cap)) or cap
    except Exception:
        pass
    return int(cap * 0.82)


def _pick_row_tile(n, n_cols, logit_itemsize, max_tile_bytes):
    """Largest TR dividing n, preferring MXU-friendly multiples of 256, then
    128 (enables the cheap diagonal-block path), then 16/8, while one (TR,
    n_cols) logits tile stays under max_tile_bytes."""
    cap = max(8, max_tile_bytes // max(1, logit_itemsize * n_cols))
    for align in (256, 128, 16, 8):
        tr = min(n, cap)
        tr -= tr % align
        while tr >= align and n % tr:
            tr -= align
        if tr >= align and n % tr == 0:
            return tr
    return n


def _vmem_limit_bytes(n, d, tr, feat_isz, logit_isz, budget, fast_diag):
    feats = 2 * tr * d * feat_isz + n * d * feat_isz
    if fast_diag:
        feats += 2 * tr * d * feat_isz                 # paired text row tiles
    tiles = 2 * 2 * tr * n * logit_isz                 # proxy + pos, double-buffered
    diag = 2 * 2 * tr * tr * logit_isz if fast_diag else 0
    scratch = (6 * n + 64) * 4
    temps = 8 * tr * n * 4                             # f32 logits / exp temporaries
    est = feats + tiles + diag + scratch + temps
    return int(min(budget, max(int(est * 1.25), 32 * 1024 * 1024)))


def nce_learnable_temp_loss(vis_feat, text_feat, temp, proxy_logits, pos_logits,
                            *, l_p_alpha=1.0, l_pos_beta=1.0, row_tile=None,
                            precision=jax.lax.Precision.DEFAULT):
    """Pallas equivalent of NCELearnableTempLoss.forward (with proxy/pos).

    proxy_logits / pos_logits may be bf16 (cast to f32 in-kernel) to halve the
    dominant HBM stream.
    """
    n, d = vis_feat.shape
    assert text_feat.shape == (n, d)
    assert proxy_logits.shape == (n, n)
    assert pos_logits.shape == (n, n)

    feat_isz = jnp.dtype(vis_feat.dtype).itemsize
    logit_isz = jnp.dtype(proxy_logits.dtype).itemsize

    budget = _vmem_budget_bytes()
    text_bytes = n * d * feat_isz
    if text_bytes > int(0.4 * budget):
        # TODO(synk): tile the t2v column dimension (inner pipeline over text
        # column tiles feeding the same online column accumulators) instead of
        # keeping text_feat fully VMEM-resident.
        raise ValueError(
            f"text_feat ({n}x{d}, {text_bytes} B) does not fit comfortably in "
            f"VMEM (budget {budget} B); column-tiled variant not implemented.")

    if row_tile is None:
        max_tile_bytes = max(1 << 20, (budget - text_bytes) // 14)
        tr = _pick_row_tile(n, n, logit_isz, max_tile_bytes)
    else:
        tr = int(row_tile)
        assert n % tr == 0 and (tr % 8 == 0 or tr == n)
    n_tiles = n // tr
    fast_diag = (tr % 128 == 0)

    # exp(temp) computed once outside the kernel (avoids an in-kernel scalar
    # transcendental); the kernel reads the logit scale from SMEM.
    scale_arr = jnp.exp(jnp.asarray(temp, jnp.float32)).reshape((1,))

    kernel = functools.partial(
        _nce_loss_kernel, alpha=float(l_p_alpha), beta=float(l_pos_beta),
        n_rows=n, tile_rows=tr, fast_diag=fast_diag, precision=precision)

    vmem_limit = _vmem_limit_bytes(n, d, tr, feat_isz, logit_isz, budget, fast_diag)

    def build(single_buffer_text):
        if single_buffer_text:
            # text_feat is reused unchanged every step -> one VMEM buffer.
            text_spec = pl.BlockSpec((n, d), lambda i: (0, 0),
                                     pipeline_mode=pl.Buffered(1))
        else:
            text_spec = pl.BlockSpec((n, d), lambda i: (0, 0))
        in_specs = [
            pl.BlockSpec(memory_space=pltpu.MemorySpace.SMEM),   # exp(temp)
            pl.BlockSpec((tr, d), lambda i: (i, 0)),             # vis row tile
            text_spec,                                           # text (resident)
            pl.BlockSpec((tr, n), lambda i: (i, 0)),             # proxy row tile
            pl.BlockSpec((tr, n), lambda i: (i, 0)),             # pos row tile
        ]
        if fast_diag:
            in_specs += [
                pl.BlockSpec((tr, d), lambda i: (i, 0)),         # paired text rows
                pl.BlockSpec((tr, tr), lambda i: (i, i)),        # proxy diag block
                pl.BlockSpec((tr, tr), lambda i: (i, i)),        # pos diag block
            ]
        return pl.pallas_call(
            kernel,
            out_shape=jax.ShapeDtypeStruct((1,), jnp.float32),
            grid=(n_tiles,),
            in_specs=in_specs,
            out_specs=pl.BlockSpec(memory_space=pltpu.MemorySpace.SMEM),
            scratch_shapes=[
                pltpu.SMEM((3,), jnp.float32),        # row-dir scalar accumulators
                pltpu.VMEM((3, 1, n), jnp.float32),   # running column max
                pltpu.VMEM((3, 1, n), jnp.float32),   # running column sum-exp
            ],
            compiler_params=pltpu.CompilerParams(
                dimension_semantics=("arbitrary",),   # accumulators carry over tiles
                vmem_limit_bytes=vmem_limit,
            ),
        )

    args = [scale_arr, vis_feat, text_feat, proxy_logits, pos_logits]
    if fast_diag:
        args += [text_feat, proxy_logits, pos_logits]

    # Prefer the single-buffered resident text block; fall back to the default
    # (double-buffered) spec if pipeline_mode=pl.Buffered(1) is not accepted.
    try:
        out = build(True)(*args)
    except Exception:
        out = build(False)(*args)
    return out[0]


def _reference_loss(vis_feat, text_feat, temp, proxy_logits, pos_logits,
                    l_p_alpha, l_pos_beta, precision):
    """Pure-JAX reference mirroring the PyTorch forward."""
    scale = jnp.exp(jnp.asarray(temp, jnp.float32))
    t2v = jax.lax.dot_general(
        vis_feat, text_feat, dimension_numbers=(((1,), (1,)), ((), ())),
        precision=precision, preferred_element_type=jnp.float32) * scale

    def ce(m):
        lse = jax.scipy.special.logsumexp(m, axis=1)
        return jnp.mean(lse - jnp.diagonal(m))

    proxy = proxy_logits.astype(jnp.float32) * scale
    pos = pos_logits.astype(jnp.float32) * scale
    proxy_loss = ce(proxy) * l_p_alpha + ce(proxy.T) * l_p_alpha
    pos_loss = ce(pos) * l_pos_beta + ce(pos.T) * l_pos_beta
    return ce(t2v) + ce(t2v.T) + proxy_loss + pos_loss


if __name__ == "__main__":
    L_P_ALPHA = 0.5    # cfg.L_p_alpha
    L_POS_BETA = 0.25  # cfg.L_pos_beta

    def run_case(name, n, d, logit_dtype, row_tile, precision, rtol, atol):
        key = jax.random.PRNGKey(0)
        k_vis, k_txt, k_proxy, k_pos = jax.random.split(key, 4)
        vis = jax.random.normal(k_vis, (n, d), jnp.float32)
        txt = jax.random.normal(k_txt, (n, d), jnp.float32)
        vis = vis / jnp.linalg.norm(vis, axis=1, keepdims=True)
        txt = txt / jnp.linalg.norm(txt, axis=1, keepdims=True)
        proxy = jax.random.normal(k_proxy, (n, n), jnp.float32).astype(logit_dtype)
        pos = jax.random.normal(k_pos, (n, n), jnp.float32).astype(logit_dtype)
        temp = jnp.asarray(jnp.log(1.0 / 0.07), jnp.float32)  # learnable temp init

        loss = nce_learnable_temp_loss(
            vis, txt, temp, proxy, pos,
            l_p_alpha=L_P_ALPHA, l_pos_beta=L_POS_BETA,
            row_tile=row_tile, precision=precision)
        loss = jax.block_until_ready(loss)

        ref = _reference_loss(vis, txt, temp, proxy, pos,
                              L_P_ALPHA, L_POS_BETA, precision)
        assert jnp.allclose(loss, ref, rtol=rtol, atol=atol), (name, loss, ref)

    # Fast path: 128-row tiles (2 grid steps), bf16 proxy/pos stream,
    # DEFAULT (single-pass MXU) matmul precision, diagonal-block BlockSpecs.
    run_case("fast", n=256, d=64, logit_dtype=jnp.bfloat16, row_tile=128,
             precision=jax.lax.Precision.DEFAULT, rtol=2e-3, atol=5e-2)
    # Fallback path: tiny non-128-aligned tiles, all f32, HIGHEST precision.
    run_case("fallback", n=16, d=32, logit_dtype=jnp.float32, row_tile=8,
             precision=jax.lax.Precision.HIGHEST, rtol=1e-4, atol=1e-3)

    print("KERNEL_OK")
</pallas_src>

<mosaic_0001>
module attributes {stable_mosaic.version = 11 : i64} {
  func.func @_nce_loss_kernel(%arg0: i32, %arg1: memref<1xf32, #tpu.memory_space<smem>>, %arg2: memref<128x64xf32, #tpu.memory_space<vmem>>, %arg3: memref<256x64xf32, #tpu.memory_space<vmem>>, %arg4: memref<128x256xbf16, #tpu.memory_space<vmem>>, %arg5: memref<128x256xbf16, #tpu.memory_space<vmem>>, %arg6: memref<128x64xf32, #tpu.memory_space<vmem>>, %arg7: memref<128x128xbf16, #tpu.memory_space<vmem>>, %arg8: memref<128x128xbf16, #tpu.memory_space<vmem>>, %arg9: memref<1xf32, #tpu.memory_space<smem>>, %arg10: memref<3xf32, #tpu.memory_space<smem>>, %arg11: memref<3x1x256xf32, #tpu.memory_space<vmem>>, %arg12: memref<3x1x256xf32, #tpu.memory_space<vmem>>) attributes {dimension_semantics = [#tpu.dimension_semantics<arbitrary>], iteration_bounds = array<i64: 2>, scalar_prefetch = 0 : i64, scratch_operands = 3 : i64, tpu.core_type = #tpu.core_type<tc>, window_params = [{transform_indices = @transform_0, window_bounds = array<i64: 1>}, {transform_indices = @transform_1, window_bounds = array<i64: 128, 64>}, {pipeline_mode = #tpu.pipeline_mode<synchronous>, transform_indices = @transform_2, window_bounds = array<i64: 256, 64>}, {transform_indices = @transform_3, window_bounds = array<i64: 128, 256>}, {transform_indices = @transform_4, window_bounds = array<i64: 128, 256>}, {transform_indices = @transform_5, window_bounds = array<i64: 128, 64>}, {transform_indices = @transform_6, window_bounds = array<i64: 128, 128>}, {transform_indices = @transform_7, window_bounds = array<i64: 128, 128>}, {transform_indices = @transform_8, window_bounds = array<i64: 1>}]} {
    %c0_i32 = arith.constant 0 : i32
    %0 = arith.cmpi eq, %arg0, %c0_i32 : i32
    %1 = arith.extui %0 : i1 to i32
    %c0_i32_0 = arith.constant 0 : i32
    %2 = arith.cmpi ne, %1, %c0_i32_0 : i32
    scf.if %2 {
      %cst_81 = arith.constant 0.000000e+00 : f32
      %c0_82 = arith.constant 0 : index
      %179 = memref.load %arg10[%c0_82] : memref<3xf32, #tpu.memory_space<smem>>
      memref.store %cst_81, %arg10[%c0_82] : memref<3xf32, #tpu.memory_space<smem>>
      %cst_83 = arith.constant 0.000000e+00 : f32
      %c1_84 = arith.constant 1 : index
      %180 = memref.load %arg10[%c1_84] : memref<3xf32, #tpu.memory_space<smem>>
      memref.store %cst_83, %arg10[%c1_84] : memref<3xf32, #tpu.memory_space<smem>>
      %cst_85 = arith.constant 0.000000e+00 : f32
      %c2_86 = arith.constant 2 : index
      %181 = memref.load %arg10[%c2_86] : memref<3xf32, #tpu.memory_space<smem>>
      memref.store %cst_85, %arg10[%c2_86] : memref<3xf32, #tpu.memory_space<smem>>
      %cst_87 = arith.constant 0xFF800000 : f32
      %182 = vector.broadcast %cst_87 : f32 to vector<3x1x256xf32>
      %c0_88 = arith.constant 0 : index
      %c0_89 = arith.constant 0 : index
      %c0_90 = arith.constant 0 : index
      %183 = vector.load %arg11[%c0_88, %c0_89, %c0_90] : memref<3x1x256xf32, #tpu.memory_space<vmem>>, vector<3x1x256xf32>
      tpu.vector_store %arg11[%c0_88, %c0_89, %c0_90], %182 {strides = array<i32>} : memref<3x1x256xf32, #tpu.memory_space<vmem>>, vector<3x1x256xf32>,
      %cst_91 = arith.constant 0.000000e+00 : f32
      %184 = vector.broadcast %cst_91 : f32 to vector<3x1x256xf32>
      %c0_92 = arith.constant 0 : index
      %c0_93 = arith.constant 0 : index
      %c0_94 = arith.constant 0 : index
      %185 = vector.load %arg12[%c0_92, %c0_93, %c0_94] : memref<3x1x256xf32, #tpu.memory_space<vmem>>, vector<3x1x256xf32>
      tpu.vector_store %arg12[%c0_92, %c0_93, %c0_94], %184 {strides = array<i32>} : memref<3x1x256xf32, #tpu.memory_space<vmem>>, vector<3x1x256xf32>,
    } else {
    }
    %c0 = arith.constant 0 : index
    %3 = memref.load %arg1[%c0] : memref<1xf32, #tpu.memory_space<smem>>
    %c0_1 = arith.constant 0 : index
    %c0_2 = arith.constant 0 : index
    %4 = vector.load %arg2[%c0_1, %c0_2] : memref<128x64xf32, #tpu.memory_space<vmem>>, vector<128x64xf32>
    %c0_3 = arith.constant 0 : index
    %c0_4 = arith.constant 0 : index
    %5 = vector.load %arg3[%c0_3, %c0_4] : memref<256x64xf32, #tpu.memory_space<vmem>>, vector<256x64xf32>
    %cst = arith.constant dense<0.000000e+00> : vector<128x256xf32>
    %6 = tpu.matmul %4, %5, %cst {dimension_numbers = #tpu.dot_dimension_numbers<[1], [1], [0], [0], [0, 0, 1, 0], [], []>} : vector<128x64xf32>, vector<256x64xf32>, vector<128x256xf32> -> vector<128x256xf32>
    %7 = vector.broadcast %3 : f32 to vector<128x256xf32>
    %8 = arith.mulf %6, %7 : vector<128x256xf32>
    %c0_5 = arith.constant 0 : index
    %c0_6 = arith.constant 0 : index
    %9 = vector.load %arg4[%c0_5, %c0_6] : memref<128x256xbf16, #tpu.memory_space<vmem>>, vector<128x256xbf16>
    %10 = arith.extf %9 : vector<128x256xbf16> to vector<128x256xf32>
    %11 = vector.broadcast %3 : f32 to vector<128x256xf32>
    %12 = arith.mulf %10, %11 : vector<128x256xf32>
    %c0_7 = arith.constant 0 : index
    %c0_8 = arith.constant 0 : index
    %13 = vector.load %arg5[%c0_7, %c0_8] : memref<128x256xbf16, #tpu.memory_space<vmem>>, vector<128x256xbf16>
    %14 = arith.extf %13 : vector<128x256xbf16> to vector<128x256xf32>
    %15 = vector.broadcast %3 : f32 to vector<128x256xf32>
    %16 = arith.mulf %14, %15 : vector<128x256xf32>
    %17 = tpu.iota {dimensions = array<i32: 0>} : vector<128x128xi32>
    %18 = tpu.iota {dimensions = array<i32: 1>} : vector<128x128xi32>
    %19 = arith.cmpi eq, %17, %18 : vector<128x128xi32>
    %c0_9 = arith.constant 0 : index
    %c0_10 = arith.constant 0 : index
    %20 = vector.load %arg6[%c0_9, %c0_10] : memref<128x64xf32, #tpu.memory_space<vmem>>, vector<128x64xf32>
    %cst_11 = arith.constant dense<0.000000e+00> : vector<128x128xf32>
    %21 = tpu.matmul %4, %20, %cst_11 {dimension_numbers = #tpu.dot_dimension_numbers<[1], [1], [0], [0], [0, 0, 1, 0], [], []>} : vector<128x64xf32>, vector<128x64xf32>, vector<128x128xf32> -> vector<128x128xf32>
    %22 = vector.broadcast %3 : f32 to vector<128x128xf32>
    %23 = arith.mulf %21, %22 : vector<128x128xf32>
    %cst_12 = arith.constant 0.000000e+00 : f32
    %24 = vector.broadcast %cst_12 : f32 to vector<128x128xf32>
    %25 = arith.select %19, %23, %24 : vector<128x128xi1>, vector<128x128xf32>
    %cst_13 = arith.constant dense<0.000000e+00> : vector<128xf32>
    %26 = vector.multi_reduction <add>, %25, %cst_13 [1] : vector<128x128xf32> to vector<128xf32>
    %27 = vector.shape_cast %26 : vector<128xf32> to vector<128x1xf32>
    %c0_14 = arith.constant 0 : index
    %c0_15 = arith.constant 0 : index
    %28 = vector.load %arg7[%c0_14, %c0_15] : memref<128x128xbf16, #tpu.memory_space<vmem>>, vector<128x128xbf16>
    %29 = arith.extf %28 : vector<128x128xbf16> to vector<128x128xf32>
    %30 = vector.broadcast %3 : f32 to vector<128x128xf32>
    %31 = arith.mulf %29, %30 : vector<128x128xf32>
    %cst_16 = arith.constant 0.000000e+00 : f32
    %32 = vector.broadcast %cst_16 : f32 to vector<128x128xf32>
    %33 = arith.select %19, %31, %32 : vector<128x128xi1>, vector<128x128xf32>
    %cst_17 = arith.constant dense<0.000000e+00> : vector<128xf32>
    %34 = vector.multi_reduction <add>, %33, %cst_17 [1] : vector<128x128xf32> to vector<128xf32>
    %35 = vector.shape_cast %34 : vector<128xf32> to vector<128x1xf32>
    %c0_18 = arith.constant 0 : index
    %c0_19 = arith.constant 0 : index
    %36 = vector.load %arg8[%c0_18, %c0_19] : memref<128x128xbf16, #tpu.memory_space<vmem>>, vector<128x128xbf16>
    %37 = arith.extf %36 : vector<128x128xbf16> to vector<128x128xf32>
    %38 = vector.broadcast %3 : f32 to vector<128x128xf32>
    %39 = arith.mulf %37, %38 : vector<128x128xf32>
    %cst_20 = arith.constant 0.000000e+00 : f32
    %40 = vector.broadcast %cst_20 : f32 to vector<128x128xf32>
    %41 = arith.select %19, %39, %40 : vector<128x128xi1>, vector<128x128xf32>
    %cst_21 = arith.constant dense<0.000000e+00> : vector<128xf32>
    %42 = vector.multi_reduction <add>, %41, %cst_21 [1] : vector<128x128xf32> to vector<128xf32>
    %43 = vector.shape_cast %42 : vector<128xf32> to vector<128x1xf32>
    %cst_22 = arith.constant dense<0xFF800000> : vector<128xf32>
    %44 = vector.multi_reduction <maximumf>, %8, %cst_22 [1] : vector<128x256xf32> to vector<128xf32>
    %45 = vector.shape_cast %44 : vector<128xf32> to vector<128x1xf32>
    %46 = vector.broadcast %45 : vector<128x1xf32> to vector<128x256xf32>
    %47 = arith.subf %8, %46 : vector<128x256xf32>
    %48 = math.exp %47 : vector<128x256xf32>
    %cst_23 = arith.constant dense<0.000000e+00> : vector<128xf32>
    %49 = vector.multi_reduction <add>, %48, %cst_23 [1] : vector<128x256xf32> to vector<128xf32>
    %50 = vector.shape_cast %49 : vector<128xf32> to vector<128x1xf32>
    %51 = math.log %50 : vector<128x1xf32>
    %52 = arith.addf %51, %45 : vector<128x1xf32>
    %c0_24 = arith.constant 0 : index
    %53 = memref.load %arg10[%c0_24] : memref<3xf32, #tpu.memory_space<smem>>
    %cst_25 = arith.constant 2.000000e+00 : f32
    %54 = vector.broadcast %cst_25 : f32 to vector<128x1xf32>
    %55 = arith.mulf %54, %27 : vector<128x1xf32>
    %56 = arith.subf %52, %55 : vector<128x1xf32>
    %57 = vector.shape_cast %56 : vector<128x1xf32> to vector<1x128x1xf32>
    %cst_26 = arith.constant dense<0.000000e+00> : vector<1xf32>
    %58 = vector.multi_reduction <add>, %57, %cst_26 [1, 2] : vector<1x128x1xf32> to vector<1xf32>
    %59 = vector.shape_cast %58 : vector<1xf32> to vector<1x1x1xf32>
    %60 = vector.extract %59[0, 0, 0] : f32 from vector<1x1x1xf32>
    %61 = arith.addf %53, %60 : f32
    %c0_27 = arith.constant 0 : index
    %62 = memref.load %arg10[%c0_27] : memref<3xf32, #tpu.memory_space<smem>>
    memref.store %61, %arg10[%c0_27] : memref<3xf32, #tpu.memory_space<smem>>
    %cst_28 = arith.constant dense<0xFF800000> : vector<256xf32>
    %63 = vector.multi_reduction <maximumf>, %8, %cst_28 [0] : vector<128x256xf32> to vector<256xf32>
    %64 = vector.shape_cast %63 : vector<256xf32> to vector<1x256xf32>
    %65 = vector.broadcast %64 : vector<1x256xf32> to vector<128x256xf32>
    %66 = arith.subf %8, %65 : vector<128x256xf32>
    %67 = math.exp %66 : vector<128x256xf32>
    %cst_29 = arith.constant dense<0.000000e+00> : vector<256xf32>
    %68 = vector.multi_reduction <add>, %67, %cst_29 [0] : vector<128x256xf32> to vector<256xf32>
    %69 = vector.shape_cast %68 : vector<256xf32> to vector<1x256xf32>
    %c0_30 = arith.constant 0 : index
    %c0_31 = arith.constant 0 : index
    %c0_32 = arith.constant 0 : index
    %70 = vector.load %arg11[%c0_30, %c0_31, %c0_32] : memref<3x1x256xf32, #tpu.memory_space<vmem>>, vector<1x1x256xf32>
    %71 = vector.shape_cast %70 : vector<1x1x256xf32> to vector<1x256xf32>
    %72 = arith.maximumf %71, %64 : vector<1x256xf32>
    %c0_33 = arith.constant 0 : index
    %c0_34 = arith.constant 0 : index
    %c0_35 = arith.constant 0 : index
    %73 = vector.load %arg12[%c0_33, %c0_34, %c0_35] : memref<3x1x256xf32, #tpu.memory_space<vmem>>, vector<1x1x256xf32>
    %74 = vector.shape_cast %73 : vector<1x1x256xf32> to vector<1x256xf32>
    %75 = arith.subf %71, %72 : vector<1x256xf32>
    %76 = math.exp %75 : vector<1x256xf32>
    %77 = arith.mulf %74, %76 : vector<1x256xf32>
    %78 = arith.subf %64, %72 : vector<1x256xf32>
    %79 = math.exp %78 : vector<1x256xf32>
    %80 = arith.mulf %69, %79 : vector<1x256xf32>
    %81 = arith.addf %77, %80 : vector<1x256xf32>
    %c0_36 = arith.constant 0 : index
    %c0_37 = arith.constant 0 : index
    %c0_38 = arith.constant 0 : index
    %82 = vector.load %arg12[%c0_36, %c0_37, %c0_38] : memref<3x1x256xf32, #tpu.memory_space<vmem>>, vector<1x1x256xf32>
    %83 = vector.shape_cast %82 : vector<1x1x256xf32> to vector<1x256xf32>
    %84 = vector.shape_cast %81 : vector<1x256xf32> to vector<1x1x256xf32>
    tpu.vector_store %arg12[%c0_36, %c0_37, %c0_38], %84 {strides = array<i32>} : memref<3x1x256xf32, #tpu.memory_space<vmem>>, vector<1x1x256xf32>,
    %c0_39 = arith.constant 0 : index
    %c0_40 = arith.constant 0 : index
    %c0_41 = arith.constant 0 : index
    %85 = vector.load %arg11[%c0_39, %c0_40, %c0_41] : memref<3x1x256xf32, #tpu.memory_space<vmem>>, vector<1x1x256xf32>
    %86 = vector.shape_cast %85 : vector<1x1x256xf32> to vector<1x256xf32>
    %87 = vector.shape_cast %72 : vector<1x256xf32> to vector<1x1x256xf32>
    tpu.vector_store %arg11[%c0_39, %c0_40, %c0_41], %87 {strides = array<i32>} : memref<3x1x256xf32, #tpu.memory_space<vmem>>, vector<1x1x256xf32>,
    %cst_42 = arith.constant dense<0xFF800000> : vector<128xf32>
    %88 = vector.multi_reduction <maximumf>, %12, %cst_42 [1] : vector<128x256xf32> to vector<128xf32>
    %89 = vector.shape_cast %88 : vector<128xf32> to vector<128x1xf32>
    %90 = vector.broadcast %89 : vector<128x1xf32> to vector<128x256xf32>
    %91 = arith.subf %12, %90 : vector<128x256xf32>
    %92 = math.exp %91 : vector<128x256xf32>
    %cst_43 = arith.constant dense<0.000000e+00> : vector<128xf32>
    %93 = vector.multi_reduction <add>, %92, %cst_43 [1] : vector<128x256xf32> to vector<128xf32>
    %94 = vector.shape_cast %93 : vector<128xf32> to vector<128x1xf32>
    %95 = math.log %94 : vector<128x1xf32>
    %96 = arith.addf %95, %89 : vector<128x1xf32>
    %c1 = arith.constant 1 : index
    %97 = memref.load %arg10[%c1] : memref<3xf32, #tpu.memory_space<smem>>
    %cst_44 = arith.constant 2.000000e+00 : f32
    %98 = vector.broadcast %cst_44 : f32 to vector<128x1xf32>
    %99 = arith.mulf %98, %35 : vector<128x1xf32>
    %100 = arith.subf %96, %99 : vector<128x1xf32>
    %101 = vector.shape_cast %100 : vector<128x1xf32> to vector<1x128x1xf32>
    %cst_45 = arith.constant dense<0.000000e+00> : vector<1xf32>
    %102 = vector.multi_reduction <add>, %101, %cst_45 [1, 2] : vector<1x128x1xf32> to vector<1xf32>
    %103 = vector.shape_cast %102 : vector<1xf32> to vector<1x1x1xf32>
    %104 = vector.extract %103[0, 0, 0] : f32 from vector<1x1x1xf32>
    %105 = arith.addf %97, %104 : f32
    %c1_46 = arith.constant 1 : index
    %106 = memref.load %arg10[%c1_46] : memref<3xf32, #tpu.memory_space<smem>>
    memref.store %105, %arg10[%c1_46] : memref<3xf32, #tpu.memory_space<smem>>
    %cst_47 = arith.constant dense<0xFF800000> : vector<256xf32>
    %107 = vector.multi_reduction <maximumf>, %12, %cst_47 [0] : vector<128x256xf32> to vector<256xf32>
    %108 = vector.shape_cast %107 : vector<256xf32> to vector<1x256xf32>
    %109 = vector.broadcast %108 : vector<1x256xf32> to vector<128x256xf32>
    %110 = arith.subf %12, %109 : vector<128x256xf32>
    %111 = math.exp %110 : vector<128x256xf32>
    %cst_48 = arith.constant dense<0.000000e+00> : vector<256xf32>
    %112 = vector.multi_reduction <add>, %111, %cst_48 [0] : vector<128x256xf32> to vector<256xf32>
    %113 = vector.shape_cast %112 : vector<256xf32> to vector<1x256xf32>
    %c1_49 = arith.constant 1 : index
    %c0_50 = arith.constant 0 : index
    %c0_51 = arith.constant 0 : index
    %114 = vector.load %arg11[%c1_49, %c0_50, %c0_51] : memref<3x1x256xf32, #tpu.memory_space<vmem>>, vector<1x1x256xf32>
    %115 = vector.shape_cast %114 : vector<1x1x256xf32> to vector<1x256xf32>
    %116 = arith.maximumf %115, %108 : vector<1x256xf32>
    %c1_52 = arith.constant 1 : index
    %c0_53 = arith.constant 0 : index
    %c0_54 = arith.constant 0 : index
    %117 = vector.load %arg12[%c1_52, %c0_53, %c0_54] : memref<3x1x256xf32, #tpu.memory_space<vmem>>, vector<1x1x256xf32>
    %118 = vector.shape_cast %117 : vector<1x1x256xf32> to vector<1x256xf32>
    %119 = arith.subf %115, %116 : vector<1x256xf32>
    %120 = math.exp %119 : vector<1x256xf32>
    %121 = arith.mulf %118, %120 : vector<1x256xf32>
    %122 = arith.subf %108, %116 : vector<1x256xf32>
    %123 = math.exp %122 : vector<1x256xf32>
    %124 = arith.mulf %113, %123 : vector<1x256xf32>
    %125 = arith.addf %121, %124 : vector<1x256xf32>
    %c1_55 = arith.constant 1 : index
    %c0_56 = arith.constant 0 : index
    %c0_57 = arith.constant 0 : index
    %126 = vector.load %arg12[%c1_55, %c0_56, %c0_57] : memref<3x1x256xf32, #tpu.memory_space<vmem>>, vector<1x1x256xf32>
    %127 = vector.shape_cast %126 : vector<1x1x256xf32> to vector<1x256xf32>
    %128 = vector.shape_cast %125 : vector<1x256xf32> to vector<1x1x256xf32>
    tpu.vector_store %arg12[%c1_55, %c0_56, %c0_57], %128 {strides = array<i32>} : memref<3x1x256xf32, #tpu.memory_space<vmem>>, vector<1x1x256xf32>,
    %c1_58 = arith.constant 1 : index
    %c0_59 = arith.constant 0 : index
    %c0_60 = arith.constant 0 : index
    %129 = vector.load %arg11[%c1_58, %c0_59, %c0_60] : memref<3x1x256xf32, #tpu.memory_space<vmem>>, vector<1x1x256xf32>
    %130 = vector.shape_cast %129 : vector<1x1x256xf32> to vector<1x256xf32>
    %131 = vector.shape_cast %116 : vector<1x256xf32> to vector<1x1x256xf32>
    tpu.vector_store %arg11[%c1_58, %c0_59, %c0_60], %131 {strides = array<i32>} : memref<3x1x256xf32, #tpu.memory_space<vmem>>, vector<1x1x256xf32>,
    %cst_61 = arith.constant dense<0xFF800000> : vector<128xf32>
    %132 = vector.multi_reduction <maximumf>, %16, %cst_61 [1] : vector<128x256xf32> to vector<128xf32>
    %133 = vector.shape_cast %132 : vector<128xf32> to vector<128x1xf32>
    %134 = vector.broadcast %133 : vector<128x1xf32> to vector<128x256xf32>
    %135 = arith.subf %16, %134 : vector<128x256xf32>
    %136 = math.exp %135 : vector<128x256xf32>
    %cst_62 = arith.constant dense<0.000000e+00> : vector<128xf32>
    %137 = vector.multi_reduction <add>, %136, %cst_62 [1] : vector<128x256xf32> to vector<128xf32>
    %138 = vector.shape_cast %137 : vector<128xf32> to vector<128x1xf32>
    %139 = math.log %138 : vector<128x1xf32>
    %140 = arith.addf %139, %133 : vector<128x1xf32>
    %c2 = arith.constant 2 : index
    %141 = memref.load %arg10[%c2] : memref<3xf32, #tpu.memory_space<smem>>
    %cst_63 = arith.constant 2.000000e+00 : f32
    %142 = vector.broadcast %cst_63 : f32 to vector<128x1xf32>
    %143 = arith.mulf %142, %43 : vector<128x1xf32>
    %144 = arith.subf %140, %143 : vector<128x1xf32>
    %145 = vector.shape_cast %144 : vector<128x1xf32> to vector<1x128x1xf32>
    %cst_64 = arith.constant dense<0.000000e+00> : vector<1xf32>
    %146 = vector.multi_reduction <add>, %145, %cst_64 [1, 2] : vector<1x128x1xf32> to vector<1xf32>
    %147 = vector.shape_cast %146 : vector<1xf32> to vector<1x1x1xf32>
    %148 = vector.extract %147[0, 0, 0] : f32 from vector<1x1x1xf32>
    %149 = arith.addf %141, %148 : f32
    %c2_65 = arith.constant 2 : index
    %150 = memref.load %arg10[%c2_65] : memref<3xf32, #tpu.memory_space<smem>>
    memref.store %149, %arg10[%c2_65] : memref<3xf32, #tpu.memory_space<smem>>
    %cst_66 = arith.constant dense<0xFF800000> : vector<256xf32>
    %151 = vector.multi_reduction <maximumf>, %16, %cst_66 [0] : vector<128x256xf32> to vector<256xf32>
    %152 = vector.shape_cast %151 : vector<256xf32> to vector<1x256xf32>
    %153 = vector.broadcast %152 : vector<1x256xf32> to vector<128x256xf32>
    %154 = arith.subf %16, %153 : vector<128x256xf32>
    %155 = math.exp %154 : vector<128x256xf32>
    %cst_67 = arith.constant dense<0.000000e+00> : vector<256xf32>
    %156 = vector.multi_reduction <add>, %155, %cst_67 [0] : vector<128x256xf32> to vector<256xf32>
    %157 = vector.shape_cast %156 : vector<256xf32> to vector<1x256xf32>
    %c2_68 = arith.constant 2 : index
    %c0_69 = arith.constant 0 : index
    %c0_70 = arith.constant 0 : index
    %158 = vector.load %arg11[%c2_68, %c0_69, %c0_70] : memref<3x1x256xf32, #tpu.memory_space<vmem>>, vector<1x1x256xf32>
    %159 = vector.shape_cast %158 : vector<1x1x256xf32> to vector<1x256xf32>
    %160 = arith.maximumf %159, %152 : vector<1x256xf32>
    %c2_71 = arith.constant 2 : index
    %c0_72 = arith.constant 0 : index
    %c0_73 = arith.constant 0 : index
    %161 = vector.load %arg12[%c2_71, %c0_72, %c0_73] : memref<3x1x256xf32, #tpu.memory_space<vmem>>, vector<1x1x256xf32>
    %162 = vector.shape_cast %161 : vector<1x1x256xf32> to vector<1x256xf32>
    %163 = arith.subf %159, %160 : vector<1x256xf32>
    %164 = math.exp %163 : vector<1x256xf32>
    %165 = arith.mulf %162, %164 : vector<1x256xf32>
    %166 = arith.subf %152, %160 : vector<1x256xf32>
    %167 = math.exp %166 : vector<1x256xf32>
    %168 = arith.mulf %157, %167 : vector<1x256xf32>
    %169 = arith.addf %165, %168 : vector<1x256xf32>
    %c2_74 = arith.constant 2 : index
    %c0_75 = arith.constant 0 : index
    %c0_76 = arith.constant 0 : index
    %170 = vector.load %arg12[%c2_74, %c0_75, %c0_76] : memref<3x1x256xf32, #tpu.memory_space<vmem>>, vector<1x1x256xf32>
    %171 = vector.shape_cast %170 : vector<1x1x256xf32> to vector<1x256xf32>
    %172 = vector.shape_cast %169 : vector<1x256xf32> to vector<1x1x256xf32>
    tpu.vector_store %arg12[%c2_74, %c0_75, %c0_76], %172 {strides = array<i32>} : memref<3x1x256xf32, #tpu.memory_space<vmem>>, vector<1x1x256xf32>,
    %c2_77 = arith.constant 2 : index
    %c0_78 = arith.constant 0 : index
    %c0_79 = arith.constant 0 : index
    %173 = vector.load %arg11[%c2_77, %c0_78, %c0_79] : memref<3x1x256xf32, #tpu.memory_space<vmem>>, vector<1x1x256xf32>
    %174 = vector.shape_cast %173 : vector<1x1x256xf32> to vector<1x256xf32>
    %175 = vector.shape_cast %160 : vector<1x256xf32> to vector<1x1x256xf32>
    tpu.vector_store %arg11[%c2_77, %c0_78, %c0_79], %175 {strides = array<i32>} : memref<3x1x256xf32, #tpu.memory_space<vmem>>, vector<1x1x256xf32>,
    %c1_i32 = arith.constant 1 : i32
    %176 = arith.cmpi eq, %arg0, %c1_i32 : i32
    %177 = arith.extui %176 : i1 to i32
    %c0_i32_80 = arith.constant 0 : i32
    %178 = arith.cmpi ne, %177, %c0_i32_80 : i32
    scf.if %178 {
      %c0_81 = arith.constant 0 : index
      %c0_82 = arith.constant 0 : index
      %c0_83 = arith.constant 0 : index
      %179 = vector.load %arg12[%c0_81, %c0_82, %c0_83] : memref<3x1x256xf32, #tpu.memory_space<vmem>>, vector<1x1x256xf32>
      %180 = vector.shape_cast %179 : vector<1x1x256xf32> to vector<1x256xf32>
      %181 = math.log %180 : vector<1x256xf32>
      %c0_84 = arith.constant 0 : index
      %c0_85 = arith.constant 0 : index
      %c0_86 = arith.constant 0 : index
      %182 = vector.load %arg11[%c0_84, %c0_85, %c0_86] : memref<3x1x256xf32, #tpu.memory_space<vmem>>, vector<1x1x256xf32>
      %183 = vector.shape_cast %182 : vector<1x1x256xf32> to vector<1x256xf32>
      %184 = arith.addf %181, %183 : vector<1x256xf32>
      %c0_87 = arith.constant 0 : index
      %185 = memref.load %arg10[%c0_87] : memref<3xf32, #tpu.memory_space<smem>>
      %186 = vector.shape_cast %184 : vector<1x256xf32> to vector<1x1x256xf32>
      %cst_88 = arith.constant dense<0.000000e+00> : vector<1xf32>
      %187 = vector.multi_reduction <add>, %186, %cst_88 [1, 2] : vector<1x1x256xf32> to vector<1xf32>
      %188 = vector.shape_cast %187 : vector<1xf32> to vector<1x1x1xf32>
      %189 = vector.extract %188[0, 0, 0] : f32 from vector<1x1x1xf32>
      %190 = arith.addf %185, %189 : f32
      %cst_89 = arith.constant 3.906250e-03 : f32
      %191 = arith.mulf %190, %cst_89 : f32
      %c1_90 = arith.constant 1 : index
      %c0_91 = arith.constant 0 : index
      %c0_92 = arith.constant 0 : index
      %192 = vector.load %arg12[%c1_90, %c0_91, %c0_92] : memref<3x1x256xf32, #tpu.memory_space<vmem>>, vector<1x1x256xf32>
      %193 = vector.shape_cast %192 : vector<1x1x256xf32> to vector<1x256xf32>
      %194 = math.log %193 : vector<1x256xf32>
      %c1_93 = arith.constant 1 : index
      %c0_94 = arith.constant 0 : index
      %c0_95 = arith.constant 0 : index
      %195 = vector.load %arg11[%c1_93, %c0_94, %c0_95] : memref<3x1x256xf32, #tpu.memory_space<vmem>>, vector<1x1x256xf32>
      %196 = vector.shape_cast %195 : vector<1x1x256xf32> to vector<1x256xf32>
      %197 = arith.addf %194, %196 : vector<1x256xf32>
      %c1_96 = arith.constant 1 : index
      %198 = memref.load %arg10[%c1_96] : memref<3xf32, #tpu.memory_space<smem>>
      %199 = vector.shape_cast %197 : vector<1x256xf32> to vector<1x1x256xf32>
      %cst_97 = arith.constant dense<0.000000e+00> : vector<1xf32>
      %200 = vector.multi_reduction <add>, %199, %cst_97 [1, 2] : vector<1x1x256xf32> to vector<1xf32>
      %201 = vector.shape_cast %200 : vector<1xf32> to vector<1x1x1xf32>
      %202 = vector.extract %201[0, 0, 0] : f32 from vector<1x1x1xf32>
      %203 = arith.addf %198, %202 : f32
      %cst_98 = arith.constant 3.906250e-03 : f32
      %204 = arith.mulf %203, %cst_98 : f32
      %cst_99 = arith.constant 5.000000e-01 : f32
      %205 = arith.mulf %cst_99, %204 : f32
      %206 = arith.addf %191, %205 : f32
      %c2_100 = arith.constant 2 : index
      %c0_101 = arith.constant 0 : index
      %c0_102 = arith.constant 0 : index
      %207 = vector.load %arg12[%c2_100, %c0_101, %c0_102] : memref<3x1x256xf32, #tpu.memory_space<vmem>>, vector<1x1x256xf32>
      %208 = vector.shape_cast %207 : vector<1x1x256xf32> to vector<1x256xf32>
      %209 = math.log %208 : vector<1x256xf32>
      %c2_103 = arith.constant 2 : index
      %c0_104 = arith.constant 0 : index
      %c0_105 = arith.constant 0 : index
      %210 = vector.load %arg11[%c2_103, %c0_104, %c0_105] : memref<3x1x256xf32, #tpu.memory_space<vmem>>, vector<1x1x256xf32>
      %211 = vector.shape_cast %210 : vector<1x1x256xf32> to vector<1x256xf32>
      %212 = arith.addf %209, %211 : vector<1x256xf32>
      %c2_106 = arith.constant 2 : index
      %213 = memref.load %arg10[%c2_106] : memref<3xf32, #tpu.memory_space<smem>>
      %214 = vector.shape_cast %212 : vector<1x256xf32> to vector<1x1x256xf32>
      %cst_107 = arith.constant dense<0.000000e+00> : vector<1xf32>
      %215 = vector.multi_reduction <add>, %214, %cst_107 [1, 2] : vector<1x1x256xf32> to vector<1xf32>
      %216 = vector.shape_cast %215 : vector<1xf32> to vector<1x1x1xf32>
      %217 = vector.extract %216[0, 0, 0] : f32 from vector<1x1x1xf32>
      %218 = arith.addf %213, %217 : f32
      %cst_108 = arith.constant 3.906250e-03 : f32
      %219 = arith.mulf %218, %cst_108 : f32
      %cst_109 = arith.constant 2.500000e-01 : f32
      %220 = arith.mulf %cst_109, %219 : f32
      %221 = arith.addf %206, %220 : f32
      %c0_110 = arith.constant 0 : index
      %222 = memref.load %arg9[%c0_110] : memref<1xf32, #tpu.memory_space<smem>>
      memref.store %221, %arg9[%c0_110] : memref<1xf32, #tpu.memory_space<smem>>
    } else {
    }
    return
  }
  func.func @transform_0(%arg0: i32) -> i32 {
    %c0_i32 = arith.constant 0 : i32
    %c0_i32_0 = arith.constant 0 : i32
    return %c0_i32 : i32
  }
  func.func @transform_1(%arg0: i32) -> (i32, i32) {
    %c0_i32 = arith.constant 0 : i32
    %c0_i32_0 = arith.constant 0 : i32
    return %arg0, %c0_i32 : i32, i32
  }
  func.func @transform_2(%arg0: i32) -> (i32, i32) {
    %c0_i32 = arith.constant 0 : i32
    %c0_i32_0 = arith.constant 0 : i32
    %c0_i32_1 = arith.constant 0 : i32
    return %c0_i32, %c0_i32_0 : i32, i32
  }
  func.func @transform_3(%arg0: i32) -> (i32, i32) {
    %c0_i32 = arith.constant 0 : i32
    %c0_i32_0 = arith.constant 0 : i32
    return %arg0, %c0_i32 : i32, i32
  }
  func.func @transform_4(%arg0: i32) -> (i32, i32) {
    %c0_i32 = arith.constant 0 : i32
    %c0_i32_0 = arith.constant 0 : i32
    return %arg0, %c0_i32 : i32, i32
  }
  func.func @transform_5(%arg0: i32) -> (i32, i32) {
    %c0_i32 = arith.constant 0 : i32
    %c0_i32_0 = arith.constant 0 : i32
    return %arg0, %c0_i32 : i32, i32
  }
  func.func @transform_6(%arg0: i32) -> (i32, i32) {
    %c0_i32 = arith.constant 0 : i32
    return %arg0, %arg0 : i32, i32
  }
  func.func @transform_7(%arg0: i32) -> (i32, i32) {
    %c0_i32 = arith.constant 0 : i32
    return %arg0, %arg0 : i32, i32
  }
  func.func @transform_8(%arg0: i32) -> i32 {
    %c0_i32 = arith.constant 0 : i32
    %c0_i32_0 = arith.constant 0 : i32
    return %c0_i32 : i32
  }
}

module attributes {stable_mosaic.version = 11 : i64} {
  func.func @_nce_loss_kernel(%arg0: i32, %arg1: memref<1xf32, #tpu.memory_space<smem>>, %arg2: memref<128x64xf32, #tpu.memory_space<vmem>>, %arg3: memref<256x64xf32, #tpu.memory_space<vmem>>, %arg4: memref<128x256xbf16, #tpu.memory_space<vmem>>, %arg5: memref<128x256xbf16, #tpu.memory_space<vmem>>, %arg6: memref<128x64xf32, #tpu.memory_space<vmem>>, %arg7: memref<128x128xbf16, #tpu.memory_space<vmem>>, %arg8: memref<128x128xbf16, #tpu.memory_space<vmem>>, %arg9: memref<1xf32, #tpu.memory_space<smem>>, %arg10: memref<3xf32, #tpu.memory_space<smem>>, %arg11: memref<3x1x256xf32, #tpu.memory_space<vmem>>, %arg12: memref<3x1x256xf32, #tpu.memory_space<vmem>>) attributes {dimension_semantics = [#tpu.dimension_semantics<arbitrary>], iteration_bounds = array<i64: 2>, scalar_prefetch = 0 : i64, scratch_operands = 3 : i64, tpu.core_type = #tpu.core_type<tc>, window_params = [{transform_indices = @transform_0, window_bounds = array<i64: 1>}, {transform_indices = @transform_1, window_bounds = array<i64: 128, 64>}, {pipeline_mode = #tpu.pipeline_mode<synchronous>, transform_indices = @transform_2, window_bounds = array<i64: 256, 64>}, {transform_indices = @transform_3, window_bounds = array<i64: 128, 256>}, {transform_indices = @transform_4, window_bounds = array<i64: 128, 256>}, {transform_indices = @transform_5, window_bounds = array<i64: 128, 64>}, {transform_indices = @transform_6, window_bounds = array<i64: 128, 128>}, {transform_indices = @transform_7, window_bounds = array<i64: 128, 128>}, {transform_indices = @transform_8, window_bounds = array<i64: 1>}]} {
    %c0_i32 = arith.constant 0 : i32
    %0 = arith.cmpi eq, %arg0, %c0_i32 : i32
    %1 = arith.extui %0 : i1 to i32
    %c0_i32_0 = arith.constant 0 : i32
    %2 = arith.cmpi ne, %1, %c0_i32_0 : i32
    scf.if %2 {
      %cst_81 = arith.constant 0.000000e+00 : f32
      %c0_82 = arith.constant 0 : index
      %179 = memref.load %arg10[%c0_82] : memref<3xf32, #tpu.memory_space<smem>>
      memref.store %cst_81, %arg10[%c0_82] : memref<3xf32, #tpu.memory_space<smem>>
      %cst_83 = arith.constant 0.000000e+00 : f32
      %c1_84 = arith.constant 1 : index
      %180 = memref.load %arg10[%c1_84] : memref<3xf32, #tpu.memory_space<smem>>
      memref.store %cst_83, %arg10[%c1_84] : memref<3xf32, #tpu.memory_space<smem>>
      %cst_85 = arith.constant 0.000000e+00 : f32
      %c2_86 = arith.constant 2 : index
      %181 = memref.load %arg10[%c2_86] : memref<3xf32, #tpu.memory_space<smem>>
      memref.store %cst_85, %arg10[%c2_86] : memref<3xf32, #tpu.memory_space<smem>>
      %cst_87 = arith.constant 0xFF800000 : f32
      %182 = vector.broadcast %cst_87 : f32 to vector<3x1x256xf32>
      %c0_88 = arith.constant 0 : index
      %c0_89 = arith.constant 0 : index
      %c0_90 = arith.constant 0 : index
      %183 = vector.load %arg11[%c0_88, %c0_89, %c0_90] : memref<3x1x256xf32, #tpu.memory_space<vmem>>, vector<3x1x256xf32>
      tpu.vector_store %arg11[%c0_88, %c0_89, %c0_90], %182 {strides = array<i32>} : memref<3x1x256xf32, #tpu.memory_space<vmem>>, vector<3x1x256xf32>,
      %cst_91 = arith.constant 0.000000e+00 : f32
      %184 = vector.broadcast %cst_91 : f32 to vector<3x1x256xf32>
      %c0_92 = arith.constant 0 : index
      %c0_93 = arith.constant 0 : index
      %c0_94 = arith.constant 0 : index
      %185 = vector.load %arg12[%c0_92, %c0_93, %c0_94] : memref<3x1x256xf32, #tpu.memory_space<vmem>>, vector<3x1x256xf32>
      tpu.vector_store %arg12[%c0_92, %c0_93, %c0_94], %184 {strides = array<i32>} : memref<3x1x256xf32, #tpu.memory_space<vmem>>, vector<3x1x256xf32>,
    } else {
    }
    %c0 = arith.constant 0 : index
    %3 = memref.load %arg1[%c0] : memref<1xf32, #tpu.memory_space<smem>>
    %c0_1 = arith.constant 0 : index
    %c0_2 = arith.constant 0 : index
    %4 = vector.load %arg2[%c0_1, %c0_2] : memref<128x64xf32, #tpu.memory_space<vmem>>, vector<128x64xf32>
    %c0_3 = arith.constant 0 : index
    %c0_4 = arith.constant 0 : index
    %5 = vector.load %arg3[%c0_3, %c0_4] : memref<256x64xf32, #tpu.memory_space<vmem>>, vector<256x64xf32>
    %cst = arith.constant dense<0.000000e+00> : vector<128x256xf32>
    %6 = tpu.matmul %4, %5, %cst {dimension_numbers = #tpu.dot_dimension_numbers<[1], [1], [0], [0], [0, 0, 1, 0], [], []>} : vector<128x64xf32>, vector<256x64xf32>, vector<128x256xf32> -> vector<128x256xf32>
    %7 = vector.broadcast %3 : f32 to vector<128x256xf32>
    %8 = arith.mulf %6, %7 : vector<128x256xf32>
    %c0_5 = arith.constant 0 : index
    %c0_6 = arith.constant 0 : index
    %9 = vector.load %arg4[%c0_5, %c0_6] : memref<128x256xbf16, #tpu.memory_space<vmem>>, vector<128x256xbf16>
    %10 = arith.extf %9 : vector<128x256xbf16> to vector<128x256xf32>
    %11 = vector.broadcast %3 : f32 to vector<128x256xf32>
    %12 = arith.mulf %10, %11 : vector<128x256xf32>
    %c0_7 = arith.constant 0 : index
    %c0_8 = arith.constant 0 : index
    %13 = vector.load %arg5[%c0_7, %c0_8] : memref<128x256xbf16, #tpu.memory_space<vmem>>, vector<128x256xbf16>
    %14 = arith.extf %13 : vector<128x256xbf16> to vector<128x256xf32>
    %15 = vector.broadcast %3 : f32 to vector<128x256xf32>
    %16 = arith.mulf %14, %15 : vector<128x256xf32>
    %17 = tpu.iota {dimensions = array<i32: 0>} : vector<128x128xi32>
    %18 = tpu.iota {dimensions = array<i32: 1>} : vector<128x128xi32>
    %19 = arith.cmpi eq, %17, %18 : vector<128x128xi32>
    %c0_9 = arith.constant 0 : index
    %c0_10 = arith.constant 0 : index
    %20 = vector.load %arg6[%c0_9, %c0_10] : memref<128x64xf32, #tpu.memory_space<vmem>>, vector<128x64xf32>
    %cst_11 = arith.constant dense<0.000000e+00> : vector<128x128xf32>
    %21 = tpu.matmul %4, %20, %cst_11 {dimension_numbers = #tpu.dot_dimension_numbers<[1], [1], [0], [0], [0, 0, 1, 0], [], []>} : vector<128x64xf32>, vector<128x64xf32>, vector<128x128xf32> -> vector<128x128xf32>
    %22 = vector.broadcast %3 : f32 to vector<128x128xf32>
    %23 = arith.mulf %21, %22 : vector<128x128xf32>
    %cst_12 = arith.constant 0.000000e+00 : f32
    %24 = vector.broadcast %cst_12 : f32 to vector<128x128xf32>
    %25 = arith.select %19, %23, %24 : vector<128x128xi1>, vector<128x128xf32>
    %cst_13 = arith.constant dense<0.000000e+00> : vector<128xf32>
    %26 = vector.multi_reduction <add>, %25, %cst_13 [1] : vector<128x128xf32> to vector<128xf32>
    %27 = vector.shape_cast %26 : vector<128xf32> to vector<128x1xf32>
    %c0_14 = arith.constant 0 : index
    %c0_15 = arith.constant 0 : index
    %28 = vector.load %arg7[%c0_14, %c0_15] : memref<128x128xbf16, #tpu.memory_space<vmem>>, vector<128x128xbf16>
    %29 = arith.extf %28 : vector<128x128xbf16> to vector<128x128xf32>
    %30 = vector.broadcast %3 : f32 to vector<128x128xf32>
    %31 = arith.mulf %29, %30 : vector<128x128xf32>
    %cst_16 = arith.constant 0.000000e+00 : f32
    %32 = vector.broadcast %cst_16 : f32 to vector<128x128xf32>
    %33 = arith.select %19, %31, %32 : vector<128x128xi1>, vector<128x128xf32>
    %cst_17 = arith.constant dense<0.000000e+00> : vector<128xf32>
    %34 = vector.multi_reduction <add>, %33, %cst_17 [1] : vector<128x128xf32> to vector<128xf32>
    %35 = vector.shape_cast %34 : vector<128xf32> to vector<128x1xf32>
    %c0_18 = arith.constant 0 : index
    %c0_19 = arith.constant 0 : index
    %36 = vector.load %arg8[%c0_18, %c0_19] : memref<128x128xbf16, #tpu.memory_space<vmem>>, vector<128x128xbf16>
    %37 = arith.extf %36 : vector<128x128xbf16> to vector<128x128xf32>
    %38 = vector.broadcast %3 : f32 to vector<128x128xf32>
    %39 = arith.mulf %37, %38 : vector<128x128xf32>
    %cst_20 = arith.constant 0.000000e+00 : f32
    %40 = vector.broadcast %cst_20 : f32 to vector<128x128xf32>
    %41 = arith.select %19, %39, %40 : vector<128x128xi1>, vector<128x128xf32>
    %cst_21 = arith.constant dense<0.000000e+00> : vector<128xf32>
    %42 = vector.multi_reduction <add>, %41, %cst_21 [1] : vector<128x128xf32> to vector<128xf32>
    %43 = vector.shape_cast %42 : vector<128xf32> to vector<128x1xf32>
    %cst_22 = arith.constant dense<0xFF800000> : vector<128xf32>
    %44 = vector.multi_reduction <maximumf>, %8, %cst_22 [1] : vector<128x256xf32> to vector<128xf32>
    %45 = vector.shape_cast %44 : vector<128xf32> to vector<128x1xf32>
    %46 = vector.broadcast %45 : vector<128x1xf32> to vector<128x256xf32>
    %47 = arith.subf %8, %46 : vector<128x256xf32>
    %48 = math.exp %47 : vector<128x256xf32>
    %cst_23 = arith.constant dense<0.000000e+00> : vector<128xf32>
    %49 = vector.multi_reduction <add>, %48, %cst_23 [1] : vector<128x256xf32> to vector<128xf32>
    %50 = vector.shape_cast %49 : vector<128xf32> to vector<128x1xf32>
    %51 = math.log %50 : vector<128x1xf32>
    %52 = arith.addf %51, %45 : vector<128x1xf32>
    %c0_24 = arith.constant 0 : index
    %53 = memref.load %arg10[%c0_24] : memref<3xf32, #tpu.memory_space<smem>>
    %cst_25 = arith.constant 2.000000e+00 : f32
    %54 = vector.broadcast %cst_25 : f32 to vector<128x1xf32>
    %55 = arith.mulf %54, %27 : vector<128x1xf32>
    %56 = arith.subf %52, %55 : vector<128x1xf32>
    %57 = vector.shape_cast %56 : vector<128x1xf32> to vector<1x128x1xf32>
    %cst_26 = arith.constant dense<0.000000e+00> : vector<1xf32>
    %58 = vector.multi_reduction <add>, %57, %cst_26 [1, 2] : vector<1x128x1xf32> to vector<1xf32>
    %59 = vector.shape_cast %58 : vector<1xf32> to vector<1x1x1xf32>
    %60 = vector.extract %59[0, 0, 0] : f32 from vector<1x1x1xf32>
    %61 = arith.addf %53, %60 : f32
    %c0_27 = arith.constant 0 : index
    %62 = memref.load %arg10[%c0_27] : memref<3xf32, #tpu.memory_space<smem>>
    memref.store %61, %arg10[%c0_27] : memref<3xf32, #tpu.memory_space<smem>>
    %cst_28 = arith.constant dense<0xFF800000> : vector<256xf32>
    %63 = vector.multi_reduction <maximumf>, %8, %cst_28 [0] : vector<128x256xf32> to vector<256xf32>
    %64 = vector.shape_cast %63 : vector<256xf32> to vector<1x256xf32>
    %65 = vector.broadcast %64 : vector<1x256xf32> to vector<128x256xf32>
    %66 = arith.subf %8, %65 : vector<128x256xf32>
    %67 = math.exp %66 : vector<128x256xf32>
    %cst_29 = arith.constant dense<0.000000e+00> : vector<256xf32>
    %68 = vector.multi_reduction <add>, %67, %cst_29 [0] : vector<128x256xf32> to vector<256xf32>
    %69 = vector.shape_cast %68 : vector<256xf32> to vector<1x256xf32>
    %c0_30 = arith.constant 0 : index
    %c0_31 = arith.constant 0 : index
    %c0_32 = arith.constant 0 : index
    %70 = vector.load %arg11[%c0_30, %c0_31, %c0_32] : memref<3x1x256xf32, #tpu.memory_space<vmem>>, vector<1x1x256xf32>
    %71 = vector.shape_cast %70 : vector<1x1x256xf32> to vector<1x256xf32>
    %72 = arith.maximumf %71, %64 : vector<1x256xf32>
    %c0_33 = arith.constant 0 : index
    %c0_34 = arith.constant 0 : index
    %c0_35 = arith.constant 0 : index
    %73 = vector.load %arg12[%c0_33, %c0_34, %c0_35] : memref<3x1x256xf32, #tpu.memory_space<vmem>>, vector<1x1x256xf32>
    %74 = vector.shape_cast %73 : vector<1x1x256xf32> to vector<1x256xf32>
    %75 = arith.subf %71, %72 : vector<1x256xf32>
    %76 = math.exp %75 : vector<1x256xf32>
    %77 = arith.mulf %74, %76 : vector<1x256xf32>
    %78 = arith.subf %64, %72 : vector<1x256xf32>
    %79 = math.exp %78 : vector<1x256xf32>
    %80 = arith.mulf %69, %79 : vector<1x256xf32>
    %81 = arith.addf %77, %80 : vector<1x256xf32>
    %c0_36 = arith.constant 0 : index
    %c0_37 = arith.constant 0 : index
    %c0_38 = arith.constant 0 : index
    %82 = vector.load %arg12[%c0_36, %c0_37, %c0_38] : memref<3x1x256xf32, #tpu.memory_space<vmem>>, vector<1x1x256xf32>
    %83 = vector.shape_cast %82 : vector<1x1x256xf32> to vector<1x256xf32>
    %84 = vector.shape_cast %81 : vector<1x256xf32> to vector<1x1x256xf32>
    tpu.vector_store %arg12[%c0_36, %c0_37, %c0_38], %84 {strides = array<i32>} : memref<3x1x256xf32, #tpu.memory_space<vmem>>, vector<1x1x256xf32>,
    %c0_39 = arith.constant 0 : index
    %c0_40 = arith.constant 0 : index
    %c0_41 = arith.constant 0 : index
    %85 = vector.load %arg11[%c0_39, %c0_40, %c0_41] : memref<3x1x256xf32, #tpu.memory_space<vmem>>, vector<1x1x256xf32>
    %86 = vector.shape_cast %85 : vector<1x1x256xf32> to vector<1x256xf32>
    %87 = vector.shape_cast %72 : vector<1x256xf32> to vector<1x1x256xf32>
    tpu.vector_store %arg11[%c0_39, %c0_40, %c0_41], %87 {strides = array<i32>} : memref<3x1x256xf32, #tpu.memory_space<vmem>>, vector<1x1x256xf32>,
    %cst_42 = arith.constant dense<0xFF800000> : vector<128xf32>
    %88 = vector.multi_reduction <maximumf>, %12, %cst_42 [1] : vector<128x256xf32> to vector<128xf32>
    %89 = vector.shape_cast %88 : vector<128xf32> to vector<128x1xf32>
    %90 = vector.broadcast %89 : vector<128x1xf32> to vector<128x256xf32>
    %91 = arith.subf %12, %90 : vector<128x256xf32>
    %92 = math.exp %91 : vector<128x256xf32>
    %cst_43 = arith.constant dense<0.000000e+00> : vector<128xf32>
    %93 = vector.multi_reduction <add>, %92, %cst_43 [1] : vector<128x256xf32> to vector<128xf32>
    %94 = vector.shape_cast %93 : vector<128xf32> to vector<128x1xf32>
    %95 = math.log %94 : vector<128x1xf32>
    %96 = arith.addf %95, %89 : vector<128x1xf32>
    %c1 = arith.constant 1 : index
    %97 = memref.load %arg10[%c1] : memref<3xf32, #tpu.memory_space<smem>>
    %cst_44 = arith.constant 2.000000e+00 : f32
    %98 = vector.broadcast %cst_44 : f32 to vector<128x1xf32>
    %99 = arith.mulf %98, %35 : vector<128x1xf32>
    %100 = arith.subf %96, %99 : vector<128x1xf32>
    %101 = vector.shape_cast %100 : vector<128x1xf32> to vector<1x128x1xf32>
    %cst_45 = arith.constant dense<0.000000e+00> : vector<1xf32>
    %102 = vector.multi_reduction <add>, %101, %cst_45 [1, 2] : vector<1x128x1xf32> to vector<1xf32>
    %103 = vector.shape_cast %102 : vector<1xf32> to vector<1x1x1xf32>
    %104 = vector.extract %103[0, 0, 0] : f32 from vector<1x1x1xf32>
    %105 = arith.addf %97, %104 : f32
    %c1_46 = arith.constant 1 : index
    %106 = memref.load %arg10[%c1_46] : memref<3xf32, #tpu.memory_space<smem>>
    memref.store %105, %arg10[%c1_46] : memref<3xf32, #tpu.memory_space<smem>>
    %cst_47 = arith.constant dense<0xFF800000> : vector<256xf32>
    %107 = vector.multi_reduction <maximumf>, %12, %cst_47 [0] : vector<128x256xf32> to vector<256xf32>
    %108 = vector.shape_cast %107 : vector<256xf32> to vector<1x256xf32>
    %109 = vector.broadcast %108 : vector<1x256xf32> to vector<128x256xf32>
    %110 = arith.subf %12, %109 : vector<128x256xf32>
    %111 = math.exp %110 : vector<128x256xf32>
    %cst_48 = arith.constant dense<0.000000e+00> : vector<256xf32>
    %112 = vector.multi_reduction <add>, %111, %cst_48 [0] : vector<128x256xf32> to vector<256xf32>
    %113 = vector.shape_cast %112 : vector<256xf32> to vector<1x256xf32>
    %c1_49 = arith.constant 1 : index
    %c0_50 = arith.constant 0 : index
    %c0_51 = arith.constant 0 : index
    %114 = vector.load %arg11[%c1_49, %c0_50, %c0_51] : memref<3x1x256xf32, #tpu.memory_space<vmem>>, vector<1x1x256xf32>
    %115 = vector.shape_cast %114 : vector<1x1x256xf32> to vector<1x256xf32>
    %116 = arith.maximumf %115, %108 : vector<1x256xf32>
    %c1_52 = arith.constant 1 : index
    %c0_53 = arith.constant 0 : index
    %c0_54 = arith.constant 0 : index
    %117 = vector.load %arg12[%c1_52, %c0_53, %c0_54] : memref<3x1x256xf32, #tpu.memory_space<vmem>>, vector<1x1x256xf32>
    %118 = vector.shape_cast %117 : vector<1x1x256xf32> to vector<1x256xf32>
    %119 = arith.subf %115, %116 : vector<1x256xf32>
    %120 = math.exp %119 : vector<1x256xf32>
    %121 = arith.mulf %118, %120 : vector<1x256xf32>
    %122 = arith.subf %108, %116 : vector<1x256xf32>
    %123 = math.exp %122 : vector<1x256xf32>
    %124 = arith.mulf %113, %123 : vector<1x256xf32>
    %125 = arith.addf %121, %124 : vector<1x256xf32>
    %c1_55 = arith.constant 1 : index
    %c0_56 = arith.constant 0 : index
    %c0_57 = arith.constant 0 : index
    %126 = vector.load %arg12[%c1_55, %c0_56, %c0_57] : memref<3x1x256xf32, #tpu.memory_space<vmem>>, vector<1x1x256xf32>
    %127 = vector.shape_cast %126 : vector<1x1x256xf32> to vector<1x256xf32>
    %128 = vector.shape_cast %125 : vector<1x256xf32> to vector<1x1x256xf32>
    tpu.vector_store %arg12[%c1_55, %c0_56, %c0_57], %128 {strides = array<i32>} : memref<3x1x256xf32, #tpu.memory_space<vmem>>, vector<1x1x256xf32>,
    %c1_58 = arith.constant 1 : index
    %c0_59 = arith.constant 0 : index
    %c0_60 = arith.constant 0 : index
    %129 = vector.load %arg11[%c1_58, %c0_59, %c0_60] : memref<3x1x256xf32, #tpu.memory_space<vmem>>, vector<1x1x256xf32>
    %130 = vector.shape_cast %129 : vector<1x1x256xf32> to vector<1x256xf32>
    %131 = vector.shape_cast %116 : vector<1x256xf32> to vector<1x1x256xf32>
    tpu.vector_store %arg11[%c1_58, %c0_59, %c0_60], %131 {strides = array<i32>} : memref<3x1x256xf32, #tpu.memory_space<vmem>>, vector<1x1x256xf32>,
    %cst_61 = arith.constant dense<0xFF800000> : vector<128xf32>
    %132 = vector.multi_reduction <maximumf>, %16, %cst_61 [1] : vector<128x256xf32> to vector<128xf32>
    %133 = vector.shape_cast %132 : vector<128xf32> to vector<128x1xf32>
    %134 = vector.broadcast %133 : vector<128x1xf32> to vector<128x256xf32>
    %135 = arith.subf %16, %134 : vector<128x256xf32>
    %136 = math.exp %135 : vector<128x256xf32>
    %cst_62 = arith.constant dense<0.000000e+00> : vector<128xf32>
    %137 = vector.multi_reduction <add>, %136, %cst_62 [1] : vector<128x256xf32> to vector<128xf32>
    %138 = vector.shape_cast %137 : vector<128xf32> to vector<128x1xf32>
    %139 = math.log %138 : vector<128x1xf32>
    %140 = arith.addf %139, %133 : vector<128x1xf32>
    %c2 = arith.constant 2 : index
    %141 = memref.load %arg10[%c2] : memref<3xf32, #tpu.memory_space<smem>>
    %cst_63 = arith.constant 2.000000e+00 : f32
    %142 = vector.broadcast %cst_63 : f32 to vector<128x1xf32>
    %143 = arith.mulf %142, %43 : vector<128x1xf32>
    %144 = arith.subf %140, %143 : vector<128x1xf32>
    %145 = vector.shape_cast %144 : vector<128x1xf32> to vector<1x128x1xf32>
    %cst_64 = arith.constant dense<0.000000e+00> : vector<1xf32>
    %146 = vector.multi_reduction <add>, %145, %cst_64 [1, 2] : vector<1x128x1xf32> to vector<1xf32>
    %147 = vector.shape_cast %146 : vector<1xf32> to vector<1x1x1xf32>
    %148 = vector.extract %147[0, 0, 0] : f32 from vector<1x1x1xf32>
    %149 = arith.addf %141, %148 : f32
    %c2_65 = arith.constant 2 : index
    %150 = memref.load %arg10[%c2_65] : memref<3xf32, #tpu.memory_space<smem>>
    memref.store %149, %arg10[%c2_65] : memref<3xf32, #tpu.memory_space<smem>>
    %cst_66 = arith.constant dense<0xFF800000> : vector<256xf32>
    %151 = vector.multi_reduction <maximumf>, %16, %cst_66 [0] : vector<128x256xf32> to vector<256xf32>
    %152 = vector.shape_cast %151 : vector<256xf32> to vector<1x256xf32>
    %153 = vector.broadcast %152 : vector<1x256xf32> to vector<128x256xf32>
    %154 = arith.subf %16, %153 : vector<128x256xf32>
    %155 = math.exp %154 : vector<128x256xf32>
    %cst_67 = arith.constant dense<0.000000e+00> : vector<256xf32>
    %156 = vector.multi_reduction <add>, %155, %cst_67 [0] : vector<128x256xf32> to vector<256xf32>
    %157 = vector.shape_cast %156 : vector<256xf32> to vector<1x256xf32>
    %c2_68 = arith.constant 2 : index
    %c0_69 = arith.constant 0 : index
    %c0_70 = arith.constant 0 : index
    %158 = vector.load %arg11[%c2_68, %c0_69, %c0_70] : memref<3x1x256xf32, #tpu.memory_space<vmem>>, vector<1x1x256xf32>
    %159 = vector.shape_cast %158 : vector<1x1x256xf32> to vector<1x256xf32>
    %160 = arith.maximumf %159, %152 : vector<1x256xf32>
    %c2_71 = arith.constant 2 : index
    %c0_72 = arith.constant 0 : index
    %c0_73 = arith.constant 0 : index
    %161 = vector.load %arg12[%c2_71, %c0_72, %c0_73] : memref<3x1x256xf32, #tpu.memory_space<vmem>>, vector<1x1x256xf32>
    %162 = vector.shape_cast %161 : vector<1x1x256xf32> to vector<1x256xf32>
    %163 = arith.subf %159, %160 : vector<1x256xf32>
    %164 = math.exp %163 : vector<1x256xf32>
    %165 = arith.mulf %162, %164 : vector<1x256xf32>
    %166 = arith.subf %152, %160 : vector<1x256xf32>
    %167 = math.exp %166 : vector<1x256xf32>
    %168 = arith.mulf %157, %167 : vector<1x256xf32>
    %169 = arith.addf %165, %168 : vector<1x256xf32>
    %c2_74 = arith.constant 2 : index
    %c0_75 = arith.constant 0 : index
    %c0_76 = arith.constant 0 : index
    %170 = vector.load %arg12[%c2_74, %c0_75, %c0_76] : memref<3x1x256xf32, #tpu.memory_space<vmem>>, vector<1x1x256xf32>
    %171 = vector.shape_cast %170 : vector<1x1x256xf32> to vector<1x256xf32>
    %172 = vector.shape_cast %169 : vector<1x256xf32> to vector<1x1x256xf32>
    tpu.vector_store %arg12[%c2_74, %c0_75, %c0_76], %172 {strides = array<i32>} : memref<3x1x256xf32, #tpu.memory_space<vmem>>, vector<1x1x256xf32>,
    %c2_77 = arith.constant 2 : index
    %c0_78 = arith.constant 0 : index
    %c0_79 = arith.constant 0 : index
    %173 = vector.load %arg11[%c2_77, %c0_78, %c0_79] : memref<3x1x256xf32, #tpu.memory_space<vmem>>, vector<1x1x256xf32>
    %174 = vector.shape_cast %173 : vector<1x1x256xf32> to vector<1x256xf32>
    %175 = vector.shape_cast %160 : vector<1x256xf32> to vector<1x1x256xf32>
    tpu.vector_store %arg11[%c2_77, %c0_78, %c0_79], %175 {strides = array<i32>} : memref<3x1x256xf32, #tpu.memory_space<vmem>>, vector<1x1x256xf32>,
    %c1_i32 = arith.constant 1 : i32
    %176 = arith.cmpi eq, %arg0, %c1_i32 : i32
    %177 = arith.extui %176 : i1 to i32
    %c0_i32_80 = arith.constant 0 : i32
    %178 = arith.cmpi ne, %177, %c0_i32_80 : i32
    scf.if %178 {
      %c0_81 = arith.constant 0 : index
      %c0_82 = arith.constant 0 : index
      %c0_83 = arith.constant 0 : index
      %179 = vector.load %arg12[%c0_81, %c0_82, %c0_83] : memref<3x1x256xf32, #tpu.memory_space<vmem>>, vector<1x1x256xf32>
      %180 = vector.shape_cast %179 : vector<1x1x256xf32> to vector<1x256xf32>
      %181 = math.log %180 : vector<1x256xf32>
      %c0_84 = arith.constant 0 : index
      %c0_85 = arith.constant 0 : index
      %c0_86 = arith.constant 0 : index
      %182 = vector.load %arg11[%c0_84, %c0_85, %c0_86] : memref<3x1x256xf32, #tpu.memory_space<vmem>>, vector<1x1x256xf32>
      %183 = vector.shape_cast %182 : vector<1x1x256xf32> to vector<1x256xf32>
      %184 = arith.addf %181, %183 : vector<1x256xf32>
      %c0_87 = arith.constant 0 : index
      %185 = memref.load %arg10[%c0_87] : memref<3xf32, #tpu.memory_space<smem>>
      %186 = vector.shape_cast %184 : vector<1x256xf32> to vector<1x1x256xf32>
      %cst_88 = arith.constant dense<0.000000e+00> : vector<1xf32>
      %187 = vector.multi_reduction <add>, %186, %cst_88 [1, 2] : vector<1x1x256xf32> to vector<1xf32>
      %188 = vector.shape_cast %187 : vector<1xf32> to vector<1x1x1xf32>
      %189 = vector.extract %188[0, 0, 0] : f32 from vector<1x1x1xf32>
      %190 = arith.addf %185, %189 : f32
      %cst_89 = arith.constant 3.906250e-03 : f32
      %191 = arith.mulf %190, %cst_89 : f32
      %c1_90 = arith.constant 1 : index
      %c0_91 = arith.constant 0 : index
      %c0_92 = arith.constant 0 : index
      %192 = vector.load %arg12[%c1_90, %c0_91, %c0_92] : memref<3x1x256xf32, #tpu.memory_space<vmem>>, vector<1x1x256xf32>
      %193 = vector.shape_cast %192 : vector<1x1x256xf32> to vector<1x256xf32>
      %194 = math.log %193 : vector<1x256xf32>
      %c1_93 = arith.constant 1 : index
      %c0_94 = arith.constant 0 : index
      %c0_95 = arith.constant 0 : index
      %195 = vector.load %arg11[%c1_93, %c0_94, %c0_95] : memref<3x1x256xf32, #tpu.memory_space<vmem>>, vector<1x1x256xf32>
      %196 = vector.shape_cast %195 : vector<1x1x256xf32> to vector<1x256xf32>
      %197 = arith.addf %194, %196 : vector<1x256xf32>
      %c1_96 = arith.constant 1 : index
      %198 = memref.load %arg10[%c1_96] : memref<3xf32, #tpu.memory_space<smem>>
      %199 = vector.shape_cast %197 : vector<1x256xf32> to vector<1x1x256xf32>
      %cst_97 = arith.constant dense<0.000000e+00> : vector<1xf32>
      %200 = vector.multi_reduction <add>, %199, %cst_97 [1, 2] : vector<1x1x256xf32> to vector<1xf32>
      %201 = vector.shape_cast %200 : vector<1xf32> to vector<1x1x1xf32>
      %202 = vector.extract %201[0, 0, 0] : f32 from vector<1x1x1xf32>
      %203 = arith.addf %198, %202 : f32
      %cst_98 = arith.constant 3.906250e-03 : f32
      %204 = arith.mulf %203, %cst_98 : f32
      %cst_99 = arith.constant 5.000000e-01 : f32
      %205 = arith.mulf %cst_99, %204 : f32
      %206 = arith.addf %191, %205 : f32
      %c2_100 = arith.constant 2 : index
      %c0_101 = arith.constant 0 : index
      %c0_102 = arith.constant 0 : index
      %207 = vector.load %arg12[%c2_100, %c0_101, %c0_102] : memref<3x1x256xf32, #tpu.memory_space<vmem>>, vector<1x1x256xf32>
      %208 = vector.shape_cast %207 : vector<1x1x256xf32> to vector<1x256xf32>
      %209 = math.log %208 : vector<1x256xf32>
      %c2_103 = arith.constant 2 : index
      %c0_104 = arith.constant 0 : index
      %c0_105 = arith.constant 0 : index
      %210 = vector.load %arg11[%c2_103, %c0_104, %c0_105] : memref<3x1x256xf32, #tpu.memory_space<vmem>>, vector<1x1x256xf32>
      %211 = vector.shape_cast %210 : vector<1x1x256xf32> to vector<1x256xf32>
      %212 = arith.addf %209, %211 : vector<1x256xf32>
      %c2_106 = arith.constant 2 : index
      %213 = memref.load %arg10[%c2_106] : memref<3xf32, #tpu.memory_space<smem>>
      %214 = vector.shape_cast %212 : vector<1x256xf32> to vector<1x1x256xf32>
      %cst_107 = arith.constant dense<0.000000e+00> : vector<1xf32>
      %215 = vector.multi_reduction <add>, %214, %cst_107 [1, 2] : vector<1x1x256xf32> to vector<1xf32>
      %216 = vector.shape_cast %215 : vector<1xf32> to vector<1x1x1xf32>
      %217 = vector.extract %216[0, 0, 0] : f32 from vector<1x1x1xf32>
      %218 = arith.addf %213, %217 : f32
      %cst_108 = arith.constant 3.906250e-03 : f32
      %219 = arith.mulf %218, %cst_108 : f32
      %cst_109 = arith.constant 2.500000e-01 : f32
      %220 = arith.mulf %cst_109, %219 : f32
      %221 = arith.addf %206, %220 : f32
      %c0_110 = arith.constant 0 : index
      %222 = memref.load %arg9[%c0_110] : memref<1xf32, #tpu.memory_space<smem>>
      memref.store %221, %arg9[%c0_110] : memref<1xf32, #tpu.memory_space<smem>>
    } else {
    }
    return
  }
  func.func @transform_0(%arg0: i32) -> i32 {
    %c0_i32 = arith.constant 0 : i32
    %c0_i32_0 = arith.constant 0 : i32
    return %c0_i32 : i32
  }
  func.func @transform_1(%arg0: i32) -> (i32, i32) {
    %c0_i32 = arith.constant 0 : i32
    %c0_i32_0 = arith.constant 0 : i32
    return %arg0, %c0_i32 : i32, i32
  }
  func.func @transform_2(%arg0: i32) -> (i32, i32) {
    %c0_i32 = arith.constant 0 : i32
    %c0_i32_0 = arith.constant 0 : i32
    %c0_i32_1 = arith.constant 0 : i32
    return %c0_i32, %c0_i32_0 : i32, i32
  }
  func.func @transform_3(%arg0: i32) -> (i32, i32) {
    %c0_i32 = arith.constant 0 : i32
    %c0_i32_0 = arith.constant 0 : i32
    return %arg0, %c0_i32 : i32, i32
  }
  func.func @transform_4(%arg0: i32) -> (i32, i32) {
    %c0_i32 = arith.constant 0 : i32
    %c0_i32_0 = arith.constant 0 : i32
    return %arg0, %c0_i32 : i32, i32
  }
  func.func @transform_5(%arg0: i32) -> (i32, i32) {
    %c0_i32 = arith.constant 0 : i32
    %c0_i32_0 = arith.constant 0 : i32
    return %arg0, %c0_i32 : i32, i32
  }
  func.func @transform_6(%arg0: i32) -> (i32, i32) {
    %c0_i32 = arith.constant 0 : i32
    return %arg0, %arg0 : i32, i32
  }
  func.func @transform_7(%arg0: i32) -> (i32, i32) {
    %c0_i32 = arith.constant 0 : i32
    return %arg0, %arg0 : i32, i32
  }
  func.func @transform_8(%arg0: i32) -> i32 {
    %c0_i32 = arith.constant 0 : i32
    %c0_i32_0 = arith.constant 0 : i32
    return %c0_i32 : i32
  }
}

</mosaic_0001>

<bundles_post_ra>
// kernel: tpu_custom_call.1
= control target key start
LH: loop header
LB: loop body
LE: loop exit
PB: predicated region body
PF: predicated region fallthrough
CT: control target
= control target key end

     0   :  { %s6596_s0 = inlined_call_operand.<no memory space> [shape: f32[1], index: 0, kind: input, shape index: {}]   ;;  %s6597_s1 = inlined_call_operand.vmem [shape: f32[256,64], index: 1, kind: input, shape index: {}]   ;;  %s6598_s2 = inlined_call_operand.vmem [shape: f32[256,64], index: 2, kind: input, shape index: {}]   ;;  %s6599_s3 = inlined_call_operand.vmem [shape: bf16[256,256], index: 3, kind: input, shape index: {}]   ;;  %s6600_s4 = inlined_call_operand.vmem [shape: bf16[256,256], index: 4, kind: input, shape index: {}]   ;;  %s6601_s5 = inlined_call_operand.vmem [shape: f32[256,64], index: 5, kind: input, shape index: {}]   ;;  %s6602_s6 = inlined_call_operand.vmem [shape: bf16[256,256], index: 6, kind: input, shape index: {}]   ;;  %s6603_s7 = inlined_call_operand.hbm [shape: bf16[256,256], index: 7, kind: input, shape index: {}]   ;;  %s6604_s8 = inlined_call_operand.hbm [shape: f32[1], index: 8, kind: output, shape index: {}]  }
   0x1   :  { %6804 = sst [smem:[#allocation142_spill]] %s6597_s1 }
   0x2   :  { %13 = sst [smem:[#allocation5]] %s6596_s0 }
   0x3   :  { %14 = vsyncpa [#allocation8], 0 }
   0x4   :  { %16 = vsyncpa [#allocation8 + $0x1], 0 }
   0x5   :  { %17 = vsyncpa [#allocation9], 0  ;;  %s4254_s29 = smov 0   ;;  %s4256_s30 = smov 0  }
   0x6   :  { %s4258_s9 = smov 0   ;;  %s4260_s10 = smov 0  }
   0x7 LB: > { %s4273_s0 = sadd.s32 4294967295, %s4197_s10   ;;  %s4276_s11 = sadd.s32 1, %s4197_s10   ;;  %s4197_s10 = sphi %s4260_s10, %s7213_s10   ;;  %s4193_s9 = sphi %s4258_s9, %s7212_s9   ;;  %s4189_s30 = sphi %s4256_s30, %s7211_s30   ;;  %s4185_s29 = sphi %s4254_s29, %s7210_s29  }
   0x8   : > { %s173_s12 = ssub.s32 %s4197_s10, %s4276_s11  ;;  %s178_s13 = sadd.s32 1, %s4193_s9 }
   0x9   : > { %s175_s14 = sor.u32 %s173_s12, %s173_s12  ;;  %p185_p0 = scmp.ne.s32.totalorder %s4193_s9, %s4189_s30 }
   0xa   : > { %p176_p1 = scmp.eq.s32.totalorder %s175_s14, 0  ;;  %p186_p2 = scmp.eq.s32.totalorder %s4197_s10, 0 }
   0xb   : > { %p219_p3 = scmp.ne.s32.totalorder %s4189_s30, %s4185_s29  ;;  %p220_p4 = scmp.eq.s32.totalorder %s4273_s0, 0 }
   0xc   : > { %s4287_s15 = scalar_select %p176_p1, %s4193_s9, %s178_s13  }
   0xd   : > { %p4289_p5 = por %p186_p2, %p185_p0  ;;  %p4293_p6 = por %p220_p4, %p219_p3 }
   0xe   : > { %p3312_p7 = scmp.ge.s32.totalorder %s4197_s10, 2 }
  0x10   : > { %266 = sbr.rel (%p3312_p7) target bundleno = 62 (0x3e), region = 24 }
  0x15   : > { %307 = sbr.rel (!%p4289_p5) target bundleno = 43 (0x2b), region = 44  ;;  %s309_s18 = sand.u32 (%p4289_p5), 1, %s4193_s9  }
  0x16   : > { %s3440_s19 = sshll.u32 (%p4289_p5), %s4197_s10, 5  ;;  %s3313_s20 = sshll.u32 (%p4289_p5), %s309_s18, 6 }
  0x17   : > { %s314_s21 = sadd.s32 (%p4289_p5), %s4197_s10, %s3440_s19  ;;  %s311_s26 = scalar_lea.vmem (%p4289_p5), [#allocation6], %s3313_s20 }
  0x18   : > { %s3316_s22 = sshll.u32 (%p4289_p5), %s314_s21, 2 }
  0x19   : > { %s4306_s25 = scalar_lea.vmem (%p4289_p5), %s6602_s6, %s3316_s22 }
  0x1a   : > { %v333_v0 = vld [vmem:[%s4306_s25] sm:$0xf]  ;;  %v335_v1 = vld [vmem:[%s4306_s25 + $0x8] sm:$0xf]  ;;  %v337_v2 = vld [vmem:[%s4306_s25 + $0x10] sm:$0xf] }
  0x1b   : > { %334 = vst [vmem:[%s311_s26] sm:$0xf] %v333_v0  ;;  %v339_v3 = vld [vmem:[%s4306_s25 + $0x18] sm:$0xf]  ;;  %v341_v4 = vld [vmem:[%s4306_s25 + $0x20] sm:$0xf] }
  0x1c   : > { %336 = vst [vmem:[%s311_s26 + $0x4] sm:$0xf] %v335_v1  ;;  %v343_v5 = vld [vmem:[%s4306_s25 + $0x28] sm:$0xf]  ;;  %v345_v6 = vld [vmem:[%s4306_s25 + $0x30] sm:$0xf] }
  0x1d   : > { %338 = vst [vmem:[%s311_s26 + $0x8] sm:$0xf] %v337_v2  ;;  %v347_v7 = vld [vmem:[%s4306_s25 + $0x38] sm:$0xf]  ;;  %v349_v8 = vld [vmem:[%s4306_s25 + $0x40] sm:$0xf] }
  0x1e   : > { %340 = vst [vmem:[%s311_s26 + $0xc] sm:$0xf] %v339_v3  ;;  %v351_v9 = vld [vmem:[%s4306_s25 + $0x48] sm:$0xf]  ;;  %v353_v10 = vld [vmem:[%s4306_s25 + $0x50] sm:$0xf] }
  0x1f   : > { %342 = vst [vmem:[%s311_s26 + $0x10] sm:$0xf] %v341_v4  ;;  %v355_v11 = vld [vmem:[%s4306_s25 + $0x58] sm:$0xf]  ;;  %v357_v12 = vld [vmem:[%s4306_s25 + $0x60] sm:$0xf] }
  0x20   : > { %344 = vst [vmem:[%s311_s26 + $0x14] sm:$0xf] %v343_v5  ;;  %v359_v13 = vld [vmem:[%s4306_s25 + $0x68] sm:$0xf]  ;;  %v361_v14 = vld [vmem:[%s4306_s25 + $0x70] sm:$0xf] }
  0x21   : > { %346 = vst [vmem:[%s311_s26 + $0x18] sm:$0xf] %v345_v6  ;;  %v363_v15 = vld [vmem:[%s4306_s25 + $0x78] sm:$0xf] }
  0x22   : > { %348 = vst [vmem:[%s311_s26 + $0x1c] sm:$0xf] %v347_v7 }
  0x23   : > { %350 = vst [vmem:[%s311_s26 + $0x20] sm:$0xf] %v349_v8 }
  0x24   : > { %352 = vst [vmem:[%s311_s26 + $0x24] sm:$0xf] %v351_v9 }
  0x25   : > { %354 = vst [vmem:[%s311_s26 + $0x28] sm:$0xf] %v353_v10 }
  0x26   : > { %356 = vst [vmem:[%s311_s26 + $0x2c] sm:$0xf] %v355_v11 }
  0x27   : > { %358 = vst [vmem:[%s311_s26 + $0x30] sm:$0xf] %v357_v12 }
  0x28   : > { %360 = vst [vmem:[%s311_s26 + $0x34] sm:$0xf] %v359_v13 }
  0x29   : > { %362 = vst [vmem:[%s311_s26 + $0x38] sm:$0xf] %v361_v14 }
  0x2a   : > { %364 = vst [vmem:[%s311_s26 + $0x3c] sm:$0xf] %v363_v15 }
  0x2b PF: > { %s421_s27 = sand.u32 1, %s4193_s9   ;;  %s3441_s28 = sshll.u32 %s4197_s10, 5 }
  0x2c   : > { %s3317_s29 = sshll.u32 %s421_s27, 6  ;;  %s430_s12 = sadd.s32 %s4197_s10, %s3441_s28 }
  0x2d   : > { %s3320_s13 = sshll.u32 %s430_s12, 2  ;;  %s425_s14 = scalar_lea.vmem [#allocation7], %s3317_s29 }
  0x2e   : > { %s435_s18 = sshll.u32 %s425_s14, 4  ;;  %s432_s21 = scalar_lea.hbm %s6603_s7, %s3320_s13  ;;  %s436_s18 = int_to_ptr.vmem [resolvable:$true] %s435_s18 }
  0x2f   : > { %s433_s22 = sshll.u32 %s432_s21, 4  ;;  %s422_s23 = scalar_lea.sflag [#allocation8], %s421_s27  ;;  %s434_s22 = int_to_ptr.hbm [resolvable:$true] %s433_s22 }
  0x30   : > { %s4117_s24 = sshra.s32 %s434_s22, 4  ;;  %s4123_s29 = scalar_lea.hbm %s6603_s7, 256  ;;  %s4118_s24 = int_to_ptr.hbm [resolvable:$true] %s4117_s24 }
  0x31   : > { %s4119_s25 = scalar_lea.hbm %s4118_s24, 64  ;;  %p4124_p11 = scmp.lt.s32.totalorder %s4118_s24, %s6603_s7 }
  0x32   : > { %p4120_p8 = scmp.ne.s32.totalorder %s4118_s24, %s4119_s25  ;;  %p4125_p12 = scmp.lt.s32.totalorder %s4123_s29, %s4119_s25 }
  0x34   : > { %p4121_p9 = pnand %p4120_p8, %p4289_p5  ;;  %p4126_p13 = por %p4125_p12, %p4124_p11 }
  0x36   : > { %p4122_p10 = pneg %p4121_p9 }
  0x38   : > { %p4127_p0 = pnand %p4126_p13, %p4122_p10 }
  0x3a   : > { %4130 = shalt.err (!%p4127_p0)
}
  0x3b   : > { %s4199_s27 = smov 128   ;;  %s4200_s13 = smov 64  }
  0x3c   : > { %s4201_s19 = smov 4  }
  0x3d   : > { %3566 = dma.hbm_to_vmem [thread:$0]  (%p4289_p5), %s434_s22, 1024, %s436_s18, %s422_s23, %s4199_s27, %s4200_s13, %s4201_s19  }
  0x3e PF: > { %p3321_p1 = scmp.ge.s32.totalorder %s4197_s10, 1  ;;  %p443_p2 = scmp.lt.s32.totalorder %s4197_s10, 3 }
  0x40   : > { %p444_p3 = pnand %p3321_p1, %p443_p2 }
  0x42   : > { %447 = sbr.rel (%p444_p3) target bundleno = 1176 (0x498), region = 89 }
  0x47   : > { %s450_s20 = sand.u32 1, %s4189_s30  }
  0x48   : > { %s3322_s21 = sshll.u32 %s450_s20, 6  ;;  %s457_s25 = scalar_lea.sflag [#allocation8], %s450_s20 }
  0x49   : > { %s4343_s24 = scalar_lea.vmem [#allocation6], %s3322_s21  ;;  %s4345_s26 = scalar_lea.vmem [#allocation7], %s3322_s21 }
  0x4a   : > { %4176 = dma.done.wait (%p4293_p6), %s457_s25, 1024  }
  0x4b   : > { %4178 = vsyncadd (%p4293_p6), %s457_s25, 4294966272  ;;  %s3324_s16 = sshll.u32 %s4273_s0, 4  ;;  %s6807_s1 = sld [smem:[#allocation142_spill]] }
  0x4c   : > { %p516_p4 = scmp.lt.s32.totalorder %s3324_s16, 31  ;;  %p3334_p5 = scmp.ne.s32.totalorder %s4273_s0, 0 }
  0x4d   : > { %s4202_s21 = smov (!%p3334_p5), 0.0  }
  0x4e   : > { %s7215_s16 = smov (!%p516_p4, %s3324_s16), 31  ;;  %546 = sbr.rel (%p3334_p5) target bundleno = 92 (0x5c), region = 101 }
  0x4f   : > { %s3325_s10 = sshll.u32 %s7215_s16, 3  ;;  %548 = sst [smem:[#allocation2]] (!%p3334_p5), %s4202_s21 }
  0x50   : > { %s4360_s12 = scalar_lea.vmem %s6599_s3, %s3325_s10  ;;  %s4365_s17 = scalar_lea.vmem %s6600_s4, %s3325_s10 }
  0x51   : > { %s4355_s23 = scalar_lea.vmem %s6807_s1, %s3325_s10  ;;  %s4370_s20 = scalar_lea.vmem %s6601_s5, %s3325_s10 }
  0x52   : > { %550 = sst [smem:[#allocation2 + $0x1]] (!%p3334_p5), %s4202_s21 }
  0x53   : > { %v553_v16 = vlaneseq  ;;  %552 = sst [smem:[#allocation2 + $0x2]] %s4202_s21  ;;  %v4203_v17 = vmov -inf   ;;  %v4204_v18 = vmov 0.0  }
  0x55   : > { %vm555_vm0 = vcmp.lt.s32.totalorder %v553_v16, 256 }
  0x56   : > { %557 = vst.msk [vmem:[#allocation3] sm:$0x3] %vm555_vm0, %v4203_v17 }
  0x57   : > { %558 = vst.msk [vmem:[#allocation3 + $0x2] sm:$0x3] %vm555_vm0, %v4203_v17 }
  0x58   : > { %559 = vst.msk [vmem:[#allocation3 + $0x4] sm:$0x3] %vm555_vm0, %v4203_v17 }
  0x59   : > { %560 = vst.msk [vmem:[#allocation4] sm:$0x3] %vm555_vm0, %v4204_v18 }
  0x5a   : > { %561 = vst.msk [vmem:[#allocation4 + $0x2] sm:$0x3] %vm555_vm0, %v4204_v18 }
  0x5b   : > { %562 = vst.msk [vmem:[#allocation4 + $0x4] sm:$0x3] %vm555_vm0, %v4204_v18 }
  0x5c PF: > { %v595_v19 = vld [vmem:[%s6598_s2 + $0x78] sm:$0xff]  ;;  %vm612_vm1 = vcmask 523264   ;;  %s563_s22 = sld [smem:[#allocation5]]  ;;  %v6607_v21 = vlaneseq  ;;  %v594_v22 = vld [vmem:[%s6598_s2 + $0x70] sm:$0xff]  ;;  %v593_v34 = vld [vmem:[%s6598_s2 + $0x68] sm:$0xff]  ;;  %p3433_p6 = scmp.ne.s32.totalorder %s4273_s0, 1 }
  0x5d   : > { %v4379_v20 = vld [vmem:[%s6598_s2 + $0xf8] sm:$0xff]  ;;  %3335 = vmatpush.xpose.msk.msra.mxu0 %vm612_vm1, %v595_v19  ;;  %3522 = vmatpush.xpose.msk.msra.mxu3 %vm612_vm1, %v595_v19  ;;  %v3445_v26 = vld [vmem:[%s4343_s24] sm:$0xff]   ;;  %v592_v51 = vld [vmem:[%s6598_s2 + $0x60] sm:$0xff] }
  0x5e   : > { %3367 = vmatpush.xpose.msk.msra.mxu1 %vm612_vm1, %v4379_v20  ;;  %v4389_v23 = vshrl.u32 %v6607_v21, 7  ;;  %v4392_v24 = vand.u32 127, %v6607_v21  ;;  %v3508_v25 = vld [vmem:[%s4343_s24 + $0x8] sm:$0xff]   ;;  %v3447_v29 = vunpack.c.h.bf16 %v3445_v26  ;;  %v3446_v30 = vunpack.c.l.bf16 %v3445_v26  ;;  %v3509_v33 = vld [vmem:[%s4343_s24 + $0x10] sm:$0xff]   ;;  %v4426_v37 = vld [vmem:[%s6598_s2 + $0xe8] sm:$0xff] }
  0x5f   : > { %v4399_v27 = vld [vmem:[%s6598_s2 + $0xf0] sm:$0xff]  ;;  %v3450_v28 = vunpack.c.l.bf16 %v3508_v25  ;;  %v3455_v36 = vunpack.c.h.bf16 %v3509_v33  ;;  %v3454_v41 = vunpack.c.l.bf16 %v3509_v33  ;;  %v1130_v42 = vld [vmem:[%s4370_s20 + $0x78] sm:$0xff]  ;;  %v3451_v45 = vunpack.c.h.bf16 %v3508_v25  ;;  %v4462_v52 = vld [vmem:[%s6598_s2 + $0xe0] sm:$0xff] }
  0x60   : > { %6808 = vst [vmem:[#allocation13_spill] sm:$0xff] %v4389_v23  ;;  %v4402_v31 = vadd.s32 16, %v4389_v23  ;;  %v4405_v32 = vadd.s32 8, %v4389_v23  ;;  %vm1099_vm2 = vcmp.eq.s32.totalorder %v4389_v23, %v4392_v24  ;;  %v4433_v43 = vadd.s32 40, %v4389_v23  ;;  %3399 = vmatpush.xpose.msk.msra.mxu2 %vm612_vm1, %v1130_v42  ;;  %v1129_v50 = vld [vmem:[%s4370_s20 + $0x70] sm:$0xff]  ;;  %v3510_v57 = vld [vmem:[%s4343_s24 + $0x18] sm:$0xff]  }
  0x61   : > { %6809 = vst [vmem:[#allocation14_spill] sm:$0xff] %v4392_v24  ;;  %3336 = vmatpush.xpose.msk.msra.mxu0 %vm612_vm1, %v594_v22  ;;  %3523 = vmatpush.xpose.msk.msra.mxu3 %vm612_vm1, %v594_v22  ;;  %v4436_v44 = vadd.s32 32, %v4389_v23  ;;  %v4451_v49 = vadd.s32 24, %v4389_v23  ;;  %v4472_v56 = vld [vmem:[%s4343_s24 + $0x20] sm:$0xff]   ;;  %v591_v59 = vld [vmem:[%s6598_s2 + $0x58] sm:$0xff]  ;;  %v4502_v1 = vadd.s32 64, %v4389_v23  ;;  %v3459_v2 = vunpack.c.h.bf16 %v3510_v57 }
  0x62   : > { %6810 = vst [vmem:[#allocation15_spill] sm:$0xff] %v4402_v31  ;;  %3368 = vmatpush.xpose.msk.msra.mxu1 %vm612_vm1, %v4399_v27  ;;  %v4417_v35 = vstv %s563_s22  ;;  %vm1101_vm3 = vcmp.eq.s32.totalorder %v4402_v31, %v4392_v24  ;;  %vm1100_vm4 = vcmp.eq.s32.totalorder %v4405_v32, %v4392_v24  ;;  %vm1104_vm5 = vcmp.eq.s32.totalorder %v4433_v43, %v4392_v24  ;;  %v1128_v58 = vld [vmem:[%s4370_s20 + $0x68] sm:$0xff]  ;;  %v4489_v60 = vld [vmem:[%s6598_s2 + $0xd8] sm:$0xff]  ;;  %v1127_v6 = vld [vmem:[%s4370_s20 + $0x60] sm:$0xff] }
  0x63   : > { %6811 = vst [vmem:[#allocation16_spill] sm:$0xff] %v4405_v32  ;;  %v1342_v38 = vmul.f32 %v3450_v28, %v4417_v35  ;;  %v1341_v39 = vmul.f32 %v3447_v29, %v4417_v35  ;;  %v1340_v40 = vmul.f32 %v3446_v30, %v4417_v35  ;;  %v1345_v53 = vmul.f32 %v3455_v36, %v4417_v35  ;;  %v590_v7 = vld [vmem:[%s6598_s2 + $0x50] sm:$0xff]  ;;  %v1126_v13 = vld [vmem:[%s4370_s20 + $0x58] sm:$0xff]  ;;  %v589_v14 = vld [vmem:[%s6598_s2 + $0x48] sm:$0xff] }
  0x64   : > { %6812 = vst [vmem:[#allocation17_spill] sm:$0xff] %v4433_v43  ;;  %v1344_v54 = vmul.f32 %v3454_v41, %v4417_v35  ;;  %vm1103_vm6 = vcmp.eq.s32.totalorder %v4436_v44, %v4392_v24  ;;  %v1343_v55 = vmul.f32 %v3451_v45, %v4417_v35  ;;  %3400 = vmatpush.xpose.msk.msra.mxu2 %vm612_vm1, %v1129_v50  ;;  %v3462_v63 = vunpack.c.l.bf16 %v4472_v56  ;;  %v4522_v8 = vld [vmem:[%s6598_s2 + $0xd0] sm:$0xff]  ;;  %v4546_v15 = vld [vmem:[%s6598_s2 + $0xc8] sm:$0xff]  ;;  %v588_v33 = vld [vmem:[%s6598_s2 + $0x40] sm:$0xff] }
  0x65   : > { %6813 = vst [vmem:[#allocation18_spill] sm:$0xff] %v4436_v44  ;;  %3337 = vmatpush.xpose.msk.msra.mxu0 %vm612_vm1, %v593_v34  ;;  %3524 = vmatpush.xpose.msk.msra.mxu3 %vm612_vm1, %v593_v34  ;;  %v1358_v46 = vsel %vm1101_vm3, %v1342_v38, 0.0  ;;  %v1357_v47 = vsel %vm1100_vm4, %v1341_v39, 0.0  ;;  %v1356_v48 = vsel %vm1099_vm2, %v1340_v40, 0.0  ;;  %vm1102_vm7 = vcmp.eq.s32.totalorder %v4451_v49, %v4392_v24  ;;  %v3512_v12 = vld [vmem:[%s4343_s24 + $0x28] sm:$0xff]   ;;  %v4579_v34 = vld [vmem:[%s6598_s2 + $0xc0] sm:$0xff] }
  0x66   : > { %6814 = vst [vmem:[#allocation19_spill] sm:$0xff] %v4451_v49  ;;  %3369 = vmatpush.xpose.msk.msra.mxu1 %vm612_vm1, %v4426_v37  ;;  %1376 = vadd.xlane.f32.xlu0 %v1358_v46  ;;  %v1361_v61 = vsel %vm1104_vm5, %v1345_v53, 0.0  ;;  %v1360_v62 = vsel %vm1103_vm6, %v1344_v54, 0.0  ;;  %v1359_v0 = vsel %vm1102_vm7, %v1343_v55, 0.0  ;;  %v3458_v3 = vunpack.c.l.bf16 %v3510_v57  ;;  %v1125_v30 = vld [vmem:[%s4370_s20 + $0x50] sm:$0xff]  ;;  %v4587_v40 = vld [vmem:[%s4343_s24 + $0x38] sm:$0xff]  }
  0x67   : > { %1374 = vadd.xlane.f32.xlu2 %v1357_v47  ;;  %1372 = vadd.xlane.f32.xlu1 %v1356_v48  ;;  %6815 = vst [vmem:[#allocation20_spill] sm:$0xff] %v4502_v1  ;;  %v4508_v4 = vadd.s32 56, %v4389_v23  ;;  %v4511_v5 = vadd.s32 48, %v4389_v23  ;;  %v1348_v9 = vmul.f32 %v3462_v63, %v4417_v35  ;;  %vm1107_vm8 = vcmp.eq.s32.totalorder %v4502_v1, %v4392_v24  ;;  %v3513_v41 = vld [vmem:[%s4343_s24 + $0x30] sm:$0xff]   ;;  %v1124_v42 = vld [vmem:[%s4370_s20 + $0x48] sm:$0xff]  ;;  %v1010_v49 = vld [vmem:[%s4365_s17 + $0x50] sm:$0xff] }
  0x68   : > { %3401 = vmatpush.xpose.msk.msra.mxu2 %vm612_vm1, %v1128_v58  ;;  %v1347_v10 = vmul.f32 %v3459_v2, %v4417_v35  ;;  %v1346_v11 = vmul.f32 %v3458_v3, %v4417_v35  ;;  %v4552_v17 = vadd.s32 88, %v4389_v23  ;;  %v3467_v18 = vunpack.c.h.bf16 %v3512_v12  ;;  %v587_v45 = vld [vmem:[%s6598_s2 + $0x38] sm:$0xff]  ;;  %v1123_v58 = vld [vmem:[%s4370_s20 + $0x40] sm:$0xff]  ;;  %v3477_v2 = vld [vmem:[%s4345_s26] sm:$0xff]  }
  0x69   : > { %3338 = vmatpush.xpose.msk.msra.mxu0 %vm612_vm1, %v592_v51  ;;  %3525 = vmatpush.xpose.msk.msra.mxu3 %vm612_vm1, %v592_v51  ;;  %6816 = vst [vmem:[#allocation21_spill] sm:$0xff] %v4508_v4  ;;  %vm1106_vm9 = vcmp.eq.s32.totalorder %v4508_v4, %v4392_v24  ;;  %vm1105_vm10 = vcmp.eq.s32.totalorder %v4511_v5, %v4392_v24  ;;  %v1364_v16 = vsel %vm1107_vm8, %v1348_v9, 0.0  ;;  %v3466_v25 = vunpack.c.l.bf16 %v3512_v12  ;;  %v4606_v46 = vld [vmem:[%s6598_s2 + $0xb8] sm:$0xff] }
  0x6a   : > { %3370 = vmatpush.xpose.msk.msra.mxu1 %vm612_vm1, %v4462_v52  ;;  %6817 = vst [vmem:[#allocation22_spill] sm:$0xff] %v4511_v5  ;;  %v1363_v19 = vsel %vm1106_vm9, %v1347_v10, 0.0  ;;  %v1362_v22 = vsel %vm1105_vm10, %v1346_v11, 0.0  ;;  %v3463_v26 = vunpack.c.h.bf16 %v4472_v56  ;;  %v4565_v28 = vadd.s32 80, %v4389_v23  ;;  %v1122_v3 = vld [vmem:[%s4370_s20 + $0x38] sm:$0xff] }
  0x6b   : > { %6818 = vst [vmem:[#allocation23_spill] sm:$0xff] %v4552_v17  ;;  %v4568_v29 = vadd.s32 72, %v4389_v23  ;;  %v1351_v36 = vmul.f32 %v3467_v18, %v4417_v35  ;;  %vm1110_vm11 = vcmp.eq.s32.totalorder %v4552_v17, %v4392_v24  ;;  %v1350_v38 = vmul.f32 %v3466_v25, %v4417_v35  ;;  %v1121_v18 = vld [vmem:[%s4370_s20 + $0x30] sm:$0xff]  ;;  %v1011_v32 = vld [vmem:[%s4365_s17 + $0x58] sm:$0xff] }
  0x6c   : > { %3402 = vmatpush.xpose.msk.msra.mxu2 %vm612_vm1, %v1127_v6  ;;  %6819 = vst [vmem:[#allocation24_spill] sm:$0xff] %v4565_v28  ;;  %v1349_v39 = vmul.f32 %v3463_v26, %v4417_v35  ;;  %vm1109_vm12 = vcmp.eq.s32.totalorder %v4565_v28, %v4392_v24  ;;  %v4612_v48 = vadd.s32 112, %v4389_v23  ;;  %v3474_v50 = vunpack.c.l.bf16 %v4587_v40  ;;  %v585_v6 = vld [vmem:[%s6598_s2 + $0x28] sm:$0xff] }
  0x6d   : > { %3339 = vmatpush.xpose.msk.msra.mxu0 %vm612_vm1, %v591_v59  ;;  %3526 = vmatpush.xpose.msk.msra.mxu3 %vm612_vm1, %v591_v59  ;;  %6820 = vst [vmem:[#allocation25_spill] sm:$0xff] %v4568_v29  ;;  %vm1108_vm13 = vcmp.eq.s32.totalorder %v4568_v29, %v4392_v24  ;;  %v1367_v47 = vsel %vm1110_vm11, %v1351_v36, 0.0  ;;  %v1366_v51 = vsel %vm1109_vm12, %v1350_v38, 0.0  ;;  %v3471_v54 = vunpack.c.h.bf16 %v3513_v41  ;;  %v586_v59 = vld [vmem:[%s6598_s2 + $0x30] sm:$0xff]  ;;  %v1120_v38 = vld [vmem:[%s4370_s20 + $0x28] sm:$0xff] }
  0x6e   : > { %3371 = vmatpush.xpose.msk.msra.mxu1 %vm612_vm1, %v4489_v60  ;;  %1382 = vadd.xlane.f32.xlu0 %v1361_v61  ;;  %6821 = vst [vmem:[#allocation26_spill] sm:$0xff] %v4612_v48  ;;  %v1365_v53 = vsel %vm1108_vm13, %v1349_v39, 0.0  ;;  %v3470_v55 = vunpack.c.l.bf16 %v3513_v41  ;;  %v4625_v56 = vadd.s32 104, %v4389_v23  ;;  %v4628_v57 = vadd.s32 96, %v4389_v23  ;;  %v4639_v61 = vld [vmem:[%s6598_s2 + $0xb0] sm:$0xff]  ;;  %v583_v39 = vld [vmem:[%s6598_s2 + $0x18] sm:$0xff] }
  0x6f   : > { %1380 = vadd.xlane.f32.xlu2 %v1360_v62  ;;  %1378 = vadd.xlane.f32.xlu1 %v1359_v0  ;;  %v1354_v62 = vmul.f32 %v3474_v50, %v4417_v35  ;;  %vm6605_vm14 = vcmp.eq.s32.totalorder %v4612_v48, %v4392_v24  ;;  %v1353_v63 = vmul.f32 %v3471_v54, %v4417_v35  ;;  %v3479_v10 = vunpack.c.h.bf16 %v3477_v2  ;;  %v3515_v36 = vld [vmem:[%s4345_s26 + $0x8] sm:$0xff]  }
  0x70   : > { %3403 = vmatpush.xpose.msk.msra.mxu2 %vm612_vm1, %v1126_v13  ;;  %6822 = vst [vmem:[#allocation27_spill] sm:$0xff] %v4625_v56  ;;  %v1352_v0 = vmul.f32 %v3470_v55, %v4417_v35  ;;  %vm6606_vm15 = vcmp.eq.s32.totalorder %v4625_v56, %v4392_v24  ;;  %vm1111_vm0 = vcmp.eq.s32.totalorder %v4628_v57, %v4392_v24  ;;  %v3478_v13 = vunpack.c.l.bf16 %v3477_v2  ;;  %v582_v54 = vld [vmem:[%s6598_s2 + $0x10] sm:$0xff]  ;;  %v581_v2 = vld [vmem:[%s6598_s2 + $0x8] sm:$0xff] }
  0x71   : > { %3340 = vmatpush.xpose.msk.msra.mxu0 %vm612_vm1, %v590_v7  ;;  %3527 = vmatpush.xpose.msk.msra.mxu3 %vm612_vm1, %v590_v7  ;;  %6823 = vst [vmem:[#allocation28_spill] sm:$0xff] %v4628_v57  ;;  %v4663_v7 = vld [vmem:[%s6598_s2 + $0xa8] sm:$0xff]  ;;  %v1370_v9 = vsel %vm6605_vm14, %v1354_v62, 0.0  ;;  %v1369_v11 = vsel %vm6606_vm15, %v1353_v63, 0.0  ;;  %v1437_v25 = vmul.f32 %v3479_v10, %v4417_v35  ;;  %v3483_v50 = vunpack.c.h.bf16 %v3515_v36  ;;  %v4734_v55 = vld [vmem:[%s6598_s2 + $0x90] sm:$0xff]  ;;  %v931_v57 = vld [vmem:[%s4360_s12 + $0x58] sm:$0xff] }
  0x72   : > { %3372 = vmatpush.xpose.msk.msra.mxu1 %vm612_vm1, %v4522_v8  ;;  %v1368_v12 = vsel %vm1111_vm0, %v1352_v0, 0.0  ;;  %v1436_v26 = vmul.f32 %v3478_v13, %v4417_v35  ;;  %v3517_v63 = vld [vmem:[%s4345_s26 + $0x18] sm:$0xff]   ;;  %v1118_v0 = vld [vmem:[%s4370_s20 + $0x18] sm:$0xff]  ;;  %v958_v1 = vunpack.c.l.bf16 %v931_v57  ;;  %v959_v4 = vunpack.c.h.bf16 %v931_v57 }
  0x73   : > { %v1453_v41 = vsel %vm1100_vm4, %v1437_v25, 0.0 }
  0x74   : > { %3404 = vmatpush.xpose.msk.msra.mxu2 %vm612_vm1, %v1125_v30  ;;  %v5138_v57 = vmul.f32 %v959_v4, %v4417_v35 }
  0x75   : > { %3341 = vmatpush.xpose.msk.msra.mxu0 %vm612_vm1, %v589_v14  ;;  %3528 = vmatpush.xpose.msk.msra.mxu3 %vm612_vm1, %v589_v14  ;;  %v3475_v14 = vunpack.c.h.bf16 %v4587_v40  ;;  %v4711_v40 = vld [vmem:[%s6598_s2 + $0x98] sm:$0xff] }
  0x76   : > { %3373 = vmatpush.xpose.msk.msra.mxu1 %vm612_vm1, %v4546_v15  ;;  %1388 = vadd.xlane.f32.xlu0 %v1364_v16  ;;  %v4679_v16 = vadd.s32 120, %v4389_v23  ;;  %6875 = vst [vmem:[#allocation79_spill] sm:$0xff] %v5138_v57 }
  0x77   : > { %1386 = vadd.xlane.f32.xlu2 %v1363_v19  ;;  %1384 = vadd.xlane.f32.xlu1 %v1362_v22  ;;  %v584_v19 = vld [vmem:[%s6598_s2 + $0x20] sm:$0xff]  ;;  %v1355_v30 = vmul.f32 %v3475_v14, %v4417_v35  ;;  %v1117_v14 = vld [vmem:[%s4370_s20 + $0x10] sm:$0xff] }
  0x78   : > { %3405 = vmatpush.xpose.msk.msra.mxu2 %vm612_vm1, %v1124_v42  ;;  %6824 = vst [vmem:[#allocation29_spill] sm:$0xff] %v4679_v16  ;;  %v4690_v22 = vld [vmem:[%s6598_s2 + $0xa0] sm:$0xff]  ;;  %vm1114_vm14 = vcmp.eq.s32.totalorder %v4679_v16, %v4392_v24 }
  0x79   : > { %3342 = vmatpush.xpose.msk.msra.mxu0 %vm612_vm1, %v588_v33  ;;  %3529 = vmatpush.xpose.msk.msra.mxu3 %vm612_vm1, %v588_v33  ;;  %v3516_v33 = vld [vmem:[%s4345_s26 + $0x10] sm:$0xff]  }
  0x7a   : > { %3374 = vmatpush.xpose.msk.msra.mxu1 %vm612_vm1, %v4579_v34  ;;  %v3486_v42 = vunpack.c.l.bf16 %v3516_v33  ;;  %v3487_v13 = vunpack.c.h.bf16 %v3516_v33  ;;  %v3519_v33 = vld [vmem:[%s4345_s26 + $0x28] sm:$0xff]  }
  0x7c   : > { %3406 = vmatpush.xpose.msk.msra.mxu2 %vm612_vm1, %v1123_v58  ;;  %v1440_v58 = vmul.f32 %v3486_v42, %v4417_v35 }
  0x7d   : > { %3343 = vmatpush.xpose.msk.msra.mxu0 %vm612_vm1, %v587_v45  ;;  %3530 = vmatpush.xpose.msk.msra.mxu3 %vm612_vm1, %v587_v45  ;;  %v1452_v45 = vsel %vm1099_vm2, %v1436_v26, 0.0 }
  0x7e   : > { %3375 = vmatpush.xpose.msk.msra.mxu1 %vm612_vm1, %v4606_v46  ;;  %1394 = vadd.xlane.f32.xlu0 %v1367_v47  ;;  %v1371_v47 = vsel %vm1114_vm14, %v1355_v30, 0.0  ;;  %v1441_v30 = vmul.f32 %v3487_v13, %v4417_v35 }
  0x7f   : > { %1392 = vadd.xlane.f32.xlu2 %v1366_v51  ;;  %1390 = vadd.xlane.f32.xlu1 %v1365_v53  ;;  %v3482_v51 = vunpack.c.l.bf16 %v3515_v36  ;;  %v1119_v53 = vld [vmem:[%s4370_s20 + $0x20] sm:$0xff] }
  0x80   : > { %3407 = vmatpush.xpose.msk.msra.mxu2 %vm612_vm1, %v1122_v3  ;;  %v4752_v3 = vld [vmem:[%s6598_s2 + $0x88] sm:$0xff]  ;;  %v564_v36 = vld [vmem:[%s4355_s23] sm:$0xff] }
  0x81   : > { %3344 = vmatpush.xpose.msk.msra.mxu0 %vm612_vm1, %v586_v59  ;;  %3531 = vmatpush.xpose.msk.msra.mxu3 %vm612_vm1, %v586_v59  ;;  %v1439_v59 = vmul.f32 %v3483_v50, %v4417_v35  ;;  %v1438_v62 = vmul.f32 %v3482_v51, %v4417_v35  ;;  %v1457_v50 = vsel %vm1104_vm5, %v1441_v30, 0.0 }
  0x82   : > { %3376 = vmatpush.xpose.msk.msra.mxu1 %vm612_vm1, %v4639_v61 }
  0x83   : > { %v1455_v10 = vsel %vm1102_vm7, %v1439_v59, 0.0 }
  0x84   : > { %3408 = vmatpush.xpose.msk.msra.mxu2 %vm612_vm1, %v1121_v18  ;;  %v580_v18 = vld [vmem:[%s6598_s2] sm:$0xff] }
  0x85   : > { %3345 = vmatpush.xpose.msk.msra.mxu0 %vm612_vm1, %v585_v6  ;;  %3532 = vmatpush.xpose.msk.msra.mxu3 %vm612_vm1, %v585_v6  ;;  %v1456_v6 = vsel %vm1103_vm6, %v1440_v58, 0.0 }
  0x86   : > { %3377 = vmatpush.xpose.msk.msra.mxu1 %vm612_vm1, %v4663_v7  ;;  %1400 = vadd.xlane.f32.xlu0 %v1370_v9  ;;  %v3491_v9 = vunpack.c.h.bf16 %v3517_v63 }
  0x87   : > { %1398 = vadd.xlane.f32.xlu2 %v1369_v11  ;;  %1396 = vadd.xlane.f32.xlu1 %v1368_v12  ;;  %v1454_v11 = vsel %vm1101_vm3, %v1438_v62, 0.0  ;;  %v3490_v12 = vunpack.c.l.bf16 %v3517_v63  ;;  %v3520_v62 = vld [vmem:[%s4345_s26 + $0x30] sm:$0xff]   ;;  %v565_v63 = vld [vmem:[%s4355_s23 + $0x8] sm:$0xff] }
  0x88   : > { %3409 = vmatpush.xpose.msk.msra.mxu2 %vm612_vm1, %v1120_v38  ;;  %v1443_v25 = vmul.f32 %v3491_v9, %v4417_v35  ;;  %v3518_v38 = vld [vmem:[%s4345_s26 + $0x20] sm:$0xff]   ;;  %v3502_v9 = vunpack.c.l.bf16 %v3520_v62 }
  0x89   : > { %3346 = vmatpush.xpose.msk.msra.mxu0 %vm612_vm1, %v584_v19  ;;  %3533 = vmatpush.xpose.msk.msra.mxu3 %vm612_vm1, %v584_v19  ;;  %v4775_v19 = vld [vmem:[%s6598_s2 + $0x80] sm:$0xff]  ;;  %v1442_v26 = vmul.f32 %v3490_v12, %v4417_v35  ;;  %v3494_v51 = vunpack.c.l.bf16 %v3518_v38 }
  0x8a   : > { %3378 = vmatpush.xpose.msk.msra.mxu1 %vm612_vm1, %v4690_v22  ;;  %v1459_v42 = vsel %vm1106_vm9, %v1443_v25, 0.0  ;;  %v1000_v12 = vld [vmem:[%s4365_s17] sm:$0xff]  ;;  %v1448_v13 = vmul.f32 %v3502_v9, %v4417_v35 }
  0x8b   : > { %v1444_v59 = vmul.f32 %v3494_v51, %v4417_v35  ;;  %v3521_v25 = vld [vmem:[%s4345_s26 + $0x38] sm:$0xff]   ;;  %v1017_v30 = vunpack.c.h.bf16 %v1000_v12  ;;  %s1740_s26 = sld [smem:[#allocation2]] }
  0x8c   : > { %3410 = vmatpush.xpose.msk.msra.mxu2 %vm612_vm1, %v1119_v53  ;;  %v1115_v53 = vld [vmem:[%s4370_s20] sm:$0xff] }
  0x8d   : > { %3347 = vmatpush.xpose.msk.msra.mxu0 %vm612_vm1, %v583_v39  ;;  %3534 = vmatpush.xpose.msk.msra.mxu3 %vm612_vm1, %v583_v39  ;;  %v1116_v39 = vld [vmem:[%s4370_s20 + $0x8] sm:$0xff] }
  0x8e   : > { %3379 = vmatpush.xpose.msk.msra.mxu1 %vm612_vm1, %v4711_v40  ;;  %1470 = vadd.xlane.f32.xlu0 %v1453_v41  ;;  %v4792_v41 = vld [vmem:[%s4355_s23 + $0x60] sm:$0xff] }
  0x8f   : > { %1468 = vadd.xlane.f32.xlu2 %v1452_v45  ;;  %1402 = vadd.xlane.f32.xlu1 %v1371_v47  ;;  %v3498_v45 = vunpack.c.l.bf16 %v3519_v33  ;;  %v1458_v47 = vsel %vm1105_vm10, %v1442_v26, 0.0  ;;  %v1016_v26 = vunpack.c.l.bf16 %v1000_v12 }
  0x90   : > { %3411 = vmatpush.xpose.msk.msra.mxu2 %vm612_vm1, %v1118_v0  ;;  %v4820_v0 = vld [vmem:[%s4355_s23 + $0x68] sm:$0xff] }
  0x91   : > { %3348 = vmatpush.xpose.msk.msra.mxu0 %vm612_vm1, %v582_v54  ;;  %3535 = vmatpush.xpose.msk.msra.mxu3 %vm612_vm1, %v582_v54  ;;  %v1446_v54 = vmul.f32 %v3498_v45, %v4417_v35  ;;  %v4869_v45 = vmul.f32 %v1017_v30, %v4417_v35 }
  0x92   : > { %3380 = vmatpush.xpose.msk.msra.mxu1 %vm612_vm1, %v4734_v55 }
  0x94   : > { %3412 = vmatpush.xpose.msk.msra.mxu2 %vm612_vm1, %v1117_v14 }
  0x95   : > { %3349 = vmatpush.xpose.msk.msra.mxu0 %vm612_vm1, %v581_v2  ;;  %3536 = vmatpush.xpose.msk.msra.mxu3 %vm612_vm1, %v581_v2  ;;  %v3503_v2 = vunpack.c.h.bf16 %v3520_v62 }
  0x96   : > { %3381 = vmatpush.xpose.msk.msra.mxu1 %vm612_vm1, %v4752_v3  ;;  %1476 = vadd.xlane.f32.xlu0 %v1456_v6 }
  0x97   : > { %1474 = vadd.xlane.f32.xlu2 %v1455_v10  ;;  %1472 = vadd.xlane.f32.xlu1 %v1454_v11  ;;  %v3499_v10 = vunpack.c.h.bf16 %v3519_v33  ;;  %v1449_v11 = vmul.f32 %v3503_v2, %v4417_v35  ;;  %v4847_v33 = vld [vmem:[%s4355_s23 + $0x70] sm:$0xff] }
  0x98   : > { %3413 = vmatpush.xpose.msk.msra.mxu2 %vm612_vm1, %v1116_v39  ;;  %v3506_v39 = vunpack.c.l.bf16 %v3521_v25 }
  0x99   : > { %3350 = vmatpush.xpose.msk.msra.mxu0 %vm612_vm1, %v580_v18  ;;  %3537 = vmatpush.xpose.msk.msra.mxu3 %vm612_vm1, %v580_v18  ;;  %v1447_v14 = vmul.f32 %v3499_v10, %v4417_v35  ;;  %v566_v18 = vld [vmem:[%s4355_s23 + $0x10] sm:$0xff] }
  0x9a   : > { %3382 = vmatpush.xpose.msk.msra.mxu1 %vm612_vm1, %v4775_v19  ;;  %v1450_v51 = vmul.f32 %v3506_v39, %v4417_v35 }
  0x9c   : > { %3351 = vmatmul.msk.f32.vlgmr.msra.gmra.mxu0 %vm612_vm1, %v564_v36  ;;  %3363 = vmatmul.msk.f32.vlgmr.msra.gmra.mxu3 %vm612_vm1, %v4792_v41 }
  0x9d   : > { %3538 = vmatpush.xpose.msk.msrb.mxu3 %vm612_vm1, %v4379_v20  ;;  %v3495_v20 = vunpack.c.h.bf16 %v3518_v38  ;;  %3383 = vmatmul.msk.f32.vlgmr.msra.gmra.mxu1 %vm612_vm1, %v564_v36  ;;  %v3507_v38 = vunpack.c.h.bf16 %v3521_v25  ;;  %v568_v25 = vld [vmem:[%s4355_s23 + $0x20] sm:$0xff] }
  0x9e   : > { %1482 = vadd.xlane.f32.xlu0 %v1459_v42  ;;  %3414 = vmatpush.xpose.msk.msra.mxu2 %vm612_vm1, %v1115_v53  ;;  %v4866_v42 = vmul.f32 %v1016_v26, %v4417_v35  ;;  %v920_v53 = vld [vmem:[%s4360_s12] sm:$0xff] }
  0x9f   : > { %1480 = vadd.xlane.f32.xlu2 %v1458_v47  ;;  %1478 = vadd.xlane.f32.xlu1 %v1457_v50  ;;  %v1445_v58 = vmul.f32 %v3495_v20, %v4417_v35  ;;  %v1002_v47 = vld [vmem:[%s4365_s17 + $0x10] sm:$0xff]  ;;  %v921_v50 = vld [vmem:[%s4360_s12 + $0x8] sm:$0xff]  ;;  %v1451_v20 = vmul.f32 %v3507_v38, %v4417_v35  ;;  %v936_v2 = vunpack.c.l.bf16 %v920_v53 }
  0xa0   : > { %v938_v62 = vunpack.c.l.bf16 %v921_v50 }
  0xa1   : > { %3539 = vmatpush.xpose.msk.msrb.mxu3 %vm612_vm1, %v4399_v27  ;;  %v1462_v27 = vsel %vm1109_vm12, %v1446_v54, 0.0  ;;  %3415 = vmatmul.msk.f32.vlgmr.msra.gmra.mxu2 %vm612_vm1, %v564_v36  ;;  %v1461_v6 = vsel %vm1108_vm13, %v1445_v58, 0.0  ;;  %v1464_v36 = vsel %vm1111_vm0, %v1448_v13, 0.0  ;;  %v567_v54 = vld [vmem:[%s4355_s23 + $0x18] sm:$0xff]  ;;  %v1020_v58 = vunpack.c.l.bf16 %v1002_v47 }
  0xa2   : > { %v4910_v13 = vmul.f32 %v936_v2, %v4417_v35 }
  0xa3   : > { %v4898_v9 = vmul.f32 %v1020_v58, %v4417_v35 }
  0xa4   : > { %3352 = vmatmul.msk.f32.gmra.mxu0 %vm612_vm1, %v565_v63  ;;  %3364 = vmatmul.msk.f32.gmra.mxu3 %vm612_vm1, %v4820_v0  ;;  %6830 = vst [vmem:[#allocation34_spill] sm:$0xff] %v4910_v13 }
  0xa5   : > { %3540 = vmatpush.xpose.msk.msrb.mxu3 %vm612_vm1, %v4426_v37  ;;  %v1460_v37 = vsel %vm1107_vm8, %v1444_v59, 0.0  ;;  %3384 = vmatmul.msk.f32.gmra.mxu1 %vm612_vm1, %v565_v63  ;;  %v1021_v59 = vunpack.c.h.bf16 %v1002_v47  ;;  %6826 = vst [vmem:[#allocation30_spill] sm:$0xff] %v4898_v9 }
  0xa6   : > { %1488 = vadd.xlane.f32.xlu0 %v1462_v27  ;;  %v939_v27 = vunpack.c.h.bf16 %v921_v50 }
  0xa7   : > { %1486 = vadd.xlane.f32.xlu2 %v1461_v6  ;;  %1484 = vadd.xlane.f32.xlu1 %v1460_v37  ;;  %v937_v6 = vunpack.c.h.bf16 %v920_v53  ;;  %v4901_v10 = vmul.f32 %v1021_v59, %v4417_v35  ;;  %v923_v53 = vld [vmem:[%s4360_s12 + $0x18] sm:$0xff] }
  0xa8   : > { %v4907_v12 = vmul.f32 %v939_v27, %v4417_v35  ;;  %v943_v27 = vunpack.c.h.bf16 %v923_v53 }
  0xa9   : > { %3541 = vmatpush.xpose.msk.msrb.mxu3 %vm612_vm1, %v4462_v52  ;;  %v1465_v52 = vsel %vm6606_vm15, %v1449_v11, 0.0  ;;  %3416 = vmatmul.msk.f32.gmra.mxu2 %vm612_vm1, %v565_v63  ;;  %v4882_v63 = vld [vmem:[%s4355_s23 + $0x78] sm:$0xff]  ;;  %vm6825_vm15 = vcmp.eq.s32.totalorder %v4612_v48, %v4392_v24  ;;  %6827 = vst [vmem:[#allocation31_spill] sm:$0xff] %v4901_v10  ;;  %v4904_v11 = vmul.f32 %v938_v62, %v4417_v35  ;;  %v942_v62 = vunpack.c.l.bf16 %v923_v53  ;;  %v1006_v53 = vld [vmem:[%s4365_s17 + $0x30] sm:$0xff]  ;;  %v932_v24 = vld [vmem:[%s4360_s12 + $0x60] sm:$0xff] }
  0xaa   : > { %v1466_v37 = vsel %vm6825_vm15, %v1450_v51, 0.0  ;;  %6829 = vst [vmem:[#allocation33_spill] sm:$0xff] %v4907_v12  ;;  %v2572_v26 = vmax.f32 %v4898_v9, %v4901_v10  ;;  %v1003_v51 = vld [vmem:[%s4365_s17 + $0x18] sm:$0xff] }
  0xab   : > { %6828 = vst [vmem:[#allocation32_spill] sm:$0xff] %v4904_v11  ;;  %v1023_v59 = vunpack.c.h.bf16 %v1003_v51  ;;  %v1007_v48 = vld [vmem:[%s4365_s17 + $0x38] sm:$0xff] }
  0xac   : > { %3353 = vmatmul.msk.f32.gmra.mxu0 %vm612_vm1, %v566_v18  ;;  %3365 = vmatmul.msk.f32.gmra.mxu3 %vm612_vm1, %v4847_v33 }
  0xad   : > { %3542 = vmatpush.xpose.msk.msrb.mxu3 %vm612_vm1, %v4489_v60  ;;  %v1463_v60 = vsel %vm1110_vm11, %v1447_v14, 0.0  ;;  %3385 = vmatmul.msk.f32.gmra.mxu1 %vm612_vm1, %v566_v18  ;;  %v922_v14 = vld [vmem:[%s4360_s12 + $0x10] sm:$0xff]  ;;  %v4961_v2 = vmul.f32 %v1023_v59, %v4417_v35 }
  0xae   : > { %1494 = vadd.xlane.f32.xlu0 %v1465_v52  ;;  %v940_v30 = vunpack.c.l.bf16 %v922_v14  ;;  %v941_v52 = vunpack.c.h.bf16 %v922_v14 }
  0xaf   : > { %1492 = vadd.xlane.f32.xlu2 %v1464_v36  ;;  %1490 = vadd.xlane.f32.xlu1 %v1463_v60  ;;  %v2038_v36 = vmax.f32 %v4904_v11, %v4907_v12  ;;  %6837 = vst [vmem:[#allocation41_spill] sm:$0xff] %v4961_v2 }
  0xb0   : > { %v4935_v47 = vmul.f32 %v941_v52, %v4417_v35  ;;  %v1004_v52 = vld [vmem:[%s4365_s17 + $0x20] sm:$0xff] }
  0xb1   : > { %3543 = vmatpush.xpose.msk.msrb.mxu3 %vm612_vm1, %v4522_v8  ;;  %v2566_v8 = vmax.f32 %v4866_v42, %v4869_v45  ;;  %3417 = vmatmul.msk.f32.gmra.mxu2 %vm612_vm1, %v566_v18  ;;  %v1001_v18 = vld [vmem:[%s4365_s17 + $0x8] sm:$0xff] }
  0xb2   : > { %v1018_v38 = vunpack.c.l.bf16 %v1001_v18  ;;  %v1019_v39 = vunpack.c.h.bf16 %v1001_v18  ;;  %6833 = vst [vmem:[#allocation37_spill] sm:$0xff] %v4935_v47  ;;  %v571_v18 = vld [vmem:[%s4355_s23 + $0x38] sm:$0xff] }
  0xb4   : > { %3354 = vmatmul.msk.f32.gmra.mxu0 %vm612_vm1, %v567_v54  ;;  %3366 = vmatmul.msk.f32.gmra.mxu3 %vm612_vm1, %v4882_v63  ;;  %v4938_v50 = vmul.f32 %v1018_v38, %v4417_v35  ;;  %v1024_v38 = vunpack.c.l.bf16 %v1004_v52 }
  0xb5   : > { %3544 = vmatpush.xpose.msk.msrb.mxu3 %vm612_vm1, %v4546_v15  ;;  %v1467_v15 = vsel %vm1114_vm14, %v1451_v20, 0.0  ;;  %3386 = vmatmul.msk.f32.gmra.mxu1 %vm612_vm1, %v567_v54  ;;  %v4941_v20 = vmul.f32 %v1019_v39, %v4417_v35  ;;  %v1025_v39 = vunpack.c.h.bf16 %v1004_v52 }
  0xb6   : > { %2567 = vmax.xlane.f32.xlu0 %v2566_v8  ;;  %6834 = vst [vmem:[#allocation38_spill] sm:$0xff] %v4938_v50  ;;  %v1022_v8 = vunpack.c.l.bf16 %v1003_v51  ;;  %v924_v51 = vld [vmem:[%s4360_s12 + $0x20] sm:$0xff]  ;;  %v5012_v59 = vmul.f32 %v1024_v38, %v4417_v35  ;;  %v1005_v38 = vld [vmem:[%s4365_s17 + $0x28] sm:$0xff] }
  0xb7   : > { %1498 = vadd.xlane.f32.xlu2 %v1467_v15  ;;  %1496 = vadd.xlane.f32.xlu1 %v1466_v37  ;;  %6835 = vst [vmem:[#allocation39_spill] sm:$0xff] %v4941_v20  ;;  %v2569_v58 = vmax.f32 %v4938_v50, %v4941_v20  ;;  %v4967_v15 = vmul.f32 %v943_v27, %v4417_v35  ;;  %v570_v37 = vld [vmem:[%s4355_s23 + $0x30] sm:$0xff] }
  0xb8   : > { %6845 = vst [vmem:[#allocation49_spill] sm:$0xff] %v5012_v59 }
  0xb9   : > { %3545 = vmatpush.xpose.msk.msrb.mxu3 %vm612_vm1, %v4579_v34  ;;  %v4913_v34 = vmul.f32 %v937_v6, %v4417_v35  ;;  %3418 = vmatmul.msk.f32.gmra.mxu2 %vm612_vm1, %v567_v54  ;;  %v569_v54 = vld [vmem:[%s4355_s23 + $0x28] sm:$0xff]  ;;  %v4964_v6 = vmul.f32 %v942_v62, %v4417_v35  ;;  %6839 = vst [vmem:[#allocation43_spill] sm:$0xff] %v4967_v15 }
  0xba   : > { %v5015_v62 = vmul.f32 %v1025_v39, %v4417_v35  ;;  %v928_v39 = vld [vmem:[%s4360_s12 + $0x40] sm:$0xff] }
  0xbb   : > { %6831 = vst [vmem:[#allocation35_spill] sm:$0xff] %v4913_v34  ;;  %v2035_v60 = vmax.f32 %v4910_v13, %v4913_v34  ;;  %v2044_v14 = vmax.f32 %v4964_v6, %v4967_v15 }
  0xbc   : > { %3355 = vmatmul.msk.f32.gmra.mxu0 %vm612_vm1, %v568_v25  ;;  %6838 = vst [vmem:[#allocation42_spill] sm:$0xff] %v4964_v6 }
  0xbd   : > { %3546 = vmatpush.xpose.msk.msrb.mxu3 %vm612_vm1, %v4606_v46  ;;  %3387 = vmatmul.msk.f32.gmra.mxu1 %vm612_vm1, %v568_v25  ;;  %v4932_v46 = vmul.f32 %v940_v30, %v4417_v35  ;;  %6846 = vst [vmem:[#allocation50_spill] sm:$0xff] %v5015_v62 }
  0xbe   : > { %2573 = vmax.xlane.f32.xlu0 %v2572_v26 }
  0xbf   : > { %6832 = vst [vmem:[#allocation36_spill] sm:$0xff] %v4932_v46  ;;  %2039 = vmax.xlane.f32.xlu2 %v2038_v36  ;;  %2036 = vmax.xlane.f32.xlu1 %v2035_v60  ;;  %v572_v60 = vld [vmem:[%s4355_s23 + $0x40] sm:$0xff] }
  0xc1   : > { %3547 = vmatpush.xpose.msk.msrb.mxu3 %vm612_vm1, %v4639_v61  ;;  %v2041_v61 = vmax.f32 %v4932_v46, %v4935_v47  ;;  %3419 = vmatmul.msk.f32.gmra.mxu2 %vm612_vm1, %v568_v25 }
  0xc4   : > { %3356 = vmatmul.msk.f32.gmra.mxu0 %vm612_vm1, %v569_v54 }
  0xc5   : > { %3548 = vmatpush.xpose.msk.msrb.mxu3 %vm612_vm1, %v4663_v7  ;;  %3388 = vmatmul.msk.f32.gmra.mxu1 %vm612_vm1, %v569_v54  ;;  %v4958_v7 = vmul.f32 %v1022_v8, %v4417_v35  ;;  %v945_v8 = vunpack.c.h.bf16 %v924_v51 }
  0xc7   : > { %6836 = vst [vmem:[#allocation40_spill] sm:$0xff] %v4958_v7  ;;  %2042 = vmax.xlane.f32.xlu2 %v2041_v61  ;;  %2570 = vmax.xlane.f32.xlu1 %v2569_v58  ;;  %v1028_v58 = vunpack.c.l.bf16 %v1006_v53  ;;  %v2883_v23 = vmax.f32 %v4938_v50, %v4958_v7 }
  0xc9   : > { %3549 = vmatpush.xpose.msk.msrb.mxu3 %vm612_vm1, %v4690_v22  ;;  %v2575_v22 = vmax.f32 %v4958_v7, %v4961_v2  ;;  %3420 = vmatmul.msk.f32.gmra.mxu2 %vm612_vm1, %v569_v54 }
  0xcc   : > { %3357 = vmatmul.msk.f32.gmra.mxu0 %vm612_vm1, %v570_v37 }
  0xcd   : > { %3550 = vmatpush.xpose.msk.msrb.mxu3 %vm612_vm1, %v4711_v40  ;;  %3389 = vmatmul.msk.f32.gmra.mxu1 %vm612_vm1, %v570_v37  ;;  %v925_v40 = vld [vmem:[%s4360_s12 + $0x28] sm:$0xff] }
  0xce   : > { %v946_v25 = vunpack.c.l.bf16 %v925_v40  ;;  %v947_v26 = vunpack.c.h.bf16 %v925_v40 }
  0xcf   : > { %2576 = vmax.xlane.f32.xlu2 %v2575_v22  ;;  %2045 = vmax.xlane.f32.xlu1 %v2044_v14  ;;  %v1029_v22 = vunpack.c.h.bf16 %v1006_v53  ;;  %v5025_v14 = vmul.f32 %v1028_v58, %v4417_v35  ;;  %v1027_v58 = vunpack.c.h.bf16 %v1005_v38 }
  0xd0   : > { %v4988_v30 = vmul.f32 %v946_v25, %v4417_v35 }
  0xd1   : > { %3551 = vmatpush.xpose.msk.msrb.mxu3 %vm612_vm1, %v4734_v55  ;;  %3421 = vmatmul.msk.f32.gmra.mxu2 %vm612_vm1, %v570_v37  ;;  %v4991_v55 = vmul.f32 %v947_v26, %v4417_v35  ;;  %v5022_v37 = vmul.f32 %v945_v8, %v4417_v35  ;;  %6849 = vst [vmem:[#allocation53_spill] sm:$0xff] %v5025_v14  ;;  %v573_v26 = vld [vmem:[%s4355_s23 + $0x48] sm:$0xff]  ;;  %v1026_v8 = vunpack.c.l.bf16 %v1005_v38 }
  0xd2   : > { %6840 = vst [vmem:[#allocation44_spill] sm:$0xff] %v4988_v30  ;;  %v5033_v25 = vmul.f32 %v1029_v22, %v4417_v35  ;;  %v952_v22 = vunpack.c.l.bf16 %v928_v39 }
  0xd3   : > { %6841 = vst [vmem:[#allocation45_spill] sm:$0xff] %v4991_v55  ;;  %v5052_v21 = vmul.f32 %v1026_v8, %v4417_v35 }
  0xd4   : > { %3358 = vmatmul.msk.f32.gmra.mxu0 %vm612_vm1, %v571_v18  ;;  %6848 = vst [vmem:[#allocation52_spill] sm:$0xff] %v5022_v37 }
  0xd5   : > { %3552 = vmatpush.xpose.msk.msrb.mxu3 %vm612_vm1, %v4752_v3  ;;  %3390 = vmatmul.msk.f32.gmra.mxu1 %vm612_vm1, %v571_v18  ;;  %v2050_v3 = vmax.f32 %v4988_v30, %v4991_v55  ;;  %6850 = vst [vmem:[#allocation54_spill] sm:$0xff] %v5033_v25 }
  0xd6   : > { %6854 = vst [vmem:[#allocation58_spill] sm:$0xff] %v5052_v21 }
  0xd7   : > { %2051 = vmax.xlane.f32.xlu2 %v2050_v3  ;;  %v2584_v3 = vmax.f32 %v5025_v14, %v5033_v25 }
  0xd9   : > { %3553 = vmatpush.xpose.msk.msrb.mxu3 %vm612_vm1, %v4775_v19  ;;  %v5001_v36 = vpop.xlane.xlu0 %1376  ;;  %v944_v19 = vunpack.c.l.bf16 %v924_v51  ;;  %3422 = vmatmul.msk.f32.gmra.mxu2 %vm612_vm1, %v571_v18  ;;  %v2578_v18 = vmax.f32 %v5012_v59, %v5015_v62  ;;  %v926_v51 = vld [vmem:[%s4360_s12 + $0x30] sm:$0xff] }
  0xda   : > { %6842 = vst [vmem:[#allocation46_spill] sm:$0xff] %v5001_v36  ;;  %v5006_v54 = vpop.xlane.xlu2 %1374  ;;  %v5008_v61 = vpop.xlane.xlu1 %1372  ;;  %v949_v38 = vunpack.c.h.bf16 %v926_v51  ;;  %v1030_v36 = vunpack.c.l.bf16 %v1007_v48 }
  0xdb   : > { %6843 = vst [vmem:[#allocation47_spill] sm:$0xff] %v5006_v54  ;;  %v5019_v27 = vmul.f32 %v944_v19, %v4417_v35  ;;  %2579 = vmax.xlane.f32.xlu1 %v2578_v18  ;;  %v953_v18 = vunpack.c.h.bf16 %v928_v39 }
  0xdc   : > { %3396 = vmatmul.msk.f32.vlgmr.msrb.gmra.mxu3 %vm612_vm1, %v4820_v0  ;;  %6844 = vst [vmem:[#allocation48_spill] sm:$0xff] %v5008_v61  ;;  %3359 = vmatmul.msk.f32.gmra.mxu0 %vm612_vm1, %v572_v60 }
  0xdd   : > { %6847 = vst [vmem:[#allocation51_spill] sm:$0xff] %v5019_v27  ;;  %3391 = vmatmul.msk.f32.gmra.mxu1 %vm612_vm1, %v572_v60  ;;  %v2047_v40 = vmax.f32 %v5019_v27, %v5022_v37 }
  0xdf   : > { %2048 = vmax.xlane.f32.xlu0 %v2047_v40  ;;  %2585 = vmax.xlane.f32.xlu2 %v2584_v3  ;;  %v948_v40 = vunpack.c.l.bf16 %v926_v51  ;;  %v5058_v3 = vmul.f32 %v952_v22, %v4417_v35  ;;  %v574_v22 = vld [vmem:[%s4355_s23 + $0x50] sm:$0xff] }
  0xe1   : > { %v5040_v52 = vpop.xlane.xlu0 %1382  ;;  %3423 = vmatmul.msk.f32.gmra.mxu2 %vm612_vm1, %v572_v60  ;;  %6856 = vst [vmem:[#allocation60_spill] sm:$0xff] %v5058_v3  ;;  %v5062_v60 = vmul.f32 %v953_v18, %v4417_v35  ;;  %v5065_v39 = vmul.f32 %v948_v40, %v4417_v35  ;;  %v927_v40 = vld [vmem:[%s4360_s12 + $0x38] sm:$0xff] }
  0xe2   : > { %6851 = vst [vmem:[#allocation55_spill] sm:$0xff] %v5040_v52  ;;  %v5045_v53 = vpop.xlane.xlu2 %1380  ;;  %v5047_v19 = vpop.xlane.xlu1 %1378  ;;  %v5055_v52 = vmul.f32 %v1027_v58, %v4417_v35  ;;  %v950_v56 = vunpack.c.l.bf16 %v927_v40  ;;  %v951_v61 = vunpack.c.h.bf16 %v927_v40 }
  0xe3   : > { %6852 = vst [vmem:[#allocation56_spill] sm:$0xff] %v5045_v53  ;;  %v5070_v53 = vmul.f32 %v949_v38, %v4417_v35  ;;  %v2059_v58 = vmax.f32 %v5058_v3, %v5062_v60 }
  0xe4   : > { %3397 = vmatmul.msk.f32.gmra.mxu3 %vm612_vm1, %v4847_v33  ;;  %6853 = vst [vmem:[#allocation57_spill] sm:$0xff] %v5047_v19  ;;  %3360 = vmatmul.msk.f32.gmra.mxu0 %vm612_vm1, %v573_v26  ;;  %v2581_v8 = vmax.f32 %v5052_v21, %v5055_v52  ;;  %v1009_v19 = vld [vmem:[%s4365_s17 + $0x48] sm:$0xff] }
  0xe5   : > { %6855 = vst [vmem:[#allocation59_spill] sm:$0xff] %v5055_v52  ;;  %3392 = vmatmul.msk.f32.gmra.mxu1 %vm612_vm1, %v573_v26  ;;  %v2053_v51 = vmax.f32 %v5065_v39, %v5070_v53  ;;  %v1035_v54 = vunpack.c.h.bf16 %v1009_v19 }
  0xe6   : > { %6857 = vst [vmem:[#allocation61_spill] sm:$0xff] %v5062_v60 }
  0xe7   : > { %6858 = vst [vmem:[#allocation62_spill] sm:$0xff] %v5065_v39  ;;  %2582 = vmax.xlane.f32.xlu0 %v2581_v8  ;;  %2060 = vmax.xlane.f32.xlu2 %v2059_v58  ;;  %v1034_v8 = vunpack.c.l.bf16 %v1009_v19  ;;  %v5104_v19 = vmul.f32 %v1030_v36, %v4417_v35  ;;  %v929_v36 = vld [vmem:[%s4360_s12 + $0x48] sm:$0xff] }
  0xe8   : > { %6859 = vst [vmem:[#allocation63_spill] sm:$0xff] %v5070_v53  ;;  %2054 = vmax.xlane.f32.xlu1 %v2053_v51  ;;  %v1031_v51 = vunpack.c.h.bf16 %v1007_v48  ;;  %v954_v5 = vunpack.c.l.bf16 %v929_v36 }
  0xe9   : > { %v5079_v18 = vpop.xlane.xlu0 %1388  ;;  %3424 = vmatmul.msk.f32.gmra.mxu2 %vm612_vm1, %v573_v26  ;;  %v5097_v58 = vmul.f32 %v1034_v8, %v4417_v35  ;;  %v5101_v26 = vmul.f32 %v1035_v54, %v4417_v35  ;;  %6867 = vst [vmem:[#allocation71_spill] sm:$0xff] %v5104_v19  ;;  %v575_v8 = vld [vmem:[%s4355_s23 + $0x58] sm:$0xff]  ;;  %v1008_v54 = vld [vmem:[%s4365_s17 + $0x40] sm:$0xff]  ;;  %s3431_s23 = sld [smem:[#allocation2 + $0x1]] }
  0xea   : > { %6860 = vst [vmem:[#allocation64_spill] sm:$0xff] %v5079_v18  ;;  %v5084_v16 = vpop.xlane.xlu2 %1386  ;;  %v5086_v38 = vpop.xlane.xlu1 %1384  ;;  %v5091_v18 = vmul.f32 %v950_v56, %v4417_v35  ;;  %v5109_v40 = vmul.f32 %v1031_v51, %v4417_v35  ;;  %v1032_v51 = vunpack.c.l.bf16 %v1008_v54  ;;  %v1033_v29 = vunpack.c.h.bf16 %v1008_v54 }
  0xeb   : > { %6861 = vst [vmem:[#allocation65_spill] sm:$0xff] %v5084_v16  ;;  %v5094_v16 = vmul.f32 %v951_v61, %v4417_v35  ;;  %v2593_v61 = vmax.f32 %v5097_v58, %v5101_v26 }
  0xec   : > { %3398 = vmatmul.msk.f32.gmra.mxu3 %vm612_vm1, %v4882_v63  ;;  %6862 = vst [vmem:[#allocation66_spill] sm:$0xff] %v5086_v38  ;;  %3361 = vmatmul.msk.f32.gmra.mxu0 %vm612_vm1, %v574_v22  ;;  %v2587_v48 = vmax.f32 %v5104_v19, %v5109_v40 }
  0xed   : > { %6863 = vst [vmem:[#allocation67_spill] sm:$0xff] %v5091_v18  ;;  %3393 = vmatmul.msk.f32.gmra.mxu1 %vm612_vm1, %v574_v22  ;;  %v2056_v56 = vmax.f32 %v5091_v18, %v5094_v16 }
  0xee   : > { %6864 = vst [vmem:[#allocation68_spill] sm:$0xff] %v5094_v16 }
  0xef   : > { %6865 = vst [vmem:[#allocation69_spill] sm:$0xff] %v5097_v58  ;;  %2057 = vmax.xlane.f32.xlu0 %v2056_v56  ;;  %2594 = vmax.xlane.f32.xlu2 %v2593_v61  ;;  %v5128_v56 = vmul.f32 %v1032_v51, %v4417_v35  ;;  %v955_v61 = vunpack.c.h.bf16 %v929_v36 }
  0xf0   : > { %6866 = vst [vmem:[#allocation70_spill] sm:$0xff] %v5101_v26  ;;  %2588 = vmax.xlane.f32.xlu1 %v2587_v48 }
  0xf1   : > { %6868 = vst [vmem:[#allocation72_spill] sm:$0xff] %v5109_v40  ;;  %v5116_v38 = vpop.xlane.xlu0 %1394  ;;  %3425 = vmatmul.msk.f32.gmra.mxu2 %vm612_vm1, %v574_v22  ;;  %v5141_v22 = vmul.f32 %v954_v5, %v4417_v35  ;;  %v930_v5 = vld [vmem:[%s4360_s12 + $0x50] sm:$0xff] }
  0xf2   : > { %6869 = vst [vmem:[#allocation73_spill] sm:$0xff] %v5116_v38  ;;  %v5121_v17 = vpop.xlane.xlu2 %1392  ;;  %v5123_v28 = vpop.xlane.xlu1 %1390  ;;  %v5131_v38 = vmul.f32 %v1033_v29, %v4417_v35  ;;  %v5146_v29 = vmul.f32 %v955_v61, %v4417_v35  ;;  %v956_v61 = vunpack.c.l.bf16 %v930_v5  ;;  %v957_v43 = vunpack.c.h.bf16 %v930_v5 }
  0xf3   : > { %6870 = vst [vmem:[#allocation74_spill] sm:$0xff] %v5121_v17  ;;  %v5134_v17 = vmul.f32 %v958_v1, %v4417_v35 }
  0xf4   : > { %6871 = vst [vmem:[#allocation75_spill] sm:$0xff] %v5123_v28  ;;  %3362 = vmatmul.msk.f32.gmra.mxu0 %vm612_vm1, %v575_v8  ;;  %v2590_v48 = vmax.f32 %v5128_v56, %v5131_v38  ;;  %v2062_v54 = vmax.f32 %v5141_v22, %v5146_v29  ;;  %v1012_v28 = vld [vmem:[%s4365_s17 + $0x60] sm:$0xff] }
  0xf5   : > { %6872 = vst [vmem:[#allocation76_spill] sm:$0xff] %v5128_v56  ;;  %3394 = vmatmul.msk.f32.gmra.mxu1 %vm612_vm1, %v575_v8  ;;  %v2068_v1 = vmax.f32 %v5134_v17, %v5138_v57  ;;  %v1040_v44 = vunpack.c.l.bf16 %v1012_v28  ;;  %v1038_v57 = vunpack.c.l.bf16 %v1011_v32 }
  0xf6   : > { %6873 = vst [vmem:[#allocation77_spill] sm:$0xff] %v5131_v38 }
  0xf7   : > { %6874 = vst [vmem:[#allocation78_spill] sm:$0xff] %v5134_v17  ;;  %2591 = vmax.xlane.f32.xlu0 %v2590_v48  ;;  %2069 = vmax.xlane.f32.xlu2 %v2068_v1  ;;  %v1041_v48 = vunpack.c.h.bf16 %v1012_v28  ;;  %v1036_v1 = vunpack.c.l.bf16 %v1010_v49  ;;  %v5171_v5 = vmul.f32 %v1040_v44, %v4417_v35  ;;  %v2882_v17 = vmax.f32 %v4866_v42, %v4898_v9 }
  0xf8   : > { %6876 = vst [vmem:[#allocation80_spill] sm:$0xff] %v5141_v22  ;;  %2063 = vmax.xlane.f32.xlu1 %v2062_v54  ;;  %v1037_v54 = vunpack.c.h.bf16 %v1010_v49  ;;  %v5208_v7 = vmul.f32 %v1038_v57, %v4417_v35  ;;  %v2885_v57 = vmax.f32 %v2883_v23, %v5052_v21  ;;  %v1013_v21 = vld [vmem:[%s4365_s17 + $0x68] sm:$0xff] }
  0xf9   : > { %6877 = vst [vmem:[#allocation81_spill] sm:$0xff] %v5146_v29  ;;  %v5152_v36 = vpop.xlane.xlu0 %1400  ;;  %3426 = vmatmul.msk.f32.gmra.mxu2 %vm612_vm1, %v575_v8  ;;  %v5174_v8 = vmul.f32 %v1041_v48, %v4417_v35  ;;  %v2903_v29 = vmax.f32 %v4869_v45, %v4901_v10 }
  0xfa   : > { %6878 = vst [vmem:[#allocation82_spill] sm:$0xff] %v5152_v36  ;;  %v5154_v4 = vpop.xlane.xlu2 %1398  ;;  %v5156_v51 = vpop.xlane.xlu1 %1396  ;;  %v5165_v36 = vmul.f32 %v956_v61, %v4417_v35  ;;  %v5179_v61 = vmul.f32 %v1036_v1, %v4417_v35  ;;  %v934_v1 = vld [vmem:[%s4360_s12 + $0x70] sm:$0xff] }
  0xfb   : > { %6879 = vst [vmem:[#allocation83_spill] sm:$0xff] %v5154_v4  ;;  %v5168_v4 = vmul.f32 %v957_v43, %v4417_v35  ;;  %v2602_v43 = vmax.f32 %v5171_v5, %v5174_v8 }
  0xfc   : > { %6880 = vst [vmem:[#allocation84_spill] sm:$0xff] %v5156_v51  ;;  %v5184_v51 = vmul.f32 %v1037_v54, %v4417_v35  ;;  %v2904_v54 = vmax.f32 %v4941_v20, %v4961_v2 }
  0xfd   : > { %3395 = vmatmul.msk.f32.gmra.mxu1 %vm612_vm1, %v4792_v41  ;;  %6881 = vst [vmem:[#allocation85_spill] sm:$0xff] %v5165_v36  ;;  %v2065_v28 = vmax.f32 %v5165_v36, %v5168_v4 }
  0xfe   : > { %6882 = vst [vmem:[#allocation86_spill] sm:$0xff] %v5168_v4  ;;  %v2596_v48 = vmax.f32 %v5179_v61, %v5184_v51 }
  0xff   : > { %6883 = vst [vmem:[#allocation87_spill] sm:$0xff] %v5171_v5  ;;  %2066 = vmax.xlane.f32.xlu0 %v2065_v28  ;;  %2603 = vmax.xlane.f32.xlu2 %v2602_v43  ;;  %v964_v28 = vunpack.c.l.bf16 %v934_v1  ;;  %v965_v43 = vunpack.c.h.bf16 %v934_v1 }
 0x100   : > { %6884 = vst [vmem:[#allocation88_spill] sm:$0xff] %v5174_v8  ;;  %2597 = vmax.xlane.f32.xlu1 %v2596_v48 }
 0x101   : > { %6885 = vst [vmem:[#allocation89_spill] sm:$0xff] %v5179_v61  ;;  %v5186_v31 = vpop.xlane.xlu0 %1470  ;;  %3427 = vmatmul.msk.f32.gmra.mxu2 %vm612_vm1, %v4792_v41  ;;  %v5217_v41 = vmul.f32 %v965_v43, %v4417_v35 }
 0x102   : > { %6886 = vst [vmem:[#allocation90_spill] sm:$0xff] %v5184_v51  ;;  %v5188_v44 = vpop.xlane.xlu2 %1468  ;;  %v5190_v49 = vpop.xlane.xlu1 %1402 }
 0x103   : > { %6887 = vst [vmem:[#allocation91_spill] sm:$0xff] %v5186_v31  ;;  %v1039_v31 = vunpack.c.h.bf16 %v1011_v32  ;;  %v5214_v32 = vmul.f32 %v964_v28, %v4417_v35 }
 0x104   : > { %6888 = vst [vmem:[#allocation92_spill] sm:$0xff] %v5188_v44  ;;  %v961_v44 = vunpack.c.h.bf16 %v932_v24 }
 0x105   : > { %6889 = vst [vmem:[#allocation93_spill] sm:$0xff] %v5190_v49  ;;  %v960_v49 = vunpack.c.l.bf16 %v932_v24  ;;  %v5211_v2 = vmul.f32 %v1039_v31, %v4417_v35  ;;  %v2906_v31 = vmax.f32 %v2904_v54, %v5055_v52  ;;  %v2077_v28 = vmax.f32 %v5214_v32, %v5217_v41  ;;  %v933_v54 = vld [vmem:[%s4360_s12 + $0x68] sm:$0xff]  ;;  %v1015_v52 = vld [vmem:[%s4365_s17 + $0x78] sm:$0xff] }
 0x106   : > { %6890 = vst [vmem:[#allocation94_spill] sm:$0xff] %v5208_v7  ;;  %v5223_v48 = vmul.f32 %v961_v44, %v4417_v35  ;;  %v2905_v44 = vmax.f32 %v2903_v29, %v5015_v62  ;;  %v962_v10 = vunpack.c.l.bf16 %v933_v54  ;;  %v963_v9 = vunpack.c.h.bf16 %v933_v54 }
 0x107   : > { %6891 = vst [vmem:[#allocation95_spill] sm:$0xff] %v5211_v2  ;;  %v5220_v24 = vmul.f32 %v960_v49, %v4417_v35  ;;  %v2599_v1 = vmax.f32 %v5208_v7, %v5211_v2  ;;  %v2884_v49 = vmax.f32 %v2882_v17, %v5012_v59  ;;  %2078 = vmax.xlane.f32.xlu2 %v2077_v28  ;;  %v1046_v17 = vunpack.c.l.bf16 %v1015_v52 }
 0x108   : > { %6892 = vst [vmem:[#allocation96_spill] sm:$0xff] %v5214_v32  ;;  %v2908_v32 = vmax.f32 %v2906_v31, %v5109_v40  ;;  %v1047_v29 = vunpack.c.h.bf16 %v1015_v52  ;;  %v5252_v28 = vmul.f32 %v963_v9, %v4417_v35  ;;  %v2907_v52 = vmax.f32 %v2905_v44, %v5033_v25 }
 0x109   : > { %6893 = vst [vmem:[#allocation97_spill] sm:$0xff] %v5217_v41  ;;  %v2071_v43 = vmax.f32 %v5220_v24, %v5223_v48  ;;  %v5233_v20 = vpop.xlane.xlu0 %1476  ;;  %2600 = vmax.xlane.f32.xlu0 %v2599_v1  ;;  %v2887_v41 = vmax.f32 %v2885_v57, %v5104_v19  ;;  %3428 = vmatmul.msk.f32.gmra.mxu2 %vm612_vm1, %v4820_v0  ;;  %v1042_v1 = vunpack.c.l.bf16 %v1013_v21 }
 0x10a   : > { %6894 = vst [vmem:[#allocation98_spill] sm:$0xff] %v5220_v24  ;;  %v5237_v50 = vpop.xlane.xlu2 %1474  ;;  %v5239_v23 = vpop.xlane.xlu1 %1472  ;;  %v5255_v57 = vmul.f32 %v1046_v17, %v4417_v35  ;;  %v5258_v31 = vmul.f32 %v1047_v29, %v4417_v35 }
 0x10b   : > { %6895 = vst [vmem:[#allocation99_spill] sm:$0xff] %v5223_v48  ;;  %2072 = vmax.xlane.f32.xlu1 %v2071_v43  ;;  %v5261_v54 = vmul.f32 %v1042_v1, %v4417_v35  ;;  %v2910_v43 = vmax.f32 %v2908_v32, %v5101_v26  ;;  %v2909_v32 = vmax.f32 %v2907_v52, %v5131_v38  ;;  %v935_v52 = vld [vmem:[%s4360_s12 + $0x78] sm:$0xff]  ;;  %s3432_s12 = sld [smem:[#allocation2 + $0x2]] }
 0x10c   : > { %6896 = vst [vmem:[#allocation100_spill] sm:$0xff] %v5233_v20  ;;  %v1043_v20 = vunpack.c.h.bf16 %v1013_v21  ;;  %v2886_v21 = vmax.f32 %v2884_v49, %v5025_v14  ;;  %v2611_v17 = vmax.f32 %v5255_v57, %v5258_v31 }
 0x10d   : > { %6897 = vst [vmem:[#allocation101_spill] sm:$0xff] %v5237_v50  ;;  %v2912_v50 = vmax.f32 %v2910_v43, %v5211_v2  ;;  %v967_v2 = vunpack.c.h.bf16 %v935_v52 }
 0x10e   : > { %6898 = vst [vmem:[#allocation102_spill] sm:$0xff] %v5239_v23  ;;  %v5249_v23 = vmul.f32 %v962_v10, %v4417_v35  ;;  %v5264_v0 = vmul.f32 %v1043_v20, %v4417_v35  ;;  %v2889_v10 = vmax.f32 %v2887_v41, %v5097_v58  ;;  %v2888_v1 = vmax.f32 %v2886_v21, %v5128_v56 }
 0x10f   : > { %6900 = vst [vmem:[#allocation104_spill] sm:$0xff] %v5252_v28  ;;  %2612 = vmax.xlane.f32.xlu2 %v2611_v17 }
 0x110   : > { %6899 = vst [vmem:[#allocation103_spill] sm:$0xff] %v5249_v23  ;;  %v2074_v9 = vmax.f32 %v5249_v23, %v5252_v28  ;;  %v2605_v29 = vmax.f32 %v5261_v54, %v5264_v0  ;;  %v2891_v44 = vmax.f32 %v2889_v10, %v5208_v7  ;;  %v2914_v21 = vmax.f32 %v2912_v50, %v5264_v0 }
 0x111   : > { %6901 = vst [vmem:[#allocation105_spill] sm:$0xff] %v5255_v57  ;;  %v5276_v20 = vpop.xlane.xlu0 %1482  ;;  %3429 = vmatmul.msk.f32.gmra.mxu2 %vm612_vm1, %v4847_v33 }
 0x112   : > { %6902 = vst [vmem:[#allocation106_spill] sm:$0xff] %v5258_v31  ;;  %2075 = vmax.xlane.f32.xlu0 %v2074_v9  ;;  %v5278_v49 = vpop.xlane.xlu2 %1480  ;;  %v5280_v41 = vpop.xlane.xlu1 %1478  ;;  %v2893_v17 = vmax.f32 %v2891_v44, %v5261_v54 }
 0x113   : > { %6903 = vst [vmem:[#allocation107_spill] sm:$0xff] %v5261_v54  ;;  %2606 = vmax.xlane.f32.xlu1 %v2605_v29  ;;  %v966_v29 = vunpack.c.l.bf16 %v935_v52 }
 0x114   : > { %6904 = vst [vmem:[#allocation108_spill] sm:$0xff] %v5264_v0  ;;  %v2351_v0 = vmax.f32 %v4910_v13, %v4932_v46 }
 0x115   : > { %6905 = vst [vmem:[#allocation109_spill] sm:$0xff] %v5276_v20  ;;  %v1014_v20 = vld [vmem:[%s4365_s17 + $0x70] sm:$0xff] }
 0x116   : > { %6906 = vst [vmem:[#allocation110_spill] sm:$0xff] %v5278_v49  ;;  %v1044_v9 = vunpack.c.l.bf16 %v1014_v20  ;;  %v1045_v26 = vunpack.c.h.bf16 %v1014_v20  ;;  %v2890_v49 = vmax.f32 %v2888_v1, %v5179_v61 }
 0x117   : > { %6907 = vst [vmem:[#allocation111_spill] sm:$0xff] %v5280_v41  ;;  %v2911_v41 = vmax.f32 %v2909_v32, %v5184_v51 }
 0x118   : > { %v5294_v10 = vmul.f32 %v1044_v9, %v4417_v35  ;;  %v5297_v33 = vmul.f32 %v1045_v26, %v4417_v35  ;;  %v2895_v9 = vmax.f32 %v2893_v17, %v5255_v57  ;;  %v2916_v26 = vmax.f32 %v2914_v21, %v5258_v31 }
 0x119   : > { %v5300_v43 = vpop.xlane.xlu0 %1488  ;;  %v5302_v20 = vpop.f32.mrf.mxu0  ;;  %3430 = vmatmul.msk.f32.gmra.mxu2 %vm612_vm1, %v4882_v63  ;;  %v2913_v52 = vmax.f32 %v2911_v41, %v5174_v8  ;;  %v5324_v17 = vmul.f32 %v967_v2, %v4417_v35  ;;  %v2352_v2 = vmax.f32 %v4904_v11, %v4964_v6  ;;  %vm2001_vm1 = vcmask 1040384  }
 0x11a   : > { %6908 = vst [vmem:[#allocation112_spill] sm:$0xff] %v5294_v10  ;;  %v5304_v1 = vpop.xlane.xlu2 %1486  ;;  %v2608_v44 = vmax.f32 %v5294_v10, %v5297_v33  ;;  %v839_v32 = vpop.f32.mrf.mxu1 }
 0x11b   : > { %6909 = vst [vmem:[#allocation113_spill] sm:$0xff] %v5297_v33  ;;  %v5308_v50 = vpop.xlane.xlu1 %1484  ;;  %v2915_v21 = vmax.f32 %v2913_v52, %v5297_v33 }
 0x11c   : > { %6910 = vst [vmem:[#allocation114_spill] sm:$0xff] %v5300_v43  ;;  %v2892_v43 = vmax.f32 %v2890_v49, %v5171_v5  ;;  %2609 = vmax.xlane.f32.xlu0 %v2608_v44 }
 0x11d   : > { %6911 = vst [vmem:[#allocation115_spill] sm:$0xff] %v5304_v1  ;;  %v5317_v1 = vmul.f32 %v966_v29, %v4417_v35  ;;  %v2917_v44 = vmax.f32 %v2915_v21, %v2916_v26  ;;  %v2353_v29 = vmax.f32 %v2351_v0, %v5019_v27 }
 0x11e   : > { %6912 = vst [vmem:[#allocation116_spill] sm:$0xff] %v5308_v50  ;;  %v2372_v50 = vmax.f32 %v4913_v34, %v4935_v47  ;;  %v2894_v63 = vmax.f32 %v2892_v43, %v5294_v10  ;;  %v2373_v43 = vmax.f32 %v4907_v12, %v4967_v15 }
 0x11f   : > { %6913 = vst [vmem:[#allocation117_spill] sm:$0xff] %v5317_v1  ;;  %v2080_v49 = vmax.f32 %v5317_v1, %v5324_v17  ;;  %v2918_v57 = vrot.slane %v2917_v44, 4  ;;  %v2355_v0 = vmax.f32 %v2353_v29, %v5065_v39 }
 0x120   : > { %6914 = vst [vmem:[#allocation118_spill] sm:$0xff] %v5324_v17  ;;  %v2896_v41 = vmax.f32 %v2894_v63, %v2895_v9  ;;  %v2374_v31 = vmax.f32 %v2372_v50, %v5022_v37 }
 0x121   : > { %v5332_v46 = vpop.xlane.xlu0 %1494  ;;  %2081 = vmax.xlane.f32.xlu1 %v2080_v49  ;;  %v777_v26 = vpop.f32.mrf.mxu0  ;;  %v2919_v21 = vmax.f32 %v2917_v44, %v2918_v57  ;;  %v2354_v49 = vmax.f32 %v2352_v2, %v4988_v30  ;;  %v2357_v27 = vmax.f32 %v2355_v0, %v5058_v3 }
 0x122   : > { %6915 = vst [vmem:[#allocation119_spill] sm:$0xff] %v5332_v46  ;;  %v5338_v47 = vpop.xlane.xlu2 %1492  ;;  %v2897_v52 = vrot.slane %v2896_v41, 4  ;;  %v2376_v50 = vmax.f32 %v2374_v31, %v5070_v53  ;;  %v842_v63 = vpop.f32.mrf.mxu1  ;;  %v2375_v46 = vmax.f32 %v2373_v43, %v4991_v55 }
 0x123   : > { %6916 = vst [vmem:[#allocation120_spill] sm:$0xff] %v5338_v47  ;;  %v5340_v17 = vpop.xlane.xlu1 %1490  ;;  %v2359_v43 = vmax.f32 %v2357_v27, %v5165_v36 }
 0x124   : > { %6917 = vst [vmem:[#allocation121_spill] sm:$0xff] %v5340_v17  ;;  %v2898_v9 = vmax.f32 %v2896_v41, %v2897_v52  ;;  %v2378_v47 = vmax.f32 %v2376_v50, %v5062_v60  ;;  %v2920_v17 = vrot.slane %v2919_v21, 2  ;;  %v2356_v41 = vmax.f32 %v2354_v49, %v5091_v18  ;;  %v6921_v60 = vld [vmem:[#allocation81_spill] sm:$0xff] }
 0x125   : > { %v2377_v29 = vmax.f32 %v2375_v46, %v5094_v16  ;;  %v5371_v27 = vmax.f32 %v2359_v43, %v5220_v24 }
 0x126   : > { %v2899_v37 = vrot.slane %v2898_v9, 2  ;;  %v2380_v0 = vmax.f32 %v2378_v47, %v5168_v4  ;;  %v2921_v50 = vmax.f32 %v2919_v21, %v2920_v17  ;;  %v2358_v49 = vmax.f32 %v2356_v41, %v5141_v22  ;;  %v6927_v41 = vld [vmem:[#allocation79_spill] sm:$0xff] }
 0x127   : > { %v2379_v46 = vmax.f32 %v2377_v29, %v6921_v60  ;;  %v5416_v22 = vmul.f32 %v4417_v35, %v777_v26 }
 0x128   : > { %v2900_v2 = vmax.f32 %v2898_v9, %v2899_v37  ;;  %v5374_v47 = vmax.f32 %v2380_v0, %v5223_v48  ;;  %v2922_v9 = vrot.slane %v2921_v50, 1  ;;  %v6931_v48 = vld [vmem:[#allocation31_spill] sm:$0xff] }
 0x129   : > { %v5348_v15 = vpop.xlane.xlu0 %2567  ;;  %v780_v3 = vpop.f32.mrf.mxu0  ;;  %v2381_v29 = vmax.f32 %v2379_v46, %v6927_v41  ;;  %6936 = vst [vmem:[#allocation131_spill] sm:$0xff] %v5416_v22 }
 0x12a   : > { %6918 = vst [vmem:[#allocation122_spill] sm:$0xff] %v5348_v15  ;;  %v5352_v31 = vpop.xlane.xlu2 %1498  ;;  %v2614_v57 = vsub.f32 %v4866_v42, %v5348_v15  ;;  %v2615_v44 = vsub.f32 %v4869_v45, %v5348_v15  ;;  %v845_v16 = vpop.f32.mrf.mxu1  ;;  %v2901_v37 = vrot.slane %v2900_v2, 1  ;;  %v5391_v0 = vmul.f32 %v4417_v35, %v780_v3 }
 0x12b   : > { %6919 = vst [vmem:[#allocation123_spill] sm:$0xff] %v5352_v31  ;;  %v5354_v52 = vpop.xlane.xlu1 %1496  ;;  %v5365_v31 = vmul.f32 %v4417_v35, %v839_v32  ;;  %v5380_v32 = vmul.f32 %v4417_v35, %v5302_v20  ;;  %v5396_v24 = vmul.f32 %v4417_v35, %v845_v16  ;;  %v5406_v3 = vmax.f32 %v2921_v50, %v2922_v9 }
 0x12c   : > { %6920 = vst [vmem:[#allocation124_spill] sm:$0xff] %v5354_v52  ;;  %v5368_v52 = vmul.f32 %v4417_v35, %v842_v63  ;;  %v2646_v18 = vmul.f32 1.442695, %v2614_v57  ;;  %v2648_v15 = vmul.f32 1.442695, %v2615_v44  ;;  %v6926_v63 = vld [vmem:[#allocation78_spill] sm:$0xff]  ;;  %v5402_v41 = vmax.f32 %v2900_v2, %v2901_v37 }
 0x12d   : > { %6922 = vst [vmem:[#allocation125_spill] sm:$0xff] %v5365_v31  ;;  %v2360_v21 = vmax.f32 %v2358_v49, %v6926_v63  ;;  %v6928_v57 = vld [vmem:[#allocation30_spill] sm:$0xff]  ;;  %v5419_v2 = vmax.f32 %v2381_v29, %v5252_v28 }
 0x12e   : > { %6923 = vst [vmem:[#allocation126_spill] sm:$0xff] %v5368_v52  ;;  %v1838_v43 = vmax.f32 %v5365_v31, %v5368_v52  ;;  %3613 = vpow2.f32 %v2646_v18  ;;  %v6934_v18 = vld [vmem:[#allocation96_spill] sm:$0xff]  ;;  %v6937_v28 = vld [vmem:[#allocation38_spill] sm:$0xff] }
 0x12f   : > { %6925 = vst [vmem:[#allocation128_spill] sm:$0xff] %v5380_v32  ;;  %3615 = vpow2.f32 %v2648_v15  ;;  %v5413_v15 = vmax.f32 %v2360_v21, %v5249_v23  ;;  %v2924_v21 = vsub.f32 %v4866_v42, %v5402_v41  ;;  %v2926_v9 = vsub.f32 %v6937_v28, %v5402_v41 }
 0x130   : > { %6930 = vst [vmem:[#allocation129_spill] sm:$0xff] %v5391_v0  ;;  %v5426_v36 = vmax.f32 %v5396_v24, %v1838_v43  ;;  %v6938_v43 = vld [vmem:[#allocation39_spill] sm:$0xff]  ;;  %v2928_v42 = vsub.f32 %v6928_v57, %v5402_v41 }
 0x131   : > { %v5376_v17 = vpop.xlane.xlu0 %2573  ;;  %6932 = vst [vmem:[#allocation31_spill] sm:$0xff] %v5396_v24  ;;  %v783_v26 = vpop.f32.mrf.mxu0 }
 0x132   : > { %6924 = vst [vmem:[#allocation127_spill] sm:$0xff] %v5376_v17  ;;  %v2618_v44 = vsub.f32 %v6928_v57, %v5376_v17  ;;  %v5386_v4 = vpop.xlane.xlu2 %2039  ;;  %v2619_v20 = vsub.f32 %v6931_v48, %v5376_v17 }
 0x133   : > { %6929 = vst [vmem:[#allocation30_spill] sm:$0xff] %v5386_v4  ;;  %v2085_v49 = vsub.f32 %v4904_v11, %v5386_v4  ;;  %v5400_v46 = vpop.xlane.xlu1 %2036  ;;  %v2086_v63 = vsub.f32 %v4907_v12, %v5386_v4  ;;  %v848_v4 = vpop.f32.mrf.mxu1  ;;  %v5447_v12 = vmul.f32 %v4417_v35, %v783_v26  ;;  %v2960_v11 = vmul.f32 1.442695, %v2926_v9  ;;  %v6943_v26 = vld [vmem:[#allocation58_spill] sm:$0xff] }
 0x134   : > { %6933 = vst [vmem:[#allocation130_spill] sm:$0xff] %v5400_v46  ;;  %v2654_v60 = vmul.f32 1.442695, %v2618_v44  ;;  %v2656_v37 = vmul.f32 1.442695, %v2619_v20  ;;  %v2083_v50 = vsub.f32 %v4910_v13, %v5400_v46  ;;  %v3614_v44 = vpop.eup %3613  ;;  %v2084_v29 = vsub.f32 %v4913_v34, %v5400_v46  ;;  %v6939_v46 = vld [vmem:[#allocation40_spill] sm:$0xff] }
 0x135   : > { %v2119_v16 = vmul.f32 1.442695, %v2085_v49  ;;  %v2121_v23 = vmul.f32 1.442695, %v2086_v63  ;;  %v2925_v20 = vsub.f32 %v4869_v45, %v5406_v3  ;;  %v3616_v53 = vpop.eup %3615  ;;  %v2927_v49 = vsub.f32 %v6938_v43, %v5406_v3  ;;  %v6940_v45 = vld [vmem:[#allocation41_spill] sm:$0xff]  ;;  %6941 = vst [vmem:[#allocation38_spill] sm:$0xff] %v5447_v12 }
 0x136   : > { %3617 = vpow2.f32 %v2654_v60  ;;  %v2929_v63 = vsub.f32 %v6931_v48, %v5406_v3  ;;  %v2115_v39 = vmul.f32 1.442695, %v2083_v50  ;;  %v2930_v55 = vsub.f32 %v6939_v46, %v5402_v41 }
 0x137   : > { %3619 = vpow2.f32 %v2656_v37  ;;  %v2931_v30 = vsub.f32 %v6940_v45, %v5406_v3  ;;  %v5450_v60 = vmul.f32 %v4417_v35, %v848_v4  ;;  %v2956_v34 = vmul.f32 1.442695, %v2924_v21  ;;  %v6944_v4 = vld [vmem:[#allocation59_spill] sm:$0xff] }
 0x138   : > { %3621 = vpow2.f32 %v2119_v16  ;;  %v2117_v57 = vmul.f32 1.442695, %v2084_v29  ;;  %v2710_v48 = vadd.f32 %v3616_v53, %v3614_v44  ;;  %v2932_v37 = vsub.f32 %v5012_v59, %v5402_v41 }
 0x139   : > { %6942 = vst [vmem:[#allocation39_spill] sm:$0xff] %v5450_v60  ;;  %3623 = vpow2.f32 %v2121_v23  ;;  %v2933_v50 = vsub.f32 %v5015_v62, %v5406_v3  ;;  %v2964_v13 = vmul.f32 1.442695, %v2928_v42  ;;  %v2934_v24 = vsub.f32 %v6943_v26, %v5402_v41 }
 0x13a   : > { %3625 = vpow2.f32 %v2956_v34  ;;  %v2935_v16 = vsub.f32 %v6944_v4, %v5406_v3  ;;  %v2958_v21 = vmul.f32 1.442695, %v2925_v20  ;;  %2711 = vadd.xlane.f32.xlu2 %v2710_v48  ;;  %v2936_v9 = vsub.f32 %v5025_v14, %v5402_v41 }
 0x13b   : > { %3627 = vpow2.f32 %v2115_v39  ;;  %v2968_v34 = vmul.f32 1.442695, %v2930_v55  ;;  %v2937_v29 = vsub.f32 %v5033_v25, %v5406_v3  ;;  %v2962_v20 = vmul.f32 1.442695, %v2927_v49  ;;  %v5478_v25 = vpop.f32.mrf.mxu0  ;;  %v5480_v49 = vpop.f32.mrf.mxu1 }
 0x13c   : > { %v5460_v23 = vpop.eup %3617  ;;  %3629 = vpow2.f32 %v2960_v11  ;;  %v2938_v48 = vsub.f32 %v5104_v19, %v5402_v41  ;;  %v2939_v53 = vsub.f32 %v5109_v40, %v5406_v3  ;;  %v2972_v14 = vmul.f32 1.442695, %v2932_v37 }
 0x13d   : > { %v3620_v44 = vpop.eup %3619  ;;  %3631 = vpow2.f32 %v2117_v57  ;;  %v2940_v55 = vsub.f32 %v5128_v56, %v5402_v41  ;;  %v2941_v57 = vsub.f32 %v5131_v38, %v5406_v3  ;;  %v2966_v39 = vmul.f32 1.442695, %v2929_v63 }
 0x13e   : > { %v3622_v42 = vpop.eup %3621  ;;  %3633 = vpow2.f32 %v2964_v13  ;;  %v2942_v19 = vsub.f32 %v5097_v58, %v5402_v41  ;;  %v6945_v13 = vld [vmem:[#allocation70_spill] sm:$0xff]  ;;  %v2976_v40 = vmul.f32 1.442695, %v2934_v24  ;;  %v2944_v56 = vsub.f32 %v5179_v61, %v5402_v41  ;;  %v6946_v58 = vld [vmem:[#allocation95_spill] sm:$0xff] }
 0x13f   : > { %v3624_v11 = vpop.eup %3623  ;;  %3635 = vpow2.f32 %v2958_v21  ;;  %v2943_v37 = vsub.f32 %v6945_v13, %v5406_v3  ;;  %v2970_v21 = vmul.f32 1.442695, %v2931_v30  ;;  %v2946_v62 = vsub.f32 %v5208_v7, %v5402_v41  ;;  %v5500_v7 = vpop.f32.mrf.mxu3 }
 0x140   : > { %v3626_v4 = vpop.eup %3625  ;;  %3637 = vpow2.f32 %v2968_v34  ;;  %v2947_v59 = vsub.f32 %v6946_v58, %v5406_v3  ;;  %v2980_v13 = vmul.f32 1.442695, %v2936_v9  ;;  %v2948_v24 = vsub.f32 %v5171_v5, %v5402_v41  ;;  %6947 = vst [vmem:[#allocation40_spill] sm:$0xff] %v5500_v7  ;;  %v6948_v9 = vld [vmem:[#allocation108_spill] sm:$0xff] }
 0x141   : > { %v3628_v26 = vpop.eup %3627  ;;  %3639 = vpow2.f32 %v2962_v20  ;;  %v2974_v61 = vmul.f32 1.442695, %v2933_v50  ;;  %v2949_v30 = vsub.f32 %v5174_v8, %v5406_v3  ;;  %v2950_v20 = vsub.f32 %v5261_v54, %v5402_v41  ;;  %v5504_v50 = vpop.f32.mrf.mxu2 }
 0x142   : > { %v3630_v38 = vpop.eup %3629  ;;  %3641 = vpow2.f32 %v2972_v14  ;;  %v2984_v63 = vmul.f32 1.442695, %v2938_v48  ;;  %v2951_v58 = vsub.f32 %v6948_v9, %v5406_v3  ;;  %v2978_v5 = vmul.f32 1.442695, %v2935_v16  ;;  %v5510_v16 = vpop.xlane.xlu2 %2042 }
 0x143   : > { %v3632_v34 = vpop.eup %3631  ;;  %3643 = vpow2.f32 %v2966_v39  ;;  %v3020_v52 = vadd.f32 %v3630_v38, %v3626_v4  ;;  %v2952_v4 = vsub.f32 %v5294_v10, %v5402_v41  ;;  %v2953_v54 = vsub.f32 %v5297_v33, %v5406_v3  ;;  %6949 = vst [vmem:[#allocation41_spill] sm:$0xff] %v5510_v16  ;;  %v6950_v10 = vld [vmem:[#allocation105_spill] sm:$0xff]  ;;  %v5515_v33 = vpop.f32.mrf.mxu0 }
 0x144   : > { %v3634_v12 = vpop.eup %3633  ;;  %3645 = vpow2.f32 %v2976_v40  ;;  %v2988_v40 = vmul.f32 1.442695, %v2940_v55  ;;  %v2982_v8 = vmul.f32 1.442695, %v2937_v29  ;;  %v2992_v7 = vmul.f32 1.442695, %v2942_v19 }
 0x145   : > { %v3636_v14 = vpop.eup %3635  ;;  %3647 = vpow2.f32 %v2970_v21  ;;  %v3021_v39 = vadd.f32 %v3634_v12, %v3020_v52  ;;  %v2716_v12 = vadd.f32 %v3620_v44, %v5460_v23  ;;  %v2182_v52 = vadd.f32 %v3624_v11, %v3622_v42  ;;  %v6951_v29 = vld [vmem:[#allocation106_spill] sm:$0xff] }
 0x146   : > { %v3638_v38 = vpop.eup %3637  ;;  %3649 = vpow2.f32 %v2980_v13  ;;  %v2179_v21 = vadd.f32 %v3632_v34, %v3628_v26  ;;  %v2954_v17 = vsub.f32 %v6950_v10, %v5402_v41  ;;  %v2986_v13 = vmul.f32 1.442695, %v2939_v53 }
 0x147   : > { %v3640_v48 = vpop.eup %3639  ;;  %3651 = vpow2.f32 %v2974_v61  ;;  %v3022_v22 = vadd.f32 %v3638_v38, %v3021_v39  ;;  %v5517_v61 = vpop.f32.mrf.mxu1  ;;  %v2990_v39 = vmul.f32 1.442695, %v2941_v57  ;;  %v2996_v23 = vmul.f32 1.442695, %v2944_v56  ;;  %2717 = vadd.xlane.f32.xlu2 %v2716_v12  ;;  %2183 = vadd.xlane.f32.xlu1 %v2182_v52 }
 0x148   : > { %v3642_v9 = vpop.eup %3641  ;;  %3653 = vpow2.f32 %v2984_v63  ;;  %v2955_v63 = vsub.f32 %v6951_v29, %v5406_v3  ;;  %v2994_v44 = vmul.f32 1.442695, %v2943_v37  ;;  %2180 = vadd.xlane.f32.xlu0 %v2179_v21  ;;  %v6952_v53 = vsub.f32 %v5184_v51, %v5406_v3 }
 0x149   : > { %v3644_v6 = vpop.eup %3643  ;;  %3655 = vpow2.f32 %v2978_v5  ;;  %v3023_v55 = vadd.f32 %v3642_v9, %v3022_v22  ;;  %v3041_v5 = vadd.f32 %v3640_v48, %v3636_v14  ;;  %v3000_v34 = vmul.f32 1.442695, %v2946_v62  ;;  %v5524_v48 = vpop.f32.mrf.mxu3 }
 0x14a   : > { %v3646_v19 = vpop.eup %3645  ;;  %3657 = vpow2.f32 %v2988_v40  ;;  %v2998_v11 = vmul.f32 1.442695, %v6952_v53  ;;  %v3002_v9 = vmul.f32 1.442695, %v2947_v59  ;;  %v3004_v56 = vmul.f32 1.442695, %v2948_v24  ;;  %v5531_v24 = vpop.f32.mrf.mxu2 }
 0x14b   : > { %v3648_v26 = vpop.eup %3647  ;;  %3659 = vpow2.f32 %v2982_v8  ;;  %v3024_v42 = vadd.f32 %v3646_v19, %v3023_v55  ;;  %v3042_v40 = vadd.f32 %v3644_v6, %v3041_v5  ;;  %v3006_v8 = vmul.f32 1.442695, %v2949_v30 }
 0x14c   : > { %v3650_v22 = vpop.eup %3649  ;;  %3661 = vpow2.f32 %v2992_v7  ;;  %v3008_v37 = vmul.f32 1.442695, %v2950_v20  ;;  %v3010_v14 = vmul.f32 1.442695, %v2951_v58  ;;  %v6953_v7 = vlaneseq  ;;  %v6956_v58 = vld [vmem:[#allocation36_spill] sm:$0xff] }
 0x14d   : > { %v3652_v38 = vpop.eup %3651  ;;  %3663 = vpow2.f32 %v2986_v13  ;;  %v3025_v57 = vadd.f32 %v3650_v22, %v3024_v42  ;;  %v3012_v59 = vmul.f32 1.442695, %v2952_v4  ;;  %v3043_v13 = vadd.f32 %v3648_v26, %v3042_v40 }
 0x14e   : > { %v3654_v12 = vpop.eup %3653  ;;  %3665 = vpow2.f32 %v2996_v23  ;;  %vm5527_vm15 = vcmp.lt.s32.totalorder %v6953_v7, 256  ;;  %v5533_v55 = vmul.f32 1.442695, %v2953_v54  ;;  %v3016_v30 = vmul.f32 1.442695, %v2954_v17  ;;  %v6960_v17 = vld [vmem:[#allocation37_spill] sm:$0xff] }
 0x14f   : > { %v3656_v52 = vpop.eup %3655  ;;  %3667 = vpow2.f32 %v2990_v39  ;;  %v3026_v62 = vadd.f32 %v3654_v12, %v3025_v57  ;;  %v2087_v20 = vsub.f32 %v6956_v58, %v5510_v16  ;;  %v5537_v23 = vmul.f32 1.442695, %v2955_v63  ;;  %v5539_v39 = vpop.xlane.xlu1 %2570 }
 0x150   : > { %v3658_v6 = vpop.eup %3657  ;;  %3669 = vpow2.f32 %v3000_v34  ;;  %v3044_v5 = vadd.f32 %v3652_v38, %v3043_v13  ;;  %6957 = vst [vmem:[#allocation36_spill] sm:$0xff] %v5539_v39  ;;  %v5543_v26 = vmul.f32 %v4417_v35, %v5478_v25  ;;  %v5547_v54 = vmul.f32 %v4417_v35, %v5480_v49  ;;  %v5553_v38 = vld [vmem:[#allocation3 + $0x4] sm:$0x3]  ;;  %v792_v57 = vpop.f32.mrf.mxu0 }
 0x151   : > { %v3660_v19 = vpop.eup %3659  ;;  %3671 = vpow2.f32 %v2994_v44  ;;  %v3027_v42 = vadd.f32 %v3658_v6, %v3026_v62  ;;  %v2088_v22 = vsub.f32 %v6960_v17, %v5510_v16  ;;  %v5551_v44 = vpop.xlane.xlu2 %2576  ;;  %v2123_v49 = vmul.f32 1.442695, %v2087_v20 }
 0x152   : > { %v3662_v4 = vpop.eup %3661  ;;  %3673 = vpow2.f32 %v3004_v56  ;;  %6958 = vst [vmem:[#allocation132_spill] sm:$0xff] %v5543_v26  ;;  %v3045_v34 = vadd.f32 %v3656_v52, %v3044_v5  ;;  %v3066_v56 = vrot.slane %v5406_v3, 7  ;;  %v5556_v25 = vpop.f32.mrf.mxu1  ;;  %v2616_v12 = vsub.f32 %v6937_v28, %v5539_v39 }
 0x153   : > { %6959 = vst [vmem:[#allocation133_spill] sm:$0xff] %v5547_v54  ;;  %v3664_v63 = vpop.eup %3663  ;;  %3675 = vpow2.f32 %v2998_v11  ;;  %v3028_v53 = vadd.f32 %v3662_v4, %v3027_v42  ;;  %v2617_v7 = vsub.f32 %v6938_v43, %v5539_v39  ;;  %v2620_v20 = vsub.f32 %v6939_v46, %v5551_v44 }
 0x154   : > { %6961 = vst [vmem:[#allocation37_spill] sm:$0xff] %v5551_v44  ;;  %v3666_v40 = vpop.eup %3665  ;;  %3677 = vpow2.f32 %v3008_v37  ;;  %v3046_v52 = vadd.f32 %v3660_v19, %v3045_v34  ;;  %v3067_v13 = vsel %vm2001_vm1, %v5402_v41, %v3066_v56  ;;  %v2125_v37 = vmul.f32 1.442695, %v2088_v22  ;;  %v5588_v56 = vpop.f32.mrf.mxu2 }
 0x155   : > { %v3668_v62 = vpop.eup %3667  ;;  %3679 = vpow2.f32 %v3002_v9  ;;  %v3029_v11 = vadd.f32 %v3666_v40, %v3028_v53  ;;  %v5565_v42 = vmax.f32 %v5553_v38, %v3067_v13  ;;  %v2621_v9 = vsub.f32 %v6940_v45, %v5551_v44  ;;  %v5586_v45 = vpop.f32.mrf.mxu3 }
 0x156   : > { %v3670_v6 = vpop.eup %3669  ;;  %3681 = vpow2.f32 %v3012_v59  ;;  %v3047_v43 = vadd.f32 %v3664_v63, %v3046_v52  ;;  %v6962_v59 = vmax.f32 %v5380_v32, %v5391_v0  ;;  %v6963_v46 = vmax.f32 %v5450_v60, %v5426_v36 }
 0x157   : > { %v3672_v28 = vpop.eup %3671  ;;  %3683 = vpow2.f32 %v3006_v8  ;;  %v3030_v5 = vadd.f32 %v3670_v6, %v3029_v11  ;;  %3096 = vst.msk [vmem:[#allocation3 + $0x4] sm:$0x3] %vm5527_vm15, %v5565_v42  ;;  %v2650_v22 = vmul.f32 1.442695, %v2616_v12  ;;  %v2652_v34 = vmul.f32 1.442695, %v2617_v7 }
 0x158   : > { %v3674_v19 = vpop.eup %3673  ;;  %3685 = vpow2.f32 %v3016_v30  ;;  %v5578_v4 = vmax.f32 %v6962_v59, %v5543_v26  ;;  %v5584_v8 = vmax.f32 %v5547_v54, %v6963_v46  ;;  %v3048_v53 = vadd.f32 %v3668_v62, %v3047_v43 }
 0x159   : > { %v3676_v30 = vpop.eup %3675  ;;  %3687 = vpow2.f32 %v3010_v14  ;;  %v3031_v63 = vadd.f32 %v3674_v19, %v3030_v5  ;;  %v2658_v11 = vmul.f32 1.442695, %v2620_v20  ;;  %v5591_v52 = vmul.f32 %v4417_v35, %v792_v57 }
 0x15a   : > { %v3678_v40 = vpop.eup %3677  ;;  %3689 = vpow2.f32 %v2123_v49  ;;  %v3049_v6 = vadd.f32 %v3672_v28, %v3048_v53  ;;  %v2660_v59 = vmul.f32 1.442695, %v2621_v9  ;;  %v2364_v7 = vmax.f32 %v5413_v15, %v5317_v1  ;;  %v6966_v28 = vld [vmem:[#allocation118_spill] sm:$0xff]  ;;  %v860_v43 = vpop.f32.mrf.mxu1 }
 0x15b   : > { %6964 = vst [vmem:[#allocation134_spill] sm:$0xff] %v5591_v52  ;;  %v3680_v13 = vpop.eup %3679  ;;  %v3032_v12 = vadd.f32 %v3678_v40, %v3031_v63  ;;  %3691 = vpow2.f32 %v2125_v37  ;;  %v5600_v49 = vmul.f32 %v5504_v50, %v4417_v35  ;;  %v5604_v57 = vmul.f32 %v4417_v35, %v5517_v61 }
 0x15c   : > { %v3682_v14 = vpop.eup %3681  ;;  %3693 = vpow2.f32 %v5533_v55  ;;  %v3050_v37 = vadd.f32 %v3676_v30, %v3049_v6  ;;  %v2385_v5 = vmax.f32 %v5419_v2, %v6966_v28  ;;  %v795_v55 = vpop.f32.mrf.mxu0  ;;  %v3072_v15 = vsub.f32 %v5553_v38, %v5565_v42  ;;  %v6968_v2 = vld [vmem:[#allocation97_spill] sm:$0xff] }
 0x15d   : > { %6965 = vst [vmem:[#allocation135_spill] sm:$0xff] %v5604_v57  ;;  %v3684_v62 = vpop.eup %3683  ;;  %3695 = vpow2.f32 %v5537_v23  ;;  %v3033_v20 = vadd.f32 %v3682_v14, %v3032_v12  ;;  %v6967_v50 = vmax.f32 %v5371_v27, %v6934_v18  ;;  %v3077_v63 = vperm.slane %v5565_v42, 0  ;;  %v5630_v61 = vpop.f32.mrf.mxu2 }
 0x15e   : > { %v3686_v9 = vpop.eup %3685  ;;  %3697 = vpow2.f32 %v2650_v22  ;;  %v3051_v30 = vadd.f32 %v3680_v13, %v3050_v37  ;;  %v6969_v53 = vmax.f32 %v5374_v47, %v6968_v2  ;;  %v3078_v38 = vperm.slane %v5565_v42, 1  ;;  %v5625_v13 = vpop.xlane.xlu1 %2045 }
 0x15f   : > { %v2365_v19 = vmax.f32 %v6967_v50, %v2364_v7  ;;  %v3688_v23 = vpop.eup %3687  ;;  %v3034_v46 = vadd.f32 %v3686_v9, %v3033_v20  ;;  %3699 = vpow2.f32 %v2652_v34  ;;  %v5623_v27 = vmul.f32 %v4417_v35, %v5515_v33  ;;  %6971 = vst [vmem:[#allocation137_spill] sm:$0xff] %v5625_v13  ;;  %v5627_v50 = vpop.f32.mrf.mxu3 }
 0x160   : > { %v2386_v40 = vmax.f32 %v6969_v53, %v2385_v5  ;;  %v3690_v12 = vpop.eup %3689  ;;  %v3052_v7 = vadd.f32 %v3684_v62, %v3051_v30  ;;  %3701 = vpow2.f32 %v2658_v11  ;;  %v3073_v9 = vmul.f32 1.442695, %v3072_v15 }
 0x161   : > { %v2366_v6 = vrot.slane %v2365_v19, 4  ;;  %6970 = vst [vmem:[#allocation136_spill] sm:$0xff] %v5623_v27  ;;  %v3692_v22 = vpop.eup %3691  ;;  %v3035_v14 = vrot.slane %v3034_v46, 4  ;;  %3703 = vpow2.f32 %v2660_v59  ;;  %v3081_v33 = vsub.f32 %v5402_v41, %v3077_v63  ;;  %v6972_v59 = vld [vmem:[#allocation42_spill] sm:$0xff] }
 0x162   : > { %v2387_v20 = vrot.slane %v2386_v40, 4  ;;  %v3694_v37 = vpop.eup %3693  ;;  %v2185_v5 = vadd.f32 %v3692_v22, %v3690_v12  ;;  %v3053_v53 = vadd.f32 %v3688_v23, %v3052_v7  ;;  %v3082_v11 = vsub.f32 %v5406_v3, %v3078_v38  ;;  %v6975_v3 = vld [vmem:[#allocation38_spill] sm:$0xff]  ;;  %v863_v10 = vpop.f32.mrf.mxu1 }
 0x163   : > { %v2367_v47 = vmax.f32 %v2365_v19, %v2366_v6  ;;  %v3696_v42 = vpop.eup %3695  ;;  %v3036_v34 = vadd.f32 %v3035_v14, %v3034_v46  ;;  %v1842_v15 = vmax.f32 %v5604_v57, %v5584_v8  ;;  %v2089_v19 = vsub.f32 %v6972_v59, %v5625_v13  ;;  %v6977_v8 = vld [vmem:[#allocation43_spill] sm:$0xff]  ;;  %v6978_v7 = vld [vmem:[#allocation126_spill] sm:$0xff] }
 0x164   : > { %v2388_v36 = vmax.f32 %v2386_v40, %v2387_v20  ;;  %v3698_v62 = vpop.eup %3697  ;;  %2186 = vadd.xlane.f32.xlu1 %v2185_v5  ;;  %v3054_v6 = vadd.f32 %v3694_v37, %v3053_v53  ;;  %v5639_v41 = vmul.f32 %v4417_v35, %v5556_v25  ;;  %v6974_v40 = vld [vmem:[#allocation131_spill] sm:$0xff]  ;;  %v2090_v14 = vsub.f32 %v6977_v8, %v5625_v13  ;;  %v798_v29 = vpop.f32.mrf.mxu0 }
 0x165   : > { %v2368_v30 = vrot.slane %v2367_v47, 2  ;;  %v3037_v12 = vrot.slane %v3036_v34, 2  ;;  %v3700_v23 = vpop.eup %3699  ;;  %v6976_v38 = vmax.f32 %v6974_v40, %v6975_v3  ;;  %v1503_v20 = vmax.f32 %v6974_v40, %v6978_v7  ;;  %v7010_v40 = vld [vmem:[#allocation60_spill] sm:$0xff] }
 0x166   : > { %v2389_v46 = vrot.slane %v2388_v36, 2  ;;  %6973 = vst [vmem:[#allocation42_spill] sm:$0xff] %v5639_v41  ;;  %v3702_v37 = vpop.eup %3701  ;;  %v3055_v5 = vadd.f32 %v3696_v42, %v3054_v6  ;;  %3705 = vpow2.f32 %v3073_v9  ;;  %v3083_v53 = vmul.f32 1.442695, %v3081_v33  ;;  %v6981_v42 = vld [vmem:[#allocation40_spill] sm:$0xff] }
 0x167   : > { %v2369_v63 = vmax.f32 %v2367_v47, %v2368_v30  ;;  %v5645_v22 = vmax.f32 %v6976_v38, %v5623_v27  ;;  %v2713_v25 = vadd.f32 %v3700_v23, %v3698_v62  ;;  %v3704_v47 = vpop.eup %3703  ;;  %v3038_v30 = vadd.f32 %v3037_v12, %v3036_v34  ;;  %v3071_v23 = vld [vmem:[#allocation4 + $0x4] sm:$0x3] }
 0x168   : > { %v3085_v51 = vmul.f32 1.442695, %v3082_v11  ;;  %v5652_v44 = vmul.f32 %v4417_v35, %v795_v55  ;;  %v5655_v38 = vmul.f32 %v4417_v35, %v860_v43  ;;  %v3056_v13 = vrot.slane %v3055_v5, 4 }
 0x169   : > { %v2370_v16 = vrot.slane %v2369_v63, 1  ;;  %v2390_v39 = vmax.f32 %v2388_v36, %v2389_v46  ;;  %2714 = vadd.xlane.f32.xlu0 %v2713_v25  ;;  %v2719_v7 = vadd.f32 %v3704_v47, %v3702_v37  ;;  %v5659_v9 = vmul.f32 %v4417_v35, %v6981_v42  ;;  %v6993_v37 = vld [vmem:[#allocation34_spill] sm:$0xff]  ;;  %v7001_v36 = vld [vmem:[#allocation33_spill] sm:$0xff] }
 0x16a   : > { %6979 = vst [vmem:[#allocation43_spill] sm:$0xff] %v5652_v44  ;;  %v1843_v33 = vmax.f32 %v5639_v41, %v1842_v15  ;;  %v2127_v62 = vmul.f32 1.442695, %v2089_v19  ;;  %v2129_v34 = vmul.f32 1.442695, %v2090_v14  ;;  %v3057_v11 = vadd.f32 %v3056_v13, %v3055_v5  ;;  %v878_v19 = vpop.f32.mrf.mxu3  ;;  %v6988_v5 = vld [vmem:[#allocation14_spill] sm:$0xff] }
 0x16b   : > { %6980 = vst [vmem:[#allocation138_spill] sm:$0xff] %v5655_v38  ;;  %3707 = vpow2.f32 %v3083_v53  ;;  %v1245_v55 = vmul.f32 %v5531_v24, %v4417_v35  ;;  %2720 = vadd.xlane.f32.xlu2 %v2719_v7  ;;  %v5665_v43 = vmul.f32 %v4417_v35, %v863_v10  ;;  %v5671_v15 = vmul.f32 %v4417_v35, %v798_v29  ;;  %v1208_v10 = vpop.f32.mrf.mxu2 }
 0x16c   : > { %6982 = vst [vmem:[#allocation40_spill] sm:$0xff] %v5659_v9  ;;  %3709 = vpow2.f32 %v3085_v51  ;;  %1504 = vmax.xlane.f32.xlu1 %v1503_v20  ;;  %v1844_v12 = vmax.f32 %v5655_v38, %v1843_v33  ;;  %v3706_v13 = vpop.eup %3705  ;;  %v3039_v6 = vrot.slane %v3038_v30, 1  ;;  %v3058_v46 = vrot.slane %v3057_v11, 2  ;;  %v6986_v20 = vld [vmem:[#allocation31_spill] sm:$0xff] }
 0x16d   : > { %6983 = vst [vmem:[#allocation139_spill] sm:$0xff] %v5665_v43  ;;  %v5673_v24 = vmax.f32 %v2369_v63, %v2370_v16  ;;  %v2391_v14 = vrot.slane %v2390_v39, 1  ;;  %v5677_v51 = vmul.f32 %v4417_v35, %v5524_v48  ;;  %v1246_v7 = vmul.f32 %v5588_v56, %v4417_v35 }
 0x16e   : > { %6984 = vst [vmem:[#allocation140_spill] sm:$0xff] %v5671_v15  ;;  %v1506_v29 = vmax.f32 %v5391_v0, %v6986_v20  ;;  %v1260_v53 = vsel %vm1099_vm2, %v5600_v49, 0.0  ;;  %v3059_v25 = vadd.f32 %v3058_v46, %v3057_v11  ;;  %v5688_v16 = vmax.f32 %v5665_v43, %v1844_v12  ;;  %v7014_v0 = vld [vmem:[#allocation85_spill] sm:$0xff] }
 0x16f   : > { %6985 = vst [vmem:[#allocation141_spill] sm:$0xff] %v5677_v51  ;;  %v5691_v63 = vmul.f32 %v4417_v35, %v878_v19  ;;  %v5696_v47 = vsel %vm1100_vm4, %v1245_v55, 0.0  ;;  %v3075_v56 = vmul.f32 %v3706_v13, %v3071_v23  ;;  %3711 = vpow2.f32 %v2127_v62  ;;  %v801_v62 = vpop.f32.mrf.mxu0  ;;  %v866_v13 = vpop.f32.mrf.mxu1 }
 0x170   : > { %6989 = vst [vmem:[#allocation13_spill] sm:$0xff] %v5688_v16  ;;  %v6992_v42 = vmax.f32 %v5578_v4, %v5591_v52  ;;  %v1248_v49 = vmul.f32 %v1208_v10, %v4417_v35  ;;  %v3040_v12 = vadd.f32 %v3039_v6, %v3038_v30  ;;  %v3060_v46 = vrot.slane %v3059_v25, 1  ;;  %v6995_v4 = vld [vmem:[#allocation32_spill] sm:$0xff] }
 0x171   : > { %6990 = vst [vmem:[#allocation14_spill] sm:$0xff] %v5691_v63  ;;  %v3708_v11 = vpop.eup %3707  ;;  %v5705_v19 = vmax.f32 %v2390_v39, %v2391_v14  ;;  %v2393_v48 = vsub.f32 %v6993_v37, %v5673_v24  ;;  %v6994_v55 = vmax.f32 %v5380_v32, %v5365_v31  ;;  %3713 = vpow2.f32 %v2129_v34 }
 0x172   : > { %v5702_v33 = vmax.f32 %v6992_v42, %v5671_v15  ;;  %v3710_v23 = vpop.eup %3709  ;;  %v2395_v42 = vsub.f32 %v6995_v4, %v5673_v24  ;;  %v5716_v30 = vmul.f32 %v4417_v35, %v5586_v45  ;;  %v5720_v39 = vmul.f32 %v5630_v61, %v4417_v35  ;;  %v7000_v4 = vld [vmem:[#allocation35_spill] sm:$0xff] }
 0x173   : > { %1501 = vmax.xlane.f32.xlu0 %v6994_v55  ;;  %v3061_v6 = vadd.f32 %v3060_v46, %v3059_v25  ;;  %v2397_v14 = vsub.f32 %v6956_v58, %v5673_v24  ;;  %1507 = vmax.xlane.f32.xlu2 %v1506_v29  ;;  %v5729_v34 = vsel %vm1101_vm3, %v1246_v7, 0.0  ;;  %v2399_v45 = vsub.f32 %v6972_v59, %v5673_v24 }
 0x174   : > { %6996 = vst [vmem:[#allocation16_spill] sm:$0xff] %v5716_v30  ;;  %v1264_v61 = vsel %vm1103_vm6, %v1248_v49, 0.0  ;;  %v5737_v25 = vmul.f32 %v4417_v35, %v801_v62  ;;  %v5740_v58 = vmul.f32 %v4417_v35, %v866_v13  ;;  %v3087_v29 = vmul.f32 %v3708_v11, %v3040_v12  ;;  %v7002_v13 = vld [vmem:[#allocation51_spill] sm:$0xff]  ;;  %v7003_v12 = vld [vmem:[#allocation52_spill] sm:$0xff] }
 0x175   : > { %v3088_v46 = vmul.f32 %v3710_v23, %v3061_v6  ;;  %v2394_v37 = vsub.f32 %v7000_v4, %v5705_v19  ;;  %v2425_v7 = vmul.f32 1.442695, %v2393_v48  ;;  %v3712_v10 = vpop.eup %3711  ;;  %v2396_v59 = vsub.f32 %v7001_v36, %v5705_v19  ;;  %v7004_v4 = vld [vmem:[#allocation44_spill] sm:$0xff]  ;;  %v7005_v36 = vld [vmem:[#allocation45_spill] sm:$0xff] }
 0x176   : > { %6999 = vst [vmem:[#allocation34_spill] sm:$0xff] %v5740_v58  ;;  %v2398_v55 = vsub.f32 %v6960_v17, %v5705_v19  ;;  %v2400_v49 = vsub.f32 %v6977_v8, %v5705_v19  ;;  %v2429_v62 = vmul.f32 1.442695, %v2395_v42  ;;  %v2401_v11 = vsub.f32 %v7002_v13, %v5673_v24  ;;  %v7006_v17 = vld [vmem:[#allocation62_spill] sm:$0xff]  ;;  %v7007_v42 = vld [vmem:[#allocation63_spill] sm:$0xff] }
 0x177   : > { %v3091_v43 = vrot.slane %v3088_v46, 7  ;;  %v2402_v23 = vsub.f32 %v7003_v12, %v5705_v19  ;;  %v2433_v6 = vmul.f32 1.442695, %v2397_v14  ;;  %v3714_v48 = vpop.eup %3713  ;;  %v2403_v20 = vsub.f32 %v7004_v4, %v5673_v24  ;;  %v7008_v12 = vld [vmem:[#allocation67_spill] sm:$0xff]  ;;  %v7009_v4 = vld [vmem:[#allocation68_spill] sm:$0xff] }
 0x178   : > { %v2404_v31 = vsub.f32 %v7005_v36, %v5705_v19  ;;  %v2405_v38 = vsub.f32 %v7006_v17, %v5673_v24  ;;  %3715 = vpow2.f32 %v2425_v7  ;;  %v2437_v13 = vmul.f32 1.442695, %v2399_v45  ;;  %v7011_v7 = vld [vmem:[#allocation61_spill] sm:$0xff] }
 0x179   : > { %v3092_v8 = vsel %vm2001_vm1, %v3087_v29, %v3091_v43  ;;  %3717 = vpow2.f32 %v2429_v62  ;;  %v2407_v15 = vsub.f32 %v7008_v12, %v5673_v24  ;;  %v2427_v36 = vmul.f32 1.442695, %v2394_v37  ;;  %v7013_v45 = vld [vmem:[#allocation81_spill] sm:$0xff]  ;;  %v7015_v12 = vld [vmem:[#allocation86_spill] sm:$0xff] }
 0x17a   : > { %v3094_v14 = vadd.f32 %v3092_v8, %v3075_v56  ;;  %v2409_v17 = vsub.f32 %v7010_v40, %v5673_v24  ;;  %3719 = vpow2.f32 %v2433_v6  ;;  %v2441_v29 = vmul.f32 1.442695, %v2401_v11  ;;  %v7016_v6 = vld [vmem:[#allocation78_spill] sm:$0xff]  ;;  %v7017_v40 = vld [vmem:[#allocation79_spill] sm:$0xff] }
 0x17b   : > { %1276 = vadd.xlane.f32.xlu0 %v1260_v53  ;;  %1284 = vadd.xlane.f32.xlu2 %v1264_v61  ;;  %v7012_v53 = vld [vmem:[#allocation80_spill] sm:$0xff]  ;;  %v2431_v8 = vmul.f32 1.442695, %v2396_v59  ;;  %v2188_v37 = vadd.f32 %v3714_v48, %v3712_v10  ;;  %v2413_v46 = vsub.f32 %v7014_v0, %v5673_v24  ;;  %3721 = vpow2.f32 %v2437_v13  ;;  %v804_v59 = vpop.f32.mrf.mxu0  ;;  %v7018_v48 = vld [vmem:[#allocation98_spill] sm:$0xff]  ;;  %v7019_v0 = vld [vmem:[#allocation99_spill] sm:$0xff] }
 0x17c   : > { %3095 = vst.msk [vmem:[#allocation4 + $0x4] sm:$0x3] %vm5527_vm15, %v3094_v14  ;;  %v2411_v56 = vsub.f32 %v7012_v53, %v5673_v24  ;;  %v2445_v11 = vmul.f32 1.442695, %v2403_v20  ;;  %v2415_v14 = vsub.f32 %v7016_v6, %v5673_v24  ;;  %3723 = vpow2.f32 %v2427_v36  ;;  %v7020_v13 = vld [vmem:[#allocation103_spill] sm:$0xff]  ;;  %v7021_v6 = vld [vmem:[#allocation104_spill] sm:$0xff] }
 0x17d   : > { %v2435_v32 = vmul.f32 1.442695, %v2398_v55  ;;  %2189 = vadd.xlane.f32.xlu1 %v2188_v37  ;;  %v2417_v62 = vsub.f32 %v7018_v48, %v5673_v24  ;;  %3725 = vpow2.f32 %v2441_v29  ;;  %v2449_v20 = vmul.f32 1.442695, %v2405_v38 }
 0x17e   : > { %v3716_v61 = vpop.eup %3715  ;;  %3727 = vpow2.f32 %v2431_v8  ;;  %v2439_v36 = vmul.f32 1.442695, %v2400_v49  ;;  %v2453_v53 = vmul.f32 1.442695, %v2407_v15  ;;  %v2443_v29 = vmul.f32 1.442695, %v2402_v23 }
 0x17f   : > { %v3718_v10 = vpop.eup %3717  ;;  %3729 = vpow2.f32 %v2445_v11  ;;  %v1515_v43 = vmax.f32 %v5623_v27, %v5604_v57  ;;  %v2457_v8 = vmul.f32 1.442695, %v2409_v17  ;;  %v1211_v11 = vpop.f32.mrf.mxu2  ;;  %v1509_v17 = vmax.f32 %v6975_v3, %v5450_v60 }
 0x180   : > { %v3720_v55 = vpop.eup %3719  ;;  %v2489_v48 = vadd.f32 %v3718_v10, %v3716_v61  ;;  %3731 = vpow2.f32 %v2435_v32  ;;  %v2447_v61 = vmul.f32 1.442695, %v2404_v31  ;;  %v5806_v32 = vmul.f32 %v4417_v35, %v5627_v50 }
 0x181   : > { %v3722_v16 = vpop.eup %3721  ;;  %3733 = vpow2.f32 %v2449_v20  ;;  %v2461_v10 = vmul.f32 1.442695, %v2411_v56  ;;  %v7023_v20 = vsub.f32 %v7007_v42, %v5705_v19  ;;  %v5815_v31 = vmul.f32 %v4417_v35, %v804_v59 }
 0x182   : > { %v2490_v37 = vadd.f32 %v3720_v55, %v2489_v48  ;;  %v3724_v15 = vpop.eup %3723  ;;  %3735 = vpow2.f32 %v2439_v36  ;;  %7022 = vst [vmem:[#allocation32_spill] sm:$0xff] %v5806_v32  ;;  %v1249_v50 = vmul.f32 %v1211_v11, %v4417_v35  ;;  %v2465_v56 = vmul.f32 1.442695, %v2413_v46 }
 0x183   : > { %1278 = vadd.xlane.f32.xlu0 %v5696_v47  ;;  %1516 = vmax.xlane.f32.xlu2 %v1515_v43  ;;  %v3726_v23 = vpop.eup %3725  ;;  %3737 = vpow2.f32 %v2453_v53  ;;  %v2451_v55 = vmul.f32 1.442695, %v7023_v20  ;;  %v2473_v47 = vmul.f32 1.442695, %v2417_v62  ;;  %v807_v59 = vpop.f32.mrf.mxu0  ;;  %v1263_v62 = vsel %vm1102_vm7, %v5720_v39, 0.0 }
 0x184   : > { %v2491_v38 = vadd.f32 %v3722_v16, %v2490_v37  ;;  %v3728_v48 = vpop.eup %3727  ;;  %3739 = vpow2.f32 %v2443_v29  ;;  %v7024_v16 = vsub.f32 %v7009_v4, %v5705_v19  ;;  %v7025_v29 = vsub.f32 %v7011_v7, %v5705_v19 }
 0x185   : > { %1280 = vadd.xlane.f32.xlu1 %v5729_v34  ;;  %v3730_v43 = vpop.eup %3729  ;;  %3741 = vpow2.f32 %v2457_v8  ;;  %v2469_v34 = vmul.f32 1.442695, %v2415_v14  ;;  %v2510_v58 = vadd.f32 %v3728_v48, %v3724_v15  ;;  %v1265_v8 = vsel %vm1104_vm5, %v1249_v50, 0.0 }
 0x186   : > { %v2455_v53 = vmul.f32 1.442695, %v7024_v16  ;;  %v2492_v36 = vadd.f32 %v3726_v23, %v2491_v38  ;;  %v3732_v37 = vpop.eup %3731  ;;  %3743 = vpow2.f32 %v2447_v61  ;;  %v2459_v20 = vmul.f32 1.442695, %v7025_v29 }
 0x187   : > { %v3734_v49 = vpop.eup %3733  ;;  %3745 = vpow2.f32 %v2461_v10  ;;  %v7027_v38 = vmax.f32 %v5645_v22, %v5652_v44  ;;  %v1825_v15 = vmax.f32 %v5702_v33, %v5815_v31  ;;  %v2511_v42 = vadd.f32 %v3732_v37, %v2510_v58 }
 0x188   : > { %v2493_v11 = vadd.f32 %v3730_v43, %v2492_v36  ;;  %v3736_v46 = vpop.eup %3735  ;;  %3747 = vpow2.f32 %v2451_v55  ;;  %v5840_v48 = vmul.f32 %v4417_v35, %v807_v59  ;;  %v7029_v22 = vsub.f32 %v7013_v45, %v5705_v19 }
 0x189   : > { %v1824_v61 = vmax.f32 %v7027_v38, %v5737_v25  ;;  %v3738_v23 = vpop.eup %3737  ;;  %3749 = vpow2.f32 %v2465_v56  ;;  %v7030_v39 = vsub.f32 %v7020_v13, %v5673_v24  ;;  %v1518_v33 = vmax.f32 %v5591_v52, %v5639_v41 }
 0x18a   : > { %v2494_v10 = vadd.f32 %v3734_v49, %v2493_v11  ;;  %v3740_v55 = vpop.eup %3739  ;;  %3751 = vpow2.f32 %v2455_v53  ;;  %v2463_v50 = vmul.f32 1.442695, %v7029_v22  ;;  %v2512_v16 = vadd.f32 %v3736_v46, %v2511_v42  ;;  %v5868_v22 = vld [vmem:[#allocation3 + $0x2] sm:$0x3] }
 0x18b   : > { %1510 = vmax.xlane.f32.xlu0 %v1509_v17  ;;  %v5837_v17 = vpop.f32.mrf.mxu1  ;;  %v2477_v43 = vmul.f32 1.442695, %v7030_v39  ;;  %1286 = vadd.xlane.f32.xlu2 %v1265_v8  ;;  %v3742_v58 = vpop.eup %3741  ;;  %3753 = vpow2.f32 %v2469_v34  ;;  %v1826_v56 = vmax.f32 %v1824_v61, %v5840_v48  ;;  %v7031_v53 = vsub.f32 %v7015_v12, %v5705_v19 }
 0x18c   : > { %v2495_v49 = vadd.f32 %v3738_v23, %v2494_v10  ;;  %v3744_v36 = vpop.eup %3743  ;;  %3755 = vpow2.f32 %v2459_v20  ;;  %v7032_v29 = vsub.f32 %v6934_v18, %v5673_v24  ;;  %v1827_v11 = vmax.f32 %v1825_v15, %v5659_v9  ;;  %v881_v39 = vpop.f32.mrf.mxu3 }
 0x18d   : > { %v2467_v37 = vmul.f32 1.442695, %v7031_v53  ;;  %1282 = vadd.xlane.f32.xlu1 %v1263_v62  ;;  %v3746_v8 = vpop.eup %3745  ;;  %3757 = vpow2.f32 %v2473_v47  ;;  %v2513_v38 = vadd.f32 %v3740_v55, %v2512_v16  ;;  %v1828_v46 = vmax.f32 %v1826_v56, %v5677_v51 }
 0x18e   : > { %v2481_v59 = vmul.f32 1.442695, %v7032_v29  ;;  %v2496_v34 = vadd.f32 %v3742_v58, %v2495_v49  ;;  %v3748_v61 = vpop.eup %3747  ;;  %3759 = vpow2.f32 %v2463_v50  ;;  %v7033_v20 = vsub.f32 %v7017_v40, %v5705_v19 }
 0x18f   : > { %v7034_v23 = vsub.f32 %v7019_v0, %v5705_v19  ;;  %v7035_v62 = vsub.f32 %v5317_v1, %v5673_v24  ;;  %v3750_v42 = vpop.eup %3749  ;;  %3761 = vpow2.f32 %v2477_v43  ;;  %v2514_v55 = vadd.f32 %v3744_v36, %v2513_v38 }
 0x190   : > { %v2471_v14 = vmul.f32 1.442695, %v7033_v20  ;;  %v2497_v47 = vadd.f32 %v3746_v8, %v2496_v34  ;;  %v2535_v50 = vrot.slane %v5705_v19, 7  ;;  %v3752_v58 = vpop.eup %3751  ;;  %3763 = vpow2.f32 %v2467_v37 }
 0x191   : > { %v2475_v10 = vmul.f32 1.442695, %v7034_v23  ;;  %v2485_v15 = vmul.f32 1.442695, %v7035_v62  ;;  %v1829_v49 = vmax.f32 %v1827_v11, %v5716_v30  ;;  %v1512_v16 = vmax.f32 %v5543_v26, %v5547_v54  ;;  %v3754_v53 = vpop.eup %3753 }
 0x192   : > { %v1830_v56 = vmax.f32 %v1828_v46, %v5806_v32  ;;  %3765 = vpow2.f32 %v2481_v59  ;;  %v2498_v43 = vadd.f32 %v3750_v42, %v2497_v47  ;;  %v2515_v29 = vadd.f32 %v3748_v61, %v2514_v55  ;;  %v3756_v8 = vpop.eup %3755  ;;  %v7040_v47 = vld [vmem:[#allocation34_spill] sm:$0xff] }
 0x193   : > { %1519 = vmax.xlane.f32.xlu0 %v1518_v33  ;;  %v2536_v36 = vsel %vm2001_vm1, %v5673_v24, %v2535_v50  ;;  %3767 = vpow2.f32 %v2471_v14  ;;  %v7036_v33 = vsub.f32 %v7021_v6, %v5705_v19  ;;  %v3758_v38 = vpop.eup %3757  ;;  %v872_v59 = vpop.f32.mrf.mxu1  ;;  %v7037_v61 = vsub.f32 %v6968_v2, %v5705_v19  ;;  %v7038_v14 = vld [vmem:[#allocation13_spill] sm:$0xff]  ;;  %v2540_v6 = vld [vmem:[#allocation4 + $0x2] sm:$0x3] }
 0x194   : > { %v5881_v11 = vmax.f32 %v5868_v22, %v2536_v36  ;;  %v1831_v34 = vmax.f32 %v1829_v49, %v1830_v56  ;;  %3769 = vpow2.f32 %v2485_v15  ;;  %v2499_v46 = vadd.f32 %v3754_v53, %v2498_v43  ;;  %v3760_v23 = vpop.eup %3759 }
 0x195   : > { %v2479_v37 = vmul.f32 1.442695, %v7036_v33  ;;  %v2516_v20 = vadd.f32 %v3752_v58, %v2515_v29  ;;  %3771 = vpow2.f32 %v2475_v10  ;;  %v2483_v62 = vmul.f32 1.442695, %v7037_v61  ;;  %1513 = vmax.xlane.f32.xlu1 %v1512_v16  ;;  %v3762_v50 = vpop.eup %3761 }
 0x196   : > { %2565 = vst.msk [vmem:[#allocation3 + $0x2] sm:$0x3] %vm5527_vm15, %v5881_v11  ;;  %v7039_v42 = vmax.f32 %v5691_v63, %v7038_v14  ;;  %v5894_v15 = vmul.f32 %v4417_v35, %v881_v39  ;;  %v7041_v10 = vsub.f32 %v6966_v28, %v5705_v19  ;;  %v2500_v49 = vadd.f32 %v3758_v38, %v2499_v46  ;;  %v3764_v43 = vpop.eup %3763  ;;  %v1214_v14 = vpop.f32.mrf.mxu2 }
 0x197   : > { %v2517_v56 = vadd.f32 %v3756_v8, %v2516_v20  ;;  %v1832_v53 = vrot.slane %v1831_v34, 4  ;;  %3773 = vpow2.f32 %v2479_v37  ;;  %v5902_v16 = vmul.f32 %v4417_v35, %v5837_v17  ;;  %v884_v46 = vpop.f32.mrf.mxu3  ;;  %v5904_v37 = vpop.xlane.xlu1 %2579 }
 0x198   : > { %v1847_v55 = vmax.f32 %v7040_v47, %v7039_v42  ;;  %v2487_v58 = vmul.f32 1.442695, %v7041_v10  ;;  %v3766_v29 = vpop.eup %3765  ;;  %v2501_v36 = vadd.f32 %v3762_v50, %v2500_v49  ;;  %3775 = vpow2.f32 %v2483_v62  ;;  %7042 = vst [vmem:[#allocation15_spill] sm:$0xff] %v5904_v37 }
 0x199   : > { %v2518_v33 = vadd.f32 %v3760_v23, %v2517_v56  ;;  %v1833_v61 = vmax.f32 %v1831_v34, %v1832_v53  ;;  %v3768_v42 = vpop.eup %3767  ;;  %v2546_v34 = vperm.slane %v5881_v11, 0  ;;  %v5907_v23 = vpop.xlane.xlu2 %2051  ;;  %v1250_v62 = vmul.f32 %v1214_v14, %v4417_v35 }
 0x19a   : > { %v1849_v39 = vmax.f32 %v1847_v55, %v5894_v15  ;;  %v3770_v28 = vpop.eup %3769  ;;  %3777 = vpow2.f32 %v2487_v58  ;;  %v2502_v38 = vadd.f32 %v3766_v29, %v2501_v36  ;;  %7043 = vst [vmem:[#allocation18_spill] sm:$0xff] %v5907_v23  ;;  %v1542_v55 = vmax.f32 %v5716_v30, %v5894_v15  ;;  %v7045_v36 = vld [vmem:[#allocation49_spill] sm:$0xff] }
 0x19b   : > { %v2519_v8 = vadd.f32 %v3764_v43, %v2518_v33  ;;  %v1834_v20 = vrot.slane %v1833_v61, 2  ;;  %v3772_v50 = vpop.eup %3771  ;;  %v1539_v17 = vmax.f32 %v5677_v51, %v5691_v63  ;;  %v2547_v49 = vperm.slane %v5881_v11, 1 }
 0x19c   : > { %v2503_v10 = vadd.f32 %v3770_v28, %v2502_v38  ;;  %v1851_v43 = vmax.f32 %v1849_v39, %v5902_v16  ;;  %v5917_v29 = vmul.f32 %v4417_v35, %v884_v46  ;;  %v2622_v33 = vsub.f32 %v7045_v36, %v5904_v37  ;;  %1543 = vmax.xlane.f32.xlu2 %v1542_v55  ;;  %v875_v39 = vpop.f32.mrf.mxu1 }
 0x19d   : > { %v2520_v58 = vadd.f32 %v3768_v42, %v2519_v8  ;;  %v1835_v56 = vmax.f32 %v1833_v61, %v1834_v20  ;;  %v3774_v53 = vpop.eup %3773  ;;  %1540 = vmax.xlane.f32.xlu1 %v1539_v17  ;;  %v1266_v1 = vsel %vm1105_vm10, %v1250_v62, 0.0  ;;  %v2541_v61 = vsub.f32 %v5868_v22, %v5881_v11 }
 0x19e   : > { %7044 = vst [vmem:[#allocation35_spill] sm:$0xff] %v5917_v29  ;;  %v2504_v28 = vrot.slane %v2503_v10, 4  ;;  %1288 = vadd.xlane.f32.xlu0 %v1266_v1  ;;  %v3776_v8 = vpop.eup %3775  ;;  %v2550_v46 = vsub.f32 %v5673_v24, %v2546_v34  ;;  %v5928_v20 = vmul.f32 %v4417_v35, %v872_v59  ;;  %v2551_v14 = vsub.f32 %v5705_v19, %v2547_v49  ;;  %v7049_v24 = vld [vmem:[#allocation50_spill] sm:$0xff]  ;;  %v7051_v19 = vld [vmem:[#allocation131_spill] sm:$0xff] }
 0x19f   : > { %v2521_v42 = vadd.f32 %v3772_v50, %v2520_v58  ;;  %v1836_v38 = vrot.slane %v1835_v56, 1  ;;  %v1848_v50 = vmax.f32 %v5917_v29, %v1851_v43  ;;  %v2662_v58 = vmul.f32 1.442695, %v2622_v33  ;;  %v5969_v0 = vpop.xlane.xlu1 %2054 }
 0x1a0   : > { %7047 = vst [vmem:[#allocation33_spill] sm:$0xff] %v5928_v20  ;;  %v3778_v55 = vpop.eup %3777  ;;  %v2505_v17 = vadd.f32 %v2504_v28, %v2503_v10  ;;  %v5935_v22 = vmul.f32 %v4417_v35, %v875_v39  ;;  %v2542_v2 = vmul.f32 1.442695, %v2541_v61  ;;  %v2623_v59 = vsub.f32 %v7049_v24, %v5904_v37  ;;  %v7050_v10 = vld [vmem:[#allocation128_spill] sm:$0xff]  ;;  %v7052_v28 = vld [vmem:[#allocation129_spill] sm:$0xff]  ;;  %v5946_v61 = vpop.xlane.xlu0 %2048 }
 0x1a1   : > { %v2522_v36 = vadd.f32 %v3774_v53, %v2521_v42  ;;  %v5931_v62 = vmax.f32 %v1835_v56, %v1836_v38  ;;  %v2552_v34 = vmul.f32 1.442695, %v2550_v46  ;;  %v1850_v56 = vmax.f32 %v1848_v50, %v5928_v20  ;;  %7053 = vst [vmem:[#allocation61_spill] sm:$0xff] %v5946_v61  ;;  %v5948_v39 = vpop.xlane.xlu2 %2585 }
 0x1a2   : > { %7048 = vst [vmem:[#allocation68_spill] sm:$0xff] %v5935_v22  ;;  %v2506_v1 = vrot.slane %v2505_v17, 2  ;;  %v2554_v33 = vmul.f32 1.442695, %v2551_v14  ;;  %3779 = vpow2.f32 %v2662_v58  ;;  %v2664_v14 = vmul.f32 1.442695, %v2623_v59 }
 0x1a3   : > { %v2523_v11 = vadd.f32 %v3776_v8, %v2522_v36  ;;  %v1859_v53 = vsub.f32 %v7050_v10, %v5931_v62  ;;  %v1861_v49 = vsub.f32 %v7051_v19, %v5931_v62  ;;  %v1863_v42 = vsub.f32 %v7052_v28, %v5931_v62  ;;  %7054 = vst [vmem:[#allocation81_spill] sm:$0xff] %v5948_v39 }
 0x1a4   : > { %v2507_v38 = vadd.f32 %v2506_v1, %v2505_v17  ;;  %v1852_v8 = vmax.f32 %v1850_v56, %v5935_v22  ;;  %3781 = vpow2.f32 %v2542_v2  ;;  %v1865_v36 = vsub.f32 %v6975_v3, %v5931_v62  ;;  %7058 = vst [vmem:[#allocation13_spill] sm:$0xff] %v5969_v0 }
 0x1a5   : > { %v2524_v43 = vadd.f32 %v3778_v55, %v2523_v11  ;;  %3783 = vpow2.f32 %v2552_v34  ;;  %v1891_v50 = vmul.f32 1.442695, %v1859_v53  ;;  %v1895_v55 = vmul.f32 1.442695, %v1861_v49 }
 0x1a6   : > { %3785 = vpow2.f32 %v2554_v33  ;;  %v1867_v17 = vsub.f32 %v5543_v26, %v5931_v62  ;;  %v1899_v58 = vmul.f32 1.442695, %v1863_v42  ;;  %v2508_v1 = vrot.slane %v2507_v38, 1 }
 0x1a7   : > { %v2525_v46 = vrot.slane %v2524_v43, 4  ;;  %3787 = vpow2.f32 %v1891_v50  ;;  %v1853_v24 = vrot.slane %v1852_v8, 4  ;;  %v1869_v2 = vsub.f32 %v5623_v27, %v5931_v62 }
 0x1a8   : > { %3789 = vpow2.f32 %v1895_v55  ;;  %v1903_v56 = vmul.f32 1.442695, %v1865_v36  ;;  %v3780_v18 = vpop.eup %3779  ;;  %v1871_v59 = vsub.f32 %v5591_v52, %v5931_v62  ;;  %v1907_v49 = vmul.f32 1.442695, %v1867_v17 }
 0x1a9   : > { %v2526_v11 = vadd.f32 %v2525_v46, %v2524_v43  ;;  %3791 = vpow2.f32 %v2664_v14  ;;  %v2509_v33 = vadd.f32 %v2508_v1, %v2507_v38  ;;  %v1873_v42 = vsub.f32 %v5652_v44, %v5931_v62  ;;  %v7055_v14 = vld [vmem:[#allocation140_spill] sm:$0xff]  ;;  %v5965_v52 = vpop.xlane.xlu2 %2060 }
 0x1aa   : > { %v3782_v34 = vpop.eup %3781  ;;  %3793 = vpow2.f32 %v1899_v58  ;;  %v1911_v55 = vmul.f32 1.442695, %v1869_v2  ;;  %v1854_v36 = vmax.f32 %v1852_v8, %v1853_v24  ;;  %7057 = vst [vmem:[#allocation19_spill] sm:$0xff] %v5965_v52  ;;  %v1545_v38 = vmax.f32 %v5806_v32, %v5917_v29 }
 0x1ab   : > { %v2527_v37 = vrot.slane %v2526_v11, 2  ;;  %v3784_v43 = vpop.eup %3783  ;;  %3795 = vpow2.f32 %v1903_v56  ;;  %v1915_v1 = vmul.f32 1.442695, %v1871_v59  ;;  %v2544_v8 = vmul.f32 %v3782_v34, %v2540_v6 }
 0x1ac   : > { %v3786_v46 = vpop.eup %3785  ;;  %3797 = vpow2.f32 %v1907_v49  ;;  %v1855_v27 = vrot.slane %v1854_v36, 2  ;;  %v2556_v24 = vmul.f32 %v3784_v43, %v2509_v33  ;;  %v1877_v56 = vsub.f32 %v5737_v25, %v5931_v62  ;;  %1546 = vmax.xlane.f32.xlu0 %v1545_v38  ;;  %v7059_v38 = vld [vmem:[#allocation138_spill] sm:$0xff] }
 0x1ad   : > { %v2528_v53 = vadd.f32 %v2527_v37, %v2526_v11  ;;  %v3788_v13 = vpop.eup %3787  ;;  %v1875_v37 = vsub.f32 %v7055_v14, %v5931_v62  ;;  %v5963_v11 = vpop.xlane.xlu0 %2582  ;;  %3799 = vpow2.f32 %v1911_v55  ;;  %v1919_v3 = vmul.f32 1.442695, %v1873_v42 }
 0x1ae   : > { %7056 = vst [vmem:[#allocation17_spill] sm:$0xff] %v5963_v11  ;;  %v3790_v17 = vpop.eup %3789  ;;  %v1856_v19 = vmax.f32 %v1854_v36, %v1855_v27  ;;  %v1881_v59 = vsub.f32 %v5840_v48, %v5931_v62  ;;  %3801 = vpow2.f32 %v1915_v1  ;;  %v1927_v42 = vmul.f32 1.442695, %v1877_v56 }
 0x1af   : > { %v2529_v50 = vrot.slane %v2528_v53, 1  ;;  %v3792_v2 = vpop.eup %3791  ;;  %v1955_v26 = vadd.f32 %v3790_v17, %v3788_v13  ;;  %v1923_v49 = vmul.f32 1.442695, %v1875_v37  ;;  %3803 = vpow2.f32 %v1919_v3  ;;  %v5982_v17 = vpop.f32.mrf.mxu2 }
 0x1b0   : > { %v3794_v40 = vpop.eup %3793  ;;  %v1857_v43 = vrot.slane %v1856_v19, 1  ;;  %v2722_v33 = vadd.f32 %v3792_v2, %v3780_v18  ;;  %v1935_v18 = vmul.f32 1.442695, %v1881_v59  ;;  %v1883_v59 = vsub.f32 %v5659_v9, %v5931_v62 }
 0x1b1   : > { %v2530_v58 = vadd.f32 %v2529_v50, %v2528_v53  ;;  %v1879_v53 = vsub.f32 %v5815_v31, %v5931_v62  ;;  %v1956_v50 = vadd.f32 %v3794_v40, %v1955_v26  ;;  %v3796_v6 = vpop.eup %3795  ;;  %3805 = vpow2.f32 %v1923_v49  ;;  %v5998_v49 = vpop.xlane.xlu1 %2588 }
 0x1b2   : > { %v3798_v55 = vpop.eup %3797  ;;  %v5980_v36 = vmax.f32 %v1856_v19, %v1857_v43  ;;  %2723 = vadd.xlane.f32.xlu2 %v2722_v33  ;;  %v7061_v19 = vld [vmem:[#allocation126_spill] sm:$0xff]  ;;  %3807 = vpow2.f32 %v1927_v42  ;;  %v1885_v42 = vsub.f32 %v5677_v51, %v5931_v62  ;;  %vm1773_vm3 = vcmask 7168  }
 0x1b3   : > { %v2557_v12 = vmul.f32 %v3786_v46, %v2530_v58  ;;  %v1957_v13 = vadd.f32 %v3796_v6, %v1956_v50  ;;  %v1521_v46 = vmax.f32 %v5652_v44, %v7059_v38  ;;  %v1931_v40 = vmul.f32 1.442695, %v1879_v53  ;;  %v3800_v37 = vpop.eup %3799  ;;  %v7060_v58 = vld [vmem:[#allocation125_spill] sm:$0xff]  ;;  %v5994_v53 = vpop.xlane.xlu2 %2594 }
 0x1b4   : > { %v1860_v1 = vsub.f32 %v7060_v58, %v5980_v36  ;;  %v1862_v2 = vsub.f32 %v7061_v19, %v5980_v36  ;;  %7064 = vst [vmem:[#allocation49_spill] sm:$0xff] %v5994_v53  ;;  %v3802_v50 = vpop.eup %3801  ;;  %v2000_v44 = vrot.slane %v5980_v36, 7 }
 0x1b5   : > { %v2560_v34 = vrot.slane %v2557_v12, 7  ;;  %v1958_v12 = vadd.f32 %v3798_v55, %v1957_v13  ;;  %1522 = vmax.xlane.f32.xlu1 %v1521_v46  ;;  %3809 = vpow2.f32 %v1931_v40  ;;  %v3804_v43 = vpop.eup %3803  ;;  %v1868_v46 = vsub.f32 %v5547_v54, %v5980_v36 }
 0x1b6   : > { %3811 = vpow2.f32 %v1935_v18  ;;  %v1893_v33 = vmul.f32 1.442695, %v1860_v1  ;;  %v1897_v55 = vmul.f32 1.442695, %v1862_v2  ;;  %v7065_v1 = vld [vmem:[#allocation51_spill] sm:$0xff]  ;;  %v2002_v51 = vsel %vm2001_vm1, %v5931_v62, %v2000_v44 }
 0x1b7   : > { %v2561_v27 = vsel %vm2001_vm1, %v2556_v24, %v2560_v34  ;;  %v1959_v3 = vadd.f32 %v3800_v37, %v1958_v12  ;;  %v7062_v24 = vld [vmem:[#allocation31_spill] sm:$0xff]  ;;  %v1866_v34 = vsub.f32 %v5450_v60, %v5980_v36  ;;  %v1939_v12 = vmul.f32 1.442695, %v1883_v59 }
 0x1b8   : > { %v2563_v26 = vadd.f32 %v2561_v27, %v2544_v8  ;;  %v1864_v56 = vsub.f32 %v7062_v24, %v5980_v36  ;;  %v5992_v8 = vpop.xlane.xlu0 %2057  ;;  %3813 = vpow2.f32 %v1893_v33  ;;  %v1870_v37 = vsub.f32 %v5604_v57, %v5980_v36 }
 0x1b9   : > { %7063 = vst [vmem:[#allocation34_spill] sm:$0xff] %v5992_v8  ;;  %v1960_v6 = vadd.f32 %v3802_v50, %v1959_v3  ;;  %3815 = vpow2.f32 %v1897_v55  ;;  %v1905_v3 = vmul.f32 1.442695, %v1866_v34  ;;  %v2091_v50 = vsub.f32 %v7065_v1, %v5946_v61  ;;  %v6020_v1 = vld [vmem:[#allocation3] sm:$0x3] }
 0x1ba   : > { %2564 = vst.msk [vmem:[#allocation4 + $0x2] sm:$0x3] %vm5527_vm15, %v2563_v26  ;;  %v1901_v27 = vmul.f32 1.442695, %v1864_v56  ;;  %v3806_v26 = vpop.eup %3805  ;;  %v1909_v59 = vmul.f32 1.442695, %v1868_v46  ;;  %v1887_v34 = vsub.f32 %v5716_v30, %v5931_v62  ;;  %v1874_v46 = vsub.f32 %v7059_v38, %v5980_v36 }
 0x1bb   : > { %v1961_v13 = vadd.f32 %v3804_v43, %v1960_v6  ;;  %v3808_v18 = vpop.eup %3807  ;;  %v6010_v6 = vpop.f32.mrf.mxu2  ;;  %v1872_v43 = vsub.f32 %v5639_v41, %v5980_v36  ;;  %v1943_v55 = vmul.f32 1.442695, %v1885_v42  ;;  %v1889_v57 = vsub.f32 %v5806_v32, %v5931_v62  ;;  %v7068_v30 = vld [vmem:[#allocation52_spill] sm:$0xff] }
 0x1bc   : > { %v3810_v2 = vpop.eup %3809  ;;  %3817 = vpow2.f32 %v1901_v27  ;;  %v1913_v27 = vmul.f32 1.442695, %v1870_v37  ;;  %v2131_v42 = vmul.f32 1.442695, %v2091_v50  ;;  %v1947_v37 = vmul.f32 1.442695, %v1887_v34 }
 0x1bd   : > { %v1962_v40 = vadd.f32 %v3806_v26, %v1961_v13  ;;  %v6016_v13 = vpop.xlane.xlu2 %2069  ;;  %v3812_v26 = vpop.eup %3811  ;;  %3819 = vpow2.f32 %v1939_v12  ;;  %v2092_v12 = vsub.f32 %v7068_v30, %v5946_v61  ;;  %v1878_v30 = vsub.f32 %v7040_v47, %v5980_v36 }
 0x1be   : > { %7067 = vst [vmem:[#allocation50_spill] sm:$0xff] %v6016_v13  ;;  %3821 = vpow2.f32 %v1905_v3  ;;  %v3814_v41 = vpop.eup %3813  ;;  %v7069_v13 = vld [vmem:[#allocation139_spill] sm:$0xff]  ;;  %v6036_v3 = vmax.f32 %v6020_v1, %v2002_v51  ;;  %v1921_v50 = vmul.f32 1.442695, %v1874_v46  ;;  %v1880_v34 = vsub.f32 %v5902_v16, %v5980_v36 }
 0x1bf   : > { %v1963_v56 = vadd.f32 %v3808_v18, %v1962_v40  ;;  %v6023_v40 = vpop.xlane.xlu1 %2063  ;;  %v3816_v54 = vpop.eup %3815  ;;  %3823 = vpow2.f32 %v1909_v59 }
 0x1c0   : > { %v6014_v33 = vpop.xlane.xlu0 %2591  ;;  %3825 = vpow2.f32 %v1943_v55  ;;  %v1976_v32 = vadd.f32 %v3816_v54, %v3814_v41  ;;  %2034 = vst.msk [vmem:[#allocation3] sm:$0x3] %vm5527_vm15, %v6036_v3  ;;  %v1951_v55 = vmul.f32 1.442695, %v1889_v57  ;;  %v1886_v57 = vsub.f32 %v5691_v63, %v5980_v36 }
 0x1c1   : > { %7066 = vst [vmem:[#allocation22_spill] sm:$0xff] %v6014_v33  ;;  %v1964_v18 = vadd.f32 %v3810_v2, %v1963_v56  ;;  %v1876_v2 = vsub.f32 %v7069_v13, %v5980_v36  ;;  %v1917_v56 = vmul.f32 1.442695, %v1872_v43  ;;  %3827 = vpow2.f32 %v1913_v27 }
 0x1c2   : > { %v3818_v60 = vpop.eup %3817  ;;  %3829 = vpow2.f32 %v2131_v42  ;;  %v2133_v43 = vmul.f32 1.442695, %v2092_v12 }
 0x1c3   : > { %v1965_v38 = vadd.f32 %v3812_v26, %v1964_v18  ;;  %v3820_v44 = vpop.eup %3819  ;;  %v1977_v59 = vadd.f32 %v3818_v60, %v1976_v32  ;;  %3831 = vpow2.f32 %v1917_v56  ;;  %v1925_v54 = vmul.f32 1.442695, %v1876_v2  ;;  %v1223_v12 = vpop.f32.mrf.mxu2 }
 0x1c4   : > { %v3822_v51 = vpop.eup %3821  ;;  %3833 = vpow2.f32 %v1947_v37  ;;  %v1882_v60 = vsub.f32 %v5928_v20, %v5980_v36  ;;  %v1929_v32 = vmul.f32 1.442695, %v1878_v30  ;;  %v1884_v2 = vsub.f32 %v5935_v22, %v5980_v36 }
 0x1c5   : > { %v6047_v26 = vpop.xlane.xlu2 %2603  ;;  %v1966_v18 = vadd.f32 %v3820_v44, %v1965_v38  ;;  %v1978_v46 = vadd.f32 %v3822_v51, %v1977_v59  ;;  %v3824_v61 = vpop.eup %3823  ;;  %3835 = vpow2.f32 %v1921_v50  ;;  %v1933_v38 = vmul.f32 1.442695, %v1880_v34  ;;  %v7073_v59 = vld [vmem:[#allocation58_spill] sm:$0xff] }
 0x1c6   : > { %7071 = vst [vmem:[#allocation129_spill] sm:$0xff] %v6047_v26  ;;  %v3826_v42 = vpop.eup %3825  ;;  %3837 = vpow2.f32 %v2133_v43  ;;  %v1251_v37 = vmul.f32 %v5982_v17, %v4417_v35  ;;  %v2624_v43 = vsub.f32 %v7073_v59, %v5963_v11  ;;  %v1888_v34 = vsub.f32 %v5894_v15, %v5980_v36 }
 0x1c7   : > { %v6049_v27 = vpop.xlane.xlu1 %2597  ;;  %v1979_v56 = vadd.f32 %v3824_v61, %v1978_v46  ;;  %v3828_v26 = vpop.eup %3827  ;;  %3839 = vpow2.f32 %v1925_v54  ;;  %v1967_v50 = vadd.f32 %v3826_v42, %v1966_v18  ;;  %v7074_v61 = vld [vmem:[#allocation59_spill] sm:$0xff]  ;;  %v1941_v54 = vmul.f32 1.442695, %v1884_v2 }
 0x1c8   : > { %v6045_v41 = vpop.xlane.xlu0 %2066  ;;  %7072 = vst [vmem:[#allocation140_spill] sm:$0xff] %v6049_v27  ;;  %v3830_v44 = vpop.eup %3829  ;;  %3841 = vpow2.f32 %v1951_v55  ;;  %v1937_v27 = vmul.f32 1.442695, %v1882_v60  ;;  %v2625_v46 = vsub.f32 %v7074_v61, %v5963_v11  ;;  %v1524_v17 = vmax.f32 %v7055_v14, %v7069_v13 }
 0x1c9   : > { %7070 = vst [vmem:[#allocation128_spill] sm:$0xff] %v6045_v41  ;;  %v1980_v30 = vadd.f32 %v3828_v26, %v1979_v56  ;;  %v3832_v51 = vpop.eup %3831  ;;  %3843 = vpow2.f32 %v1929_v32  ;;  %v1945_v26 = vmul.f32 1.442695, %v1886_v57  ;;  %v1267_v32 = vsel %vm1106_vm9, %v1251_v37, 0.0 }
 0x1ca   : > { %v3834_v41 = vpop.eup %3833  ;;  %3845 = vpow2.f32 %v1933_v38  ;;  %v1527_v60 = vmax.f32 %v5737_v25, %v7040_v47  ;;  %v2666_v61 = vmul.f32 1.442695, %v2624_v43  ;;  %1525 = vmax.xlane.f32.xlu2 %v1524_v17  ;;  %1290 = vadd.xlane.f32.xlu1 %v1267_v32  ;;  %v1890_v57 = vsub.f32 %v5917_v29, %v5980_v36 }
 0x1cb   : > { %v1981_v63 = vadd.f32 %v3832_v51, %v1980_v30  ;;  %v3836_v55 = vpop.eup %3835  ;;  %v1968_v56 = vadd.f32 %v3834_v41, %v1967_v50  ;;  %3847 = vpow2.f32 %v1937_v27  ;;  %v2668_v38 = vmul.f32 1.442695, %v2625_v46  ;;  %v1226_v18 = vpop.f32.mrf.mxu2 }
 0x1cc   : > { %v3838_v42 = vpop.eup %3837  ;;  %1528 = vmax.xlane.f32.xlu0 %v1527_v60  ;;  %3849 = vpow2.f32 %v1941_v54  ;;  %v1252_v41 = vmul.f32 %v6010_v6, %v4417_v35  ;;  %v1949_v43 = vmul.f32 1.442695, %v1888_v34  ;;  %v1953_v29 = vmul.f32 1.442695, %v1890_v57  ;;  %v7080_v60 = vld [vmem:[#allocation45_spill] sm:$0xff] }
 0x1cd   : > { %v1982_v59 = vadd.f32 %v3836_v55, %v1981_v63  ;;  %v6074_v30 = vpop.xlane.xlu2 %2078  ;;  %v3840_v51 = vpop.eup %3839  ;;  %3851 = vpow2.f32 %v1945_v26  ;;  %v1253_v27 = vmul.f32 %v1223_v12, %v4417_v35 }
 0x1ce   : > { %v3842_v11 = vpop.eup %3841  ;;  %3853 = vpow2.f32 %v2666_v61  ;;  %v1268_v54 = vsel %vm1107_vm8, %v1252_v41, 0.0 }
 0x1cf   : > { %v6078_v37 = vpop.xlane.xlu1 %2072  ;;  %v1983_v63 = vadd.f32 %v3840_v51, %v1982_v59  ;;  %v3844_v50 = vpop.eup %3843  ;;  %v1969_v17 = vadd.f32 %v3842_v11, %v1968_v56  ;;  %3855 = vpow2.f32 %v2668_v38  ;;  %v2191_v59 = vadd.f32 %v3838_v42, %v3830_v44 }
 0x1d0   : > { %v6072_v2 = vpop.xlane.xlu0 %2600  ;;  %v3846_v32 = vpop.eup %3845  ;;  %3857 = vpow2.f32 %v1949_v43  ;;  %v1269_v34 = vsel %vm1108_vm13, %v1253_v27, 0.0 }
 0x1d1   : > { %v1984_v55 = vadd.f32 %v3844_v50, %v1983_v63  ;;  %v3848_v51 = vpop.eup %3847  ;;  %v1970_v26 = vrot.slane %v1969_v17, 4  ;;  %3859 = vpow2.f32 %v1953_v29  ;;  %v7079_v50 = vld [vmem:[#allocation44_spill] sm:$0xff]  ;;  %v2011_v29 = vperm.slane %v6036_v3, 0 }
 0x1d2   : > { %v3850_v11 = vpop.eup %3849  ;;  %1292 = vadd.xlane.f32.xlu2 %v1268_v54  ;;  %2192 = vadd.xlane.f32.xlu1 %v2191_v59  ;;  %v2093_v43 = vsub.f32 %v7079_v50, %v5907_v23  ;;  %v2094_v54 = vsub.f32 %v7080_v60, %v5907_v23  ;;  %v1530_v59 = vmax.f32 %v5815_v31, %v5902_v16 }
 0x1d3   : > { %v1985_v46 = vadd.f32 %v3846_v32, %v1984_v55  ;;  %v3852_v57 = vpop.eup %3851  ;;  %v1229_v44 = vpop.f32.mrf.mxu2  ;;  %v2012_v55 = vperm.slane %v6036_v3, 1  ;;  %v1971_v32 = vadd.f32 %v1970_v26, %v1969_v17  ;;  %v1536_v50 = vmax.f32 %v5659_v9, %v5935_v22  ;;  %v2005_v9 = vld [vmem:[#allocation4] sm:$0x3] }
 0x1d4   : > { %1294 = vadd.xlane.f32.xlu0 %v1269_v34  ;;  %v3854_v42 = vpop.eup %3853  ;;  %v2100_v22 = vsub.f32 %v7011_v7, %v5965_v52 }
 0x1d5   : > { %v1986_v56 = vadd.f32 %v3848_v51, %v1985_v46  ;;  %v6091_v12 = vpop.xlane.xlu2 %2612  ;;  %v3856_v41 = vpop.eup %3855  ;;  %v1972_v17 = vrot.slane %v1971_v32, 2 }
 0x1d6   : > { %7078 = vst [vmem:[#allocation125_spill] sm:$0xff] %v6091_v12  ;;  %v3858_v46 = vpop.eup %3857  ;;  %v2725_v6 = vadd.f32 %v3856_v41, %v3854_v42  ;;  %v2015_v42 = vsub.f32 %v5931_v62, %v2011_v29 }
 0x1d7   : > { %v6093_v38 = vpop.xlane.xlu1 %2606  ;;  %v1987_v63 = vadd.f32 %v3850_v11, %v1986_v56  ;;  %v3860_v34 = vpop.eup %3859  ;;  %v2135_v11 = vmul.f32 1.442695, %v2093_v43  ;;  %v2016_v56 = vsub.f32 %v5980_v36, %v2012_v55  ;;  %v7081_v36 = vld [vmem:[#allocation53_spill] sm:$0xff]  ;;  %v1254_v55 = vmul.f32 %v1226_v18, %v4417_v35  ;;  %v7084_v18 = vld [vmem:[#allocation63_spill] sm:$0xff] }
 0x1d8   : > { %v6089_v61 = vpop.xlane.xlu0 %2075  ;;  %v2626_v41 = vsub.f32 %v7081_v36, %v5948_v39  ;;  %v2017_v36 = vmul.f32 1.442695, %v2015_v42  ;;  %v2096_v23 = vsub.f32 %v7084_v18, %v5969_v0  ;;  %v7088_v18 = vld [vmem:[#allocation71_spill] sm:$0xff] }
 0x1d9   : > { %v1988_v27 = vadd.f32 %v3852_v57, %v1987_v63  ;;  %v2006_v57 = vsub.f32 %v6020_v1, %v6036_v3  ;;  %3861 = vpow2.f32 %v2135_v11  ;;  %v7082_v1 = vld [vmem:[#allocation54_spill] sm:$0xff]  ;;  %v1270_v11 = vsel %vm1109_vm12, %v1254_v55, 0.0 }
 0x1da   : > { %2726 = vadd.xlane.f32.xlu2 %v2725_v6  ;;  %1531 = vmax.xlane.f32.xlu1 %v1530_v59  ;;  %v2627_v3 = vsub.f32 %v7082_v1, %v5948_v39  ;;  %v2019_v59 = vmul.f32 1.442695, %v2016_v56  ;;  %v7083_v6 = vld [vmem:[#allocation62_spill] sm:$0xff]  ;;  %v2670_v1 = vmul.f32 1.442695, %v2626_v41  ;;  %v1255_v55 = vmul.f32 %v1229_v44, %v4417_v35 }
 0x1db   : > { %v1989_v51 = vadd.f32 %v3858_v46, %v1988_v27  ;;  %v2137_v27 = vmul.f32 1.442695, %v2094_v54  ;;  %v2095_v54 = vsub.f32 %v7083_v6, %v5969_v0  ;;  %v2007_v29 = vmul.f32 1.442695, %v2006_v57 }
 0x1dc   : > { %1537 = vmax.xlane.f32.xlu0 %v1536_v50  ;;  %v1533_v50 = vmax.f32 %v5840_v48, %v5928_v20  ;;  %v2672_v39 = vmul.f32 1.442695, %v2627_v3  ;;  %v2141_v41 = vmul.f32 1.442695, %v2096_v23 }
 0x1dd   : > { %v1990_v26 = vadd.f32 %v3860_v34, %v1989_v51  ;;  %v6110_v60 = vpop.xlane.xlu2 %2711  ;;  %v1232_v51 = vpop.f32.mrf.mxu2  ;;  %v1973_v34 = vadd.f32 %v1972_v17, %v1971_v32  ;;  %3863 = vpow2.f32 %v2137_v27  ;;  %v2139_v6 = vmul.f32 1.442695, %v2095_v54 }
 0x1de   : > { %3865 = vpow2.f32 %v2019_v59  ;;  %v7087_v59 = vld [vmem:[#allocation67_spill] sm:$0xff]  ;;  %v1256_v0 = vmul.f32 %v1232_v51, %v4417_v35 }
 0x1df   : > { %v1991_v43 = vrot.slane %v1990_v26, 4  ;;  %v6116_v46 = vpop.xlane.xlu1 %2081  ;;  %v1974_v32 = vrot.slane %v1973_v34, 1  ;;  %3867 = vpow2.f32 %v2007_v29  ;;  %v2097_v54 = vsub.f32 %v7087_v59, %v5992_v8 }
 0x1e0   : > { %v6108_v63 = vpop.xlane.xlu0 %2609  ;;  %3869 = vpow2.f32 %v2017_v36  ;;  %v2628_v36 = vsub.f32 %v7088_v18, %v5998_v49  ;;  %v2098_v18 = vsub.f32 %v7009_v4, %v5992_v8 }
 0x1e1   : > { %v1992_v62 = vadd.f32 %v1991_v43, %v1990_v26  ;;  %v7086_v26 = vld [vmem:[#allocation60_spill] sm:$0xff]  ;;  %v3862_v43 = vpop.eup %3861  ;;  %3871 = vpow2.f32 %v2670_v1  ;;  %v1975_v23 = vadd.f32 %v1974_v32, %v1973_v34 }
 0x1e2   : > { %v2099_v57 = vsub.f32 %v7086_v26, %v5965_v52  ;;  %1534 = vmax.xlane.f32.xlu2 %v1533_v50  ;;  %1296 = vadd.xlane.f32.xlu1 %v1270_v11  ;;  %3873 = vpow2.f32 %v2672_v39  ;;  %v7089_v11 = vld [vmem:[#allocation72_spill] sm:$0xff]  ;;  %v2149_v26 = vmul.f32 1.442695, %v2100_v22  ;;  %v1271_v52 = vsel %vm1110_vm11, %v1255_v55, 0.0 }
 0x1e3   : > { %v1993_v56 = vrot.slane %v1992_v62, 2  ;;  %v3864_v50 = vpop.eup %3863  ;;  %v2629_v7 = vsub.f32 %v7089_v11, %v5998_v49  ;;  %3875 = vpow2.f32 %v2139_v6  ;;  %v2143_v11 = vmul.f32 1.442695, %v2097_v54 }
 0x1e4   : > { %v2147_v44 = vmul.f32 1.442695, %v2099_v57  ;;  %v3866_v1 = vpop.eup %3865  ;;  %3877 = vpow2.f32 %v2141_v41  ;;  %v2194_v34 = vadd.f32 %v3864_v50, %v3862_v43  ;;  %v7091_v57 = vld [vmem:[#allocation76_spill] sm:$0xff] }
 0x1e5   : > { %v1994_v17 = vadd.f32 %v1993_v56, %v1992_v62  ;;  %v6131_v27 = vpop.xlane.xlu2 %2717  ;;  %v6142_v29 = vpop.f32.mrf.mxu2  ;;  %v2676_v6 = vmul.f32 1.442695, %v2629_v7  ;;  %v2630_v22 = vsub.f32 %v7091_v57, %v6014_v33  ;;  %v2145_v7 = vmul.f32 1.442695, %v2098_v18  ;;  %v7093_v18 = vld [vmem:[#allocation77_spill] sm:$0xff]  ;;  %v7096_v57 = vld [vmem:[#allocation47_spill] sm:$0xff] }
 0x1e6   : > { %v3868_v39 = vpop.eup %3867  ;;  %3879 = vpow2.f32 %v2147_v44 }
 0x1e7   : > { %v1995_v3 = vrot.slane %v1994_v17, 1  ;;  %v6140_v62 = vpop.xlane.xlu1 %2183  ;;  %v3870_v32 = vpop.eup %3869  ;;  %v2009_v43 = vmul.f32 %v3868_v39, %v2005_v9  ;;  %3881 = vpow2.f32 %v2149_v26 }
 0x1e8   : > { %v6133_v42 = vpop.xlane.xlu0 %2180  ;;  %v3872_v41 = vpop.eup %3871  ;;  %3883 = vpow2.f32 %v2143_v11  ;;  %v2631_v11 = vsub.f32 %v7093_v18, %v6014_v33 }
 0x1e9   : > { %v1996_v56 = vadd.f32 %v1995_v3, %v1994_v17  ;;  %v2674_v17 = vmul.f32 1.442695, %v2628_v36  ;;  %v2021_v3 = vmul.f32 %v3870_v32, %v1975_v23  ;;  %v3874_v54 = vpop.eup %3873  ;;  %v7094_v32 = vld [vmem:[#allocation46_spill] sm:$0xff] }
 0x1ea   : > { %1298 = vadd.xlane.f32.xlu2 %v1271_v52  ;;  %2195 = vadd.xlane.f32.xlu1 %v2194_v34  ;;  %v3876_v50 = vpop.eup %3875  ;;  %v2678_v52 = vmul.f32 1.442695, %v2630_v22  ;;  %v2728_v9 = vadd.f32 %v3874_v54, %v3872_v41  ;;  %v6182_v22 = vmul.f32 2.0, %v7096_v57  ;;  %v7097_v41 = vld [vmem:[#allocation69_spill] sm:$0xff] }
 0x1eb   : > { %v2022_v20 = vmul.f32 %v3866_v1, %v1996_v56  ;;  %v1272_v56 = vsel %vm1111_vm0, %v1256_v0, 0.0  ;;  %3885 = vpow2.f32 %v2674_v17  ;;  %v6174_v17 = vmul.f32 2.0, %v7094_v32 }
 0x1ec   : > { %1300 = vadd.xlane.f32.xlu0 %v1272_v56  ;;  %3887 = vpow2.f32 %v2676_v6  ;;  %v7098_v56 = vld [vmem:[#allocation48_spill] sm:$0xff] }
 0x1ed   : > { %v2025_v59 = vrot.slane %v2022_v20, 7  ;;  %v2721_v4 = vpop.xlane.xlu2 %2720  ;;  %v3878_v20 = vpop.eup %3877  ;;  %3889 = vlog2.f32 %v6110_v60  ;;  %v6190_v54 = vmul.f32 2.0, %v7098_v56 }
 0x1ee   : > { %v6160_v1 = vpop.f32.mrf.mxu2  ;;  %v6165_v0 = vpop.eup %3879  ;;  %3891 = vpow2.f32 %v2145_v7  ;;  %v2197_v26 = vadd.f32 %v3878_v20, %v3876_v50 }
 0x1ef   : > { %v2026_v36 = vsel %vm2001_vm1, %v2021_v3, %v2025_v59  ;;  %v2187_v23 = vpop.xlane.xlu1 %2186  ;;  %v6167_v39 = vpop.eup %3881  ;;  %3893 = vpow2.f32 %v2678_v52  ;;  %v2632_v3 = vsub.f32 %v7097_v41, %v5994_v53  ;;  %v1257_v59 = vmul.f32 %v6142_v29, %v4417_v35  ;;  %v7103_v41 = vld [vmem:[#allocation102_spill] sm:$0xff] }
 0x1f0   : > { %v2715_v51 = vpop.xlane.xlu0 %2714  ;;  %v2028_v44 = vadd.f32 %v2026_v36, %v2009_v43  ;;  %v6171_v34 = vpop.eup %3883  ;;  %3895 = vlog2.f32 %v6131_v27  ;;  %v7099_v27 = vld [vmem:[#allocation91_spill] sm:$0xff]  ;;  %v6213_v56 = vmul.f32 2.0, %v7103_v41 }
 0x1f1   : > { %v3886_v6 = vpop.eup %3885  ;;  %3897 = vlog2.f32 %v6133_v42  ;;  %v6193_v43 = vmul.f32 2.0, %v7099_v27  ;;  %v7100_v42 = vld [vmem:[#allocation70_spill] sm:$0xff] }
 0x1f2   : > { %2033 = vst.msk [vmem:[#allocation4] sm:$0x3] %vm5527_vm15, %v2028_v44  ;;  %2729 = vadd.xlane.f32.xlu2 %v2728_v9  ;;  %2198 = vadd.xlane.f32.xlu1 %v2197_v26  ;;  %v3888_v55 = vpop.eup %3887  ;;  %3899 = vlog2.f32 %v6140_v62  ;;  %v2633_v20 = vsub.f32 %v7100_v42, %v5994_v53  ;;  %v2680_v44 = vmul.f32 1.442695, %v2631_v11  ;;  %v7101_v26 = vld [vmem:[#allocation92_spill] sm:$0xff]  ;;  %v7102_v62 = vld [vmem:[#allocation101_spill] sm:$0xff] }
 0x1f3   : > { %v3890_v7 = vpop.eup %3889  ;;  %3901 = vlog2.f32 %v2715_v51  ;;  %v6205_v18 = vmul.f32 2.0, %v7101_v26  ;;  %v6208_v32 = vmul.f32 2.0, %v7102_v62  ;;  %v6215_v11 = vmul.f32 1.442695, %v2632_v3  ;;  %v7104_v51 = vld [vmem:[#allocation27_spill] sm:$0xff]  ;;  %v7106_v42 = vld [vmem:[#allocation122_spill] sm:$0xff] }
 0x1f4   : > { %v3892_v9 = vpop.eup %3891  ;;  %v2759_v57 = vmul.f32 0.6931472, %v3890_v7  ;;  %3903 = vlog2.f32 %v2187_v23  ;;  %vm7105_vm2 = vcmp.eq.s32.totalorder %v7104_v51, %v6988_v5  ;;  %v2731_v53 = vadd.f32 %v3888_v55, %v3886_v6 }
 0x1f5   : > { %v6179_v60 = vpop.xlane.xlu2 %1507  ;;  %3905 = vlog2.f32 %v2721_v4 }
 0x1f6   : > { %7095 = vst [vmem:[#allocation126_spill] sm:$0xff] %v6179_v60  ;;  %v1552_v36 = vsub.f32 %v7052_v28, %v6179_v60  ;;  %v1553_v29 = vsub.f32 %v7062_v24, %v6179_v60  ;;  %v1241_v52 = vpop.f32.mrf.mxu2  ;;  %v6210_v28 = vpop.eup %3893  ;;  %v1273_v24 = vsel %vm7105_vm2, %v1257_v59, 0.0  ;;  %v2790_v26 = vadd.f32 %v2759_v57, %v7106_v42  ;;  %v7109_v57 = vld [vmem:[#allocation130_spill] sm:$0xff] }
 0x1f7   : > { %v6196_v50 = vpop.xlane.xlu1 %1504  ;;  %v3896_v27 = vpop.eup %3895  ;;  %v1259_v7 = vmul.f32 %v1241_v52, %v4417_v35  ;;  %v6222_v60 = vmul.f32 1.442695, %v2633_v20  ;;  %3907 = vpow2.f32 %v2680_v44  ;;  %v7108_v20 = vld [vmem:[#allocation127_spill] sm:$0xff] }
 0x1f8   : > { %v6177_v21 = vpop.xlane.xlu0 %1501  ;;  %v1588_v62 = vmul.f32 1.442695, %v1552_v36  ;;  %v3898_v23 = vpop.eup %3897  ;;  %v2763_v41 = vmul.f32 0.6931472, %v3896_v27  ;;  %v1590_v33 = vmul.f32 1.442695, %v1553_v29  ;;  %v2823_v8 = vsub.f32 %v2790_v26, %v6205_v18 }
 0x1f9   : > { %v3900_v3 = vpop.eup %3899  ;;  %v2228_v51 = vmul.f32 0.6931472, %v3898_v23  ;;  %v1275_v6 = vsel %vm1114_vm14, %v1259_v7, 0.0  ;;  %v1258_v29 = vmul.f32 %v6160_v1, %v4417_v35  ;;  %v1548_v18 = vsub.f32 %v7050_v10, %v6177_v21  ;;  %v7111_v10 = vld [vmem:[#allocation36_spill] sm:$0xff] }
 0x1fa   : > { %2732 = vadd.xlane.f32.xlu2 %v2731_v53  ;;  %1302 = vadd.xlane.f32.xlu1 %v1273_v24  ;;  %v3902_v36 = vpop.eup %3901  ;;  %v2792_v44 = vadd.f32 %v2763_v41, %v7108_v20  ;;  %v2230_v52 = vmul.f32 0.6931472, %v3900_v3  ;;  %v1549_v42 = vsub.f32 %v7060_v58, %v6177_v21  ;;  %3909 = vpow2.f32 %v1588_v62  ;;  %v7110_v41 = vld [vmem:[#allocation30_spill] sm:$0xff]  ;;  %v7112_v20 = vld [vmem:[#allocation41_spill] sm:$0xff] }
 0x1fb   : > { %1306 = vadd.xlane.f32.xlu0 %v1275_v6  ;;  %v3904_v53 = vpop.eup %3903  ;;  %v2259_v24 = vadd.f32 %v2228_v51, %v7109_v57  ;;  %v2761_v27 = vmul.f32 0.6931472, %v3902_v36  ;;  %3911 = vpow2.f32 %v1590_v33  ;;  %v7113_v62 = vld [vmem:[#allocation26_spill] sm:$0xff] }
 0x1fc   : > { %v3906_v7 = vpop.eup %3905  ;;  %v2825_v23 = vsub.f32 %v2792_v44, %v6213_v56  ;;  %v2260_v3 = vadd.f32 %v2230_v52, %v7110_v41  ;;  %v2232_v59 = vmul.f32 0.6931472, %v3904_v53  ;;  %vm7114_vm4 = vcmp.eq.s32.totalorder %v7113_v62, %v6988_v5  ;;  %v7115_v52 = vld [vmem:[#allocation37_spill] sm:$0xff] }
 0x1fd   : > { %v6230_v55 = vpop.xlane.xlu2 %1284  ;;  %v2292_v35 = vsub.f32 %v2259_v24, %v6190_v54  ;;  %v2791_v1 = vadd.f32 %v2761_v27, %v7111_v10  ;;  %v2765_v6 = vmul.f32 0.6931472, %v3906_v7  ;;  %v3908_v51 = vpop.eup %3907  ;;  %v1274_v57 = vsel %vm7114_vm4, %v1258_v29, 0.0  ;;  %v7116_v24 = vld [vmem:[#allocation80_spill] sm:$0xff]  ;;  %v7118_v62 = vld [vmem:[#allocation57_spill] sm:$0xff] }
 0x1fe   : > { %v2293_v36 = vsub.f32 %v2260_v3, %v6182_v22  ;;  %v2261_v58 = vadd.f32 %v2232_v59, %v7112_v20  ;;  %v1580_v56 = vmul.f32 1.442695, %v1548_v18  ;;  %v2200_v54 = vadd.f32 %v3892_v9, %v6171_v34  ;;  %v7117_v20 = vld [vmem:[#allocation131_spill] sm:$0xff] }
 0x1ff   : > { %v2190_v26 = vpop.xlane.xlu1 %2189  ;;  %v2308_v44 = vsel %vm1773_vm3, %v2292_v35, 0.0  ;;  %v2824_v33 = vsub.f32 %v2791_v1, %v6193_v43  ;;  %v2793_v53 = vadd.f32 %v2765_v6, %v7115_v52  ;;  %v2101_v27 = vsub.f32 %v7116_v24, %v6023_v40 }
 0x200   : > { %v6225_v4 = vpop.xlane.xlu0 %1276  ;;  %3913 = vlog2.f32 %v2190_v26  ;;  %v2309_v22 = vsel %vm1773_vm3, %v2293_v36, 0.0  ;;  %v2294_v26 = vsub.f32 %v2261_v58, %v6174_v17  ;;  %v1582_v7 = vmul.f32 1.442695, %v1549_v42  ;;  %v3910_v41 = vpop.eup %3909 }
 0x201   : > { %v2839_v5 = vsel %vm1773_vm3, %v2823_v8, 0.0  ;;  %v2310_v29 = vadd.f32 %v2309_v22, %v2308_v44  ;;  %v2840_v18 = vsel %vm1773_vm3, %v2824_v33, 0.0  ;;  %v2826_v34 = vsub.f32 %v2793_v53, %v6208_v32  ;;  %v3912_v9 = vpop.eup %3911  ;;  %v7119_v33 = vld [vmem:[#allocation137_spill] sm:$0xff] }
 0x202   : > { %1304 = vadd.xlane.f32.xlu2 %v1274_v57  ;;  %2201 = vadd.xlane.f32.xlu1 %v2200_v54  ;;  %v2102_v3 = vsub.f32 %v7013_v45, %v6023_v40  ;;  %v2841_v59 = vadd.f32 %v2840_v18, %v2839_v5  ;;  %v2311_v17 = vsel %vm1773_vm3, %v2294_v26, 0.0  ;;  %3915 = vpow2.f32 %v1580_v56 }
 0x203   : > { %v2842_v35 = vsel %vm1773_vm3, %v2825_v23, 0.0  ;;  %v2312_v10 = vadd.f32 %v2311_v17, %v2310_v29  ;;  %v2844_v1 = vsel %vm1773_vm3, %v2826_v34, 0.0  ;;  %v1650_v32 = vadd.f32 %v3912_v9, %v3910_v41  ;;  %v7120_v41 = vld [vmem:[#allocation38_spill] sm:$0xff] }
 0x204   : > { %v2843_v36 = vadd.f32 %v2842_v35, %v2841_v59  ;;  %v1550_v58 = vsub.f32 %v7117_v20, %v6196_v50  ;;  %3917 = vpow2.f32 %v1582_v7  ;;  %v2279_v57 = vmul.f32 2.0, %v7118_v62  ;;  %v7124_v59 = vld [vmem:[#allocation86_spill] sm:$0xff] }
 0x205   : > { %v6265_v42 = vpop.xlane.xlu2 %1516  ;;  %3919 = vpow2.f32 %v6215_v11  ;;  %v1551_v56 = vsub.f32 %v7061_v19, %v6196_v50  ;;  %1651 = vadd.xlane.f32.xlu0 %v1650_v32  ;;  %v2151_v23 = vmul.f32 1.442695, %v2101_v27  ;;  %v2153_v52 = vmul.f32 1.442695, %v2102_v3  ;;  %v7125_v32 = vld [vmem:[#allocation140_spill] sm:$0xff] }
 0x206   : > { %v3914_v8 = vpop.eup %3913  ;;  %3921 = vpow2.f32 %v6222_v60  ;;  %v6278_v44 = vadd.f32 %v2844_v1, %v2843_v36  ;;  %v2734_v53 = vadd.f32 %v3908_v51, %v6210_v28  ;;  %v2203_v24 = vadd.f32 %v6167_v39, %v6165_v0  ;;  %v7121_v28 = vld [vmem:[#allocation39_spill] sm:$0xff]  ;;  %v7122_v0 = vld [vmem:[#allocation128_spill] sm:$0xff]  ;;  %v7123_v39 = vld [vmem:[#allocation85_spill] sm:$0xff] }
 0x207   : > { %v6269_v6 = vpop.xlane.xlu1 %1280  ;;  %v2234_v45 = vmul.f32 0.6931472, %v3914_v8  ;;  %v1584_v26 = vmul.f32 1.442695, %v1550_v58  ;;  %v1586_v7 = vmul.f32 1.442695, %v1551_v56  ;;  %3923 = vpow2.f32 %v2151_v23 }
 0x208   : > { %v6260_v43 = vpop.xlane.xlu0 %1278  ;;  %v3916_v22 = vpop.eup %3915  ;;  %3925 = vpow2.f32 %v2153_v52  ;;  %v2103_v18 = vsub.f32 %v7123_v39, %v7122_v0  ;;  %v2104_v17 = vsub.f32 %v7124_v59, %v7122_v0  ;;  %v7126_v36 = vld [vmem:[#allocation89_spill] sm:$0xff]  ;;  %v7134_v59 = vld [vmem:[#allocation95_spill] sm:$0xff] }
 0x209   : > { %v2262_v54 = vadd.f32 %v2234_v45, %v7119_v33  ;;  %3927 = vpow2.f32 %v1584_v26  ;;  %v2634_v20 = vsub.f32 %v7126_v36, %v7125_v32  ;;  %v7127_v45 = vld [vmem:[#allocation90_spill] sm:$0xff] }
 0x20a   : > { %2735 = vadd.xlane.f32.xlu2 %v2734_v53  ;;  %2204 = vadd.xlane.f32.xlu1 %v2203_v24  ;;  %v3918_v60 = vpop.eup %3917  ;;  %3929 = vpow2.f32 %v1586_v7  ;;  %v2155_v62 = vmul.f32 1.442695, %v2103_v18  ;;  %v2157_v23 = vmul.f32 1.442695, %v2104_v17  ;;  %v7128_v26 = vld [vmem:[#allocation50_spill] sm:$0xff]  ;;  %v2637_v17 = vsub.f32 %v7134_v59, %v6072_v2  ;;  %v7142_v59 = vld [vmem:[#allocation99_spill] sm:$0xff] }
 0x20b   : > { %v2295_v11 = vsub.f32 %v2262_v54, %v2279_v57  ;;  %v3920_v29 = vpop.eup %3919  ;;  %v1644_v58 = vadd.f32 %v3918_v60, %v3916_v22  ;;  %v2686_v54 = vmul.f32 1.442695, %v2634_v20  ;;  %v7133_v18 = vld [vmem:[#allocation94_spill] sm:$0xff] }
 0x20c   : > { %v3922_v3 = vpop.eup %3921 }
 0x20d   : > { %v2313_v27 = vsel %vm1773_vm3, %v2295_v11, 0.0  ;;  %v6299_v1 = vpop.xlane.xlu2 %1286  ;;  %v2737_v57 = vadd.f32 %v3922_v3, %v3920_v29  ;;  %v3924_v56 = vpop.eup %3923  ;;  %v7129_v11 = vld [vmem:[#allocation78_spill] sm:$0xff]  ;;  %v2636_v3 = vsub.f32 %v7133_v18, %v6072_v2 }
 0x20e   : > { %v6293_v34 = vadd.f32 %v2313_v27, %v2312_v10  ;;  %v2635_v10 = vsub.f32 %v7127_v45, %v7125_v32  ;;  %v3926_v33 = vpop.eup %3925  ;;  %v2105_v7 = vsub.f32 %v7129_v11, %v7128_v26  ;;  %v7130_v27 = vld [vmem:[#allocation79_spill] sm:$0xff]  ;;  %v7136_v45 = vld [vmem:[#allocation129_spill] sm:$0xff] }
 0x20f   : > { %v6295_v9 = vpop.xlane.xlu1 %1282  ;;  %v3928_v52 = vpop.eup %3927 }
 0x210   : > { %v6284_v19 = vpop.xlane.xlu0 %1510  ;;  %v2688_v53 = vmul.f32 1.442695, %v2635_v10  ;;  %v3930_v24 = vpop.eup %3929  ;;  %v7137_v10 = vld [vmem:[#allocation87_spill] sm:$0xff] }
 0x211   : > { %v1554_v5 = vsub.f32 %v7120_v41, %v6284_v19  ;;  %v1555_v51 = vsub.f32 %v7121_v28, %v6284_v19  ;;  %v2106_v41 = vsub.f32 %v7130_v27, %v7128_v26  ;;  %v7138_v27 = vld [vmem:[#allocation88_spill] sm:$0xff] }
 0x212   : > { %2738 = vadd.xlane.f32.xlu2 %v2737_v57  ;;  %1645 = vadd.xlane.f32.xlu1 %v1644_v58  ;;  %v2159_v58 = vmul.f32 1.442695, %v2105_v7  ;;  %v1647_v57 = vadd.f32 %v3930_v24, %v3928_v52  ;;  %v7140_v24 = vld [vmem:[#allocation141_spill] sm:$0xff] }
 0x213   : > { %v1592_v8 = vmul.f32 1.442695, %v1554_v5  ;;  %v1594_v35 = vmul.f32 1.442695, %v1555_v51  ;;  %v7131_v5 = vld [vmem:[#allocation132_spill] sm:$0xff]  ;;  %v7132_v51 = vld [vmem:[#allocation133_spill] sm:$0xff] }
 0x214   : > { %v2161_v11 = vmul.f32 1.442695, %v2106_v41 }
 0x215   : > { %3931 = vpow2.f32 %v1592_v8  ;;  %v6319_v20 = vpop.xlane.xlu2 %1543 }
 0x216   : > { %3933 = vpow2.f32 %v1594_v35  ;;  %7135 = vst [vmem:[#allocation31_spill] sm:$0xff] %v6319_v20 }
 0x217   : > { %3935 = vpow2.f32 %v2155_v62  ;;  %v6307_v22 = vpop.xlane.xlu1 %1513  ;;  %v2638_v62 = vsub.f32 %v7137_v10, %v7136_v45 }
 0x218   : > { %3937 = vpow2.f32 %v2157_v23  ;;  %v1556_v28 = vsub.f32 %v7131_v5, %v6307_v22  ;;  %v1557_v29 = vsub.f32 %v7132_v51, %v6307_v22  ;;  %v2206_v23 = vadd.f32 %v3926_v33, %v3924_v56  ;;  %v7139_v56 = vld [vmem:[#allocation98_spill] sm:$0xff] }
 0x219   : > { %3939 = vpow2.f32 %v2686_v54  ;;  %v2639_v5 = vsub.f32 %v7138_v27, %v7136_v45  ;;  %v2690_v51 = vmul.f32 1.442695, %v2636_v3  ;;  %v2694_v7 = vmul.f32 1.442695, %v2638_v62 }
 0x21a   : > { %3941 = vpow2.f32 %v2688_v53  ;;  %v1596_v8 = vmul.f32 1.442695, %v1556_v28  ;;  %v1598_v35 = vmul.f32 1.442695, %v1557_v29  ;;  %1648 = vadd.xlane.f32.xlu2 %v1647_v57  ;;  %2207 = vadd.xlane.f32.xlu1 %v2206_v23  ;;  %v2107_v33 = vsub.f32 %v7139_v56, %v6078_v37  ;;  %v7144_v57 = vld [vmem:[#allocation135_spill] sm:$0xff] }
 0x21b   : > { %v3932_v60 = vpop.eup %3931  ;;  %v2696_v3 = vmul.f32 1.442695, %v2639_v5  ;;  %v1559_v23 = vsub.f32 %v7144_v57, %v6265_v42 }
 0x21c   : > { %v3934_v39 = vpop.eup %3933  ;;  %3943 = vpow2.f32 %v1596_v8  ;;  %v2163_v56 = vmul.f32 1.442695, %v2107_v33 }
 0x21d   : > { %v1653_v36 = vadd.f32 %v3934_v39, %v3932_v60  ;;  %v3936_v54 = vpop.eup %3935  ;;  %3945 = vpow2.f32 %v1598_v35  ;;  %v2692_v60 = vmul.f32 1.442695, %v2637_v17  ;;  %v7141_v39 = vld [vmem:[#allocation14_spill] sm:$0xff]  ;;  %v2108_v17 = vsub.f32 %v7142_v59, %v6078_v37  ;;  %v7143_v35 = vld [vmem:[#allocation136_spill] sm:$0xff] }
 0x21e   : > { %v3938_v53 = vpop.eup %3937  ;;  %3947 = vpow2.f32 %v2159_v58 }
 0x21f   : > { %1654 = vadd.xlane.f32.xlu0 %v1653_v36  ;;  %v3940_v28 = vpop.eup %3939  ;;  %v6325_v29 = vpop.xlane.xlu1 %1540  ;;  %3949 = vpow2.f32 %v2161_v11  ;;  %v1558_v36 = vsub.f32 %v7143_v35, %v6265_v42  ;;  %v2209_v27 = vadd.f32 %v3938_v53, %v3936_v54  ;;  %v1602_v53 = vmul.f32 1.442695, %v1559_v23 }
 0x220   : > { %v3942_v52 = vpop.eup %3941  ;;  %v1574_v41 = vsub.f32 %v7140_v24, %v6325_v29  ;;  %v1575_v18 = vsub.f32 %v7141_v39, %v6325_v29  ;;  %3951 = vpow2.f32 %v2690_v51  ;;  %v2165_v39 = vmul.f32 1.442695, %v2108_v17 }
 0x221   : > { %3953 = vpow2.f32 %v2692_v60  ;;  %v2740_v11 = vadd.f32 %v3942_v52, %v3940_v28  ;;  %v1600_v35 = vmul.f32 1.442695, %v1558_v36  ;;  %v7147_v52 = vld [vmem:[#allocation107_spill] sm:$0xff] }
 0x222   : > { %v3944_v8 = vpop.eup %3943  ;;  %v1632_v58 = vmul.f32 1.442695, %v1574_v41  ;;  %v1634_v10 = vmul.f32 1.442695, %v1575_v18  ;;  %3955 = vpow2.f32 %v2694_v7  ;;  %2210 = vadd.xlane.f32.xlu1 %v2209_v27  ;;  %v7145_v41 = vld [vmem:[#allocation103_spill] sm:$0xff]  ;;  %v7146_v7 = vld [vmem:[#allocation104_spill] sm:$0xff]  ;;  %v2640_v33 = vsub.f32 %v7147_v52, %v6093_v38 }
 0x223   : > { %v3946_v62 = vpop.eup %3945  ;;  %2741 = vadd.xlane.f32.xlu2 %v2740_v11  ;;  %v2109_v18 = vsub.f32 %v7145_v41, %v6089_v61  ;;  %v2110_v59 = vsub.f32 %v7146_v7, %v6089_v61  ;;  %v7149_v11 = vld [vmem:[#allocation16_spill] sm:$0xff] }
 0x224   : > { %3957 = vpow2.f32 %v1632_v58  ;;  %v1656_v5 = vadd.f32 %v3946_v62, %v3944_v8  ;;  %v3948_v24 = vpop.eup %3947  ;;  %v7148_v8 = vld [vmem:[#allocation108_spill] sm:$0xff] }
 0x225   : > { %v2724_v51 = vpop.xlane.xlu2 %2723  ;;  %3959 = vpow2.f32 %v1634_v10  ;;  %v3950_v60 = vpop.eup %3949  ;;  %v2641_v58 = vsub.f32 %v7148_v8, %v6093_v38  ;;  %v2167_v57 = vmul.f32 1.442695, %v2109_v18  ;;  %v2169_v36 = vmul.f32 1.442695, %v2110_v59  ;;  %v7150_v52 = vld [vmem:[#allocation96_spill] sm:$0xff] }
 0x226   : > { %3961 = vlog2.f32 %v2724_v51  ;;  %v3952_v54 = vpop.eup %3951  ;;  %v6347_v10 = vpop.xlane.xlu0 %1519  ;;  %v2111_v8 = vsub.f32 %v7150_v52, %v6074_v30  ;;  %v7155_v52 = vld [vmem:[#allocation113_spill] sm:$0xff] }
 0x227   : > { %1657 = vadd.xlane.f32.xlu0 %v1656_v5  ;;  %3963 = vpow2.f32 %v2696_v3  ;;  %v3954_v28 = vpop.eup %3953  ;;  %v1576_v3 = vsub.f32 %v7149_v11, %v6319_v20  ;;  %v1577_v5 = vsub.f32 %v5894_v15, %v6319_v20  ;;  %v2700_v18 = vmul.f32 1.442695, %v2641_v58  ;;  %v7151_v11 = vld [vmem:[#allocation97_spill] sm:$0xff]  ;;  %v7152_v15 = vld [vmem:[#allocation100_spill] sm:$0xff] }
 0x228   : > { %3965 = vpow2.f32 %v2163_v56  ;;  %v3956_v17 = vpop.eup %3955  ;;  %v2743_v27 = vadd.f32 %v3954_v28, %v3952_v54  ;;  %v2212_v56 = vadd.f32 %v3950_v60, %v3948_v24  ;;  %v2811_v54 = vmul.f32 2.0, %v7152_v15  ;;  %v7154_v58 = vld [vmem:[#allocation112_spill] sm:$0xff] }
 0x229   : > { %3967 = vpow2.f32 %v2165_v39  ;;  %v2698_v39 = vmul.f32 1.442695, %v2640_v33  ;;  %v1636_v24 = vmul.f32 1.442695, %v1576_v3  ;;  %v1638_v28 = vmul.f32 1.442695, %v1577_v5 }
 0x22a   : > { %v3958_v62 = vpop.eup %3957  ;;  %3969 = vpow2.f32 %v1600_v35  ;;  %2213 = vadd.xlane.f32.xlu1 %v2212_v56  ;;  %v7153_v33 = vld [vmem:[#allocation15_spill] sm:$0xff]  ;;  %v7157_v5 = vld [vmem:[#allocation42_spill] sm:$0xff] }
 0x22b   : > { %v3960_v23 = vpop.eup %3959  ;;  %3971 = vpow2.f32 %v1602_v53  ;;  %2744 = vadd.xlane.f32.xlu2 %v2743_v27  ;;  %v2112_v53 = vsub.f32 %v7151_v11, %v6074_v30  ;;  %v2642_v27 = vsub.f32 %v7154_v58, %v6108_v63  ;;  %v7156_v11 = vld [vmem:[#allocation134_spill] sm:$0xff] }
 0x22c   : > { %v3962_v51 = vpop.eup %3961  ;;  %v1683_v41 = vadd.f32 %v3960_v23, %v3958_v62  ;;  %3973 = vpow2.f32 %v2167_v57  ;;  %v2643_v57 = vsub.f32 %v7155_v52, %v6108_v63  ;;  %v1560_v15 = vsub.f32 %v7156_v11, %v6347_v10 }
 0x22d   : > { %v3964_v7 = vpop.eup %3963  ;;  %v2767_v59 = vmul.f32 0.6931472, %v3962_v51  ;;  %3975 = vpow2.f32 %v2169_v36  ;;  %v2171_v51 = vmul.f32 1.442695, %v2111_v8  ;;  %v2702_v58 = vmul.f32 1.442695, %v2642_v27 }
 0x22e   : > { %v3966_v35 = vpop.eup %3965  ;;  %3977 = vpow2.f32 %v2698_v39  ;;  %v6367_v39 = vpop.xlane.xlu0 %1288 }
 0x22f   : > { %1684 = vadd.xlane.f32.xlu0 %v1683_v41  ;;  %v3968_v60 = vpop.eup %3967  ;;  %v2794_v62 = vadd.f32 %v2767_v59, %v7153_v33  ;;  %3979 = vpow2.f32 %v2700_v18  ;;  %v2173_v41 = vmul.f32 1.442695, %v2112_v53  ;;  %v1561_v59 = vsub.f32 %v7157_v5, %v6347_v10 }
 0x230   : > { %v3970_v23 = vpop.eup %3969  ;;  %3981 = vpow2.f32 %v1636_v24  ;;  %v2215_v36 = vadd.f32 %v3968_v60, %v3966_v35  ;;  %v2746_v33 = vadd.f32 %v3964_v7, %v3956_v17  ;;  %v7158_v24 = vld [vmem:[#allocation105_spill] sm:$0xff]  ;;  %v1604_v7 = vmul.f32 1.442695, %v1560_v15  ;;  %v7162_v15 = vld [vmem:[#allocation43_spill] sm:$0xff] }
 0x231   : > { %v3972_v56 = vpop.eup %3971  ;;  %v2827_v3 = vsub.f32 %v2794_v62, %v2811_v54  ;;  %3983 = vpow2.f32 %v1638_v28  ;;  %v2704_v62 = vmul.f32 1.442695, %v2643_v57  ;;  %v2644_v60 = vsub.f32 %v7158_v24, %v6091_v12  ;;  %v7159_v28 = vld [vmem:[#allocation106_spill] sm:$0xff] }
 0x232   : > { %v3974_v18 = vpop.eup %3973  ;;  %v1659_v53 = vadd.f32 %v3972_v56, %v3970_v23  ;;  %2216 = vadd.xlane.f32.xlu1 %v2215_v36  ;;  %3985 = vpow2.f32 %v2171_v51  ;;  %v2645_v17 = vsub.f32 %v7159_v28, %v6091_v12  ;;  %v7160_v56 = vld [vmem:[#allocation117_spill] sm:$0xff]  ;;  %v7161_v51 = vld [vmem:[#allocation118_spill] sm:$0xff] }
 0x233   : > { %v2846_v8 = vsel %vm1773_vm3, %v2827_v3, 0.0  ;;  %v3976_v54 = vpop.eup %3975  ;;  %2747 = vadd.xlane.f32.xlu2 %v2746_v33  ;;  %v6377_v3 = vpop.xlane.xlu1 %1522  ;;  %3987 = vpow2.f32 %v2173_v41  ;;  %v2113_v57 = vsub.f32 %v7160_v56, %v6116_v46  ;;  %v2114_v36 = vsub.f32 %v7161_v51, %v6116_v46  ;;  %v7163_v41 = vld [vmem:[#allocation138_spill] sm:$0xff] }
 0x234   : > { %v6371_v52 = vadd.f32 %v2846_v8, %v6278_v44  ;;  %v3978_v35 = vpop.eup %3977  ;;  %v1606_v44 = vmul.f32 1.442695, %v1561_v59  ;;  %3989 = vpow2.f32 %v2702_v58  ;;  %v2706_v5 = vmul.f32 1.442695, %v2644_v60 }
 0x235   : > { %v3980_v27 = vpop.eup %3979  ;;  %3991 = vpow2.f32 %v2704_v62  ;;  %v2708_v33 = vmul.f32 1.442695, %v2645_v17  ;;  %v1562_v8 = vsub.f32 %v7162_v15, %v6377_v3  ;;  %v1563_v59 = vsub.f32 %v7163_v41, %v6377_v3 }
 0x236   : > { %v3982_v23 = vpop.eup %3981  ;;  %3993 = vpow2.f32 %v1604_v7  ;;  %v2218_v58 = vadd.f32 %v3976_v54, %v3974_v18  ;;  %v2175_v28 = vmul.f32 1.442695, %v2113_v57  ;;  %v2177_v62 = vmul.f32 1.442695, %v2114_v36  ;;  %v6387_v12 = vpop.xlane.xlu0 %1546 }
 0x237   : > { %1660 = vadd.xlane.f32.xlu0 %v1659_v53  ;;  %v3984_v11 = vpop.eup %3983  ;;  %3995 = vpow2.f32 %v1606_v44  ;;  %v2749_v53 = vadd.f32 %v3980_v27, %v3978_v35  ;;  %7164 = vst [vmem:[#allocation51_spill] sm:$0xff] %v6387_v12  ;;  %v1608_v17 = vmul.f32 1.442695, %v1562_v8  ;;  %v1610_v44 = vmul.f32 1.442695, %v1563_v59 }
 0x238   : > { %v3986_v24 = vpop.eup %3985  ;;  %v1686_v56 = vadd.f32 %v3984_v11, %v3982_v23  ;;  %3997 = vpow2.f32 %v2706_v5 }
 0x239   : > { %v3988_v20 = vpop.eup %3987  ;;  %3999 = vpow2.f32 %v2708_v33 }
 0x23a   : > { %2219 = vadd.xlane.f32.xlu1 %v2218_v58  ;;  %v3990_v60 = vpop.eup %3989  ;;  %4001 = vpow2.f32 %v2175_v28  ;;  %v2221_v11 = vadd.f32 %v3988_v20, %v3986_v24 }
 0x23b   : > { %2750 = vadd.xlane.f32.xlu2 %v2749_v53  ;;  %v3992_v7 = vpop.eup %3991  ;;  %4003 = vpow2.f32 %v2177_v62 }
 0x23c   : > { %v3994_v51 = vpop.eup %3993  ;;  %4005 = vpow2.f32 %v1608_v17  ;;  %v2752_v57 = vadd.f32 %v3992_v7, %v3990_v60 }
 0x23d   : > { %v6389_v35 = vpop.xlane.xlu2 %1525  ;;  %v6391_v18 = vpop.xlane.xlu1 %1290  ;;  %4007 = vpow2.f32 %v1610_v44 }
 0x23e   : > { %v3996_v54 = vpop.eup %3995  ;;  %v1564_v27 = vsub.f32 %v7055_v14, %v6389_v35  ;;  %v1565_v23 = vsub.f32 %v7069_v13, %v6389_v35 }
 0x23f   : > { %1687 = vadd.xlane.f32.xlu0 %v1686_v56  ;;  %v3998_v36 = vpop.eup %3997  ;;  %v1662_v5 = vadd.f32 %v3996_v54, %v3994_v51  ;;  %v6397_v53 = vpop.xlane.xlu0 %1528 }
 0x240   : > { %v4000_v33 = vpop.eup %3999  ;;  %v1612_v8 = vmul.f32 1.442695, %v1564_v27  ;;  %v1614_v59 = vmul.f32 1.442695, %v1565_v23  ;;  %v1566_v13 = vsub.f32 %v5737_v25, %v6397_v53  ;;  %v1567_v20 = vsub.f32 %v7040_v47, %v6397_v53  ;;  %v7165_v25 = vld [vmem:[#allocation56_spill] sm:$0xff]  ;;  %v7166_v47 = vld [vmem:[#allocation61_spill] sm:$0xff] }
 0x241   : > { %v4002_v15 = vpop.eup %4001  ;;  %v2755_v24 = vadd.f32 %v4000_v33, %v3998_v36 }
 0x242   : > { %2222 = vadd.xlane.f32.xlu1 %v2221_v11  ;;  %v4004_v41 = vpop.eup %4003  ;;  %v1616_v17 = vmul.f32 1.442695, %v1566_v13  ;;  %v1618_v44 = vmul.f32 1.442695, %v1567_v20  ;;  %v2280_v11 = vmul.f32 2.0, %v7165_v25 }
 0x243   : > { %2753 = vadd.xlane.f32.xlu2 %v2752_v57  ;;  %v4006_v58 = vpop.eup %4005  ;;  %v2224_v62 = vadd.f32 %v4004_v41, %v4002_v15 }
 0x244   : > { %v4008_v56 = vpop.eup %4007 }
 0x245   : > { %v6399_v14 = vpop.xlane.xlu2 %1292  ;;  %v2193_v28 = vpop.xlane.xlu1 %2192  ;;  %v1665_v60 = vadd.f32 %v4008_v56, %v4006_v58 }
 0x246   : > { %4009 = vlog2.f32 %v2193_v28 }
 0x247   : > { %1663 = vadd.xlane.f32.xlu0 %v1662_v5  ;;  %4011 = vpow2.f32 %v1612_v8  ;;  %v6411_v33 = vpop.xlane.xlu0 %1294 }
 0x248   : > { %4013 = vpow2.f32 %v1614_v59 }
 0x24a   : > { %2225 = vadd.xlane.f32.xlu1 %v2224_v62 }
 0x24b   : > { %2756 = vadd.xlane.f32.xlu2 %v2755_v24 }
 0x24c   : > { %v4010_v7 = vpop.eup %4009 }
 0x24d   : > { %v4012_v51 = vpop.eup %4011  ;;  %v2236_v54 = vmul.f32 0.6931472, %v4010_v7  ;;  %v2727_v27 = vpop.xlane.xlu2 %2726 }
 0x24e   : > { %v6405_v23 = vpop.xlane.xlu1 %1531  ;;  %v4014_v57 = vpop.eup %4013  ;;  %4015 = vlog2.f32 %v2727_v27 }
 0x24f   : > { %1666 = vadd.xlane.f32.xlu0 %v1665_v60  ;;  %4017 = vpow2.f32 %v1616_v17  ;;  %v2263_v36 = vadd.f32 %v2236_v54, %v7166_v47  ;;  %v1568_v5 = vsub.f32 %v5815_v31, %v6405_v23  ;;  %v1569_v15 = vsub.f32 %v5902_v16, %v6405_v23  ;;  %v7167_v17 = vld [vmem:[#allocation111_spill] sm:$0xff]  ;;  %v7168_v16 = vld [vmem:[#allocation17_spill] sm:$0xff]  ;;  %v6427_v25 = vpop.xlane.xlu0 %1537 }
 0x250   : > { %4019 = vpow2.f32 %v1618_v44  ;;  %v1668_v41 = vadd.f32 %v4014_v57, %v4012_v51  ;;  %v2812_v7 = vmul.f32 2.0, %v7167_v17  ;;  %v7169_v54 = vld [vmem:[#allocation33_spill] sm:$0xff] }
 0x251   : > { %v2296_v8 = vsub.f32 %v2263_v36, %v2280_v11  ;;  %v1620_v58 = vmul.f32 1.442695, %v1568_v5  ;;  %v1622_v13 = vmul.f32 1.442695, %v1569_v15 }
 0x253   : > { %v2315_v59 = vsel %vm1773_vm3, %v2296_v8, 0.0  ;;  %4021 = vpow2.f32 %v1620_v58  ;;  %v7170_v8 = vld [vmem:[#allocation40_spill] sm:$0xff] }
 0x254   : > { %v4016_v28 = vpop.eup %4015  ;;  %v2316_v56 = vadd.f32 %v2315_v59, %v6293_v34  ;;  %4023 = vpow2.f32 %v1622_v13 }
 0x255   : > { %v4018_v20 = vpop.eup %4017  ;;  %v2769_v24 = vmul.f32 0.6931472, %v4016_v28  ;;  %v6417_v62 = vpop.xlane.xlu2 %1534  ;;  %v7171_v28 = vld [vmem:[#allocation68_spill] sm:$0xff] }
 0x256   : > { %v6419_v31 = vpop.xlane.xlu1 %1296  ;;  %v4020_v60 = vpop.eup %4019  ;;  %v1570_v51 = vsub.f32 %v5840_v48, %v6417_v62  ;;  %v1571_v34 = vsub.f32 %v7169_v54, %v6417_v62  ;;  %v1573_v13 = vsub.f32 %v7171_v28, %v6427_v25  ;;  %v7172_v54 = vld [vmem:[#allocation55_spill] sm:$0xff] }
 0x257   : > { %1669 = vadd.xlane.f32.xlu0 %v1668_v41  ;;  %v2795_v44 = vadd.f32 %v2769_v24, %v7168_v16  ;;  %v1671_v57 = vadd.f32 %v4020_v60, %v4018_v20  ;;  %v1572_v41 = vsub.f32 %v7170_v8, %v6427_v25 }
 0x258   : > { %v1624_v47 = vmul.f32 1.442695, %v1570_v51  ;;  %v1626_v5 = vmul.f32 1.442695, %v1571_v34  ;;  %v2281_v34 = vmul.f32 2.0, %v7172_v54 }
 0x259   : > { %v2828_v27 = vsub.f32 %v2795_v44, %v2812_v7  ;;  %v4022_v15 = vpop.eup %4021  ;;  %v1628_v20 = vmul.f32 1.442695, %v1572_v41 }
 0x25a   : > { %v4024_v58 = vpop.eup %4023 }
 0x25b   : > { %v2848_v11 = vsel %vm1773_vm3, %v2828_v27, 0.0  ;;  %v1674_v24 = vadd.f32 %v4024_v58, %v4022_v15  ;;  %v7173_v27 = vld [vmem:[#allocation32_spill] sm:$0xff] }
 0x25c   : > { %v2849_v36 = vadd.f32 %v2848_v11, %v6371_v52  ;;  %v1630_v52 = vmul.f32 1.442695, %v1573_v13  ;;  %v7174_v11 = vld [vmem:[#allocation18_spill] sm:$0xff] }
 0x25d   : > { %v6433_v48 = vpop.xlane.xlu2 %1298 }
 0x25e   : > { %v2196_v59 = vpop.xlane.xlu1 %2195 }
 0x25f   : > { %1672 = vadd.xlane.f32.xlu0 %v1671_v57  ;;  %4025 = vlog2.f32 %v2196_v59  ;;  %v1578_v57 = vsub.f32 %v7173_v27, %v6387_v12 }
 0x260   : > { %4027 = vpow2.f32 %v1624_v47 }
 0x261   : > { %4029 = vpow2.f32 %v1626_v5  ;;  %v7175_v5 = vld [vmem:[#allocation35_spill] sm:$0xff]  ;;  %v1640_v58 = vmul.f32 1.442695, %v1578_v57  ;;  %v7178_v57 = vld [vmem:[#allocation66_spill] sm:$0xff] }
 0x262   : > { %4031 = vpow2.f32 %v1628_v20  ;;  %v1579_v15 = vsub.f32 %v7175_v5, %v6387_v12  ;;  %v7179_v5 = vld [vmem:[#allocation13_spill] sm:$0xff] }
 0x264   : > { %v1642_v20 = vmul.f32 1.442695, %v1579_v15 }
 0x265   : > { %v4026_v60 = vpop.eup %4025  ;;  %v2730_v16 = vpop.xlane.xlu2 %2729 }
 0x266   : > { %v4028_v17 = vpop.eup %4027  ;;  %v2238_v7 = vmul.f32 0.6931472, %v4026_v60  ;;  %v2199_v44 = vpop.xlane.xlu1 %2198  ;;  %4033 = vlog2.f32 %v2730_v16 }
 0x267   : > { %1675 = vadd.xlane.f32.xlu0 %v1674_v24  ;;  %v4030_v51 = vpop.eup %4029  ;;  %4035 = vlog2.f32 %v2199_v44  ;;  %v6444_v60 = vpop.xlane.xlu0 %1300 }
 0x268   : > { %v2264_v47 = vadd.f32 %v2238_v7, %v7174_v11  ;;  %4037 = vpow2.f32 %v1630_v52  ;;  %v1677_v41 = vadd.f32 %v4030_v51, %v4028_v17  ;;  %v4032_v59 = vpop.eup %4031  ;;  %v7176_v52 = vld [vmem:[#allocation110_spill] sm:$0xff]  ;;  %v7177_v51 = vld [vmem:[#allocation81_spill] sm:$0xff] }
 0x269   : > { %v2813_v17 = vmul.f32 2.0, %v7176_v52 }
 0x26a   : > { %v2297_v8 = vsub.f32 %v2264_v47, %v2281_v34  ;;  %v2282_v47 = vmul.f32 2.0, %v7178_v57 }
 0x26c   : > { %v2317_v28 = vsel %vm1773_vm3, %v2297_v8, 0.0  ;;  %v4034_v13 = vpop.eup %4033 }
 0x26d   : > { %v2318_v24 = vadd.f32 %v2317_v28, %v2316_v56  ;;  %v4036_v16 = vpop.eup %4035  ;;  %v2771_v54 = vmul.f32 0.6931472, %v4034_v13  ;;  %v2733_v7 = vpop.xlane.xlu2 %2732 }
 0x26e   : > { %v6446_v44 = vpop.xlane.xlu1 %1302  ;;  %v4038_v27 = vpop.eup %4037  ;;  %v2240_v11 = vmul.f32 0.6931472, %v4036_v16  ;;  %4039 = vlog2.f32 %v2733_v7 }
 0x26f   : > { %1678 = vadd.xlane.f32.xlu0 %v1677_v41  ;;  %4041 = vpow2.f32 %v1640_v58  ;;  %v2796_v34 = vadd.f32 %v2771_v54, %v7177_v51  ;;  %v1680_v8 = vadd.f32 %v4038_v27, %v4032_v59  ;;  %v6454_v7 = vpop.xlane.xlu0 %1306 }
 0x270   : > { %4043 = vpow2.f32 %v1642_v20  ;;  %v2265_v56 = vadd.f32 %v2240_v11, %v7179_v5  ;;  %7180 = vst [vmem:[#allocation52_spill] sm:$0xff] %v6454_v7  ;;  %v7182_v11 = vld [vmem:[#allocation109_spill] sm:$0xff] }
 0x271   : > { %v2829_v15 = vsub.f32 %v2796_v34, %v2813_v17  ;;  %v2814_v59 = vmul.f32 2.0, %v7182_v11 }
 0x272   : > { %v2298_v41 = vsub.f32 %v2265_v56, %v2282_v47 }
 0x273   : > { %v2850_v28 = vsel %vm1773_vm3, %v2829_v15, 0.0 }
 0x274   : > { %v4040_v13 = vpop.eup %4039  ;;  %v2851_v12 = vadd.f32 %v2850_v28, %v2849_v36  ;;  %v2319_v16 = vsel %vm1773_vm3, %v2298_v41, 0.0  ;;  %v7183_v41 = vld [vmem:[#allocation65_spill] sm:$0xff] }
 0x275   : > { %v4042_v58 = vpop.eup %4041  ;;  %v2320_v52 = vadd.f32 %v2319_v16, %v2318_v24  ;;  %v2773_v54 = vmul.f32 0.6931472, %v4040_v13  ;;  %v6456_v51 = vpop.xlane.xlu2 %1304  ;;  %v2283_v28 = vmul.f32 2.0, %v7183_v41  ;;  %v7184_v13 = vld [vmem:[#allocation34_spill] sm:$0xff]  ;;  %v7188_v41 = vld [vmem:[#allocation19_spill] sm:$0xff] }
 0x276   : > { %7181 = vst [vmem:[#allocation139_spill] sm:$0xff] %v6456_v51  ;;  %v2202_v20 = vpop.xlane.xlu1 %2201  ;;  %v4044_v57 = vpop.eup %4043 }
 0x277   : > { %1681 = vadd.xlane.f32.xlu0 %v1680_v8  ;;  %4045 = vlog2.f32 %v2202_v20  ;;  %v2797_v27 = vadd.f32 %v2773_v54, %v5998_v49  ;;  %v1689_v34 = vadd.f32 %v4044_v57, %v4042_v58 }
 0x278   : > { %v1652_v8 = vpop.xlane.xlu0 %1651 }
 0x279   : > { %v2830_v17 = vsub.f32 %v2797_v27, %v2814_v59 }
 0x27b   : > { %v2852_v36 = vsel %vm1773_vm3, %v2830_v17, 0.0 }
 0x27c   : > { %v2853_v5 = vadd.f32 %v2852_v36, %v2851_v12 }
 0x27d   : > { %v4046_v47 = vpop.eup %4045  ;;  %v2736_v15 = vpop.xlane.xlu2 %2735 }
 0x27e   : > { %v2242_v56 = vmul.f32 0.6931472, %v4046_v47  ;;  %v2205_v24 = vpop.xlane.xlu1 %2204  ;;  %4047 = vlog2.f32 %v2736_v15  ;;  %v7186_v47 = vld [vmem:[#allocation22_spill] sm:$0xff] }
 0x27f   : > { %1690 = vadd.xlane.f32.xlu0 %v1689_v34  ;;  %4049 = vlog2.f32 %v2205_v24  ;;  %v7185_v34 = vld [vmem:[#allocation116_spill] sm:$0xff] }
 0x280   : > { %v2266_v16 = vadd.f32 %v2242_v56, %v7184_v13  ;;  %4051 = vlog2.f32 %v1652_v8  ;;  %v2815_v36 = vmul.f32 2.0, %v7185_v34  ;;  %v7187_v24 = vld [vmem:[#allocation64_spill] sm:$0xff]  ;;  %v1743_v13 = vmul.f32 2.0, %v6269_v6  ;;  %v7190_v6 = vld [vmem:[#allocation115_spill] sm:$0xff] }
 0x281   : > { %v2284_v8 = vmul.f32 2.0, %v7187_v24 }
 0x282   : > { %v2299_v20 = vsub.f32 %v2266_v16, %v2283_v28  ;;  %v7189_v16 = vld [vmem:[#allocation126_spill] sm:$0xff] }
 0x284   : > { %v2321_v49 = vsel %vm1773_vm3, %v2299_v20, 0.0  ;;  %v4048_v58 = vpop.eup %4047 }
 0x285   : > { %v2322_v54 = vadd.f32 %v2321_v49, %v2320_v52  ;;  %v4050_v57 = vpop.eup %4049  ;;  %v2775_v11 = vmul.f32 0.6931472, %v4048_v58  ;;  %v2739_v59 = vpop.xlane.xlu2 %2738 }
 0x286   : > { %v1646_v12 = vpop.xlane.xlu1 %1645  ;;  %v4052_v27 = vpop.eup %4051  ;;  %v2244_v17 = vmul.f32 0.6931472, %v4050_v57  ;;  %4053 = vlog2.f32 %v2739_v59 }
 0x287   : > { %v2798_v15 = vadd.f32 %v2775_v11, %v7186_v47  ;;  %4055 = vlog2.f32 %v1646_v12  ;;  %v1697_v56 = vmul.f32 0.6931472, %v4052_v27 }
 0x288   : > { %v2267_v28 = vadd.f32 %v2244_v17, %v7188_v41 }
 0x289   : > { %v2831_v52 = vsub.f32 %v2798_v15, %v2815_v36  ;;  %v1726_v20 = vadd.f32 %v1697_v56, %v7189_v16  ;;  %v2816_v36 = vmul.f32 2.0, %v7190_v6  ;;  %v7191_v15 = vld [vmem:[#allocation49_spill] sm:$0xff] }
 0x28a   : > { %v2300_v49 = vsub.f32 %v2267_v28, %v2284_v8  ;;  %v1741_v8 = vmul.f32 2.0, %v6225_v4 }
 0x28b   : > { %v2854_v58 = vsel %vm1773_vm3, %v2831_v52, 0.0  ;;  %v1759_v57 = vsub.f32 %v1726_v20, %v1743_v13 }
 0x28c   : > { %v4054_v59 = vpop.eup %4053  ;;  %v2855_v7 = vadd.f32 %v2854_v58, %v2853_v5  ;;  %v2323_v34 = vsel %vm1773_vm3, %v2300_v49, 0.0 }
 0x28d   : > { %v4056_v11 = vpop.eup %4055  ;;  %v2324_v12 = vadd.f32 %v2323_v34, %v2322_v54  ;;  %v2777_v27 = vmul.f32 0.6931472, %v4054_v59  ;;  %v1649_v47 = vpop.xlane.xlu2 %1648 }
 0x28e   : > { %v2208_v24 = vpop.xlane.xlu1 %2207  ;;  %v1693_v51 = vmul.f32 0.6931472, %v4056_v11  ;;  %4057 = vlog2.f32 %v1649_v47 }
 0x28f   : > { %v2799_v56 = vadd.f32 %v2777_v27, %v7191_v15  ;;  %4059 = vlog2.f32 %v2208_v24  ;;  %v1742_v27 = vmul.f32 2.0, %v6260_v43  ;;  %v1777_v43 = vsel %vm1773_vm3, %v1759_v57, 0.0 }
 0x290   : > { %v1724_v41 = vadd.f32 %v1693_v51, %v6177_v21  ;;  %v7192_v51 = vld [vmem:[#allocation75_spill] sm:$0xff] }
 0x291   : > { %v2832_v5 = vsub.f32 %v2799_v56, %v2816_v36  ;;  %v2285_v47 = vmul.f32 2.0, %v7192_v51  ;;  %v1745_v51 = vmul.f32 2.0, %v6230_v55 }
 0x292   : > { %v1655_v17 = vpop.xlane.xlu0 %1654  ;;  %v1757_v28 = vsub.f32 %v1724_v41, %v1741_v8 }
 0x293   : > { %4061 = vlog2.f32 %v1655_v17  ;;  %v2856_v54 = vsel %vm1773_vm3, %v2832_v5, 0.0 }
 0x294   : > { %v4058_v13 = vpop.eup %4057  ;;  %v2857_v52 = vadd.f32 %v2856_v54, %v2855_v7  ;;  %v1744_v7 = vmul.f32 2.0, %v6295_v9  ;;  %v1774_v15 = vsel %vm1773_vm3, %v1757_v28, 0.0 }
 0x295   : > { %v4060_v16 = vpop.eup %4059  ;;  %v1695_v20 = vmul.f32 0.6931472, %v4058_v13 }
 0x296   : > { %v2742_v49 = vpop.xlane.xlu2 %2741  ;;  %v2211_v58 = vpop.xlane.xlu1 %2210  ;;  %v2246_v34 = vmul.f32 0.6931472, %v4060_v16 }
 0x297   : > { %4063 = vlog2.f32 %v2742_v49  ;;  %v1725_v4 = vadd.f32 %v1695_v20, %v6196_v50 }
 0x298   : > { %4065 = vlog2.f32 %v2211_v58  ;;  %v2268_v24 = vadd.f32 %v2246_v34, %v6023_v40 }
 0x299   : > { %v4062_v59 = vpop.eup %4061  ;;  %v1758_v17 = vsub.f32 %v1725_v4, %v1742_v27  ;;  %v7194_v27 = vld [vmem:[#allocation74_spill] sm:$0xff] }
 0x29a   : > { %v1658_v11 = vpop.xlane.xlu0 %1657  ;;  %v1699_v21 = vmul.f32 0.6931472, %v4062_v59  ;;  %v2301_v36 = vsub.f32 %v2268_v24, %v2285_v47  ;;  %v7193_v59 = vld [vmem:[#allocation114_spill] sm:$0xff]  ;;  %v2286_v4 = vmul.f32 2.0, %v7194_v27 }
 0x29b   : > { %4067 = vlog2.f32 %v1658_v11  ;;  %v1775_v56 = vsel %vm1773_vm3, %v1758_v17, 0.0  ;;  %v2817_v34 = vmul.f32 2.0, %v7193_v59 }
 0x29c   : > { %v1727_v6 = vadd.f32 %v1699_v21, %v6284_v19  ;;  %v1776_v41 = vadd.f32 %v1775_v56, %v1774_v15  ;;  %v2325_v5 = vsel %vm1773_vm3, %v2301_v36, 0.0 }
 0x29d   : > { %v4064_v8 = vpop.eup %4063  ;;  %v2326_v40 = vadd.f32 %v2325_v5, %v2324_v12 }
 0x29e   : > { %v1760_v50 = vsub.f32 %v1727_v6, %v1744_v7  ;;  %v4066_v54 = vpop.eup %4065  ;;  %v2779_v13 = vmul.f32 0.6931472, %v4064_v8  ;;  %v2745_v16 = vpop.xlane.xlu2 %2744  ;;  %v1778_v49 = vadd.f32 %v1777_v43, %v1776_v41 }
 0x29f   : > { %v2214_v9 = vpop.xlane.xlu1 %2213  ;;  %v2248_v58 = vmul.f32 0.6931472, %v4066_v54  ;;  %4069 = vlog2.f32 %v2745_v16 }
 0x2a0   : > { %v1779_v20 = vsel %vm1773_vm3, %v1760_v50, 0.0  ;;  %v2800_v57 = vadd.f32 %v2779_v13, %v7125_v32  ;;  %4071 = vlog2.f32 %v2214_v9  ;;  %v7195_v13 = vld [vmem:[#allocation121_spill] sm:$0xff] }
 0x2a1   : > { %v4068_v19 = vpop.eup %4067  ;;  %v2269_v12 = vadd.f32 %v2248_v58, %v7122_v0  ;;  %v1780_v21 = vadd.f32 %v1779_v20, %v1778_v49  ;;  %v2818_v16 = vmul.f32 2.0, %v7195_v13  ;;  %v7196_v20 = vld [vmem:[#allocation73_spill] sm:$0xff]  ;;  %v6502_v49 = vmul.f32 2.0, %v6446_v44 }
 0x2a2   : > { %v1685_v28 = vpop.xlane.xlu0 %1684  ;;  %v1701_v11 = vmul.f32 0.6931472, %v4068_v19  ;;  %v2833_v47 = vsub.f32 %v2800_v57, %v2817_v34  ;;  %v2287_v19 = vmul.f32 2.0, %v7196_v20 }
 0x2a3   : > { %4073 = vlog2.f32 %v1685_v28  ;;  %v2302_v7 = vsub.f32 %v2269_v12, %v2286_v4 }
 0x2a4   : > { %v1728_v24 = vadd.f32 %v1701_v11, %v6307_v22  ;;  %v2858_v17 = vsel %vm1773_vm3, %v2833_v47, 0.0 }
 0x2a5   : > { %v4070_v36 = vpop.eup %4069  ;;  %v2859_v15 = vadd.f32 %v2858_v17, %v2857_v52  ;;  %v2327_v32 = vsel %vm1773_vm3, %v2302_v7, 0.0 }
 0x2a6   : > { %v1761_v6 = vsub.f32 %v1728_v24, %v1745_v51  ;;  %v4072_v56 = vpop.eup %4071  ;;  %v2328_v43 = vadd.f32 %v2327_v32, %v2326_v40  ;;  %v2781_v50 = vmul.f32 0.6931472, %v4070_v36  ;;  %v2748_v8 = vpop.xlane.xlu2 %2747  ;;  %v7197_v24 = vld [vmem:[#allocation120_spill] sm:$0xff] }
 0x2a7   : > { %v2217_v0 = vpop.xlane.xlu1 %2216  ;;  %v2250_v55 = vmul.f32 0.6931472, %v4072_v56  ;;  %4075 = vlog2.f32 %v2748_v8  ;;  %v2819_v7 = vmul.f32 2.0, %v7197_v24  ;;  %v7198_v36 = vld [vmem:[#allocation84_spill] sm:$0xff]  ;;  %v1746_v56 = vmul.f32 2.0, %v6299_v1 }
 0x2a8   : > { %v1781_v41 = vsel %vm1773_vm3, %v1761_v6, 0.0  ;;  %v2801_v9 = vadd.f32 %v2781_v50, %v6072_v2  ;;  %4077 = vlog2.f32 %v2217_v0 }
 0x2a9   : > { %v4074_v5 = vpop.eup %4073  ;;  %v1782_v54 = vadd.f32 %v1781_v41, %v1780_v21  ;;  %v2270_v40 = vadd.f32 %v2250_v55, %v7128_v26 }
 0x2aa   : > { %v1661_v22 = vpop.xlane.xlu0 %1660  ;;  %v1719_v52 = vmul.f32 0.6931472, %v4074_v5  ;;  %v2834_v58 = vsub.f32 %v2801_v9, %v2818_v16 }
 0x2ab   : > { %4079 = vlog2.f32 %v1661_v22  ;;  %v2303_v59 = vsub.f32 %v2270_v40, %v2287_v19 }
 0x2ac   : > { %v6505_v28 = vadd.f32 %v1719_v52, %v6325_v29  ;;  %v2860_v34 = vsel %vm1773_vm3, %v2834_v58, 0.0 }
 0x2ad   : > { %v4076_v57 = vpop.eup %4075  ;;  %v2861_v11 = vadd.f32 %v2860_v34, %v2859_v15  ;;  %v2329_v27 = vsel %vm1773_vm3, %v2303_v59, 0.0  ;;  %v2288_v15 = vmul.f32 2.0, %v7198_v36  ;;  %v7200_v59 = vld [vmem:[#allocation83_spill] sm:$0xff] }
 0x2ae   : > { %v1770_v2 = vsub.f32 %v6505_v28, %v6502_v49  ;;  %v4078_v4 = vpop.eup %4077  ;;  %v2330_v26 = vadd.f32 %v2329_v27, %v2328_v43  ;;  %v2783_v12 = vmul.f32 0.6931472, %v4076_v57  ;;  %v2751_v21 = vpop.xlane.xlu2 %2750  ;;  %v2289_v34 = vmul.f32 2.0, %v7200_v59  ;;  %v7205_v59 = vld [vmem:[#allocation93_spill] sm:$0xff] }
 0x2af   : > { %v2220_v44 = vpop.xlane.xlu1 %2219  ;;  %v2252_v47 = vmul.f32 0.6931472, %v4078_v4  ;;  %4081 = vlog2.f32 %v2751_v21 }
 0x2b0   : > { %v2802_v17 = vadd.f32 %v2783_v12, %v7136_v45  ;;  %4083 = vlog2.f32 %v2220_v44 }
 0x2b1   : > { %v4080_v51 = vpop.eup %4079  ;;  %v2271_v32 = vadd.f32 %v2252_v47, %v6078_v37 }
 0x2b2   : > { %v6511_v29 = vpop.xlane.xlu0 %1687  ;;  %v1703_v6 = vmul.f32 0.6931472, %v4080_v51  ;;  %v2835_v43 = vsub.f32 %v2802_v17, %v2819_v7 }
 0x2b3   : > { %v2304_v8 = vsub.f32 %v2271_v32, %v2288_v15  ;;  %v7202_v32 = vld [vmem:[#allocation82_spill] sm:$0xff] }
 0x2b4   : > { %v1729_v50 = vadd.f32 %v1703_v6, %v6265_v42  ;;  %v2862_v0 = vsel %vm1773_vm3, %v2835_v43, 0.0  ;;  %v7199_v42 = vld [vmem:[#allocation119_spill] sm:$0xff]  ;;  %v7201_v6 = vld [vmem:[#allocation124_spill] sm:$0xff] }
 0x2b5   : > { %v4082_v5 = vpop.eup %4081  ;;  %v2331_v55 = vsel %vm1773_vm3, %v2304_v8, 0.0  ;;  %v2863_v22 = vadd.f32 %v2862_v0, %v2861_v11  ;;  %v2820_v40 = vmul.f32 2.0, %v7199_v42 }
 0x2b6   : > { %v1762_v41 = vsub.f32 %v1729_v50, %v1746_v56  ;;  %v4084_v45 = vpop.eup %4083  ;;  %v2785_v13 = vmul.f32 0.6931472, %v4082_v5  ;;  %v2754_v16 = vpop.xlane.xlu2 %2753  ;;  %v2332_v37 = vadd.f32 %v2331_v55, %v2330_v26  ;;  %v2290_v56 = vmul.f32 2.0, %v7202_v32 }
 0x2b7   : > { %v2223_v9 = vpop.xlane.xlu1 %2222  ;;  %v2254_v20 = vmul.f32 0.6931472, %v4084_v45  ;;  %4085 = vlog2.f32 %v2754_v16  ;;  %v1747_v50 = vmul.f32 2.0, %v6367_v39  ;;  %v1750_v32 = vmul.f32 2.0, %v6411_v33 }
 0x2b8   : > { %v1783_v52 = vsel %vm1773_vm3, %v1762_v41, 0.0  ;;  %v2803_v58 = vadd.f32 %v2785_v13, %v6093_v38  ;;  %4087 = vlog2.f32 %v2223_v9 }
 0x2b9   : > { %v1784_v1 = vadd.f32 %v1783_v52, %v1782_v54  ;;  %v2272_v57 = vadd.f32 %v2254_v20, %v6089_v61  ;;  %v2821_v61 = vmul.f32 2.0, %v7201_v6 }
 0x2ba   : > { %v1664_v19 = vpop.xlane.xlu0 %1663  ;;  %v2836_v11 = vsub.f32 %v2803_v58, %v2820_v40 }
 0x2bb   : > { %4089 = vlog2.f32 %v1664_v19  ;;  %v2305_v27 = vsub.f32 %v2272_v57, %v2289_v34  ;;  %v7203_v19 = vld [vmem:[#allocation123_spill] sm:$0xff]  ;;  %v2291_v34 = vmul.f32 2.0, %v7205_v59 }
 0x2bc   : > { %v2864_v4 = vsel %vm1773_vm3, %v2836_v11, 0.0  ;;  %v2822_v42 = vmul.f32 2.0, %v7203_v19  ;;  %v1748_v11 = vmul.f32 2.0, %v6391_v18  ;;  %v1749_v18 = vmul.f32 2.0, %v6399_v14  ;;  %v7206_v19 = vld [vmem:[#allocation31_spill] sm:$0xff] }
 0x2bd   : > { %v4086_v12 = vpop.eup %4085  ;;  %v2865_v26 = vadd.f32 %v2864_v4, %v2863_v22  ;;  %v2333_v21 = vsel %vm1773_vm3, %v2305_v27, 0.0 }
 0x2be   : > { %v4088_v54 = vpop.eup %4087  ;;  %v2787_v44 = vmul.f32 0.6931472, %v4086_v12  ;;  %v2757_v51 = vpop.xlane.xlu2 %2756  ;;  %v2334_v24 = vadd.f32 %v2333_v21, %v2332_v37 }
 0x2bf   : > { %v2226_v47 = vpop.xlane.xlu1 %2225  ;;  %v2256_v7 = vmul.f32 0.6931472, %v4088_v54  ;;  %4091 = vlog2.f32 %v2757_v51 }
 0x2c0   : > { %v2804_v36 = vadd.f32 %v2787_v44, %v6108_v63  ;;  %4093 = vlog2.f32 %v2226_v47 }
 0x2c1   : > { %v4090_v38 = vpop.eup %4089  ;;  %v2273_v43 = vadd.f32 %v2256_v7, %v6074_v30 }
 0x2c2   : > { %v1667_v17 = vpop.xlane.xlu0 %1666  ;;  %v1705_v15 = vmul.f32 0.6931472, %v4090_v38  ;;  %v2837_v8 = vsub.f32 %v2804_v36, %v2821_v61 }
 0x2c3   : > { %4095 = vlog2.f32 %v1667_v17  ;;  %v2306_v41 = vsub.f32 %v2273_v43, %v2290_v56 }
 0x2c4   : > { %v1730_v0 = vadd.f32 %v1705_v15, %v6347_v10  ;;  %v2866_v55 = vsel %vm1773_vm3, %v2837_v8, 0.0  ;;  %v7204_v10 = vld [vmem:[#allocation125_spill] sm:$0xff] }
 0x2c5   : > { %v4092_v22 = vpop.eup %4091  ;;  %v2867_v45 = vadd.f32 %v2866_v55, %v2865_v26  ;;  %v2335_v63 = vsel %vm1773_vm3, %v2306_v41, 0.0 }
 0x2c6   : > { %v1763_v5 = vsub.f32 %v1730_v0, %v1747_v50  ;;  %v4094_v13 = vpop.eup %4093  ;;  %v2789_v16 = vmul.f32 0.6931472, %v4092_v22  ;;  %v2336_v52 = vadd.f32 %v2335_v63, %v2334_v24 }
 0x2c7   : > { %v2258_v37 = vmul.f32 0.6931472, %v4094_v13  ;;  %v1752_v13 = vmul.f32 2.0, %v6433_v48 }
 0x2c8   : > { %v1785_v9 = vsel %vm1773_vm3, %v1763_v5, 0.0  ;;  %v2805_v40 = vadd.f32 %v2789_v16, %v7204_v10 }
 0x2c9   : > { %v4096_v30 = vpop.eup %4095  ;;  %v1786_v20 = vadd.f32 %v1785_v9, %v1784_v1  ;;  %v2274_v57 = vadd.f32 %v2258_v37, %v6116_v46 }
 0x2ca   : > { %v1670_v39 = vpop.xlane.xlu0 %1669  ;;  %v1707_v58 = vmul.f32 0.6931472, %v4096_v30  ;;  %v2838_v27 = vsub.f32 %v2805_v40, %v2822_v42  ;;  %v7207_v40 = vld [vmem:[#allocation139_spill] sm:$0xff] }
 0x2cb   : > { %4097 = vlog2.f32 %v1670_v39  ;;  %v2307_v12 = vsub.f32 %v2274_v57, %v2291_v34  ;;  %v1753_v39 = vmul.f32 2.0, %v6444_v60  ;;  %v1755_v48 = vmul.f32 2.0, %v7207_v40  ;;  %v7208_v60 = vld [vmem:[#allocation52_spill] sm:$0xff] }
 0x2cc   : > { %v1731_v4 = vadd.f32 %v1707_v58, %v6377_v3  ;;  %v2868_v26 = vsel %vm1773_vm3, %v2838_v27, 0.0  ;;  %v1799_v27 = vsel %vm1773_vm3, %v1770_v2, 0.0 }
 0x2cd   : > { %v2869_v21 = vadd.f32 %v2868_v26, %v2867_v45  ;;  %v2337_v54 = vsel %vm1773_vm3, %v2307_v12, 0.0  ;;  %v1756_v12 = vmul.f32 2.0, %v7208_v60  ;;  %v7209_v26 = vld [vmem:[#allocation51_spill] sm:$0xff] }
 0x2ce   : > { %v1764_v1 = vsub.f32 %v1731_v4, %v1748_v11  ;;  %v2338_v47 = vadd.f32 %v2337_v54, %v2336_v52 }
 0x2cf   : > { %2870 = vadd.xlane.f32.xlu2 %v2869_v21 }
 0x2d0   : > { %v1787_v51 = vsel %vm1773_vm3, %v1764_v1, 0.0  ;;  %2339 = vadd.xlane.f32.xlu1 %v2338_v47 }
 0x2d1   : > { %v4098_v44 = vpop.eup %4097  ;;  %v1788_v24 = vadd.f32 %v1787_v51, %v1786_v20 }
 0x2d2   : > { %v1709_v38 = vmul.f32 0.6931472, %v4098_v44  ;;  %v1673_v46 = vpop.xlane.xlu0 %1672 }
 0x2d3   : > { %4099 = vlog2.f32 %v1673_v46 }
 0x2d4   : > { %v1732_v3 = vadd.f32 %v1709_v38, %v6389_v35  ;;  %v1751_v35 = vmul.f32 2.0, %v6419_v31 }
 0x2d6   : > { %v1765_v7 = vsub.f32 %v1732_v3, %v1749_v18 }
 0x2d8   : > { %v1789_v17 = vsel %vm1773_vm3, %v1765_v7, 0.0 }
 0x2d9   : > { %v4100_v6 = vpop.eup %4099  ;;  %v1790_v61 = vadd.f32 %v1789_v17, %v1788_v24 }
 0x2da   : > { %v1711_v36 = vmul.f32 0.6931472, %v4100_v6  ;;  %v1676_v15 = vpop.xlane.xlu0 %1675 }
 0x2db   : > { %4101 = vlog2.f32 %v1676_v15 }
 0x2dc   : > { %v1733_v56 = vadd.f32 %v1711_v36, %v6397_v53 }
 0x2de   : > { %v1766_v43 = vsub.f32 %v1733_v56, %v1750_v32 }
 0x2e0   : > { %v1791_v50 = vsel %vm1773_vm3, %v1766_v43, 0.0 }
 0x2e1   : > { %v4102_v8 = vpop.eup %4101  ;;  %v1792_v0 = vadd.f32 %v1791_v50, %v1790_v61 }
 0x2e2   : > { %v1713_v14 = vmul.f32 0.6931472, %v4102_v8  ;;  %v1679_v41 = vpop.xlane.xlu0 %1678 }
 0x2e3   : > { %4103 = vlog2.f32 %v1679_v41 }
 0x2e4   : > { %v1734_v5 = vadd.f32 %v1713_v14, %v6405_v23  ;;  %4105 = vlog2.f32 %v6511_v29 }
 0x2e6   : > { %v1767_v55 = vsub.f32 %v1734_v5, %v1751_v35 }
 0x2e8   : > { %v1793_v22 = vsel %vm1773_vm3, %v1767_v55, 0.0 }
 0x2e9   : > { %v4104_v33 = vpop.eup %4103  ;;  %v1794_v45 = vadd.f32 %v1793_v22, %v1792_v0 }
 0x2ea   : > { %v1715_v53 = vmul.f32 0.6931472, %v4104_v33  ;;  %v1682_v63 = vpop.xlane.xlu0 %1681  ;;  %v4106_v9 = vpop.eup %4105 }
 0x2eb   : > { %4107 = vlog2.f32 %v1682_v63  ;;  %v1721_v30 = vmul.f32 0.6931472, %v4106_v9 }
 0x2ec   : > { %v1735_v16 = vadd.f32 %v1715_v53, %v6417_v62 }
 0x2ed   : > { %v1738_v42 = vadd.f32 %v1721_v30, %v7206_v19 }
 0x2ee   : > { %v1768_v52 = vsub.f32 %v1735_v16, %v1752_v13 }
 0x2ef   : > { %v1771_v62 = vsub.f32 %v1738_v42, %v1755_v48 }
 0x2f0   : > { %v1795_v31 = vsel %vm1773_vm3, %v1768_v52, 0.0 }
 0x2f1   : > { %v4108_v23 = vpop.eup %4107  ;;  %v1796_v37 = vadd.f32 %v1795_v31, %v1794_v45 }
 0x2f2   : > { %v1717_v20 = vmul.f32 0.6931472, %v4108_v23  ;;  %v1691_v29 = vpop.xlane.xlu0 %1690 }
 0x2f3   : > { %4109 = vlog2.f32 %v1691_v29 }
 0x2f4   : > { %v1736_v10 = vadd.f32 %v1717_v20, %v6427_v25  ;;  %v1801_v25 = vsel %vm1773_vm3, %v1771_v62, 0.0 }
 0x2f6   : > { %v1769_v58 = vsub.f32 %v1736_v10, %v1753_v39 }
 0x2f8   : > { %v1797_v59 = vsel %vm1773_vm3, %v1769_v58, 0.0 }
 0x2f9   : > { %v4110_v34 = vpop.eup %4109  ;;  %v1798_v57 = vadd.f32 %v1797_v59, %v1796_v37 }
 0x2fa   : > { %v1723_v11 = vmul.f32 0.6931472, %v4110_v34 }
 0x2fb   : > { %v1800_v4 = vadd.f32 %v1799_v27, %v1798_v57 }
 0x2fc   : > { %v1739_v1 = vadd.f32 %v1723_v11, %v7209_v26 }
 0x2fd   : > { %v1802_v21 = vadd.f32 %v1801_v25, %v1800_v4 }
 0x2fe   : > { %v1772_v54 = vsub.f32 %v1739_v1, %v1756_v12 }
 0x300   : > { %v1803_v44 = vsel %vm1773_vm3, %v1772_v54, 0.0 }
 0x301   : > { %v1804_v51 = vadd.f32 %v1803_v44, %v1802_v21 }
 0x303   : > { %1805 = vadd.xlane.f32.xlu0 %v1804_v51 }
 0x342   : > { %v2871_v24 = vpop.xlane.xlu2 %2870 }
 0x343   : > { %v2340_v47 = vpop.xlane.xlu1 %2339  ;;  %v2872_v46 = vrot.slane %v2871_v24, 4 }
 0x344   : > { %v2341_v38 = vrot.slane %v2340_v47, 4 }
 0x345   : > { %v2873_v28 = vadd.f32 %v2872_v46, %v2871_v24 }
 0x346   : > { %v2342_v49 = vadd.f32 %v2341_v38, %v2340_v47 }
 0x347   : > { %v2874_v3 = vrot.slane %v2873_v28, 2 }
 0x348   : > { %v2343_v2 = vrot.slane %v2342_v49, 2 }
 0x349   : > { %v2875_v61 = vadd.f32 %v2874_v3, %v2873_v28 }
 0x34a   : > { %v2344_v6 = vadd.f32 %v2343_v2, %v2342_v49 }
 0x34b   : > { %v2876_v43 = vrot.slane %v2875_v61, 1 }
 0x34c   : > { %v2345_v32 = vrot.slane %v2344_v6, 1 }
 0x34d   : > { %v2877_v0 = vadd.f32 %v2876_v43, %v2875_v61 }
 0x34e   : > { %v2346_v8 = vadd.f32 %v2345_v32, %v2344_v6 }
 0x376   : > { %v1806_v18 = vpop.xlane.xlu0 %1805 }
 0x377   : > { %v1807_v7 = vrot.slane %v1806_v18, 4 }
 0x379   : > { %v1808_v17 = vadd.f32 %v1807_v7, %v1806_v18 }
 0x37b   : > { %v1809_v36 = vrot.slane %v1808_v17, 2 }
 0x37d   : > { %v1810_v15 = vadd.f32 %v1809_v36, %v1808_v17 }
 0x37f   : > { %v1811_v56 = vrot.slane %v1810_v15, 1 }
 0x381   : > { %v1812_v50 = vadd.f32 %v1811_v56, %v1810_v15 }
 0x383   : > { %3554 = vpush %v1812_v50 }
 0x384   : > { %3556 = vpush %v2346_v8 }
 0x385   : > { %3558 = vpush %v2877_v0 }
 0x3b4   : > { %s3555_s17 = spop %3554 }
 0x3b5   : > { %s1814_s20 = sadd.f32 %s3555_s17, %s1740_s26  ;;  %s3557_s10 = spop %3556 }
 0x3b6   : > { %s2348_s18 = sadd.f32 %s3557_s10, %s3431_s23  ;;  %s3559_s22 = spop %3558 }
 0x3b7   : > { %1816 = sst [smem:[#allocation2]] %s1814_s20  ;;  %3100 = sbr.rel (%p3433_p6) target bundleno = 1170 (0x492), region = 105 }
 0x3b8   : > { %2350 = sst [smem:[#allocation2 + $0x1]] %s2348_s18 }
 0x3b9   : > { %s2879_s28 = sadd.f32 %s3559_s22, %s3432_s12 }
 0x3ba   : > { %s3106_s29 = sld [smem:[#allocation2]] (!%p3433_p6) }
 0x3bb   : > { %2881 = sst [smem:[#allocation2 + $0x2]] %s2879_s28 }
 0x3bc   : > { %v3101_v14 = vld [vmem:[#allocation4] sm:$0x3]  ;;  %v3153_v41 = vld [vmem:[#allocation4 + $0x4] sm:$0x3]  ;;  %v3126_v35 = vld [vmem:[#allocation4 + $0x2] sm:$0x3] }
 0x3bd   : > { %4111 = vlog2.f32 %v3101_v14  ;;  %v3104_v55 = vld [vmem:[#allocation3] sm:$0x3]  ;;  %v3156_v45 = vld [vmem:[#allocation3 + $0x4] sm:$0x3]  ;;  %v3129_v13 = vld [vmem:[#allocation3 + $0x2] sm:$0x3] }
 0x3be   : > { %4113 = vlog2.f32 %v3153_v41  ;;  %s3434_s14 = sld [smem:[#allocation2 + $0x1]] }
 0x3bf   : > { %4115 = vlog2.f32 %v3126_v35  ;;  %s3435_s27 = sld [smem:[#allocation2 + $0x2]] }
 0x3c3   : > { %v4112_v5 = vpop.eup %4111 }
 0x3c4   : > { %v4114_v22 = vpop.eup %4113  ;;  %v3103_v33 = vmul.f32 0.6931472, %v4112_v5 }
 0x3c5   : > { %v4116_v53 = vpop.eup %4115  ;;  %v3155_v63 = vmul.f32 0.6931472, %v4114_v22 }
 0x3c6   : > { %v3105_v16 = vadd.f32 %v3104_v55, %v3103_v33  ;;  %v3128_v9 = vmul.f32 0.6931472, %v4116_v53 }
 0x3c7   : > { %v3157_v52 = vadd.f32 %v3156_v45, %v3155_v63 }
 0x3c8   : > { %v3108_v30 = vperm.slane %v3105_v16, 0  ;;  %v3109_v31 = vperm.slane %v3105_v16, 1  ;;  %v3130_v23 = vadd.f32 %v3129_v13, %v3128_v9 }
 0x3c9   : > { %v3160_v37 = vperm.slane %v3157_v52, 0  ;;  %v3161_v20 = vperm.slane %v3157_v52, 1 }
 0x3ca   : > { %v3112_v29 = vsel %vm2001_vm1, %v3108_v30, 0.0  ;;  %v3113_v39 = vsel %vm2001_vm1, %v3109_v31, 0.0  ;;  %v3133_v19 = vperm.slane %v3130_v23, 0  ;;  %v3134_v42 = vperm.slane %v3130_v23, 1 }
 0x3cb   : > { %v3114_v10 = vadd.f32 %v3113_v39, %v3112_v29  ;;  %v3164_v40 = vsel %vm2001_vm1, %v3160_v37, 0.0  ;;  %v3165_v48 = vsel %vm2001_vm1, %v3161_v20, 0.0 }
 0x3cc   : > { %v3166_v58 = vadd.f32 %v3165_v48, %v3164_v40  ;;  %v3137_v62 = vsel %vm2001_vm1, %v3133_v19, 0.0  ;;  %v3138_v59 = vsel %vm2001_vm1, %v3134_v42, 0.0 }
 0x3cd   : > { %3115 = vadd.xlane.f32.xlu0 %v3114_v10  ;;  %v3139_v34 = vadd.f32 %v3138_v59, %v3137_v62 }
 0x3ce   : > { %3167 = vadd.xlane.f32.xlu1 %v3166_v58 }
 0x3d5   : > { %3140 = vadd.xlane.f32.xlu0 %v3139_v34 }
 0x440   : > { %v3116_v57 = vpop.xlane.xlu0 %3115 }
 0x441   : > { %v3117_v11 = vrot.slane %v3116_v57, 4  ;;  %v3168_v27 = vpop.xlane.xlu1 %3167 }
 0x442   : > { %v3169_v4 = vrot.slane %v3168_v27, 4 }
 0x443   : > { %v3118_v60 = vadd.f32 %v3117_v11, %v3116_v57 }
 0x444   : > { %v3170_v12 = vadd.f32 %v3169_v4, %v3168_v27 }
 0x445   : > { %v3119_v26 = vrot.slane %v3118_v60, 2 }
 0x446   : > { %v3171_v25 = vrot.slane %v3170_v12, 2 }
 0x447   : > { %v3120_v1 = vadd.f32 %v3119_v26, %v3118_v60 }
 0x448   : > { %v3141_v21 = vpop.xlane.xlu0 %3140  ;;  %v3172_v24 = vadd.f32 %v3171_v25, %v3170_v12 }
 0x449   : > { %v3142_v54 = vrot.slane %v3141_v21, 4  ;;  %v3121_v44 = vrot.slane %v3120_v1, 1 }
 0x44a   : > { %v3173_v49 = vrot.slane %v3172_v24, 1 }
 0x44b   : > { %v3143_v51 = vadd.f32 %v3142_v54, %v3141_v21  ;;  %v3122_v47 = vadd.f32 %v3121_v44, %v3120_v1 }
 0x44c   : > { %v3174_v18 = vadd.f32 %v3173_v49, %v3172_v24 }
 0x44d   : > { %v3144_v38 = vrot.slane %v3143_v51, 2  ;;  %3560 = vpush %v3122_v47 }
 0x44f   : > { %v3145_v46 = vadd.f32 %v3144_v38, %v3143_v51 }
 0x451   : > { %v3146_v28 = vrot.slane %v3145_v46, 1 }
 0x453   : > { %v3147_v2 = vadd.f32 %v3146_v28, %v3145_v46 }
 0x455   : > { %3562 = vpush %v3147_v2 }
 0x456   : > { %3564 = vpush %v3174_v18 }
 0x47e   : > { %s3561_s13 = spop %3560 }
 0x47f   : > { %s3124_s19 = sadd.f32 %s3561_s13, %s3106_s29 }
 0x481   : > { %s3125_s16 = smul.f32 0.00390625, %s3124_s19 }
 0x486   : > { %s3563_s21 = spop %3562 }
 0x487   : > { %s3149_s25 = sadd.f32 %s3563_s21, %s3434_s14  ;;  %s3565_s24 = spop %3564 }
 0x488   : > { %s3176_s26 = sadd.f32 %s3565_s24, %s3435_s27 }
 0x489   : > { %s3150_s23 = smul.f32 0.00390625, %s3149_s25 }
 0x48a   : > { %s3177_s12 = smul.f32 0.00390625, %s3176_s26 }
 0x48b   : > { %s3151_s17 = smul.f32 0.5, %s3150_s23 }
 0x48c   : > { %s3178_s10 = smul.f32 0.25, %s3177_s12 }
 0x48d   : > { %s3152_s20 = sadd.f32 %s3151_s17, %s3125_s16 }
 0x48f   : > { %s3179_s18 = sadd.f32 %s3178_s10, %s3152_s20 }
 0x491   : > { %3181 = sst [smem:[#allocation10]] %s3179_s18 }
 0x492 PF: > { %p3572_p7 = scmp.eq.s32.totalorder %s4273_s0, 1  ;;  %s3188_s1 = sshll.u32 %s6604_s8, 4  ;;  %s3189_s1 = int_to_ptr.hbm [resolvable:$true] %s3188_s1 }
 0x493   : > { %s4205_s29 = smov [#allocation10]  }
 0x494   : > { %3569 = dma.smem_to_hbm (%p3572_p7), %s4205_s29, 16, %s3189_s1, [#allocation9]  }
 0x495   : > { %4180 = dma.done.wait (%p3572_p7), [#allocation9], 16  }
 0x496   : > { %4182 = vsyncadd (%p3572_p7), [#allocation9], 4294967280 }
 0x497   : > { %3197 = sfence }
 0x498 PF: > { %p20_p8 = scmp.ge.s32.totalorder %s4276_s11, 4   ;;  %s7210_s29 = smov %s4189_s30 }
 0x499   : > { %s7211_s30 = smov %s4193_s9  ;;  %s7212_s9 = smov %s4287_s15 }
 0x49a   : > { %s7213_s10 = smov %s4276_s11  ;;  %22 = sbr.rel (!%p20_p8) target bundleno = 7 (0x7), region = 169 }
 0x49f   :  { %3203 = vsyncpa [#allocation8], 1 }
 0x4a0   :  { %3205 = vsyncpa [#allocation8 + $0x1], 1 }
 0x4a1   :  { %3206 = vsyncpa [#allocation9], 1 }
 0x4a2   :  { %3208 = vsyncpa [#allocation9 + $0x1], 1 }

// kernel: tpu_custom_call.1
= control target key start
LH: loop header
LB: loop body
LE: loop exit
PB: predicated region body
PF: predicated region fallthrough
CT: control target
= control target key end

     0   :  { %s6596_s0 = inlined_call_operand.<no memory space> [shape: f32[1], index: 0, kind: input, shape index: {}]   ;;  %s6597_s1 = inlined_call_operand.vmem [shape: f32[256,64], index: 1, kind: input, shape index: {}]   ;;  %s6598_s2 = inlined_call_operand.vmem [shape: f32[256,64], index: 2, kind: input, shape index: {}]   ;;  %s6599_s3 = inlined_call_operand.vmem [shape: bf16[256,256], index: 3, kind: input, shape index: {}]   ;;  %s6600_s4 = inlined_call_operand.vmem [shape: bf16[256,256], index: 4, kind: input, shape index: {}]   ;;  %s6601_s5 = inlined_call_operand.vmem [shape: f32[256,64], index: 5, kind: input, shape index: {}]   ;;  %s6602_s6 = inlined_call_operand.vmem [shape: bf16[256,256], index: 6, kind: input, shape index: {}]   ;;  %s6603_s7 = inlined_call_operand.hbm [shape: bf16[256,256], index: 7, kind: input, shape index: {}]   ;;  %s6604_s8 = inlined_call_operand.hbm [shape: f32[1], index: 8, kind: output, shape index: {}]  }
   0x1   :  { %6804 = sst [smem:[#allocation142_spill]] %s6597_s1 }
   0x2   :  { %13 = sst [smem:[#allocation5]] %s6596_s0 }
   0x3   :  { %14 = vsyncpa [#allocation8], 0 }
   0x4   :  { %16 = vsyncpa [#allocation8 + $0x1], 0 }
   0x5   :  { %17 = vsyncpa [#allocation9], 0  ;;  %s4254_s29 = smov 0   ;;  %s4256_s30 = smov 0  }
   0x6   :  { %s4258_s9 = smov 0   ;;  %s4260_s10 = smov 0  }
   0x7 LB: > { %s4273_s0 = sadd.s32 4294967295, %s4197_s10   ;;  %s4276_s11 = sadd.s32 1, %s4197_s10   ;;  %s4197_s10 = sphi %s4260_s10, %s7213_s10   ;;  %s4193_s9 = sphi %s4258_s9, %s7212_s9   ;;  %s4189_s30 = sphi %s4256_s30, %s7211_s30   ;;  %s4185_s29 = sphi %s4254_s29, %s7210_s29  }
   0x8   : > { %s173_s12 = ssub.s32 %s4197_s10, %s4276_s11  ;;  %s178_s13 = sadd.s32 1, %s4193_s9 }
   0x9   : > { %s175_s14 = sor.u32 %s173_s12, %s173_s12  ;;  %p185_p0 = scmp.ne.s32.totalorder %s4193_s9, %s4189_s30 }
   0xa   : > { %p176_p1 = scmp.eq.s32.totalorder %s175_s14, 0  ;;  %p186_p2 = scmp.eq.s32.totalorder %s4197_s10, 0 }
   0xb   : > { %p219_p3 = scmp.ne.s32.totalorder %s4189_s30, %s4185_s29  ;;  %p220_p4 = scmp.eq.s32.totalorder %s4273_s0, 0 }
   0xc   : > { %s4287_s15 = scalar_select %p176_p1, %s4193_s9, %s178_s13  }
   0xd   : > { %p4289_p5 = por %p186_p2, %p185_p0  ;;  %p4293_p6 = por %p220_p4, %p219_p3 }
   0xe   : > { %p3312_p7 = scmp.ge.s32.totalorder %s4197_s10, 2 }
  0x10   : > { %266 = sbr.rel (%p3312_p7) target bundleno = 62 (0x3e), region = 24 }
  0x15   : > { %307 = sbr.rel (!%p4289_p5) target bundleno = 43 (0x2b), region = 44  ;;  %s309_s18 = sand.u32 (%p4289_p5), 1, %s4193_s9  }
  0x16   : > { %s3440_s19 = sshll.u32 (%p4289_p5), %s4197_s10, 5  ;;  %s3313_s20 = sshll.u32 (%p4289_p5), %s309_s18, 6 }
  0x17   : > { %s314_s21 = sadd.s32 (%p4289_p5), %s4197_s10, %s3440_s19  ;;  %s311_s26 = scalar_lea.vmem (%p4289_p5), [#allocation6], %s3313_s20 }
  0x18   : > { %s3316_s22 = sshll.u32 (%p4289_p5), %s314_s21, 2 }
  0x19   : > { %s4306_s25 = scalar_lea.vmem (%p4289_p5), %s6602_s6, %s3316_s22 }
  0x1a   : > { %v333_v0 = vld [vmem:[%s4306_s25] sm:$0xf]  ;;  %v335_v1 = vld [vmem:[%s4306_s25 + $0x8] sm:$0xf]  ;;  %v337_v2 = vld [vmem:[%s4306_s25 + $0x10] sm:$0xf] }
  0x1b   : > { %334 = vst [vmem:[%s311_s26] sm:$0xf] %v333_v0  ;;  %v339_v3 = vld [vmem:[%s4306_s25 + $0x18] sm:$0xf]  ;;  %v341_v4 = vld [vmem:[%s4306_s25 + $0x20] sm:$0xf] }
  0x1c   : > { %336 = vst [vmem:[%s311_s26 + $0x4] sm:$0xf] %v335_v1  ;;  %v343_v5 = vld [vmem:[%s4306_s25 + $0x28] sm:$0xf]  ;;  %v345_v6 = vld [vmem:[%s4306_s25 + $0x30] sm:$0xf] }
  0x1d   : > { %338 = vst [vmem:[%s311_s26 + $0x8] sm:$0xf] %v337_v2  ;;  %v347_v7 = vld [vmem:[%s4306_s25 + $0x38] sm:$0xf]  ;;  %v349_v8 = vld [vmem:[%s4306_s25 + $0x40] sm:$0xf] }
  0x1e   : > { %340 = vst [vmem:[%s311_s26 + $0xc] sm:$0xf] %v339_v3  ;;  %v351_v9 = vld [vmem:[%s4306_s25 + $0x48] sm:$0xf]  ;;  %v353_v10 = vld [vmem:[%s4306_s25 + $0x50] sm:$0xf] }
  0x1f   : > { %342 = vst [vmem:[%s311_s26 + $0x10] sm:$0xf] %v341_v4  ;;  %v355_v11 = vld [vmem:[%s4306_s25 + $0x58] sm:$0xf]  ;;  %v357_v12 = vld [vmem:[%s4306_s25 + $0x60] sm:$0xf] }
  0x20   : > { %344 = vst [vmem:[%s311_s26 + $0x14] sm:$0xf] %v343_v5  ;;  %v359_v13 = vld [vmem:[%s4306_s25 + $0x68] sm:$0xf]  ;;  %v361_v14 = vld [vmem:[%s4306_s25 + $0x70] sm:$0xf] }
  0x21   : > { %346 = vst [vmem:[%s311_s26 + $0x18] sm:$0xf] %v345_v6  ;;  %v363_v15 = vld [vmem:[%s4306_s25 + $0x78] sm:$0xf] }
  0x22   : > { %348 = vst [vmem:[%s311_s26 + $0x1c] sm:$0xf] %v347_v7 }
  0x23   : > { %350 = vst [vmem:[%s311_s26 + $0x20] sm:$0xf] %v349_v8 }
  0x24   : > { %352 = vst [vmem:[%s311_s26 + $0x24] sm:$0xf] %v351_v9 }
  0x25   : > { %354 = vst [vmem:[%s311_s26 + $0x28] sm:$0xf] %v353_v10 }
  0x26   : > { %356 = vst [vmem:[%s311_s26 + $0x2c] sm:$0xf] %v355_v11 }
  0x27   : > { %358 = vst [vmem:[%s311_s26 + $0x30] sm:$0xf] %v357_v12 }
  0x28   : > { %360 = vst [vmem:[%s311_s26 + $0x34] sm:$0xf] %v359_v13 }
  0x29   : > { %362 = vst [vmem:[%s311_s26 + $0x38] sm:$0xf] %v361_v14 }
  0x2a   : > { %364 = vst [vmem:[%s311_s26 + $0x3c] sm:$0xf] %v363_v15 }
  0x2b PF: > { %s421_s27 = sand.u32 1, %s4193_s9   ;;  %s3441_s28 = sshll.u32 %s4197_s10, 5 }
  0x2c   : > { %s3317_s29 = sshll.u32 %s421_s27, 6  ;;  %s430_s12 = sadd.s32 %s4197_s10, %s3441_s28 }
  0x2d   : > { %s3320_s13 = sshll.u32 %s430_s12, 2  ;;  %s425_s14 = scalar_lea.vmem [#allocation7], %s3317_s29 }
  0x2e   : > { %s435_s18 = sshll.u32 %s425_s14, 4  ;;  %s432_s21 = scalar_lea.hbm %s6603_s7, %s3320_s13  ;;  %s436_s18 = int_to_ptr.vmem [resolvable:$true] %s435_s18 }
  0x2f   : > { %s433_s22 = sshll.u32 %s432_s21, 4  ;;  %s422_s23 = scalar_lea.sflag [#allocation8], %s421_s27  ;;  %s434_s22 = int_to_ptr.hbm [resolvable:$true] %s433_s22 }
  0x30   : > { %s4117_s24 = sshra.s32 %s434_s22, 4  ;;  %s4123_s29 = scalar_lea.hbm %s6603_s7, 256  ;;  %s4118_s24 = int_to_ptr.hbm [resolvable:$true] %s4117_s24 }
  0x31   : > { %s4119_s25 = scalar_lea.hbm %s4118_s24, 64  ;;  %p4124_p11 = scmp.lt.s32.totalorder %s4118_s24, %s6603_s7 }
  0x32   : > { %p4120_p8 = scmp.ne.s32.totalorder %s4118_s24, %s4119_s25  ;;  %p4125_p12 = scmp.lt.s32.totalorder %s4123_s29, %s4119_s25 }
  0x34   : > { %p4121_p9 = pnand %p4120_p8, %p4289_p5  ;;  %p4126_p13 = por %p4125_p12, %p4124_p11 }
  0x36   : > { %p4122_p10 = pneg %p4121_p9 }
  0x38   : > { %p4127_p0 = pnand %p4126_p13, %p4122_p10 }
  0x3a   : > { %4130 = shalt.err (!%p4127_p0)
}
  0x3b   : > { %s4199_s27 = smov 128   ;;  %s4200_s13 = smov 64  }
  0x3c   : > { %s4201_s19 = smov 4  }
  0x3d   : > { %3566 = dma.hbm_to_vmem [thread:$0]  (%p4289_p5), %s434_s22, 1024, %s436_s18, %s422_s23, %s4199_s27, %s4200_s13, %s4201_s19  }
  0x3e PF: > { %p3321_p1 = scmp.ge.s32.totalorder %s4197_s10, 1  ;;  %p443_p2 = scmp.lt.s32.totalorder %s4197_s10, 3 }
  0x40   : > { %p444_p3 = pnand %p3321_p1, %p443_p2 }
  0x42   : > { %447 = sbr.rel (%p444_p3) target bundleno = 1176 (0x498), region = 89 }
  0x47   : > { %s450_s20 = sand.u32 1, %s4189_s30  }
  0x48   : > { %s3322_s21 = sshll.u32 %s450_s20, 6  ;;  %s457_s25 = scalar_lea.sflag [#allocation8], %s450_s20 }
  0x49   : > { %s4343_s24 = scalar_lea.vmem [#allocation6], %s3322_s21  ;;  %s4345_s26 = scalar_lea.vmem [#allocation7], %s3322_s21 }
  0x4a   : > { %4176 = dma.done.wait (%p4293_p6), %s457_s25, 1024  }
  0x4b   : > { %4178 = vsyncadd (%p4293_p6), %s457_s25, 4294966272  ;;  %s3324_s16 = sshll.u32 %s4273_s0, 4  ;;  %s6807_s1 = sld [smem:[#allocation142_spill]] }
  0x4c   : > { %p516_p4 = scmp.lt.s32.totalorder %s3324_s16, 31  ;;  %p3334_p5 = scmp.ne.s32.totalorder %s4273_s0, 0 }
  0x4d   : > { %s4202_s21 = smov (!%p3334_p5), 0.0  }
  0x4e   : > { %s7215_s16 = smov (!%p516_p4, %s3324_s16), 31  ;;  %546 = sbr.rel (%p3334_p5) target bundleno = 92 (0x5c), region = 101 }
  0x4f   : > { %s3325_s10 = sshll.u32 %s7215_s16, 3  ;;  %548 = sst [smem:[#allocation2]] (!%p3334_p5), %s4202_s21 }
  0x50   : > { %s4360_s12 = scalar_lea.vmem %s6599_s3, %s3325_s10  ;;  %s4365_s17 = scalar_lea.vmem %s6600_s4, %s3325_s10 }
  0x51   : > { %s4355_s23 = scalar_lea.vmem %s6807_s1, %s3325_s10  ;;  %s4370_s20 = scalar_lea.vmem %s6601_s5, %s3325_s10 }
  0x52   : > { %550 = sst [smem:[#allocation2 + $0x1]] (!%p3334_p5), %s4202_s21 }
  0x53   : > { %v553_v16 = vlaneseq  ;;  %552 = sst [smem:[#allocation2 + $0x2]] %s4202_s21  ;;  %v4203_v17 = vmov -inf   ;;  %v4204_v18 = vmov 0.0  }
  0x55   : > { %vm555_vm0 = vcmp.lt.s32.totalorder %v553_v16, 256 }
  0x56   : > { %557 = vst.msk [vmem:[#allocation3] sm:$0x3] %vm555_vm0, %v4203_v17 }
  0x57   : > { %558 = vst.msk [vmem:[#allocation3 + $0x2] sm:$0x3] %vm555_vm0, %v4203_v17 }
  0x58   : > { %559 = vst.msk [vmem:[#allocation3 + $0x4] sm:$0x3] %vm555_vm0, %v4203_v17 }
  0x59   : > { %560 = vst.msk [vmem:[#allocation4] sm:$0x3] %vm555_vm0, %v4204_v18 }
  0x5a   : > { %561 = vst.msk [vmem:[#allocation4 + $0x2] sm:$0x3] %vm555_vm0, %v4204_v18 }
  0x5b   : > { %562 = vst.msk [vmem:[#allocation4 + $0x4] sm:$0x3] %vm555_vm0, %v4204_v18 }
  0x5c PF: > { %v595_v19 = vld [vmem:[%s6598_s2 + $0x78] sm:$0xff]  ;;  %vm612_vm1 = vcmask 523264   ;;  %s563_s22 = sld [smem:[#allocation5]]  ;;  %v6607_v21 = vlaneseq  ;;  %v594_v22 = vld [vmem:[%s6598_s2 + $0x70] sm:$0xff]  ;;  %v593_v34 = vld [vmem:[%s6598_s2 + $0x68] sm:$0xff]  ;;  %p3433_p6 = scmp.ne.s32.totalorder %s4273_s0, 1 }
  0x5d   : > { %v4379_v20 = vld [vmem:[%s6598_s2 + $0xf8] sm:$0xff]  ;;  %3335 = vmatpush.xpose.msk.msra.mxu0 %vm612_vm1, %v595_v19  ;;  %3522 = vmatpush.xpose.msk.msra.mxu3 %vm612_vm1, %v595_v19  ;;  %v3445_v26 = vld [vmem:[%s4343_s24] sm:$0xff]   ;;  %v592_v51 = vld [vmem:[%s6598_s2 + $0x60] sm:$0xff] }
  0x5e   : > { %3367 = vmatpush.xpose.msk.msra.mxu1 %vm612_vm1, %v4379_v20  ;;  %v4389_v23 = vshrl.u32 %v6607_v21, 7  ;;  %v4392_v24 = vand.u32 127, %v6607_v21  ;;  %v3508_v25 = vld [vmem:[%s4343_s24 + $0x8] sm:$0xff]   ;;  %v3447_v29 = vunpack.c.h.bf16 %v3445_v26  ;;  %v3446_v30 = vunpack.c.l.bf16 %v3445_v26  ;;  %v3509_v33 = vld [vmem:[%s4343_s24 + $0x10] sm:$0xff]   ;;  %v4426_v37 = vld [vmem:[%s6598_s2 + $0xe8] sm:$0xff] }
  0x5f   : > { %v4399_v27 = vld [vmem:[%s6598_s2 + $0xf0] sm:$0xff]  ;;  %v3450_v28 = vunpack.c.l.bf16 %v3508_v25  ;;  %v3455_v36 = vunpack.c.h.bf16 %v3509_v33  ;;  %v3454_v41 = vunpack.c.l.bf16 %v3509_v33  ;;  %v1130_v42 = vld [vmem:[%s4370_s20 + $0x78] sm:$0xff]  ;;  %v3451_v45 = vunpack.c.h.bf16 %v3508_v25  ;;  %v4462_v52 = vld [vmem:[%s6598_s2 + $0xe0] sm:$0xff] }
  0x60   : > { %6808 = vst [vmem:[#allocation13_spill] sm:$0xff] %v4389_v23  ;;  %v4402_v31 = vadd.s32 16, %v4389_v23  ;;  %v4405_v32 = vadd.s32 8, %v4389_v23  ;;  %vm1099_vm2 = vcmp.eq.s32.totalorder %v4389_v23, %v4392_v24  ;;  %v4433_v43 = vadd.s32 40, %v4389_v23  ;;  %3399 = vmatpush.xpose.msk.msra.mxu2 %vm612_vm1, %v1130_v42  ;;  %v1129_v50 = vld [vmem:[%s4370_s20 + $0x70] sm:$0xff]  ;;  %v3510_v57 = vld [vmem:[%s4343_s24 + $0x18] sm:$0xff]  }
  0x61   : > { %6809 = vst [vmem:[#allocation14_spill] sm:$0xff] %v4392_v24  ;;  %3336 = vmatpush.xpose.msk.msra.mxu0 %vm612_vm1, %v594_v22  ;;  %3523 = vmatpush.xpose.msk.msra.mxu3 %vm612_vm1, %v594_v22  ;;  %v4436_v44 = vadd.s32 32, %v4389_v23  ;;  %v4451_v49 = vadd.s32 24, %v4389_v23  ;;  %v4472_v56 = vld [vmem:[%s4343_s24 + $0x20] sm:$0xff]   ;;  %v591_v59 = vld [vmem:[%s6598_s2 + $0x58] sm:$0xff]  ;;  %v4502_v1 = vadd.s32 64, %v4389_v23  ;;  %v3459_v2 = vunpack.c.h.bf16 %v3510_v57 }
  0x62   : > { %6810 = vst [vmem:[#allocation15_spill] sm:$0xff] %v4402_v31  ;;  %3368 = vmatpush.xpose.msk.msra.mxu1 %vm612_vm1, %v4399_v27  ;;  %v4417_v35 = vstv %s563_s22  ;;  %vm1101_vm3 = vcmp.eq.s32.totalorder %v4402_v31, %v4392_v24  ;;  %vm1100_vm4 = vcmp.eq.s32.totalorder %v4405_v32, %v4392_v24  ;;  %vm1104_vm5 = vcmp.eq.s32.totalorder %v4433_v43, %v4392_v24  ;;  %v1128_v58 = vld [vmem:[%s4370_s20 + $0x68] sm:$0xff]  ;;  %v4489_v60 = vld [vmem:[%s6598_s2 + $0xd8] sm:$0xff]  ;;  %v1127_v6 = vld [vmem:[%s4370_s20 + $0x60] sm:$0xff] }
  0x63   : > { %6811 = vst [vmem:[#allocation16_spill] sm:$0xff] %v4405_v32  ;;  %v1342_v38 = vmul.f32 %v3450_v28, %v4417_v35  ;;  %v1341_v39 = vmul.f32 %v3447_v29, %v4417_v35  ;;  %v1340_v40 = vmul.f32 %v3446_v30, %v4417_v35  ;;  %v1345_v53 = vmul.f32 %v3455_v36, %v4417_v35  ;;  %v590_v7 = vld [vmem:[%s6598_s2 + $0x50] sm:$0xff]  ;;  %v1126_v13 = vld [vmem:[%s4370_s20 + $0x58] sm:$0xff]  ;;  %v589_v14 = vld [vmem:[%s6598_s2 + $0x48] sm:$0xff] }
  0x64   : > { %6812 = vst [vmem:[#allocation17_spill] sm:$0xff] %v4433_v43  ;;  %v1344_v54 = vmul.f32 %v3454_v41, %v4417_v35  ;;  %vm1103_vm6 = vcmp.eq.s32.totalorder %v4436_v44, %v4392_v24  ;;  %v1343_v55 = vmul.f32 %v3451_v45, %v4417_v35  ;;  %3400 = vmatpush.xpose.msk.msra.mxu2 %vm612_vm1, %v1129_v50  ;;  %v3462_v63 = vunpack.c.l.bf16 %v4472_v56  ;;  %v4522_v8 = vld [vmem:[%s6598_s2 + $0xd0] sm:$0xff]  ;;  %v4546_v15 = vld [vmem:[%s6598_s2 + $0xc8] sm:$0xff]  ;;  %v588_v33 = vld [vmem:[%s6598_s2 + $0x40] sm:$0xff] }
  0x65   : > { %6813 = vst [vmem:[#allocation18_spill] sm:$0xff] %v4436_v44  ;;  %3337 = vmatpush.xpose.msk.msra.mxu0 %vm612_vm1, %v593_v34  ;;  %3524 = vmatpush.xpose.msk.msra.mxu3 %vm612_vm1, %v593_v34  ;;  %v1358_v46 = vsel %vm1101_vm3, %v1342_v38, 0.0  ;;  %v1357_v47 = vsel %vm1100_vm4, %v1341_v39, 0.0  ;;  %v1356_v48 = vsel %vm1099_vm2, %v1340_v40, 0.0  ;;  %vm1102_vm7 = vcmp.eq.s32.totalorder %v4451_v49, %v4392_v24  ;;  %v3512_v12 = vld [vmem:[%s4343_s24 + $0x28] sm:$0xff]   ;;  %v4579_v34 = vld [vmem:[%s6598_s2 + $0xc0] sm:$0xff] }
  0x66   : > { %6814 = vst [vmem:[#allocation19_spill] sm:$0xff] %v4451_v49  ;;  %3369 = vmatpush.xpose.msk.msra.mxu1 %vm612_vm1, %v4426_v37  ;;  %1376 = vadd.xlane.f32.xlu0 %v1358_v46  ;;  %v1361_v61 = vsel %vm1104_vm5, %v1345_v53, 0.0  ;;  %v1360_v62 = vsel %vm1103_vm6, %v1344_v54, 0.0  ;;  %v1359_v0 = vsel %vm1102_vm7, %v1343_v55, 0.0  ;;  %v3458_v3 = vunpack.c.l.bf16 %v3510_v57  ;;  %v1125_v30 = vld [vmem:[%s4370_s20 + $0x50] sm:$0xff]  ;;  %v4587_v40 = vld [vmem:[%s4343_s24 + $0x38] sm:$0xff]  }
  0x67   : > { %1374 = vadd.xlane.f32.xlu2 %v1357_v47  ;;  %1372 = vadd.xlane.f32.xlu1 %v1356_v48  ;;  %6815 = vst [vmem:[#allocation20_spill] sm:$0xff] %v4502_v1  ;;  %v4508_v4 = vadd.s32 56, %v4389_v23  ;;  %v4511_v5 = vadd.s32 48, %v4389_v23  ;;  %v1348_v9 = vmul.f32 %v3462_v63, %v4417_v35  ;;  %vm1107_vm8 = vcmp.eq.s32.totalorder %v4502_v1, %v4392_v24  ;;  %v3513_v41 = vld [vmem:[%s4343_s24 + $0x30] sm:$0xff]   ;;  %v1124_v42 = vld [vmem:[%s4370_s20 + $0x48] sm:$0xff]  ;;  %v1010_v49 = vld [vmem:[%s4365_s17 + $0x50] sm:$0xff] }
  0x68   : > { %3401 = vmatpush.xpose.msk.msra.mxu2 %vm612_vm1, %v1128_v58  ;;  %v1347_v10 = vmul.f32 %v3459_v2, %v4417_v35  ;;  %v1346_v11 = vmul.f32 %v3458_v3, %v4417_v35  ;;  %v4552_v17 = vadd.s32 88, %v4389_v23  ;;  %v3467_v18 = vunpack.c.h.bf16 %v3512_v12  ;;  %v587_v45 = vld [vmem:[%s6598_s2 + $0x38] sm:$0xff]  ;;  %v1123_v58 = vld [vmem:[%s4370_s20 + $0x40] sm:$0xff]  ;;  %v3477_v2 = vld [vmem:[%s4345_s26] sm:$0xff]  }
  0x69   : > { %3338 = vmatpush.xpose.msk.msra.mxu0 %vm612_vm1, %v592_v51  ;;  %3525 = vmatpush.xpose.msk.msra.mxu3 %vm612_vm1, %v592_v51  ;;  %6816 = vst [vmem:[#allocation21_spill] sm:$0xff] %v4508_v4  ;;  %vm1106_vm9 = vcmp.eq.s32.totalorder %v4508_v4, %v4392_v24  ;;  %vm1105_vm10 = vcmp.eq.s32.totalorder %v4511_v5, %v4392_v24  ;;  %v1364_v16 = vsel %vm1107_vm8, %v1348_v9, 0.0  ;;  %v3466_v25 = vunpack.c.l.bf16 %v3512_v12  ;;  %v4606_v46 = vld [vmem:[%s6598_s2 + $0xb8] sm:$0xff] }
  0x6a   : > { %3370 = vmatpush.xpose.msk.msra.mxu1 %vm612_vm1, %v4462_v52  ;;  %6817 = vst [vmem:[#allocation22_spill] sm:$0xff] %v4511_v5  ;;  %v1363_v19 = vsel %vm1106_vm9, %v1347_v10, 0.0  ;;  %v1362_v22 = vsel %vm1105_vm10, %v1346_v11, 0.0  ;;  %v3463_v26 = vunpack.c.h.bf16 %v4472_v56  ;;  %v4565_v28 = vadd.s32 80, %v4389_v23  ;;  %v1122_v3 = vld [vmem:[%s4370_s20 + $0x38] sm:$0xff] }
  0x6b   : > { %6818 = vst [vmem:[#allocation23_spill] sm:$0xff] %v4552_v17  ;;  %v4568_v29 = vadd.s32 72, %v4389_v23  ;;  %v1351_v36 = vmul.f32 %v3467_v18, %v4417_v35  ;;  %vm1110_vm11 = vcmp.eq.s32.totalorder %v4552_v17, %v4392_v24  ;;  %v1350_v38 = vmul.f32 %v3466_v25, %v4417_v35  ;;  %v1121_v18 = vld [vmem:[%s4370_s20 + $0x30] sm:$0xff]  ;;  %v1011_v32 = vld [vmem:[%s4365_s17 + $0x58] sm:$0xff] }
  0x6c   : > { %3402 = vmatpush.xpose.msk.msra.mxu2 %vm612_vm1, %v1127_v6  ;;  %6819 = vst [vmem:[#allocation24_spill] sm:$0xff] %v4565_v28  ;;  %v1349_v39 = vmul.f32 %v3463_v26, %v4417_v35  ;;  %vm1109_vm12 = vcmp.eq.s32.totalorder %v4565_v28, %v4392_v24  ;;  %v4612_v48 = vadd.s32 112, %v4389_v23  ;;  %v3474_v50 = vunpack.c.l.bf16 %v4587_v40  ;;  %v585_v6 = vld [vmem:[%s6598_s2 + $0x28] sm:$0xff] }
  0x6d   : > { %3339 = vmatpush.xpose.msk.msra.mxu0 %vm612_vm1, %v591_v59  ;;  %3526 = vmatpush.xpose.msk.msra.mxu3 %vm612_vm1, %v591_v59  ;;  %6820 = vst [vmem:[#allocation25_spill] sm:$0xff] %v4568_v29  ;;  %vm1108_vm13 = vcmp.eq.s32.totalorder %v4568_v29, %v4392_v24  ;;  %v1367_v47 = vsel %vm1110_vm11, %v1351_v36, 0.0  ;;  %v1366_v51 = vsel %vm1109_vm12, %v1350_v38, 0.0  ;;  %v3471_v54 = vunpack.c.h.bf16 %v3513_v41  ;;  %v586_v59 = vld [vmem:[%s6598_s2 + $0x30] sm:$0xff]  ;;  %v1120_v38 = vld [vmem:[%s4370_s20 + $0x28] sm:$0xff] }
  0x6e   : > { %3371 = vmatpush.xpose.msk.msra.mxu1 %vm612_vm1, %v4489_v60  ;;  %1382 = vadd.xlane.f32.xlu0 %v1361_v61  ;;  %6821 = vst [vmem:[#allocation26_spill] sm:$0xff] %v4612_v48  ;;  %v1365_v53 = vsel %vm1108_vm13, %v1349_v39, 0.0  ;;  %v3470_v55 = vunpack.c.l.bf16 %v3513_v41  ;;  %v4625_v56 = vadd.s32 104, %v4389_v23  ;;  %v4628_v57 = vadd.s32 96, %v4389_v23  ;;  %v4639_v61 = vld [vmem:[%s6598_s2 + $0xb0] sm:$0xff]  ;;  %v583_v39 = vld [vmem:[%s6598_s2 + $0x18] sm:$0xff] }
  0x6f   : > { %1380 = vadd.xlane.f32.xlu2 %v1360_v62  ;;  %1378 = vadd.xlane.f32.xlu1 %v1359_v0  ;;  %v1354_v62 = vmul.f32 %v3474_v50, %v4417_v35  ;;  %vm6605_vm14 = vcmp.eq.s32.totalorder %v4612_v48, %v4392_v24  ;;  %v1353_v63 = vmul.f32 %v3471_v54, %v4417_v35  ;;  %v3479_v10 = vunpack.c.h.bf16 %v3477_v2  ;;  %v3515_v36 = vld [vmem:[%s4345_s26 + $0x8] sm:$0xff]  }
  0x70   : > { %3403 = vmatpush.xpose.msk.msra.mxu2 %vm612_vm1, %v1126_v13  ;;  %6822 = vst [vmem:[#allocation27_spill] sm:$0xff] %v4625_v56  ;;  %v1352_v0 = vmul.f32 %v3470_v55, %v4417_v35  ;;  %vm6606_vm15 = vcmp.eq.s32.totalorder %v4625_v56, %v4392_v24  ;;  %vm1111_vm0 = vcmp.eq.s32.totalorder %v4628_v57, %v4392_v24  ;;  %v3478_v13 = vunpack.c.l.bf16 %v3477_v2  ;;  %v582_v54 = vld [vmem:[%s6598_s2 + $0x10] sm:$0xff]  ;;  %v581_v2 = vld [vmem:[%s6598_s2 + $0x8] sm:$0xff] }
  0x71   : > { %3340 = vmatpush.xpose.msk.msra.mxu0 %vm612_vm1, %v590_v7  ;;  %3527 = vmatpush.xpose.msk.msra.mxu3 %vm612_vm1, %v590_v7  ;;  %6823 = vst [vmem:[#allocation28_spill] sm:$0xff] %v4628_v57  ;;  %v4663_v7 = vld [vmem:[%s6598_s2 + $0xa8] sm:$0xff]  ;;  %v1370_v9 = vsel %vm6605_vm14, %v1354_v62, 0.0  ;;  %v1369_v11 = vsel %vm6606_vm15, %v1353_v63, 0.0  ;;  %v1437_v25 = vmul.f32 %v3479_v10, %v4417_v35  ;;  %v3483_v50 = vunpack.c.h.bf16 %v3515_v36  ;;  %v4734_v55 = vld [vmem:[%s6598_s2 + $0x90] sm:$0xff]  ;;  %v931_v57 = vld [vmem:[%s4360_s12 + $0x58] sm:$0xff] }
  0x72   : > { %3372 = vmatpush.xpose.msk.msra.mxu1 %vm612_vm1, %v4522_v8  ;;  %v1368_v12 = vsel %vm1111_vm0, %v1352_v0, 0.0  ;;  %v1436_v26 = vmul.f32 %v3478_v13, %v4417_v35  ;;  %v3517_v63 = vld [vmem:[%s4345_s26 + $0x18] sm:$0xff]   ;;  %v1118_v0 = vld [vmem:[%s4370_s20 + $0x18] sm:$0xff]  ;;  %v958_v1 = vunpack.c.l.bf16 %v931_v57  ;;  %v959_v4 = vunpack.c.h.bf16 %v931_v57 }
  0x73   : > { %v1453_v41 = vsel %vm1100_vm4, %v1437_v25, 0.0 }
  0x74   : > { %3404 = vmatpush.xpose.msk.msra.mxu2 %vm612_vm1, %v1125_v30  ;;  %v5138_v57 = vmul.f32 %v959_v4, %v4417_v35 }
  0x75   : > { %3341 = vmatpush.xpose.msk.msra.mxu0 %vm612_vm1, %v589_v14  ;;  %3528 = vmatpush.xpose.msk.msra.mxu3 %vm612_vm1, %v589_v14  ;;  %v3475_v14 = vunpack.c.h.bf16 %v4587_v40  ;;  %v4711_v40 = vld [vmem:[%s6598_s2 + $0x98] sm:$0xff] }
  0x76   : > { %3373 = vmatpush.xpose.msk.msra.mxu1 %vm612_vm1, %v4546_v15  ;;  %1388 = vadd.xlane.f32.xlu0 %v1364_v16  ;;  %v4679_v16 = vadd.s32 120, %v4389_v23  ;;  %6875 = vst [vmem:[#allocation79_spill] sm:$0xff] %v5138_v57 }
  0x77   : > { %1386 = vadd.xlane.f32.xlu2 %v1363_v19  ;;  %1384 = vadd.xlane.f32.xlu1 %v1362_v22  ;;  %v584_v19 = vld [vmem:[%s6598_s2 + $0x20] sm:$0xff]  ;;  %v1355_v30 = vmul.f32 %v3475_v14, %v4417_v35  ;;  %v1117_v14 = vld [vmem:[%s4370_s20 + $0x10] sm:$0xff] }
  0x78   : > { %3405 = vmatpush.xpose.msk.msra.mxu2 %vm612_vm1, %v1124_v42  ;;  %6824 = vst [vmem:[#allocation29_spill] sm:$0xff] %v4679_v16  ;;  %v4690_v22 = vld [vmem:[%s6598_s2 + $0xa0] sm:$0xff]  ;;  %vm1114_vm14 = vcmp.eq.s32.totalorder %v4679_v16, %v4392_v24 }
  0x79   : > { %3342 = vmatpush.xpose.msk.msra.mxu0 %vm612_vm1, %v588_v33  ;;  %3529 = vmatpush.xpose.msk.msra.mxu3 %vm612_vm1, %v588_v33  ;;  %v3516_v33 = vld [vmem:[%s4345_s26 + $0x10] sm:$0xff]  }
  0x7a   : > { %3374 = vmatpush.xpose.msk.msra.mxu1 %vm612_vm1, %v4579_v34  ;;  %v3486_v42 = vunpack.c.l.bf16 %v3516_v33  ;;  %v3487_v13 = vunpack.c.h.bf16 %v3516_v33  ;;  %v3519_v33 = vld [vmem:[%s4345_s26 + $0x28] sm:$0xff]  }
  0x7c   : > { %3406 = vmatpush.xpose.msk.msra.mxu2 %vm612_vm1, %v1123_v58  ;;  %v1440_v58 = vmul.f32 %v3486_v42, %v4417_v35 }
  0x7d   : > { %3343 = vmatpush.xpose.msk.msra.mxu0 %vm612_vm1, %v587_v45  ;;  %3530 = vmatpush.xpose.msk.msra.mxu3 %vm612_vm1, %v587_v45  ;;  %v1452_v45 = vsel %vm1099_vm2, %v1436_v26, 0.0 }
  0x7e   : > { %3375 = vmatpush.xpose.msk.msra.mxu1 %vm612_vm1, %v4606_v46  ;;  %1394 = vadd.xlane.f32.xlu0 %v1367_v47  ;;  %v1371_v47 = vsel %vm1114_vm14, %v1355_v30, 0.0  ;;  %v1441_v30 = vmul.f32 %v3487_v13, %v4417_v35 }
  0x7f   : > { %1392 = vadd.xlane.f32.xlu2 %v1366_v51  ;;  %1390 = vadd.xlane.f32.xlu1 %v1365_v53  ;;  %v3482_v51 = vunpack.c.l.bf16 %v3515_v36  ;;  %v1119_v53 = vld [vmem:[%s4370_s20 + $0x20] sm:$0xff] }
  0x80   : > { %3407 = vmatpush.xpose.msk.msra.mxu2 %vm612_vm1, %v1122_v3  ;;  %v4752_v3 = vld [vmem:[%s6598_s2 + $0x88] sm:$0xff]  ;;  %v564_v36 = vld [vmem:[%s4355_s23] sm:$0xff] }
  0x81   : > { %3344 = vmatpush.xpose.msk.msra.mxu0 %vm612_vm1, %v586_v59  ;;  %3531 = vmatpush.xpose.msk.msra.mxu3 %vm612_vm1, %v586_v59  ;;  %v1439_v59 = vmul.f32 %v3483_v50, %v4417_v35  ;;  %v1438_v62 = vmul.f32 %v3482_v51, %v4417_v35  ;;  %v1457_v50 = vsel %vm1104_vm5, %v1441_v30, 0.0 }
  0x82   : > { %3376 = vmatpush.xpose.msk.msra.mxu1 %vm612_vm1, %v4639_v61 }
  0x83   : > { %v1455_v10 = vsel %vm1102_vm7, %v1439_v59, 0.0 }
  0x84   : > { %3408 = vmatpush.xpose.msk.msra.mxu2 %vm612_vm1, %v1121_v18  ;;  %v580_v18 = vld [vmem:[%s6598_s2] sm:$0xff] }
  0x85   : > { %3345 = vmatpush.xpose.msk.msra.mxu0 %vm612_vm1, %v585_v6  ;;  %3532 = vmatpush.xpose.msk.msra.mxu3 %vm612_vm1, %v585_v6  ;;  %v1456_v6 = vsel %vm1103_vm6, %v1440_v58, 0.0 }
  0x86   : > { %3377 = vmatpush.xpose.msk.msra.mxu1 %vm612_vm1, %v4663_v7  ;;  %1400 = vadd.xlane.f32.xlu0 %v1370_v9  ;;  %v3491_v9 = vunpack.c.h.bf16 %v3517_v63 }
  0x87   : > { %1398 = vadd.xlane.f32.xlu2 %v1369_v11  ;;  %1396 = vadd.xlane.f32.xlu1 %v1368_v12  ;;  %v1454_v11 = vsel %vm1101_vm3, %v1438_v62, 0.0  ;;  %v3490_v12 = vunpack.c.l.bf16 %v3517_v63  ;;  %v3520_v62 = vld [vmem:[%s4345_s26 + $0x30] sm:$0xff]   ;;  %v565_v63 = vld [vmem:[%s4355_s23 + $0x8] sm:$0xff] }
  0x88   : > { %3409 = vmatpush.xpose.msk.msra.mxu2 %vm612_vm1, %v1120_v38  ;;  %v1443_v25 = vmul.f32 %v3491_v9, %v4417_v35  ;;  %v3518_v38 = vld [vmem:[%s4345_s26 + $0x20] sm:$0xff]   ;;  %v3502_v9 = vunpack.c.l.bf16 %v3520_v62 }
  0x89   : > { %3346 = vmatpush.xpose.msk.msra.mxu0 %vm612_vm1, %v584_v19  ;;  %3533 = vmatpush.xpose.msk.msra.mxu3 %vm612_vm1, %v584_v19  ;;  %v4775_v19 = vld [vmem:[%s6598_s2 + $0x80] sm:$0xff]  ;;  %v1442_v26 = vmul.f32 %v3490_v12, %v4417_v35  ;;  %v3494_v51 = vunpack.c.l.bf16 %v3518_v38 }
  0x8a   : > { %3378 = vmatpush.xpose.msk.msra.mxu1 %vm612_vm1, %v4690_v22  ;;  %v1459_v42 = vsel %vm1106_vm9, %v1443_v25, 0.0  ;;  %v1000_v12 = vld [vmem:[%s4365_s17] sm:$0xff]  ;;  %v1448_v13 = vmul.f32 %v3502_v9, %v4417_v35 }
  0x8b   : > { %v1444_v59 = vmul.f32 %v3494_v51, %v4417_v35  ;;  %v3521_v25 = vld [vmem:[%s4345_s26 + $0x38] sm:$0xff]   ;;  %v1017_v30 = vunpack.c.h.bf16 %v1000_v12  ;;  %s1740_s26 = sld [smem:[#allocation2]] }
  0x8c   : > { %3410 = vmatpush.xpose.msk.msra.mxu2 %vm612_vm1, %v1119_v53  ;;  %v1115_v53 = vld [vmem:[%s4370_s20] sm:$0xff] }
  0x8d   : > { %3347 = vmatpush.xpose.msk.msra.mxu0 %vm612_vm1, %v583_v39  ;;  %3534 = vmatpush.xpose.msk.msra.mxu3 %vm612_vm1, %v583_v39  ;;  %v1116_v39 = vld [vmem:[%s4370_s20 + $0x8] sm:$0xff] }
  0x8e   : > { %3379 = vmatpush.xpose.msk.msra.mxu1 %vm612_vm1, %v4711_v40  ;;  %1470 = vadd.xlane.f32.xlu0 %v1453_v41  ;;  %v4792_v41 = vld [vmem:[%s4355_s23 + $0x60] sm:$0xff] }
  0x8f   : > { %1468 = vadd.xlane.f32.xlu2 %v1452_v45  ;;  %1402 = vadd.xlane.f32.xlu1 %v1371_v47  ;;  %v3498_v45 = vunpack.c.l.bf16 %v3519_v33  ;;  %v1458_v47 = vsel %vm1105_vm10, %v1442_v26, 0.0  ;;  %v1016_v26 = vunpack.c.l.bf16 %v1000_v12 }
  0x90   : > { %3411 = vmatpush.xpose.msk.msra.mxu2 %vm612_vm1, %v1118_v0  ;;  %v4820_v0 = vld [vmem:[%s4355_s23 + $0x68] sm:$0xff] }
  0x91   : > { %3348 = vmatpush.xpose.msk.msra.mxu0 %vm612_vm1, %v582_v54  ;;  %3535 = vmatpush.xpose.msk.msra.mxu3 %vm612_vm1, %v582_v54  ;;  %v1446_v54 = vmul.f32 %v3498_v45, %v4417_v35  ;;  %v4869_v45 = vmul.f32 %v1017_v30, %v4417_v35 }
  0x92   : > { %3380 = vmatpush.xpose.msk.msra.mxu1 %vm612_vm1, %v4734_v55 }
  0x94   : > { %3412 = vmatpush.xpose.msk.msra.mxu2 %vm612_vm1, %v1117_v14 }
  0x95   : > { %3349 = vmatpush.xpose.msk.msra.mxu0 %vm612_vm1, %v581_v2  ;;  %3536 = vmatpush.xpose.msk.msra.mxu3 %vm612_vm1, %v581_v2  ;;  %v3503_v2 = vunpack.c.h.bf16 %v3520_v62 }
  0x96   : > { %3381 = vmatpush.xpose.msk.msra.mxu1 %vm612_vm1, %v4752_v3  ;;  %1476 = vadd.xlane.f32.xlu0 %v1456_v6 }
  0x97   : > { %1474 = vadd.xlane.f32.xlu2 %v1455_v10  ;;  %1472 = vadd.xlane.f32.xlu1 %v1454_v11  ;;  %v3499_v10 = vunpack.c.h.bf16 %v3519_v33  ;;  %v1449_v11 = vmul.f32 %v3503_v2, %v4417_v35  ;;  %v4847_v33 = vld [vmem:[%s4355_s23 + $0x70] sm:$0xff] }
  0x98   : > { %3413 = vmatpush.xpose.msk.msra.mxu2 %vm612_vm1, %v1116_v39  ;;  %v3506_v39 = vunpack.c.l.bf16 %v3521_v25 }
  0x99   : > { %3350 = vmatpush.xpose.msk.msra.mxu0 %vm612_vm1, %v580_v18  ;;  %3537 = vmatpush.xpose.msk.msra.mxu3 %vm612_vm1, %v580_v18  ;;  %v1447_v14 = vmul.f32 %v3499_v10, %v4417_v35  ;;  %v566_v18 = vld [vmem:[%s4355_s23 + $0x10] sm:$0xff] }
  0x9a   : > { %3382 = vmatpush.xpose.msk.msra.mxu1 %vm612_vm1, %v4775_v19  ;;  %v1450_v51 = vmul.f32 %v3506_v39, %v4417_v35 }
  0x9c   : > { %3351 = vmatmul.msk.f32.vlgmr.msra.gmra.mxu0 %vm612_vm1, %v564_v36  ;;  %3363 = vmatmul.msk.f32.vlgmr.msra.gmra.mxu3 %vm612_vm1, %v4792_v41 }
  0x9d   : > { %3538 = vmatpush.xpose.msk.msrb.mxu3 %vm612_vm1, %v4379_v20  ;;  %v3495_v20 = vunpack.c.h.bf16 %v3518_v38  ;;  %3383 = vmatmul.msk.f32.vlgmr.msra.gmra.mxu1 %vm612_vm1, %v564_v36  ;;  %v3507_v38 = vunpack.c.h.bf16 %v3521_v25  ;;  %v568_v25 = vld [vmem:[%s4355_s23 + $0x20] sm:$0xff] }
  0x9e   : > { %1482 = vadd.xlane.f32.xlu0 %v1459_v42  ;;  %3414 = vmatpush.xpose.msk.msra.mxu2 %vm612_vm1, %v1115_v53  ;;  %v4866_v42 = vmul.f32 %v1016_v26, %v4417_v35  ;;  %v920_v53 = vld [vmem:[%s4360_s12] sm:$0xff] }
  0x9f   : > { %1480 = vadd.xlane.f32.xlu2 %v1458_v47  ;;  %1478 = vadd.xlane.f32.xlu1 %v1457_v50  ;;  %v1445_v58 = vmul.f32 %v3495_v20, %v4417_v35  ;;  %v1002_v47 = vld [vmem:[%s4365_s17 + $0x10] sm:$0xff]  ;;  %v921_v50 = vld [vmem:[%s4360_s12 + $0x8] sm:$0xff]  ;;  %v1451_v20 = vmul.f32 %v3507_v38, %v4417_v35  ;;  %v936_v2 = vunpack.c.l.bf16 %v920_v53 }
  0xa0   : > { %v938_v62 = vunpack.c.l.bf16 %v921_v50 }
  0xa1   : > { %3539 = vmatpush.xpose.msk.msrb.mxu3 %vm612_vm1, %v4399_v27  ;;  %v1462_v27 = vsel %vm1109_vm12, %v1446_v54, 0.0  ;;  %3415 = vmatmul.msk.f32.vlgmr.msra.gmra.mxu2 %vm612_vm1, %v564_v36  ;;  %v1461_v6 = vsel %vm1108_vm13, %v1445_v58, 0.0  ;;  %v1464_v36 = vsel %vm1111_vm0, %v1448_v13, 0.0  ;;  %v567_v54 = vld [vmem:[%s4355_s23 + $0x18] sm:$0xff]  ;;  %v1020_v58 = vunpack.c.l.bf16 %v1002_v47 }
  0xa2   : > { %v4910_v13 = vmul.f32 %v936_v2, %v4417_v35 }
  0xa3   : > { %v4898_v9 = vmul.f32 %v1020_v58, %v4417_v35 }
  0xa4   : > { %3352 = vmatmul.msk.f32.gmra.mxu0 %vm612_vm1, %v565_v63  ;;  %3364 = vmatmul.msk.f32.gmra.mxu3 %vm612_vm1, %v4820_v0  ;;  %6830 = vst [vmem:[#allocation34_spill] sm:$0xff] %v4910_v13 }
  0xa5   : > { %3540 = vmatpush.xpose.msk.msrb.mxu3 %vm612_vm1, %v4426_v37  ;;  %v1460_v37 = vsel %vm1107_vm8, %v1444_v59, 0.0  ;;  %3384 = vmatmul.msk.f32.gmra.mxu1 %vm612_vm1, %v565_v63  ;;  %v1021_v59 = vunpack.c.h.bf16 %v1002_v47  ;;  %6826 = vst [vmem:[#allocation30_spill] sm:$0xff] %v4898_v9 }
  0xa6   : > { %1488 = vadd.xlane.f32.xlu0 %v1462_v27  ;;  %v939_v27 = vunpack.c.h.bf16 %v921_v50 }
  0xa7   : > { %1486 = vadd.xlane.f32.xlu2 %v1461_v6  ;;  %1484 = vadd.xlane.f32.xlu1 %v1460_v37  ;;  %v937_v6 = vunpack.c.h.bf16 %v920_v53  ;;  %v4901_v10 = vmul.f32 %v1021_v59, %v4417_v35  ;;  %v923_v53 = vld [vmem:[%s4360_s12 + $0x18] sm:$0xff] }
  0xa8   : > { %v4907_v12 = vmul.f32 %v939_v27, %v4417_v35  ;;  %v943_v27 = vunpack.c.h.bf16 %v923_v53 }
  0xa9   : > { %3541 = vmatpush.xpose.msk.msrb.mxu3 %vm612_vm1, %v4462_v52  ;;  %v1465_v52 = vsel %vm6606_vm15, %v1449_v11, 0.0  ;;  %3416 = vmatmul.msk.f32.gmra.mxu2 %vm612_vm1, %v565_v63  ;;  %v4882_v63 = vld [vmem:[%s4355_s23 + $0x78] sm:$0xff]  ;;  %vm6825_vm15 = vcmp.eq.s32.totalorder %v4612_v48, %v4392_v24  ;;  %6827 = vst [vmem:[#allocation31_spill] sm:$0xff] %v4901_v10  ;;  %v4904_v11 = vmul.f32 %v938_v62, %v4417_v35  ;;  %v942_v62 = vunpack.c.l.bf16 %v923_v53  ;;  %v1006_v53 = vld [vmem:[%s4365_s17 + $0x30] sm:$0xff]  ;;  %v932_v24 = vld [vmem:[%s4360_s12 + $0x60] sm:$0xff] }
  0xaa   : > { %v1466_v37 = vsel %vm6825_vm15, %v1450_v51, 0.0  ;;  %6829 = vst [vmem:[#allocation33_spill] sm:$0xff] %v4907_v12  ;;  %v2572_v26 = vmax.f32 %v4898_v9, %v4901_v10  ;;  %v1003_v51 = vld [vmem:[%s4365_s17 + $0x18] sm:$0xff] }
  0xab   : > { %6828 = vst [vmem:[#allocation32_spill] sm:$0xff] %v4904_v11  ;;  %v1023_v59 = vunpack.c.h.bf16 %v1003_v51  ;;  %v1007_v48 = vld [vmem:[%s4365_s17 + $0x38] sm:$0xff] }
  0xac   : > { %3353 = vmatmul.msk.f32.gmra.mxu0 %vm612_vm1, %v566_v18  ;;  %3365 = vmatmul.msk.f32.gmra.mxu3 %vm612_vm1, %v4847_v33 }
  0xad   : > { %3542 = vmatpush.xpose.msk.msrb.mxu3 %vm612_vm1, %v4489_v60  ;;  %v1463_v60 = vsel %vm1110_vm11, %v1447_v14, 0.0  ;;  %3385 = vmatmul.msk.f32.gmra.mxu1 %vm612_vm1, %v566_v18  ;;  %v922_v14 = vld [vmem:[%s4360_s12 + $0x10] sm:$0xff]  ;;  %v4961_v2 = vmul.f32 %v1023_v59, %v4417_v35 }
  0xae   : > { %1494 = vadd.xlane.f32.xlu0 %v1465_v52  ;;  %v940_v30 = vunpack.c.l.bf16 %v922_v14  ;;  %v941_v52 = vunpack.c.h.bf16 %v922_v14 }
  0xaf   : > { %1492 = vadd.xlane.f32.xlu2 %v1464_v36  ;;  %1490 = vadd.xlane.f32.xlu1 %v1463_v60  ;;  %v2038_v36 = vmax.f32 %v4904_v11, %v4907_v12  ;;  %6837 = vst [vmem:[#allocation41_spill] sm:$0xff] %v4961_v2 }
  0xb0   : > { %v4935_v47 = vmul.f32 %v941_v52, %v4417_v35  ;;  %v1004_v52 = vld [vmem:[%s4365_s17 + $0x20] sm:$0xff] }
  0xb1   : > { %3543 = vmatpush.xpose.msk.msrb.mxu3 %vm612_vm1, %v4522_v8  ;;  %v2566_v8 = vmax.f32 %v4866_v42, %v4869_v45  ;;  %3417 = vmatmul.msk.f32.gmra.mxu2 %vm612_vm1, %v566_v18  ;;  %v1001_v18 = vld [vmem:[%s4365_s17 + $0x8] sm:$0xff] }
  0xb2   : > { %v1018_v38 = vunpack.c.l.bf16 %v1001_v18  ;;  %v1019_v39 = vunpack.c.h.bf16 %v1001_v18  ;;  %6833 = vst [vmem:[#allocation37_spill] sm:$0xff] %v4935_v47  ;;  %v571_v18 = vld [vmem:[%s4355_s23 + $0x38] sm:$0xff] }
  0xb4   : > { %3354 = vmatmul.msk.f32.gmra.mxu0 %vm612_vm1, %v567_v54  ;;  %3366 = vmatmul.msk.f32.gmra.mxu3 %vm612_vm1, %v4882_v63  ;;  %v4938_v50 = vmul.f32 %v1018_v38, %v4417_v35  ;;  %v1024_v38 = vunpack.c.l.bf16 %v1004_v52 }
  0xb5   : > { %3544 = vmatpush.xpose.msk.msrb.mxu3 %vm612_vm1, %v4546_v15  ;;  %v1467_v15 = vsel %vm1114_vm14, %v1451_v20, 0.0  ;;  %3386 = vmatmul.msk.f32.gmra.mxu1 %vm612_vm1, %v567_v54  ;;  %v4941_v20 = vmul.f32 %v1019_v39, %v4417_v35  ;;  %v1025_v39 = vunpack.c.h.bf16 %v1004_v52 }
  0xb6   : > { %2567 = vmax.xlane.f32.xlu0 %v2566_v8  ;;  %6834 = vst [vmem:[#allocation38_spill] sm:$0xff] %v4938_v50  ;;  %v1022_v8 = vunpack.c.l.bf16 %v1003_v51  ;;  %v924_v51 = vld [vmem:[%s4360_s12 + $0x20] sm:$0xff]  ;;  %v5012_v59 = vmul.f32 %v1024_v38, %v4417_v35  ;;  %v1005_v38 = vld [vmem:[%s4365_s17 + $0x28] sm:$0xff] }
  0xb7   : > { %1498 = vadd.xlane.f32.xlu2 %v1467_v15  ;;  %1496 = vadd.xlane.f32.xlu1 %v1466_v37  ;;  %6835 = vst [vmem:[#allocation39_spill] sm:$0xff] %v4941_v20  ;;  %v2569_v58 = vmax.f32 %v4938_v50, %v4941_v20  ;;  %v4967_v15 = vmul.f32 %v943_v27, %v4417_v35  ;;  %v570_v37 = vld [vmem:[%s4355_s23 + $0x30] sm:$0xff] }
  0xb8   : > { %6845 = vst [vmem:[#allocation49_spill] sm:$0xff] %v5012_v59 }
  0xb9   : > { %3545 = vmatpush.xpose.msk.msrb.mxu3 %vm612_vm1, %v4579_v34  ;;  %v4913_v34 = vmul.f32 %v937_v6, %v4417_v35  ;;  %3418 = vmatmul.msk.f32.gmra.mxu2 %vm612_vm1, %v567_v54  ;;  %v569_v54 = vld [vmem:[%s4355_s23 + $0x28] sm:$0xff]  ;;  %v4964_v6 = vmul.f32 %v942_v62, %v4417_v35  ;;  %6839 = vst [vmem:[#allocation43_spill] sm:$0xff] %v4967_v15 }
  0xba   : > { %v5015_v62 = vmul.f32 %v1025_v39, %v4417_v35  ;;  %v928_v39 = vld [vmem:[%s4360_s12 + $0x40] sm:$0xff] }
  0xbb   : > { %6831 = vst [vmem:[#allocation35_spill] sm:$0xff] %v4913_v34  ;;  %v2035_v60 = vmax.f32 %v4910_v13, %v4913_v34  ;;  %v2044_v14 = vmax.f32 %v4964_v6, %v4967_v15 }
  0xbc   : > { %3355 = vmatmul.msk.f32.gmra.mxu0 %vm612_vm1, %v568_v25  ;;  %6838 = vst [vmem:[#allocation42_spill] sm:$0xff] %v4964_v6 }
  0xbd   : > { %3546 = vmatpush.xpose.msk.msrb.mxu3 %vm612_vm1, %v4606_v46  ;;  %3387 = vmatmul.msk.f32.gmra.mxu1 %vm612_vm1, %v568_v25  ;;  %v4932_v46 = vmul.f32 %v940_v30, %v4417_v35  ;;  %6846 = vst [vmem:[#allocation50_spill] sm:$0xff] %v5015_v62 }
  0xbe   : > { %2573 = vmax.xlane.f32.xlu0 %v2572_v26 }
  0xbf   : > { %6832 = vst [vmem:[#allocation36_spill] sm:$0xff] %v4932_v46  ;;  %2039 = vmax.xlane.f32.xlu2 %v2038_v36  ;;  %2036 = vmax.xlane.f32.xlu1 %v2035_v60  ;;  %v572_v60 = vld [vmem:[%s4355_s23 + $0x40] sm:$0xff] }
  0xc1   : > { %3547 = vmatpush.xpose.msk.msrb.mxu3 %vm612_vm1, %v4639_v61  ;;  %v2041_v61 = vmax.f32 %v4932_v46, %v4935_v47  ;;  %3419 = vmatmul.msk.f32.gmra.mxu2 %vm612_vm1, %v568_v25 }
  0xc4   : > { %3356 = vmatmul.msk.f32.gmra.mxu0 %vm612_vm1, %v569_v54 }
  0xc5   : > { %3548 = vmatpush.xpose.msk.msrb.mxu3 %vm612_vm1, %v4663_v7  ;;  %3388 = vmatmul.msk.f32.gmra.mxu1 %vm612_vm1, %v569_v54  ;;  %v4958_v7 = vmul.f32 %v1022_v8, %v4417_v35  ;;  %v945_v8 = vunpack.c.h.bf16 %v924_v51 }
  0xc7   : > { %6836 = vst [vmem:[#allocation40_spill] sm:$0xff] %v4958_v7  ;;  %2042 = vmax.xlane.f32.xlu2 %v2041_v61  ;;  %2570 = vmax.xlane.f32.xlu1 %v2569_v58  ;;  %v1028_v58 = vunpack.c.l.bf16 %v1006_v53  ;;  %v2883_v23 = vmax.f32 %v4938_v50, %v4958_v7 }
  0xc9   : > { %3549 = vmatpush.xpose.msk.msrb.mxu3 %vm612_vm1, %v4690_v22  ;;  %v2575_v22 = vmax.f32 %v4958_v7, %v4961_v2  ;;  %3420 = vmatmul.msk.f32.gmra.mxu2 %vm612_vm1, %v569_v54 }
  0xcc   : > { %3357 = vmatmul.msk.f32.gmra.mxu0 %vm612_vm1, %v570_v37 }
  0xcd   : > { %3550 = vmatpush.xpose.msk.msrb.mxu3 %vm612_vm1, %v4711_v40  ;;  %3389 = vmatmul.msk.f32.gmra.mxu1 %vm612_vm1, %v570_v37  ;;  %v925_v40 = vld [vmem:[%s4360_s12 + $0x28] sm:$0xff] }
  0xce   : > { %v946_v25 = vunpack.c.l.bf16 %v925_v40  ;;  %v947_v26 = vunpack.c.h.bf16 %v925_v40 }
  0xcf   : > { %2576 = vmax.xlane.f32.xlu2 %v2575_v22  ;;  %2045 = vmax.xlane.f32.xlu1 %v2044_v14  ;;  %v1029_v22 = vunpack.c.h.bf16 %v1006_v53  ;;  %v5025_v14 = vmul.f32 %v1028_v58, %v4417_v35  ;;  %v1027_v58 = vunpack.c.h.bf16 %v1005_v38 }
  0xd0   : > { %v4988_v30 = vmul.f32 %v946_v25, %v4417_v35 }
  0xd1   : > { %3551 = vmatpush.xpose.msk.msrb.mxu3 %vm612_vm1, %v4734_v55  ;;  %3421 = vmatmul.msk.f32.gmra.mxu2 %vm612_vm1, %v570_v37  ;;  %v4991_v55 = vmul.f32 %v947_v26, %v4417_v35  ;;  %v5022_v37 = vmul.f32 %v945_v8, %v4417_v35  ;;  %6849 = vst [vmem:[#allocation53_spill] sm:$0xff] %v5025_v14  ;;  %v573_v26 = vld [vmem:[%s4355_s23 + $0x48] sm:$0xff]  ;;  %v1026_v8 = vunpack.c.l.bf16 %v1005_v38 }
  0xd2   : > { %6840 = vst [vmem:[#allocation44_spill] sm:$0xff] %v4988_v30  ;;  %v5033_v25 = vmul.f32 %v1029_v22, %v4417_v35  ;;  %v952_v22 = vunpack.c.l.bf16 %v928_v39 }
  0xd3   : > { %6841 = vst [vmem:[#allocation45_spill] sm:$0xff] %v4991_v55  ;;  %v5052_v21 = vmul.f32 %v1026_v8, %v4417_v35 }
  0xd4   : > { %3358 = vmatmul.msk.f32.gmra.mxu0 %vm612_vm1, %v571_v18  ;;  %6848 = vst [vmem:[#allocation52_spill] sm:$0xff] %v5022_v37 }
  0xd5   : > { %3552 = vmatpush.xpose.msk.msrb.mxu3 %vm612_vm1, %v4752_v3  ;;  %3390 = vmatmul.msk.f32.gmra.mxu1 %vm612_vm1, %v571_v18  ;;  %v2050_v3 = vmax.f32 %v4988_v30, %v4991_v55  ;;  %6850 = vst [vmem:[#allocation54_spill] sm:$0xff] %v5033_v25 }
  0xd6   : > { %6854 = vst [vmem:[#allocation58_spill] sm:$0xff] %v5052_v21 }
  0xd7   : > { %2051 = vmax.xlane.f32.xlu2 %v2050_v3  ;;  %v2584_v3 = vmax.f32 %v5025_v14, %v5033_v25 }
  0xd9   : > { %3553 = vmatpush.xpose.msk.msrb.mxu3 %vm612_vm1, %v4775_v19  ;;  %v5001_v36 = vpop.xlane.xlu0 %1376  ;;  %v944_v19 = vunpack.c.l.bf16 %v924_v51  ;;  %3422 = vmatmul.msk.f32.gmra.mxu2 %vm612_vm1, %v571_v18  ;;  %v2578_v18 = vmax.f32 %v5012_v59, %v5015_v62  ;;  %v926_v51 = vld [vmem:[%s4360_s12 + $0x30] sm:$0xff] }
  0xda   : > { %6842 = vst [vmem:[#allocation46_spill] sm:$0xff] %v5001_v36  ;;  %v5006_v54 = vpop.xlane.xlu2 %1374  ;;  %v5008_v61 = vpop.xlane.xlu1 %1372  ;;  %v949_v38 = vunpack.c.h.bf16 %v926_v51  ;;  %v1030_v36 = vunpack.c.l.bf16 %v1007_v48 }
  0xdb   : > { %6843 = vst [vmem:[#allocation47_spill] sm:$0xff] %v5006_v54  ;;  %v5019_v27 = vmul.f32 %v944_v19, %v4417_v35  ;;  %2579 = vmax.xlane.f32.xlu1 %v2578_v18  ;;  %v953_v18 = vunpack.c.h.bf16 %v928_v39 }
  0xdc   : > { %3396 = vmatmul.msk.f32.vlgmr.msrb.gmra.mxu3 %vm612_vm1, %v4820_v0  ;;  %6844 = vst [vmem:[#allocation48_spill] sm:$0xff] %v5008_v61  ;;  %3359 = vmatmul.msk.f32.gmra.mxu0 %vm612_vm1, %v572_v60 }
  0xdd   : > { %6847 = vst [vmem:[#allocation51_spill] sm:$0xff] %v5019_v27  ;;  %3391 = vmatmul.msk.f32.gmra.mxu1 %vm612_vm1, %v572_v60  ;;  %v2047_v40 = vmax.f32 %v5019_v27, %v5022_v37 }
  0xdf   : > { %2048 = vmax.xlane.f32.xlu0 %v2047_v40  ;;  %2585 = vmax.xlane.f32.xlu2 %v2584_v3  ;;  %v948_v40 = vunpack.c.l.bf16 %v926_v51  ;;  %v5058_v3 = vmul.f32 %v952_v22, %v4417_v35  ;;  %v574_v22 = vld [vmem:[%s4355_s23 + $0x50] sm:$0xff] }
  0xe1   : > { %v5040_v52 = vpop.xlane.xlu0 %1382  ;;  %3423 = vmatmul.msk.f32.gmra.mxu2 %vm612_vm1, %v572_v60  ;;  %6856 = vst [vmem:[#allocation60_spill] sm:$0xff] %v5058_v3  ;;  %v5062_v60 = vmul.f32 %v953_v18, %v4417_v35  ;;  %v5065_v39 = vmul.f32 %v948_v40, %v4417_v35  ;;  %v927_v40 = vld [vmem:[%s4360_s12 + $0x38] sm:$0xff] }
  0xe2   : > { %6851 = vst [vmem:[#allocation55_spill] sm:$0xff] %v5040_v52  ;;  %v5045_v53 = vpop.xlane.xlu2 %1380  ;;  %v5047_v19 = vpop.xlane.xlu1 %1378  ;;  %v5055_v52 = vmul.f32 %v1027_v58, %v4417_v35  ;;  %v950_v56 = vunpack.c.l.bf16 %v927_v40  ;;  %v951_v61 = vunpack.c.h.bf16 %v927_v40 }
  0xe3   : > { %6852 = vst [vmem:[#allocation56_spill] sm:$0xff] %v5045_v53  ;;  %v5070_v53 = vmul.f32 %v949_v38, %v4417_v35  ;;  %v2059_v58 = vmax.f32 %v5058_v3, %v5062_v60 }
  0xe4   : > { %3397 = vmatmul.msk.f32.gmra.mxu3 %vm612_vm1, %v4847_v33  ;;  %6853 = vst [vmem:[#allocation57_spill] sm:$0xff] %v5047_v19  ;;  %3360 = vmatmul.msk.f32.gmra.mxu0 %vm612_vm1, %v573_v26  ;;  %v2581_v8 = vmax.f32 %v5052_v21, %v5055_v52  ;;  %v1009_v19 = vld [vmem:[%s4365_s17 + $0x48] sm:$0xff] }
  0xe5   : > { %6855 = vst [vmem:[#allocation59_spill] sm:$0xff] %v5055_v52  ;;  %3392 = vmatmul.msk.f32.gmra.mxu1 %vm612_vm1, %v573_v26  ;;  %v2053_v51 = vmax.f32 %v5065_v39, %v5070_v53  ;;  %v1035_v54 = vunpack.c.h.bf16 %v1009_v19 }
  0xe6   : > { %6857 = vst [vmem:[#allocation61_spill] sm:$0xff] %v5062_v60 }
  0xe7   : > { %6858 = vst [vmem:[#allocation62_spill] sm:$0xff] %v5065_v39  ;;  %2582 = vmax.xlane.f32.xlu0 %v2581_v8  ;;  %2060 = vmax.xlane.f32.xlu2 %v2059_v58  ;;  %v1034_v8 = vunpack.c.l.bf16 %v1009_v19  ;;  %v5104_v19 = vmul.f32 %v1030_v36, %v4417_v35  ;;  %v929_v36 = vld [vmem:[%s4360_s12 + $0x48] sm:$0xff] }
  0xe8   : > { %6859 = vst [vmem:[#allocation63_spill] sm:$0xff] %v5070_v53  ;;  %2054 = vmax.xlane.f32.xlu1 %v2053_v51  ;;  %v1031_v51 = vunpack.c.h.bf16 %v1007_v48  ;;  %v954_v5 = vunpack.c.l.bf16 %v929_v36 }
  0xe9   : > { %v5079_v18 = vpop.xlane.xlu0 %1388  ;;  %3424 = vmatmul.msk.f32.gmra.mxu2 %vm612_vm1, %v573_v26  ;;  %v5097_v58 = vmul.f32 %v1034_v8, %v4417_v35  ;;  %v5101_v26 = vmul.f32 %v1035_v54, %v4417_v35  ;;  %6867 = vst [vmem:[#allocation71_spill] sm:$0xff] %v5104_v19  ;;  %v575_v8 = vld [vmem:[%s4355_s23 + $0x58] sm:$0xff]  ;;  %v1008_v54 = vld [vmem:[%s4365_s17 + $0x40] sm:$0xff]  ;;  %s3431_s23 = sld [smem:[#allocation2 + $0x1]] }
  0xea   : > { %6860 = vst [vmem:[#allocation64_spill] sm:$0xff] %v5079_v18  ;;  %v5084_v16 = vpop.xlane.xlu2 %1386  ;;  %v5086_v38 = vpop.xlane.xlu1 %1384  ;;  %v5091_v18 = vmul.f32 %v950_v56, %v4417_v35  ;;  %v5109_v40 = vmul.f32 %v1031_v51, %v4417_v35  ;;  %v1032_v51 = vunpack.c.l.bf16 %v1008_v54  ;;  %v1033_v29 = vunpack.c.h.bf16 %v1008_v54 }
  0xeb   : > { %6861 = vst [vmem:[#allocation65_spill] sm:$0xff] %v5084_v16  ;;  %v5094_v16 = vmul.f32 %v951_v61, %v4417_v35  ;;  %v2593_v61 = vmax.f32 %v5097_v58, %v5101_v26 }
  0xec   : > { %3398 = vmatmul.msk.f32.gmra.mxu3 %vm612_vm1, %v4882_v63  ;;  %6862 = vst [vmem:[#allocation66_spill] sm:$0xff] %v5086_v38  ;;  %3361 = vmatmul.msk.f32.gmra.mxu0 %vm612_vm1, %v574_v22  ;;  %v2587_v48 = vmax.f32 %v5104_v19, %v5109_v40 }
  0xed   : > { %6863 = vst [vmem:[#allocation67_spill] sm:$0xff] %v5091_v18  ;;  %3393 = vmatmul.msk.f32.gmra.mxu1 %vm612_vm1, %v574_v22  ;;  %v2056_v56 = vmax.f32 %v5091_v18, %v5094_v16 }
  0xee   : > { %6864 = vst [vmem:[#allocation68_spill] sm:$0xff] %v5094_v16 }
  0xef   : > { %6865 = vst [vmem:[#allocation69_spill] sm:$0xff] %v5097_v58  ;;  %2057 = vmax.xlane.f32.xlu0 %v2056_v56  ;;  %2594 = vmax.xlane.f32.xlu2 %v2593_v61  ;;  %v5128_v56 = vmul.f32 %v1032_v51, %v4417_v35  ;;  %v955_v61 = vunpack.c.h.bf16 %v929_v36 }
  0xf0   : > { %6866 = vst [vmem:[#allocation70_spill] sm:$0xff] %v5101_v26  ;;  %2588 = vmax.xlane.f32.xlu1 %v2587_v48 }
  0xf1   : > { %6868 = vst [vmem:[#allocation72_spill] sm:$0xff] %v5109_v40  ;;  %v5116_v38 = vpop.xlane.xlu0 %1394  ;;  %3425 = vmatmul.msk.f32.gmra.mxu2 %vm612_vm1, %v574_v22  ;;  %v5141_v22 = vmul.f32 %v954_v5, %v4417_v35  ;;  %v930_v5 = vld [vmem:[%s4360_s12 + $0x50] sm:$0xff] }
  0xf2   : > { %6869 = vst [vmem:[#allocation73_spill] sm:$0xff] %v5116_v38  ;;  %v5121_v17 = vpop.xlane.xlu2 %1392  ;;  %v5123_v28 = vpop.xlane.xlu1 %1390  ;;  %v5131_v38 = vmul.f32 %v1033_v29, %v4417_v35  ;;  %v5146_v29 = vmul.f32 %v955_v61, %v4417_v35  ;;  %v956_v61 = vunpack.c.l.bf16 %v930_v5  ;;  %v957_v43 = vunpack.c.h.bf16 %v930_v5 }
  0xf3   : > { %6870 = vst [vmem:[#allocation74_spill] sm:$0xff] %v5121_v17  ;;  %v5134_v17 = vmul.f32 %v958_v1, %v4417_v35 }
  0xf4   : > { %6871 = vst [vmem:[#allocation75_spill] sm:$0xff] %v5123_v28  ;;  %3362 = vmatmul.msk.f32.gmra.mxu0 %vm612_vm1, %v575_v8  ;;  %v2590_v48 = vmax.f32 %v5128_v56, %v5131_v38  ;;  %v2062_v54 = vmax.f32 %v5141_v22, %v5146_v29  ;;  %v1012_v28 = vld [vmem:[%s4365_s17 + $0x60] sm:$0xff] }
  0xf5   : > { %6872 = vst [vmem:[#allocation76_spill] sm:$0xff] %v5128_v56  ;;  %3394 = vmatmul.msk.f32.gmra.mxu1 %vm612_vm1, %v575_v8  ;;  %v2068_v1 = vmax.f32 %v5134_v17, %v5138_v57  ;;  %v1040_v44 = vunpack.c.l.bf16 %v1012_v28  ;;  %v1038_v57 = vunpack.c.l.bf16 %v1011_v32 }
  0xf6   : > { %6873 = vst [vmem:[#allocation77_spill] sm:$0xff] %v5131_v38 }
  0xf7   : > { %6874 = vst [vmem:[#allocation78_spill] sm:$0xff] %v5134_v17  ;;  %2591 = vmax.xlane.f32.xlu0 %v2590_v48  ;;  %2069 = vmax.xlane.f32.xlu2 %v2068_v1  ;;  %v1041_v48 = vunpack.c.h.bf16 %v1012_v28  ;;  %v1036_v1 = vunpack.c.l.bf16 %v1010_v49  ;;  %v5171_v5 = vmul.f32 %v1040_v44, %v4417_v35  ;;  %v2882_v17 = vmax.f32 %v4866_v42, %v4898_v9 }
  0xf8   : > { %6876 = vst [vmem:[#allocation80_spill] sm:$0xff] %v5141_v22  ;;  %2063 = vmax.xlane.f32.xlu1 %v2062_v54  ;;  %v1037_v54 = vunpack.c.h.bf16 %v1010_v49  ;;  %v5208_v7 = vmul.f32 %v1038_v57, %v4417_v35  ;;  %v2885_v57 = vmax.f32 %v2883_v23, %v5052_v21  ;;  %v1013_v21 = vld [vmem:[%s4365_s17 + $0x68] sm:$0xff] }
  0xf9   : > { %6877 = vst [vmem:[#allocation81_spill] sm:$0xff] %v5146_v29  ;;  %v5152_v36 = vpop.xlane.xlu0 %1400  ;;  %3426 = vmatmul.msk.f32.gmra.mxu2 %vm612_vm1, %v575_v8  ;;  %v5174_v8 = vmul.f32 %v1041_v48, %v4417_v35  ;;  %v2903_v29 = vmax.f32 %v4869_v45, %v4901_v10 }
  0xfa   : > { %6878 = vst [vmem:[#allocation82_spill] sm:$0xff] %v5152_v36  ;;  %v5154_v4 = vpop.xlane.xlu2 %1398  ;;  %v5156_v51 = vpop.xlane.xlu1 %1396  ;;  %v5165_v36 = vmul.f32 %v956_v61, %v4417_v35  ;;  %v5179_v61 = vmul.f32 %v1036_v1, %v4417_v35  ;;  %v934_v1 = vld [vmem:[%s4360_s12 + $0x70] sm:$0xff] }
  0xfb   : > { %6879 = vst [vmem:[#allocation83_spill] sm:$0xff] %v5154_v4  ;;  %v5168_v4 = vmul.f32 %v957_v43, %v4417_v35  ;;  %v2602_v43 = vmax.f32 %v5171_v5, %v5174_v8 }
  0xfc   : > { %6880 = vst [vmem:[#allocation84_spill] sm:$0xff] %v5156_v51  ;;  %v5184_v51 = vmul.f32 %v1037_v54, %v4417_v35  ;;  %v2904_v54 = vmax.f32 %v4941_v20, %v4961_v2 }
  0xfd   : > { %3395 = vmatmul.msk.f32.gmra.mxu1 %vm612_vm1, %v4792_v41  ;;  %6881 = vst [vmem:[#allocation85_spill] sm:$0xff] %v5165_v36  ;;  %v2065_v28 = vmax.f32 %v5165_v36, %v5168_v4 }
  0xfe   : > { %6882 = vst [vmem:[#allocation86_spill] sm:$0xff] %v5168_v4  ;;  %v2596_v48 = vmax.f32 %v5179_v61, %v5184_v51 }
  0xff   : > { %6883 = vst [vmem:[#allocation87_spill] sm:$0xff] %v5171_v5  ;;  %2066 = vmax.xlane.f32.xlu0 %v2065_v28  ;;  %2603 = vmax.xlane.f32.xlu2 %v2602_v43  ;;  %v964_v28 = vunpack.c.l.bf16 %v934_v1  ;;  %v965_v43 = vunpack.c.h.bf16 %v934_v1 }
 0x100   : > { %6884 = vst [vmem:[#allocation88_spill] sm:$0xff] %v5174_v8  ;;  %2597 = vmax.xlane.f32.xlu1 %v2596_v48 }
 0x101   : > { %6885 = vst [vmem:[#allocation89_spill] sm:$0xff] %v5179_v61  ;;  %v5186_v31 = vpop.xlane.xlu0 %1470  ;;  %3427 = vmatmul.msk.f32.gmra.mxu2 %vm612_vm1, %v4792_v41  ;;  %v5217_v41 = vmul.f32 %v965_v43, %v4417_v35 }
 0x102   : > { %6886 = vst [vmem:[#allocation90_spill] sm:$0xff] %v5184_v51  ;;  %v5188_v44 = vpop.xlane.xlu2 %1468  ;;  %v5190_v49 = vpop.xlane.xlu1 %1402 }
 0x103   : > { %6887 = vst [vmem:[#allocation91_spill] sm:$0xff] %v5186_v31  ;;  %v1039_v31 = vunpack.c.h.bf16 %v1011_v32  ;;  %v5214_v32 = vmul.f32 %v964_v28, %v4417_v35 }
 0x104   : > { %6888 = vst [vmem:[#allocation92_spill] sm:$0xff] %v5188_v44  ;;  %v961_v44 = vunpack.c.h.bf16 %v932_v24 }
 0x105   : > { %6889 = vst [vmem:[#allocation93_spill] sm:$0xff] %v5190_v49  ;;  %v960_v49 = vunpack.c.l.bf16 %v932_v24  ;;  %v5211_v2 = vmul.f32 %v1039_v31, %v4417_v35  ;;  %v2906_v31 = vmax.f32 %v2904_v54, %v5055_v52  ;;  %v2077_v28 = vmax.f32 %v5214_v32, %v5217_v41  ;;  %v933_v54 = vld [vmem:[%s4360_s12 + $0x68] sm:$0xff]  ;;  %v1015_v52 = vld [vmem:[%s4365_s17 + $0x78] sm:$0xff] }
 0x106   : > { %6890 = vst [vmem:[#allocation94_spill] sm:$0xff] %v5208_v7  ;;  %v5223_v48 = vmul.f32 %v961_v44, %v4417_v35  ;;  %v2905_v44 = vmax.f32 %v2903_v29, %v5015_v62  ;;  %v962_v10 = vunpack.c.l.bf16 %v933_v54  ;;  %v963_v9 = vunpack.c.h.bf16 %v933_v54 }
 0x107   : > { %6891 = vst [vmem:[#allocation95_spill] sm:$0xff] %v5211_v2  ;;  %v5220_v24 = vmul.f32 %v960_v49, %v4417_v35  ;;  %v2599_v1 = vmax.f32 %v5208_v7, %v5211_v2  ;;  %v2884_v49 = vmax.f32 %v2882_v17, %v5012_v59  ;;  %2078 = vmax.xlane.f32.xlu2 %v2077_v28  ;;  %v1046_v17 = vunpack.c.l.bf16 %v1015_v52 }
 0x108   : > { %6892 = vst [vmem:[#allocation96_spill] sm:$0xff] %v5214_v32  ;;  %v2908_v32 = vmax.f32 %v2906_v31, %v5109_v40  ;;  %v1047_v29 = vunpack.c.h.bf16 %v1015_v52  ;;  %v5252_v28 = vmul.f32 %v963_v9, %v4417_v35  ;;  %v2907_v52 = vmax.f32 %v2905_v44, %v5033_v25 }
 0x109   : > { %6893 = vst [vmem:[#allocation97_spill] sm:$0xff] %v5217_v41  ;;  %v2071_v43 = vmax.f32 %v5220_v24, %v5223_v48  ;;  %v5233_v20 = vpop.xlane.xlu0 %1476  ;;  %2600 = vmax.xlane.f32.xlu0 %v2599_v1  ;;  %v2887_v41 = vmax.f32 %v2885_v57, %v5104_v19  ;;  %3428 = vmatmul.msk.f32.gmra.mxu2 %vm612_vm1, %v4820_v0  ;;  %v1042_v1 = vunpack.c.l.bf16 %v1013_v21 }
 0x10a   : > { %6894 = vst [vmem:[#allocation98_spill] sm:$0xff] %v5220_v24  ;;  %v5237_v50 = vpop.xlane.xlu2 %1474  ;;  %v5239_v23 = vpop.xlane.xlu1 %1472  ;;  %v5255_v57 = vmul.f32 %v1046_v17, %v4417_v35  ;;  %v5258_v31 = vmul.f32 %v1047_v29, %v4417_v35 }
 0x10b   : > { %6895 = vst [vmem:[#allocation99_spill] sm:$0xff] %v5223_v48  ;;  %2072 = vmax.xlane.f32.xlu1 %v2071_v43  ;;  %v5261_v54 = vmul.f32 %v1042_v1, %v4417_v35  ;;  %v2910_v43 = vmax.f32 %v2908_v32, %v5101_v26  ;;  %v2909_v32 = vmax.f32 %v2907_v52, %v5131_v38  ;;  %v935_v52 = vld [vmem:[%s4360_s12 + $0x78] sm:$0xff]  ;;  %s3432_s12 = sld [smem:[#allocation2 + $0x2]] }
 0x10c   : > { %6896 = vst [vmem:[#allocation100_spill] sm:$0xff] %v5233_v20  ;;  %v1043_v20 = vunpack.c.h.bf16 %v1013_v21  ;;  %v2886_v21 = vmax.f32 %v2884_v49, %v5025_v14  ;;  %v2611_v17 = vmax.f32 %v5255_v57, %v5258_v31 }
 0x10d   : > { %6897 = vst [vmem:[#allocation101_spill] sm:$0xff] %v5237_v50  ;;  %v2912_v50 = vmax.f32 %v2910_v43, %v5211_v2  ;;  %v967_v2 = vunpack.c.h.bf16 %v935_v52 }
 0x10e   : > { %6898 = vst [vmem:[#allocation102_spill] sm:$0xff] %v5239_v23  ;;  %v5249_v23 = vmul.f32 %v962_v10, %v4417_v35  ;;  %v5264_v0 = vmul.f32 %v1043_v20, %v4417_v35  ;;  %v2889_v10 = vmax.f32 %v2887_v41, %v5097_v58  ;;  %v2888_v1 = vmax.f32 %v2886_v21, %v5128_v56 }
 0x10f   : > { %6900 = vst [vmem:[#allocation104_spill] sm:$0xff] %v5252_v28  ;;  %2612 = vmax.xlane.f32.xlu2 %v2611_v17 }
 0x110   : > { %6899 = vst [vmem:[#allocation103_spill] sm:$0xff] %v5249_v23  ;;  %v2074_v9 = vmax.f32 %v5249_v23, %v5252_v28  ;;  %v2605_v29 = vmax.f32 %v5261_v54, %v5264_v0  ;;  %v2891_v44 = vmax.f32 %v2889_v10, %v5208_v7  ;;  %v2914_v21 = vmax.f32 %v2912_v50, %v5264_v0 }
 0x111   : > { %6901 = vst [vmem:[#allocation105_spill] sm:$0xff] %v5255_v57  ;;  %v5276_v20 = vpop.xlane.xlu0 %1482  ;;  %3429 = vmatmul.msk.f32.gmra.mxu2 %vm612_vm1, %v4847_v33 }
 0x112   : > { %6902 = vst [vmem:[#allocation106_spill] sm:$0xff] %v5258_v31  ;;  %2075 = vmax.xlane.f32.xlu0 %v2074_v9  ;;  %v5278_v49 = vpop.xlane.xlu2 %1480  ;;  %v5280_v41 = vpop.xlane.xlu1 %1478  ;;  %v2893_v17 = vmax.f32 %v2891_v44, %v5261_v54 }
 0x113   : > { %6903 = vst [vmem:[#allocation107_spill] sm:$0xff] %v5261_v54  ;;  %2606 = vmax.xlane.f32.xlu1 %v2605_v29  ;;  %v966_v29 = vunpack.c.l.bf16 %v935_v52 }
 0x114   : > { %6904 = vst [vmem:[#allocation108_spill] sm:$0xff] %v5264_v0  ;;  %v2351_v0 = vmax.f32 %v4910_v13, %v4932_v46 }
 0x115   : > { %6905 = vst [vmem:[#allocation109_spill] sm:$0xff] %v5276_v20  ;;  %v1014_v20 = vld [vmem:[%s4365_s17 + $0x70] sm:$0xff] }
 0x116   : > { %6906 = vst [vmem:[#allocation110_spill] sm:$0xff] %v5278_v49  ;;  %v1044_v9 = vunpack.c.l.bf16 %v1014_v20  ;;  %v1045_v26 = vunpack.c.h.bf16 %v1014_v20  ;;  %v2890_v49 = vmax.f32 %v2888_v1, %v5179_v61 }
 0x117   : > { %6907 = vst [vmem:[#allocation111_spill] sm:$0xff] %v5280_v41  ;;  %v2911_v41 = vmax.f32 %v2909_v32, %v5184_v51 }
 0x118   : > { %v5294_v10 = vmul.f32 %v1044_v9, %v4417_v35  ;;  %v5297_v33 = vmul.f32 %v1045_v26, %v4417_v35  ;;  %v2895_v9 = vmax.f32 %v2893_v17, %v5255_v57  ;;  %v2916_v26 = vmax.f32 %v2914_v21, %v5258_v31 }
 0x119   : > { %v5300_v43 = vpop.xlane.xlu0 %1488  ;;  %v5302_v20 = vpop.f32.mrf.mxu0  ;;  %3430 = vmatmul.msk.f32.gmra.mxu2 %vm612_vm1, %v4882_v63  ;;  %v2913_v52 = vmax.f32 %v2911_v41, %v5174_v8  ;;  %v5324_v17 = vmul.f32 %v967_v2, %v4417_v35  ;;  %v2352_v2 = vmax.f32 %v4904_v11, %v4964_v6  ;;  %vm2001_vm1 = vcmask 1040384  }
 0x11a   : > { %6908 = vst [vmem:[#allocation112_spill] sm:$0xff] %v5294_v10  ;;  %v5304_v1 = vpop.xlane.xlu2 %1486  ;;  %v2608_v44 = vmax.f32 %v5294_v10, %v5297_v33  ;;  %v839_v32 = vpop.f32.mrf.mxu1 }
 0x11b   : > { %6909 = vst [vmem:[#allocation113_spill] sm:$0xff] %v5297_v33  ;;  %v5308_v50 = vpop.xlane.xlu1 %1484  ;;  %v2915_v21 = vmax.f32 %v2913_v52, %v5297_v33 }
 0x11c   : > { %6910 = vst [vmem:[#allocation114_spill] sm:$0xff] %v5300_v43  ;;  %v2892_v43 = vmax.f32 %v2890_v49, %v5171_v5  ;;  %2609 = vmax.xlane.f32.xlu0 %v2608_v44 }
 0x11d   : > { %6911 = vst [vmem:[#allocation115_spill] sm:$0xff] %v5304_v1  ;;  %v5317_v1 = vmul.f32 %v966_v29, %v4417_v35  ;;  %v2917_v44 = vmax.f32 %v2915_v21, %v2916_v26  ;;  %v2353_v29 = vmax.f32 %v2351_v0, %v5019_v27 }
 0x11e   : > { %6912 = vst [vmem:[#allocation116_spill] sm:$0xff] %v5308_v50  ;;  %v2372_v50 = vmax.f32 %v4913_v34, %v4935_v47  ;;  %v2894_v63 = vmax.f32 %v2892_v43, %v5294_v10  ;;  %v2373_v43 = vmax.f32 %v4907_v12, %v4967_v15 }
 0x11f   : > { %6913 = vst [vmem:[#allocation117_spill] sm:$0xff] %v5317_v1  ;;  %v2080_v49 = vmax.f32 %v5317_v1, %v5324_v17  ;;  %v2918_v57 = vrot.slane %v2917_v44, 4  ;;  %v2355_v0 = vmax.f32 %v2353_v29, %v5065_v39 }
 0x120   : > { %6914 = vst [vmem:[#allocation118_spill] sm:$0xff] %v5324_v17  ;;  %v2896_v41 = vmax.f32 %v2894_v63, %v2895_v9  ;;  %v2374_v31 = vmax.f32 %v2372_v50, %v5022_v37 }
 0x121   : > { %v5332_v46 = vpop.xlane.xlu0 %1494  ;;  %2081 = vmax.xlane.f32.xlu1 %v2080_v49  ;;  %v777_v26 = vpop.f32.mrf.mxu0  ;;  %v2919_v21 = vmax.f32 %v2917_v44, %v2918_v57  ;;  %v2354_v49 = vmax.f32 %v2352_v2, %v4988_v30  ;;  %v2357_v27 = vmax.f32 %v2355_v0, %v5058_v3 }
 0x122   : > { %6915 = vst [vmem:[#allocation119_spill] sm:$0xff] %v5332_v46  ;;  %v5338_v47 = vpop.xlane.xlu2 %1492  ;;  %v2897_v52 = vrot.slane %v2896_v41, 4  ;;  %v2376_v50 = vmax.f32 %v2374_v31, %v5070_v53  ;;  %v842_v63 = vpop.f32.mrf.mxu1  ;;  %v2375_v46 = vmax.f32 %v2373_v43, %v4991_v55 }
 0x123   : > { %6916 = vst [vmem:[#allocation120_spill] sm:$0xff] %v5338_v47  ;;  %v5340_v17 = vpop.xlane.xlu1 %1490  ;;  %v2359_v43 = vmax.f32 %v2357_v27, %v5165_v36 }
 0x124   : > { %6917 = vst [vmem:[#allocation121_spill] sm:$0xff] %v5340_v17  ;;  %v2898_v9 = vmax.f32 %v2896_v41, %v2897_v52  ;;  %v2378_v47 = vmax.f32 %v2376_v50, %v5062_v60  ;;  %v2920_v17 = vrot.slane %v2919_v21, 2  ;;  %v2356_v41 = vmax.f32 %v2354_v49, %v5091_v18  ;;  %v6921_v60 = vld [vmem:[#allocation81_spill] sm:$0xff] }
 0x125   : > { %v2377_v29 = vmax.f32 %v2375_v46, %v5094_v16  ;;  %v5371_v27 = vmax.f32 %v2359_v43, %v5220_v24 }
 0x126   : > { %v2899_v37 = vrot.slane %v2898_v9, 2  ;;  %v2380_v0 = vmax.f32 %v2378_v47, %v5168_v4  ;;  %v2921_v50 = vmax.f32 %v2919_v21, %v2920_v17  ;;  %v2358_v49 = vmax.f32 %v2356_v41, %v5141_v22  ;;  %v6927_v41 = vld [vmem:[#allocation79_spill] sm:$0xff] }
 0x127   : > { %v2379_v46 = vmax.f32 %v2377_v29, %v6921_v60  ;;  %v5416_v22 = vmul.f32 %v4417_v35, %v777_v26 }
 0x128   : > { %v2900_v2 = vmax.f32 %v2898_v9, %v2899_v37  ;;  %v5374_v47 = vmax.f32 %v2380_v0, %v5223_v48  ;;  %v2922_v9 = vrot.slane %v2921_v50, 1  ;;  %v6931_v48 = vld [vmem:[#allocation31_spill] sm:$0xff] }
 0x129   : > { %v5348_v15 = vpop.xlane.xlu0 %2567  ;;  %v780_v3 = vpop.f32.mrf.mxu0  ;;  %v2381_v29 = vmax.f32 %v2379_v46, %v6927_v41  ;;  %6936 = vst [vmem:[#allocation131_spill] sm:$0xff] %v5416_v22 }
 0x12a   : > { %6918 = vst [vmem:[#allocation122_spill] sm:$0xff] %v5348_v15  ;;  %v5352_v31 = vpop.xlane.xlu2 %1498  ;;  %v2614_v57 = vsub.f32 %v4866_v42, %v5348_v15  ;;  %v2615_v44 = vsub.f32 %v4869_v45, %v5348_v15  ;;  %v845_v16 = vpop.f32.mrf.mxu1  ;;  %v2901_v37 = vrot.slane %v2900_v2, 1  ;;  %v5391_v0 = vmul.f32 %v4417_v35, %v780_v3 }
 0x12b   : > { %6919 = vst [vmem:[#allocation123_spill] sm:$0xff] %v5352_v31  ;;  %v5354_v52 = vpop.xlane.xlu1 %1496  ;;  %v5365_v31 = vmul.f32 %v4417_v35, %v839_v32  ;;  %v5380_v32 = vmul.f32 %v4417_v35, %v5302_v20  ;;  %v5396_v24 = vmul.f32 %v4417_v35, %v845_v16  ;;  %v5406_v3 = vmax.f32 %v2921_v50, %v2922_v9 }
 0x12c   : > { %6920 = vst [vmem:[#allocation124_spill] sm:$0xff] %v5354_v52  ;;  %v5368_v52 = vmul.f32 %v4417_v35, %v842_v63  ;;  %v2646_v18 = vmul.f32 1.442695, %v2614_v57  ;;  %v2648_v15 = vmul.f32 1.442695, %v2615_v44  ;;  %v6926_v63 = vld [vmem:[#allocation78_spill] sm:$0xff]  ;;  %v5402_v41 = vmax.f32 %v2900_v2, %v2901_v37 }
 0x12d   : > { %6922 = vst [vmem:[#allocation125_spill] sm:$0xff] %v5365_v31  ;;  %v2360_v21 = vmax.f32 %v2358_v49, %v6926_v63  ;;  %v6928_v57 = vld [vmem:[#allocation30_spill] sm:$0xff]  ;;  %v5419_v2 = vmax.f32 %v2381_v29, %v5252_v28 }
 0x12e   : > { %6923 = vst [vmem:[#allocation126_spill] sm:$0xff] %v5368_v52  ;;  %v1838_v43 = vmax.f32 %v5365_v31, %v5368_v52  ;;  %3613 = vpow2.f32 %v2646_v18  ;;  %v6934_v18 = vld [vmem:[#allocation96_spill] sm:$0xff]  ;;  %v6937_v28 = vld [vmem:[#allocation38_spill] sm:$0xff] }
 0x12f   : > { %6925 = vst [vmem:[#allocation128_spill] sm:$0xff] %v5380_v32  ;;  %3615 = vpow2.f32 %v2648_v15  ;;  %v5413_v15 = vmax.f32 %v2360_v21, %v5249_v23  ;;  %v2924_v21 = vsub.f32 %v4866_v42, %v5402_v41  ;;  %v2926_v9 = vsub.f32 %v6937_v28, %v5402_v41 }
 0x130   : > { %6930 = vst [vmem:[#allocation129_spill] sm:$0xff] %v5391_v0  ;;  %v5426_v36 = vmax.f32 %v5396_v24, %v1838_v43  ;;  %v6938_v43 = vld [vmem:[#allocation39_spill] sm:$0xff]  ;;  %v2928_v42 = vsub.f32 %v6928_v57, %v5402_v41 }
 0x131   : > { %v5376_v17 = vpop.xlane.xlu0 %2573  ;;  %6932 = vst [vmem:[#allocation31_spill] sm:$0xff] %v5396_v24  ;;  %v783_v26 = vpop.f32.mrf.mxu0 }
 0x132   : > { %6924 = vst [vmem:[#allocation127_spill] sm:$0xff] %v5376_v17  ;;  %v2618_v44 = vsub.f32 %v6928_v57, %v5376_v17  ;;  %v5386_v4 = vpop.xlane.xlu2 %2039  ;;  %v2619_v20 = vsub.f32 %v6931_v48, %v5376_v17 }
 0x133   : > { %6929 = vst [vmem:[#allocation30_spill] sm:$0xff] %v5386_v4  ;;  %v2085_v49 = vsub.f32 %v4904_v11, %v5386_v4  ;;  %v5400_v46 = vpop.xlane.xlu1 %2036  ;;  %v2086_v63 = vsub.f32 %v4907_v12, %v5386_v4  ;;  %v848_v4 = vpop.f32.mrf.mxu1  ;;  %v5447_v12 = vmul.f32 %v4417_v35, %v783_v26  ;;  %v2960_v11 = vmul.f32 1.442695, %v2926_v9  ;;  %v6943_v26 = vld [vmem:[#allocation58_spill] sm:$0xff] }
 0x134   : > { %6933 = vst [vmem:[#allocation130_spill] sm:$0xff] %v5400_v46  ;;  %v2654_v60 = vmul.f32 1.442695, %v2618_v44  ;;  %v2656_v37 = vmul.f32 1.442695, %v2619_v20  ;;  %v2083_v50 = vsub.f32 %v4910_v13, %v5400_v46  ;;  %v3614_v44 = vpop.eup %3613  ;;  %v2084_v29 = vsub.f32 %v4913_v34, %v5400_v46  ;;  %v6939_v46 = vld [vmem:[#allocation40_spill] sm:$0xff] }
 0x135   : > { %v2119_v16 = vmul.f32 1.442695, %v2085_v49  ;;  %v2121_v23 = vmul.f32 1.442695, %v2086_v63  ;;  %v2925_v20 = vsub.f32 %v4869_v45, %v5406_v3  ;;  %v3616_v53 = vpop.eup %3615  ;;  %v2927_v49 = vsub.f32 %v6938_v43, %v5406_v3  ;;  %v6940_v45 = vld [vmem:[#allocation41_spill] sm:$0xff]  ;;  %6941 = vst [vmem:[#allocation38_spill] sm:$0xff] %v5447_v12 }
 0x136   : > { %3617 = vpow2.f32 %v2654_v60  ;;  %v2929_v63 = vsub.f32 %v6931_v48, %v5406_v3  ;;  %v2115_v39 = vmul.f32 1.442695, %v2083_v50  ;;  %v2930_v55 = vsub.f32 %v6939_v46, %v5402_v41 }
 0x137   : > { %3619 = vpow2.f32 %v2656_v37  ;;  %v2931_v30 = vsub.f32 %v6940_v45, %v5406_v3  ;;  %v5450_v60 = vmul.f32 %v4417_v35, %v848_v4  ;;  %v2956_v34 = vmul.f32 1.442695, %v2924_v21  ;;  %v6944_v4 = vld [vmem:[#allocation59_spill] sm:$0xff] }
 0x138   : > { %3621 = vpow2.f32 %v2119_v16  ;;  %v2117_v57 = vmul.f32 1.442695, %v2084_v29  ;;  %v2710_v48 = vadd.f32 %v3616_v53, %v3614_v44  ;;  %v2932_v37 = vsub.f32 %v5012_v59, %v5402_v41 }
 0x139   : > { %6942 = vst [vmem:[#allocation39_spill] sm:$0xff] %v5450_v60  ;;  %3623 = vpow2.f32 %v2121_v23  ;;  %v2933_v50 = vsub.f32 %v5015_v62, %v5406_v3  ;;  %v2964_v13 = vmul.f32 1.442695, %v2928_v42  ;;  %v2934_v24 = vsub.f32 %v6943_v26, %v5402_v41 }
 0x13a   : > { %3625 = vpow2.f32 %v2956_v34  ;;  %v2935_v16 = vsub.f32 %v6944_v4, %v5406_v3  ;;  %v2958_v21 = vmul.f32 1.442695, %v2925_v20  ;;  %2711 = vadd.xlane.f32.xlu2 %v2710_v48  ;;  %v2936_v9 = vsub.f32 %v5025_v14, %v5402_v41 }
 0x13b   : > { %3627 = vpow2.f32 %v2115_v39  ;;  %v2968_v34 = vmul.f32 1.442695, %v2930_v55  ;;  %v2937_v29 = vsub.f32 %v5033_v25, %v5406_v3  ;;  %v2962_v20 = vmul.f32 1.442695, %v2927_v49  ;;  %v5478_v25 = vpop.f32.mrf.mxu0  ;;  %v5480_v49 = vpop.f32.mrf.mxu1 }
 0x13c   : > { %v5460_v23 = vpop.eup %3617  ;;  %3629 = vpow2.f32 %v2960_v11  ;;  %v2938_v48 = vsub.f32 %v5104_v19, %v5402_v41  ;;  %v2939_v53 = vsub.f32 %v5109_v40, %v5406_v3  ;;  %v2972_v14 = vmul.f32 1.442695, %v2932_v37 }
 0x13d   : > { %v3620_v44 = vpop.eup %3619  ;;  %3631 = vpow2.f32 %v2117_v57  ;;  %v2940_v55 = vsub.f32 %v5128_v56, %v5402_v41  ;;  %v2941_v57 = vsub.f32 %v5131_v38, %v5406_v3  ;;  %v2966_v39 = vmul.f32 1.442695, %v2929_v63 }
 0x13e   : > { %v3622_v42 = vpop.eup %3621  ;;  %3633 = vpow2.f32 %v2964_v13  ;;  %v2942_v19 = vsub.f32 %v5097_v58, %v5402_v41  ;;  %v6945_v13 = vld [vmem:[#allocation70_spill] sm:$0xff]  ;;  %v2976_v40 = vmul.f32 1.442695, %v2934_v24  ;;  %v2944_v56 = vsub.f32 %v5179_v61, %v5402_v41  ;;  %v6946_v58 = vld [vmem:[#allocation95_spill] sm:$0xff] }
 0x13f   : > { %v3624_v11 = vpop.eup %3623  ;;  %3635 = vpow2.f32 %v2958_v21  ;;  %v2943_v37 = vsub.f32 %v6945_v13, %v5406_v3  ;;  %v2970_v21 = vmul.f32 1.442695, %v2931_v30  ;;  %v2946_v62 = vsub.f32 %v5208_v7, %v5402_v41  ;;  %v5500_v7 = vpop.f32.mrf.mxu3 }
 0x140   : > { %v3626_v4 = vpop.eup %3625  ;;  %3637 = vpow2.f32 %v2968_v34  ;;  %v2947_v59 = vsub.f32 %v6946_v58, %v5406_v3  ;;  %v2980_v13 = vmul.f32 1.442695, %v2936_v9  ;;  %v2948_v24 = vsub.f32 %v5171_v5, %v5402_v41  ;;  %6947 = vst [vmem:[#allocation40_spill] sm:$0xff] %v5500_v7  ;;  %v6948_v9 = vld [vmem:[#allocation108_spill] sm:$0xff] }
 0x141   : > { %v3628_v26 = vpop.eup %3627  ;;  %3639 = vpow2.f32 %v2962_v20  ;;  %v2974_v61 = vmul.f32 1.442695, %v2933_v50  ;;  %v2949_v30 = vsub.f32 %v5174_v8, %v5406_v3  ;;  %v2950_v20 = vsub.f32 %v5261_v54, %v5402_v41  ;;  %v5504_v50 = vpop.f32.mrf.mxu2 }
 0x142   : > { %v3630_v38 = vpop.eup %3629  ;;  %3641 = vpow2.f32 %v2972_v14  ;;  %v2984_v63 = vmul.f32 1.442695, %v2938_v48  ;;  %v2951_v58 = vsub.f32 %v6948_v9, %v5406_v3  ;;  %v2978_v5 = vmul.f32 1.442695, %v2935_v16  ;;  %v5510_v16 = vpop.xlane.xlu2 %2042 }
 0x143   : > { %v3632_v34 = vpop.eup %3631  ;;  %3643 = vpow2.f32 %v2966_v39  ;;  %v3020_v52 = vadd.f32 %v3630_v38, %v3626_v4  ;;  %v2952_v4 = vsub.f32 %v5294_v10, %v5402_v41  ;;  %v2953_v54 = vsub.f32 %v5297_v33, %v5406_v3  ;;  %6949 = vst [vmem:[#allocation41_spill] sm:$0xff] %v5510_v16  ;;  %v6950_v10 = vld [vmem:[#allocation105_spill] sm:$0xff]  ;;  %v5515_v33 = vpop.f32.mrf.mxu0 }
 0x144   : > { %v3634_v12 = vpop.eup %3633  ;;  %3645 = vpow2.f32 %v2976_v40  ;;  %v2988_v40 = vmul.f32 1.442695, %v2940_v55  ;;  %v2982_v8 = vmul.f32 1.442695, %v2937_v29  ;;  %v2992_v7 = vmul.f32 1.442695, %v2942_v19 }
 0x145   : > { %v3636_v14 = vpop.eup %3635  ;;  %3647 = vpow2.f32 %v2970_v21  ;;  %v3021_v39 = vadd.f32 %v3634_v12, %v3020_v52  ;;  %v2716_v12 = vadd.f32 %v3620_v44, %v5460_v23  ;;  %v2182_v52 = vadd.f32 %v3624_v11, %v3622_v42  ;;  %v6951_v29 = vld [vmem:[#allocation106_spill] sm:$0xff] }
 0x146   : > { %v3638_v38 = vpop.eup %3637  ;;  %3649 = vpow2.f32 %v2980_v13  ;;  %v2179_v21 = vadd.f32 %v3632_v34, %v3628_v26  ;;  %v2954_v17 = vsub.f32 %v6950_v10, %v5402_v41  ;;  %v2986_v13 = vmul.f32 1.442695, %v2939_v53 }
 0x147   : > { %v3640_v48 = vpop.eup %3639  ;;  %3651 = vpow2.f32 %v2974_v61  ;;  %v3022_v22 = vadd.f32 %v3638_v38, %v3021_v39  ;;  %v5517_v61 = vpop.f32.mrf.mxu1  ;;  %v2990_v39 = vmul.f32 1.442695, %v2941_v57  ;;  %v2996_v23 = vmul.f32 1.442695, %v2944_v56  ;;  %2717 = vadd.xlane.f32.xlu2 %v2716_v12  ;;  %2183 = vadd.xlane.f32.xlu1 %v2182_v52 }
 0x148   : > { %v3642_v9 = vpop.eup %3641  ;;  %3653 = vpow2.f32 %v2984_v63  ;;  %v2955_v63 = vsub.f32 %v6951_v29, %v5406_v3  ;;  %v2994_v44 = vmul.f32 1.442695, %v2943_v37  ;;  %2180 = vadd.xlane.f32.xlu0 %v2179_v21  ;;  %v6952_v53 = vsub.f32 %v5184_v51, %v5406_v3 }
 0x149   : > { %v3644_v6 = vpop.eup %3643  ;;  %3655 = vpow2.f32 %v2978_v5  ;;  %v3023_v55 = vadd.f32 %v3642_v9, %v3022_v22  ;;  %v3041_v5 = vadd.f32 %v3640_v48, %v3636_v14  ;;  %v3000_v34 = vmul.f32 1.442695, %v2946_v62  ;;  %v5524_v48 = vpop.f32.mrf.mxu3 }
 0x14a   : > { %v3646_v19 = vpop.eup %3645  ;;  %3657 = vpow2.f32 %v2988_v40  ;;  %v2998_v11 = vmul.f32 1.442695, %v6952_v53  ;;  %v3002_v9 = vmul.f32 1.442695, %v2947_v59  ;;  %v3004_v56 = vmul.f32 1.442695, %v2948_v24  ;;  %v5531_v24 = vpop.f32.mrf.mxu2 }
 0x14b   : > { %v3648_v26 = vpop.eup %3647  ;;  %3659 = vpow2.f32 %v2982_v8  ;;  %v3024_v42 = vadd.f32 %v3646_v19, %v3023_v55  ;;  %v3042_v40 = vadd.f32 %v3644_v6, %v3041_v5  ;;  %v3006_v8 = vmul.f32 1.442695, %v2949_v30 }
 0x14c   : > { %v3650_v22 = vpop.eup %3649  ;;  %3661 = vpow2.f32 %v2992_v7  ;;  %v3008_v37 = vmul.f32 1.442695, %v2950_v20  ;;  %v3010_v14 = vmul.f32 1.442695, %v2951_v58  ;;  %v6953_v7 = vlaneseq  ;;  %v6956_v58 = vld [vmem:[#allocation36_spill] sm:$0xff] }
 0x14d   : > { %v3652_v38 = vpop.eup %3651  ;;  %3663 = vpow2.f32 %v2986_v13  ;;  %v3025_v57 = vadd.f32 %v3650_v22, %v3024_v42  ;;  %v3012_v59 = vmul.f32 1.442695, %v2952_v4  ;;  %v3043_v13 = vadd.f32 %v3648_v26, %v3042_v40 }
 0x14e   : > { %v3654_v12 = vpop.eup %3653  ;;  %3665 = vpow2.f32 %v2996_v23  ;;  %vm5527_vm15 = vcmp.lt.s32.totalorder %v6953_v7, 256  ;;  %v5533_v55 = vmul.f32 1.442695, %v2953_v54  ;;  %v3016_v30 = vmul.f32 1.442695, %v2954_v17  ;;  %v6960_v17 = vld [vmem:[#allocation37_spill] sm:$0xff] }
 0x14f   : > { %v3656_v52 = vpop.eup %3655  ;;  %3667 = vpow2.f32 %v2990_v39  ;;  %v3026_v62 = vadd.f32 %v3654_v12, %v3025_v57  ;;  %v2087_v20 = vsub.f32 %v6956_v58, %v5510_v16  ;;  %v5537_v23 = vmul.f32 1.442695, %v2955_v63  ;;  %v5539_v39 = vpop.xlane.xlu1 %2570 }
 0x150   : > { %v3658_v6 = vpop.eup %3657  ;;  %3669 = vpow2.f32 %v3000_v34  ;;  %v3044_v5 = vadd.f32 %v3652_v38, %v3043_v13  ;;  %6957 = vst [vmem:[#allocation36_spill] sm:$0xff] %v5539_v39  ;;  %v5543_v26 = vmul.f32 %v4417_v35, %v5478_v25  ;;  %v5547_v54 = vmul.f32 %v4417_v35, %v5480_v49  ;;  %v5553_v38 = vld [vmem:[#allocation3 + $0x4] sm:$0x3]  ;;  %v792_v57 = vpop.f32.mrf.mxu0 }
 0x151   : > { %v3660_v19 = vpop.eup %3659  ;;  %3671 = vpow2.f32 %v2994_v44  ;;  %v3027_v42 = vadd.f32 %v3658_v6, %v3026_v62  ;;  %v2088_v22 = vsub.f32 %v6960_v17, %v5510_v16  ;;  %v5551_v44 = vpop.xlane.xlu2 %2576  ;;  %v2123_v49 = vmul.f32 1.442695, %v2087_v20 }
 0x152   : > { %v3662_v4 = vpop.eup %3661  ;;  %3673 = vpow2.f32 %v3004_v56  ;;  %6958 = vst [vmem:[#allocation132_spill] sm:$0xff] %v5543_v26  ;;  %v3045_v34 = vadd.f32 %v3656_v52, %v3044_v5  ;;  %v3066_v56 = vrot.slane %v5406_v3, 7  ;;  %v5556_v25 = vpop.f32.mrf.mxu1  ;;  %v2616_v12 = vsub.f32 %v6937_v28, %v5539_v39 }
 0x153   : > { %6959 = vst [vmem:[#allocation133_spill] sm:$0xff] %v5547_v54  ;;  %v3664_v63 = vpop.eup %3663  ;;  %3675 = vpow2.f32 %v2998_v11  ;;  %v3028_v53 = vadd.f32 %v3662_v4, %v3027_v42  ;;  %v2617_v7 = vsub.f32 %v6938_v43, %v5539_v39  ;;  %v2620_v20 = vsub.f32 %v6939_v46, %v5551_v44 }
 0x154   : > { %6961 = vst [vmem:[#allocation37_spill] sm:$0xff] %v5551_v44  ;;  %v3666_v40 = vpop.eup %3665  ;;  %3677 = vpow2.f32 %v3008_v37  ;;  %v3046_v52 = vadd.f32 %v3660_v19, %v3045_v34  ;;  %v3067_v13 = vsel %vm2001_vm1, %v5402_v41, %v3066_v56  ;;  %v2125_v37 = vmul.f32 1.442695, %v2088_v22  ;;  %v5588_v56 = vpop.f32.mrf.mxu2 }
 0x155   : > { %v3668_v62 = vpop.eup %3667  ;;  %3679 = vpow2.f32 %v3002_v9  ;;  %v3029_v11 = vadd.f32 %v3666_v40, %v3028_v53  ;;  %v5565_v42 = vmax.f32 %v5553_v38, %v3067_v13  ;;  %v2621_v9 = vsub.f32 %v6940_v45, %v5551_v44  ;;  %v5586_v45 = vpop.f32.mrf.mxu3 }
 0x156   : > { %v3670_v6 = vpop.eup %3669  ;;  %3681 = vpow2.f32 %v3012_v59  ;;  %v3047_v43 = vadd.f32 %v3664_v63, %v3046_v52  ;;  %v6962_v59 = vmax.f32 %v5380_v32, %v5391_v0  ;;  %v6963_v46 = vmax.f32 %v5450_v60, %v5426_v36 }
 0x157   : > { %v3672_v28 = vpop.eup %3671  ;;  %3683 = vpow2.f32 %v3006_v8  ;;  %v3030_v5 = vadd.f32 %v3670_v6, %v3029_v11  ;;  %3096 = vst.msk [vmem:[#allocation3 + $0x4] sm:$0x3] %vm5527_vm15, %v5565_v42  ;;  %v2650_v22 = vmul.f32 1.442695, %v2616_v12  ;;  %v2652_v34 = vmul.f32 1.442695, %v2617_v7 }
 0x158   : > { %v3674_v19 = vpop.eup %3673  ;;  %3685 = vpow2.f32 %v3016_v30  ;;  %v5578_v4 = vmax.f32 %v6962_v59, %v5543_v26  ;;  %v5584_v8 = vmax.f32 %v5547_v54, %v6963_v46  ;;  %v3048_v53 = vadd.f32 %v3668_v62, %v3047_v43 }
 0x159   : > { %v3676_v30 = vpop.eup %3675  ;;  %3687 = vpow2.f32 %v3010_v14  ;;  %v3031_v63 = vadd.f32 %v3674_v19, %v3030_v5  ;;  %v2658_v11 = vmul.f32 1.442695, %v2620_v20  ;;  %v5591_v52 = vmul.f32 %v4417_v35, %v792_v57 }
 0x15a   : > { %v3678_v40 = vpop.eup %3677  ;;  %3689 = vpow2.f32 %v2123_v49  ;;  %v3049_v6 = vadd.f32 %v3672_v28, %v3048_v53  ;;  %v2660_v59 = vmul.f32 1.442695, %v2621_v9  ;;  %v2364_v7 = vmax.f32 %v5413_v15, %v5317_v1  ;;  %v6966_v28 = vld [vmem:[#allocation118_spill] sm:$0xff]  ;;  %v860_v43 = vpop.f32.mrf.mxu1 }
 0x15b   : > { %6964 = vst [vmem:[#allocation134_spill] sm:$0xff] %v5591_v52  ;;  %v3680_v13 = vpop.eup %3679  ;;  %v3032_v12 = vadd.f32 %v3678_v40, %v3031_v63  ;;  %3691 = vpow2.f32 %v2125_v37  ;;  %v5600_v49 = vmul.f32 %v5504_v50, %v4417_v35  ;;  %v5604_v57 = vmul.f32 %v4417_v35, %v5517_v61 }
 0x15c   : > { %v3682_v14 = vpop.eup %3681  ;;  %3693 = vpow2.f32 %v5533_v55  ;;  %v3050_v37 = vadd.f32 %v3676_v30, %v3049_v6  ;;  %v2385_v5 = vmax.f32 %v5419_v2, %v6966_v28  ;;  %v795_v55 = vpop.f32.mrf.mxu0  ;;  %v3072_v15 = vsub.f32 %v5553_v38, %v5565_v42  ;;  %v6968_v2 = vld [vmem:[#allocation97_spill] sm:$0xff] }
 0x15d   : > { %6965 = vst [vmem:[#allocation135_spill] sm:$0xff] %v5604_v57  ;;  %v3684_v62 = vpop.eup %3683  ;;  %3695 = vpow2.f32 %v5537_v23  ;;  %v3033_v20 = vadd.f32 %v3682_v14, %v3032_v12  ;;  %v6967_v50 = vmax.f32 %v5371_v27, %v6934_v18  ;;  %v3077_v63 = vperm.slane %v5565_v42, 0  ;;  %v5630_v61 = vpop.f32.mrf.mxu2 }
 0x15e   : > { %v3686_v9 = vpop.eup %3685  ;;  %3697 = vpow2.f32 %v2650_v22  ;;  %v3051_v30 = vadd.f32 %v3680_v13, %v3050_v37  ;;  %v6969_v53 = vmax.f32 %v5374_v47, %v6968_v2  ;;  %v3078_v38 = vperm.slane %v5565_v42, 1  ;;  %v5625_v13 = vpop.xlane.xlu1 %2045 }
 0x15f   : > { %v2365_v19 = vmax.f32 %v6967_v50, %v2364_v7  ;;  %v3688_v23 = vpop.eup %3687  ;;  %v3034_v46 = vadd.f32 %v3686_v9, %v3033_v20  ;;  %3699 = vpow2.f32 %v2652_v34  ;;  %v5623_v27 = vmul.f32 %v4417_v35, %v5515_v33  ;;  %6971 = vst [vmem:[#allocation137_spill] sm:$0xff] %v5625_v13  ;;  %v5627_v50 = vpop.f32.mrf.mxu3 }
 0x160   : > { %v2386_v40 = vmax.f32 %v6969_v53, %v2385_v5  ;;  %v3690_v12 = vpop.eup %3689  ;;  %v3052_v7 = vadd.f32 %v3684_v62, %v3051_v30  ;;  %3701 = vpow2.f32 %v2658_v11  ;;  %v3073_v9 = vmul.f32 1.442695, %v3072_v15 }
 0x161   : > { %v2366_v6 = vrot.slane %v2365_v19, 4  ;;  %6970 = vst [vmem:[#allocation136_spill] sm:$0xff] %v5623_v27  ;;  %v3692_v22 = vpop.eup %3691  ;;  %v3035_v14 = vrot.slane %v3034_v46, 4  ;;  %3703 = vpow2.f32 %v2660_v59  ;;  %v3081_v33 = vsub.f32 %v5402_v41, %v3077_v63  ;;  %v6972_v59 = vld [vmem:[#allocation42_spill] sm:$0xff] }
 0x162   : > { %v2387_v20 = vrot.slane %v2386_v40, 4  ;;  %v3694_v37 = vpop.eup %3693  ;;  %v2185_v5 = vadd.f32 %v3692_v22, %v3690_v12  ;;  %v3053_v53 = vadd.f32 %v3688_v23, %v3052_v7  ;;  %v3082_v11 = vsub.f32 %v5406_v3, %v3078_v38  ;;  %v6975_v3 = vld [vmem:[#allocation38_spill] sm:$0xff]  ;;  %v863_v10 = vpop.f32.mrf.mxu1 }
 0x163   : > { %v2367_v47 = vmax.f32 %v2365_v19, %v2366_v6  ;;  %v3696_v42 = vpop.eup %3695  ;;  %v3036_v34 = vadd.f32 %v3035_v14, %v3034_v46  ;;  %v1842_v15 = vmax.f32 %v5604_v57, %v5584_v8  ;;  %v2089_v19 = vsub.f32 %v6972_v59, %v5625_v13  ;;  %v6977_v8 = vld [vmem:[#allocation43_spill] sm:$0xff]  ;;  %v6978_v7 = vld [vmem:[#allocation126_spill] sm:$0xff] }
 0x164   : > { %v2388_v36 = vmax.f32 %v2386_v40, %v2387_v20  ;;  %v3698_v62 = vpop.eup %3697  ;;  %2186 = vadd.xlane.f32.xlu1 %v2185_v5  ;;  %v3054_v6 = vadd.f32 %v3694_v37, %v3053_v53  ;;  %v5639_v41 = vmul.f32 %v4417_v35, %v5556_v25  ;;  %v6974_v40 = vld [vmem:[#allocation131_spill] sm:$0xff]  ;;  %v2090_v14 = vsub.f32 %v6977_v8, %v5625_v13  ;;  %v798_v29 = vpop.f32.mrf.mxu0 }
 0x165   : > { %v2368_v30 = vrot.slane %v2367_v47, 2  ;;  %v3037_v12 = vrot.slane %v3036_v34, 2  ;;  %v3700_v23 = vpop.eup %3699  ;;  %v6976_v38 = vmax.f32 %v6974_v40, %v6975_v3  ;;  %v1503_v20 = vmax.f32 %v6974_v40, %v6978_v7  ;;  %v7010_v40 = vld [vmem:[#allocation60_spill] sm:$0xff] }
 0x166   : > { %v2389_v46 = vrot.slane %v2388_v36, 2  ;;  %6973 = vst [vmem:[#allocation42_spill] sm:$0xff] %v5639_v41  ;;  %v3702_v37 = vpop.eup %3701  ;;  %v3055_v5 = vadd.f32 %v3696_v42, %v3054_v6  ;;  %3705 = vpow2.f32 %v3073_v9  ;;  %v3083_v53 = vmul.f32 1.442695, %v3081_v33  ;;  %v6981_v42 = vld [vmem:[#allocation40_spill] sm:$0xff] }
 0x167   : > { %v2369_v63 = vmax.f32 %v2367_v47, %v2368_v30  ;;  %v5645_v22 = vmax.f32 %v6976_v38, %v5623_v27  ;;  %v2713_v25 = vadd.f32 %v3700_v23, %v3698_v62  ;;  %v3704_v47 = vpop.eup %3703  ;;  %v3038_v30 = vadd.f32 %v3037_v12, %v3036_v34  ;;  %v3071_v23 = vld [vmem:[#allocation4 + $0x4] sm:$0x3] }
 0x168   : > { %v3085_v51 = vmul.f32 1.442695, %v3082_v11  ;;  %v5652_v44 = vmul.f32 %v4417_v35, %v795_v55  ;;  %v5655_v38 = vmul.f32 %v4417_v35, %v860_v43  ;;  %v3056_v13 = vrot.slane %v3055_v5, 4 }
 0x169   : > { %v2370_v16 = vrot.slane %v2369_v63, 1  ;;  %v2390_v39 = vmax.f32 %v2388_v36, %v2389_v46  ;;  %2714 = vadd.xlane.f32.xlu0 %v2713_v25  ;;  %v2719_v7 = vadd.f32 %v3704_v47, %v3702_v37  ;;  %v5659_v9 = vmul.f32 %v4417_v35, %v6981_v42  ;;  %v6993_v37 = vld [vmem:[#allocation34_spill] sm:$0xff]  ;;  %v7001_v36 = vld [vmem:[#allocation33_spill] sm:$0xff] }
 0x16a   : > { %6979 = vst [vmem:[#allocation43_spill] sm:$0xff] %v5652_v44  ;;  %v1843_v33 = vmax.f32 %v5639_v41, %v1842_v15  ;;  %v2127_v62 = vmul.f32 1.442695, %v2089_v19  ;;  %v2129_v34 = vmul.f32 1.442695, %v2090_v14  ;;  %v3057_v11 = vadd.f32 %v3056_v13, %v3055_v5  ;;  %v878_v19 = vpop.f32.mrf.mxu3  ;;  %v6988_v5 = vld [vmem:[#allocation14_spill] sm:$0xff] }
 0x16b   : > { %6980 = vst [vmem:[#allocation138_spill] sm:$0xff] %v5655_v38  ;;  %3707 = vpow2.f32 %v3083_v53  ;;  %v1245_v55 = vmul.f32 %v5531_v24, %v4417_v35  ;;  %2720 = vadd.xlane.f32.xlu2 %v2719_v7  ;;  %v5665_v43 = vmul.f32 %v4417_v35, %v863_v10  ;;  %v5671_v15 = vmul.f32 %v4417_v35, %v798_v29  ;;  %v1208_v10 = vpop.f32.mrf.mxu2 }
 0x16c   : > { %6982 = vst [vmem:[#allocation40_spill] sm:$0xff] %v5659_v9  ;;  %3709 = vpow2.f32 %v3085_v51  ;;  %1504 = vmax.xlane.f32.xlu1 %v1503_v20  ;;  %v1844_v12 = vmax.f32 %v5655_v38, %v1843_v33  ;;  %v3706_v13 = vpop.eup %3705  ;;  %v3039_v6 = vrot.slane %v3038_v30, 1  ;;  %v3058_v46 = vrot.slane %v3057_v11, 2  ;;  %v6986_v20 = vld [vmem:[#allocation31_spill] sm:$0xff] }
 0x16d   : > { %6983 = vst [vmem:[#allocation139_spill] sm:$0xff] %v5665_v43  ;;  %v5673_v24 = vmax.f32 %v2369_v63, %v2370_v16  ;;  %v2391_v14 = vrot.slane %v2390_v39, 1  ;;  %v5677_v51 = vmul.f32 %v4417_v35, %v5524_v48  ;;  %v1246_v7 = vmul.f32 %v5588_v56, %v4417_v35 }
 0x16e   : > { %6984 = vst [vmem:[#allocation140_spill] sm:$0xff] %v5671_v15  ;;  %v1506_v29 = vmax.f32 %v5391_v0, %v6986_v20  ;;  %v1260_v53 = vsel %vm1099_vm2, %v5600_v49, 0.0  ;;  %v3059_v25 = vadd.f32 %v3058_v46, %v3057_v11  ;;  %v5688_v16 = vmax.f32 %v5665_v43, %v1844_v12  ;;  %v7014_v0 = vld [vmem:[#allocation85_spill] sm:$0xff] }
 0x16f   : > { %6985 = vst [vmem:[#allocation141_spill] sm:$0xff] %v5677_v51  ;;  %v5691_v63 = vmul.f32 %v4417_v35, %v878_v19  ;;  %v5696_v47 = vsel %vm1100_vm4, %v1245_v55, 0.0  ;;  %v3075_v56 = vmul.f32 %v3706_v13, %v3071_v23  ;;  %3711 = vpow2.f32 %v2127_v62  ;;  %v801_v62 = vpop.f32.mrf.mxu0  ;;  %v866_v13 = vpop.f32.mrf.mxu1 }
 0x170   : > { %6989 = vst [vmem:[#allocation13_spill] sm:$0xff] %v5688_v16  ;;  %v6992_v42 = vmax.f32 %v5578_v4, %v5591_v52  ;;  %v1248_v49 = vmul.f32 %v1208_v10, %v4417_v35  ;;  %v3040_v12 = vadd.f32 %v3039_v6, %v3038_v30  ;;  %v3060_v46 = vrot.slane %v3059_v25, 1  ;;  %v6995_v4 = vld [vmem:[#allocation32_spill] sm:$0xff] }
 0x171   : > { %6990 = vst [vmem:[#allocation14_spill] sm:$0xff] %v5691_v63  ;;  %v3708_v11 = vpop.eup %3707  ;;  %v5705_v19 = vmax.f32 %v2390_v39, %v2391_v14  ;;  %v2393_v48 = vsub.f32 %v6993_v37, %v5673_v24  ;;  %v6994_v55 = vmax.f32 %v5380_v32, %v5365_v31  ;;  %3713 = vpow2.f32 %v2129_v34 }
 0x172   : > { %v5702_v33 = vmax.f32 %v6992_v42, %v5671_v15  ;;  %v3710_v23 = vpop.eup %3709  ;;  %v2395_v42 = vsub.f32 %v6995_v4, %v5673_v24  ;;  %v5716_v30 = vmul.f32 %v4417_v35, %v5586_v45  ;;  %v5720_v39 = vmul.f32 %v5630_v61, %v4417_v35  ;;  %v7000_v4 = vld [vmem:[#allocation35_spill] sm:$0xff] }
 0x173   : > { %1501 = vmax.xlane.f32.xlu0 %v6994_v55  ;;  %v3061_v6 = vadd.f32 %v3060_v46, %v3059_v25  ;;  %v2397_v14 = vsub.f32 %v6956_v58, %v5673_v24  ;;  %1507 = vmax.xlane.f32.xlu2 %v1506_v29  ;;  %v5729_v34 = vsel %vm1101_vm3, %v1246_v7, 0.0  ;;  %v2399_v45 = vsub.f32 %v6972_v59, %v5673_v24 }
 0x174   : > { %6996 = vst [vmem:[#allocation16_spill] sm:$0xff] %v5716_v30  ;;  %v1264_v61 = vsel %vm1103_vm6, %v1248_v49, 0.0  ;;  %v5737_v25 = vmul.f32 %v4417_v35, %v801_v62  ;;  %v5740_v58 = vmul.f32 %v4417_v35, %v866_v13  ;;  %v3087_v29 = vmul.f32 %v3708_v11, %v3040_v12  ;;  %v7002_v13 = vld [vmem:[#allocation51_spill] sm:$0xff]  ;;  %v7003_v12 = vld [vmem:[#allocation52_spill] sm:$0xff] }
 0x175   : > { %v3088_v46 = vmul.f32 %v3710_v23, %v3061_v6  ;;  %v2394_v37 = vsub.f32 %v7000_v4, %v5705_v19  ;;  %v2425_v7 = vmul.f32 1.442695, %v2393_v48  ;;  %v3712_v10 = vpop.eup %3711  ;;  %v2396_v59 = vsub.f32 %v7001_v36, %v5705_v19  ;;  %v7004_v4 = vld [vmem:[#allocation44_spill] sm:$0xff]  ;;  %v7005_v36 = vld [vmem:[#allocation45_spill] sm:$0xff] }
 0x176   : > { %6999 = vst [vmem:[#allocation34_spill] sm:$0xff] %v5740_v58  ;;  %v2398_v55 = vsub.f32 %v6960_v17, %v5705_v19  ;;  %v2400_v49 = vsub.f32 %v6977_v8, %v5705_v19  ;;  %v2429_v62 = vmul.f32 1.442695, %v2395_v42  ;;  %v2401_v11 = vsub.f32 %v7002_v13, %v5673_v24  ;;  %v7006_v17 = vld [vmem:[#allocation62_spill] sm:$0xff]  ;;  %v7007_v42 = vld [vmem:[#allocation63_spill] sm:$0xff] }
 0x177   : > { %v3091_v43 = vrot.slane %v3088_v46, 7  ;;  %v2402_v23 = vsub.f32 %v7003_v12, %v5705_v19  ;;  %v2433_v6 = vmul.f32 1.442695, %v2397_v14  ;;  %v3714_v48 = vpop.eup %3713  ;;  %v2403_v20 = vsub.f32 %v7004_v4, %v5673_v24  ;;  %v7008_v12 = vld [vmem:[#allocation67_spill] sm:$0xff]  ;;  %v7009_v4 = vld [vmem:[#allocation68_spill] sm:$0xff] }
 0x178   : > { %v2404_v31 = vsub.f32 %v7005_v36, %v5705_v19  ;;  %v2405_v38 = vsub.f32 %v7006_v17, %v5673_v24  ;;  %3715 = vpow2.f32 %v2425_v7  ;;  %v2437_v13 = vmul.f32 1.442695, %v2399_v45  ;;  %v7011_v7 = vld [vmem:[#allocation61_spill] sm:$0xff] }
 0x179   : > { %v3092_v8 = vsel %vm2001_vm1, %v3087_v29, %v3091_v43  ;;  %3717 = vpow2.f32 %v2429_v62  ;;  %v2407_v15 = vsub.f32 %v7008_v12, %v5673_v24  ;;  %v2427_v36 = vmul.f32 1.442695, %v2394_v37  ;;  %v7013_v45 = vld [vmem:[#allocation81_spill] sm:$0xff]  ;;  %v7015_v12 = vld [vmem:[#allocation86_spill] sm:$0xff] }
 0x17a   : > { %v3094_v14 = vadd.f32 %v3092_v8, %v3075_v56  ;;  %v2409_v17 = vsub.f32 %v7010_v40, %v5673_v24  ;;  %3719 = vpow2.f32 %v2433_v6  ;;  %v2441_v29 = vmul.f32 1.442695, %v2401_v11  ;;  %v7016_v6 = vld [vmem:[#allocation78_spill] sm:$0xff]  ;;  %v7017_v40 = vld [vmem:[#allocation79_spill] sm:$0xff] }
 0x17b   : > { %1276 = vadd.xlane.f32.xlu0 %v1260_v53  ;;  %1284 = vadd.xlane.f32.xlu2 %v1264_v61  ;;  %v7012_v53 = vld [vmem:[#allocation80_spill] sm:$0xff]  ;;  %v2431_v8 = vmul.f32 1.442695, %v2396_v59  ;;  %v2188_v37 = vadd.f32 %v3714_v48, %v3712_v10  ;;  %v2413_v46 = vsub.f32 %v7014_v0, %v5673_v24  ;;  %3721 = vpow2.f32 %v2437_v13  ;;  %v804_v59 = vpop.f32.mrf.mxu0  ;;  %v7018_v48 = vld [vmem:[#allocation98_spill] sm:$0xff]  ;;  %v7019_v0 = vld [vmem:[#allocation99_spill] sm:$0xff] }
 0x17c   : > { %3095 = vst.msk [vmem:[#allocation4 + $0x4] sm:$0x3] %vm5527_vm15, %v3094_v14  ;;  %v2411_v56 = vsub.f32 %v7012_v53, %v5673_v24  ;;  %v2445_v11 = vmul.f32 1.442695, %v2403_v20  ;;  %v2415_v14 = vsub.f32 %v7016_v6, %v5673_v24  ;;  %3723 = vpow2.f32 %v2427_v36  ;;  %v7020_v13 = vld [vmem:[#allocation103_spill] sm:$0xff]  ;;  %v7021_v6 = vld [vmem:[#allocation104_spill] sm:$0xff] }
 0x17d   : > { %v2435_v32 = vmul.f32 1.442695, %v2398_v55  ;;  %2189 = vadd.xlane.f32.xlu1 %v2188_v37  ;;  %v2417_v62 = vsub.f32 %v7018_v48, %v5673_v24  ;;  %3725 = vpow2.f32 %v2441_v29  ;;  %v2449_v20 = vmul.f32 1.442695, %v2405_v38 }
 0x17e   : > { %v3716_v61 = vpop.eup %3715  ;;  %3727 = vpow2.f32 %v2431_v8  ;;  %v2439_v36 = vmul.f32 1.442695, %v2400_v49  ;;  %v2453_v53 = vmul.f32 1.442695, %v2407_v15  ;;  %v2443_v29 = vmul.f32 1.442695, %v2402_v23 }
 0x17f   : > { %v3718_v10 = vpop.eup %3717  ;;  %3729 = vpow2.f32 %v2445_v11  ;;  %v1515_v43 = vmax.f32 %v5623_v27, %v5604_v57  ;;  %v2457_v8 = vmul.f32 1.442695, %v2409_v17  ;;  %v1211_v11 = vpop.f32.mrf.mxu2  ;;  %v1509_v17 = vmax.f32 %v6975_v3, %v5450_v60 }
 0x180   : > { %v3720_v55 = vpop.eup %3719  ;;  %v2489_v48 = vadd.f32 %v3718_v10, %v3716_v61  ;;  %3731 = vpow2.f32 %v2435_v32  ;;  %v2447_v61 = vmul.f32 1.442695, %v2404_v31  ;;  %v5806_v32 = vmul.f32 %v4417_v35, %v5627_v50 }
 0x181   : > { %v3722_v16 = vpop.eup %3721  ;;  %3733 = vpow2.f32 %v2449_v20  ;;  %v2461_v10 = vmul.f32 1.442695, %v2411_v56  ;;  %v7023_v20 = vsub.f32 %v7007_v42, %v5705_v19  ;;  %v5815_v31 = vmul.f32 %v4417_v35, %v804_v59 }
 0x182   : > { %v2490_v37 = vadd.f32 %v3720_v55, %v2489_v48  ;;  %v3724_v15 = vpop.eup %3723  ;;  %3735 = vpow2.f32 %v2439_v36  ;;  %7022 = vst [vmem:[#allocation32_spill] sm:$0xff] %v5806_v32  ;;  %v1249_v50 = vmul.f32 %v1211_v11, %v4417_v35  ;;  %v2465_v56 = vmul.f32 1.442695, %v2413_v46 }
 0x183   : > { %1278 = vadd.xlane.f32.xlu0 %v5696_v47  ;;  %1516 = vmax.xlane.f32.xlu2 %v1515_v43  ;;  %v3726_v23 = vpop.eup %3725  ;;  %3737 = vpow2.f32 %v2453_v53  ;;  %v2451_v55 = vmul.f32 1.442695, %v7023_v20  ;;  %v2473_v47 = vmul.f32 1.442695, %v2417_v62  ;;  %v807_v59 = vpop.f32.mrf.mxu0  ;;  %v1263_v62 = vsel %vm1102_vm7, %v5720_v39, 0.0 }
 0x184   : > { %v2491_v38 = vadd.f32 %v3722_v16, %v2490_v37  ;;  %v3728_v48 = vpop.eup %3727  ;;  %3739 = vpow2.f32 %v2443_v29  ;;  %v7024_v16 = vsub.f32 %v7009_v4, %v5705_v19  ;;  %v7025_v29 = vsub.f32 %v7011_v7, %v5705_v19 }
 0x185   : > { %1280 = vadd.xlane.f32.xlu1 %v5729_v34  ;;  %v3730_v43 = vpop.eup %3729  ;;  %3741 = vpow2.f32 %v2457_v8  ;;  %v2469_v34 = vmul.f32 1.442695, %v2415_v14  ;;  %v2510_v58 = vadd.f32 %v3728_v48, %v3724_v15  ;;  %v1265_v8 = vsel %vm1104_vm5, %v1249_v50, 0.0 }
 0x186   : > { %v2455_v53 = vmul.f32 1.442695, %v7024_v16  ;;  %v2492_v36 = vadd.f32 %v3726_v23, %v2491_v38  ;;  %v3732_v37 = vpop.eup %3731  ;;  %3743 = vpow2.f32 %v2447_v61  ;;  %v2459_v20 = vmul.f32 1.442695, %v7025_v29 }
 0x187   : > { %v3734_v49 = vpop.eup %3733  ;;  %3745 = vpow2.f32 %v2461_v10  ;;  %v7027_v38 = vmax.f32 %v5645_v22, %v5652_v44  ;;  %v1825_v15 = vmax.f32 %v5702_v33, %v5815_v31  ;;  %v2511_v42 = vadd.f32 %v3732_v37, %v2510_v58 }
 0x188   : > { %v2493_v11 = vadd.f32 %v3730_v43, %v2492_v36  ;;  %v3736_v46 = vpop.eup %3735  ;;  %3747 = vpow2.f32 %v2451_v55  ;;  %v5840_v48 = vmul.f32 %v4417_v35, %v807_v59  ;;  %v7029_v22 = vsub.f32 %v7013_v45, %v5705_v19 }
 0x189   : > { %v1824_v61 = vmax.f32 %v7027_v38, %v5737_v25  ;;  %v3738_v23 = vpop.eup %3737  ;;  %3749 = vpow2.f32 %v2465_v56  ;;  %v7030_v39 = vsub.f32 %v7020_v13, %v5673_v24  ;;  %v1518_v33 = vmax.f32 %v5591_v52, %v5639_v41 }
 0x18a   : > { %v2494_v10 = vadd.f32 %v3734_v49, %v2493_v11  ;;  %v3740_v55 = vpop.eup %3739  ;;  %3751 = vpow2.f32 %v2455_v53  ;;  %v2463_v50 = vmul.f32 1.442695, %v7029_v22  ;;  %v2512_v16 = vadd.f32 %v3736_v46, %v2511_v42  ;;  %v5868_v22 = vld [vmem:[#allocation3 + $0x2] sm:$0x3] }
 0x18b   : > { %1510 = vmax.xlane.f32.xlu0 %v1509_v17  ;;  %v5837_v17 = vpop.f32.mrf.mxu1  ;;  %v2477_v43 = vmul.f32 1.442695, %v7030_v39  ;;  %1286 = vadd.xlane.f32.xlu2 %v1265_v8  ;;  %v3742_v58 = vpop.eup %3741  ;;  %3753 = vpow2.f32 %v2469_v34  ;;  %v1826_v56 = vmax.f32 %v1824_v61, %v5840_v48  ;;  %v7031_v53 = vsub.f32 %v7015_v12, %v5705_v19 }
 0x18c   : > { %v2495_v49 = vadd.f32 %v3738_v23, %v2494_v10  ;;  %v3744_v36 = vpop.eup %3743  ;;  %3755 = vpow2.f32 %v2459_v20  ;;  %v7032_v29 = vsub.f32 %v6934_v18, %v5673_v24  ;;  %v1827_v11 = vmax.f32 %v1825_v15, %v5659_v9  ;;  %v881_v39 = vpop.f32.mrf.mxu3 }
 0x18d   : > { %v2467_v37 = vmul.f32 1.442695, %v7031_v53  ;;  %1282 = vadd.xlane.f32.xlu1 %v1263_v62  ;;  %v3746_v8 = vpop.eup %3745  ;;  %3757 = vpow2.f32 %v2473_v47  ;;  %v2513_v38 = vadd.f32 %v3740_v55, %v2512_v16  ;;  %v1828_v46 = vmax.f32 %v1826_v56, %v5677_v51 }
 0x18e   : > { %v2481_v59 = vmul.f32 1.442695, %v7032_v29  ;;  %v2496_v34 = vadd.f32 %v3742_v58, %v2495_v49  ;;  %v3748_v61 = vpop.eup %3747  ;;  %3759 = vpow2.f32 %v2463_v50  ;;  %v7033_v20 = vsub.f32 %v7017_v40, %v5705_v19 }
 0x18f   : > { %v7034_v23 = vsub.f32 %v7019_v0, %v5705_v19  ;;  %v7035_v62 = vsub.f32 %v5317_v1, %v5673_v24  ;;  %v3750_v42 = vpop.eup %3749  ;;  %3761 = vpow2.f32 %v2477_v43  ;;  %v2514_v55 = vadd.f32 %v3744_v36, %v2513_v38 }
 0x190   : > { %v2471_v14 = vmul.f32 1.442695, %v7033_v20  ;;  %v2497_v47 = vadd.f32 %v3746_v8, %v2496_v34  ;;  %v2535_v50 = vrot.slane %v5705_v19, 7  ;;  %v3752_v58 = vpop.eup %3751  ;;  %3763 = vpow2.f32 %v2467_v37 }
 0x191   : > { %v2475_v10 = vmul.f32 1.442695, %v7034_v23  ;;  %v2485_v15 = vmul.f32 1.442695, %v7035_v62  ;;  %v1829_v49 = vmax.f32 %v1827_v11, %v5716_v30  ;;  %v1512_v16 = vmax.f32 %v5543_v26, %v5547_v54  ;;  %v3754_v53 = vpop.eup %3753 }
 0x192   : > { %v1830_v56 = vmax.f32 %v1828_v46, %v5806_v32  ;;  %3765 = vpow2.f32 %v2481_v59  ;;  %v2498_v43 = vadd.f32 %v3750_v42, %v2497_v47  ;;  %v2515_v29 = vadd.f32 %v3748_v61, %v2514_v55  ;;  %v3756_v8 = vpop.eup %3755  ;;  %v7040_v47 = vld [vmem:[#allocation34_spill] sm:$0xff] }
 0x193   : > { %1519 = vmax.xlane.f32.xlu0 %v1518_v33  ;;  %v2536_v36 = vsel %vm2001_vm1, %v5673_v24, %v2535_v50  ;;  %3767 = vpow2.f32 %v2471_v14  ;;  %v7036_v33 = vsub.f32 %v7021_v6, %v5705_v19  ;;  %v3758_v38 = vpop.eup %3757  ;;  %v872_v59 = vpop.f32.mrf.mxu1  ;;  %v7037_v61 = vsub.f32 %v6968_v2, %v5705_v19  ;;  %v7038_v14 = vld [vmem:[#allocation13_spill] sm:$0xff]  ;;  %v2540_v6 = vld [vmem:[#allocation4 + $0x2] sm:$0x3] }
 0x194   : > { %v5881_v11 = vmax.f32 %v5868_v22, %v2536_v36  ;;  %v1831_v34 = vmax.f32 %v1829_v49, %v1830_v56  ;;  %3769 = vpow2.f32 %v2485_v15  ;;  %v2499_v46 = vadd.f32 %v3754_v53, %v2498_v43  ;;  %v3760_v23 = vpop.eup %3759 }
 0x195   : > { %v2479_v37 = vmul.f32 1.442695, %v7036_v33  ;;  %v2516_v20 = vadd.f32 %v3752_v58, %v2515_v29  ;;  %3771 = vpow2.f32 %v2475_v10  ;;  %v2483_v62 = vmul.f32 1.442695, %v7037_v61  ;;  %1513 = vmax.xlane.f32.xlu1 %v1512_v16  ;;  %v3762_v50 = vpop.eup %3761 }
 0x196   : > { %2565 = vst.msk [vmem:[#allocation3 + $0x2] sm:$0x3] %vm5527_vm15, %v5881_v11  ;;  %v7039_v42 = vmax.f32 %v5691_v63, %v7038_v14  ;;  %v5894_v15 = vmul.f32 %v4417_v35, %v881_v39  ;;  %v7041_v10 = vsub.f32 %v6966_v28, %v5705_v19  ;;  %v2500_v49 = vadd.f32 %v3758_v38, %v2499_v46  ;;  %v3764_v43 = vpop.eup %3763  ;;  %v1214_v14 = vpop.f32.mrf.mxu2 }
 0x197   : > { %v2517_v56 = vadd.f32 %v3756_v8, %v2516_v20  ;;  %v1832_v53 = vrot.slane %v1831_v34, 4  ;;  %3773 = vpow2.f32 %v2479_v37  ;;  %v5902_v16 = vmul.f32 %v4417_v35, %v5837_v17  ;;  %v884_v46 = vpop.f32.mrf.mxu3  ;;  %v5904_v37 = vpop.xlane.xlu1 %2579 }
 0x198   : > { %v1847_v55 = vmax.f32 %v7040_v47, %v7039_v42  ;;  %v2487_v58 = vmul.f32 1.442695, %v7041_v10  ;;  %v3766_v29 = vpop.eup %3765  ;;  %v2501_v36 = vadd.f32 %v3762_v50, %v2500_v49  ;;  %3775 = vpow2.f32 %v2483_v62  ;;  %7042 = vst [vmem:[#allocation15_spill] sm:$0xff] %v5904_v37 }
 0x199   : > { %v2518_v33 = vadd.f32 %v3760_v23, %v2517_v56  ;;  %v1833_v61 = vmax.f32 %v1831_v34, %v1832_v53  ;;  %v3768_v42 = vpop.eup %3767  ;;  %v2546_v34 = vperm.slane %v5881_v11, 0  ;;  %v5907_v23 = vpop.xlane.xlu2 %2051  ;;  %v1250_v62 = vmul.f32 %v1214_v14, %v4417_v35 }
 0x19a   : > { %v1849_v39 = vmax.f32 %v1847_v55, %v5894_v15  ;;  %v3770_v28 = vpop.eup %3769  ;;  %3777 = vpow2.f32 %v2487_v58  ;;  %v2502_v38 = vadd.f32 %v3766_v29, %v2501_v36  ;;  %7043 = vst [vmem:[#allocation18_spill] sm:$0xff] %v5907_v23  ;;  %v1542_v55 = vmax.f32 %v5716_v30, %v5894_v15  ;;  %v7045_v36 = vld [vmem:[#allocation49_spill] sm:$0xff] }
 0x19b   : > { %v2519_v8 = vadd.f32 %v3764_v43, %v2518_v33  ;;  %v1834_v20 = vrot.slane %v1833_v61, 2  ;;  %v3772_v50 = vpop.eup %3771  ;;  %v1539_v17 = vmax.f32 %v5677_v51, %v5691_v63  ;;  %v2547_v49 = vperm.slane %v5881_v11, 1 }
 0x19c   : > { %v2503_v10 = vadd.f32 %v3770_v28, %v2502_v38  ;;  %v1851_v43 = vmax.f32 %v1849_v39, %v5902_v16  ;;  %v5917_v29 = vmul.f32 %v4417_v35, %v884_v46  ;;  %v2622_v33 = vsub.f32 %v7045_v36, %v5904_v37  ;;  %1543 = vmax.xlane.f32.xlu2 %v1542_v55  ;;  %v875_v39 = vpop.f32.mrf.mxu1 }
 0x19d   : > { %v2520_v58 = vadd.f32 %v3768_v42, %v2519_v8  ;;  %v1835_v56 = vmax.f32 %v1833_v61, %v1834_v20  ;;  %v3774_v53 = vpop.eup %3773  ;;  %1540 = vmax.xlane.f32.xlu1 %v1539_v17  ;;  %v1266_v1 = vsel %vm1105_vm10, %v1250_v62, 0.0  ;;  %v2541_v61 = vsub.f32 %v5868_v22, %v5881_v11 }
 0x19e   : > { %7044 = vst [vmem:[#allocation35_spill] sm:$0xff] %v5917_v29  ;;  %v2504_v28 = vrot.slane %v2503_v10, 4  ;;  %1288 = vadd.xlane.f32.xlu0 %v1266_v1  ;;  %v3776_v8 = vpop.eup %3775  ;;  %v2550_v46 = vsub.f32 %v5673_v24, %v2546_v34  ;;  %v5928_v20 = vmul.f32 %v4417_v35, %v872_v59  ;;  %v2551_v14 = vsub.f32 %v5705_v19, %v2547_v49  ;;  %v7049_v24 = vld [vmem:[#allocation50_spill] sm:$0xff]  ;;  %v7051_v19 = vld [vmem:[#allocation131_spill] sm:$0xff] }
 0x19f   : > { %v2521_v42 = vadd.f32 %v3772_v50, %v2520_v58  ;;  %v1836_v38 = vrot.slane %v1835_v56, 1  ;;  %v1848_v50 = vmax.f32 %v5917_v29, %v1851_v43  ;;  %v2662_v58 = vmul.f32 1.442695, %v2622_v33  ;;  %v5969_v0 = vpop.xlane.xlu1 %2054 }
 0x1a0   : > { %7047 = vst [vmem:[#allocation33_spill] sm:$0xff] %v5928_v20  ;;  %v3778_v55 = vpop.eup %3777  ;;  %v2505_v17 = vadd.f32 %v2504_v28, %v2503_v10  ;;  %v5935_v22 = vmul.f32 %v4417_v35, %v875_v39  ;;  %v2542_v2 = vmul.f32 1.442695, %v2541_v61  ;;  %v2623_v59 = vsub.f32 %v7049_v24, %v5904_v37  ;;  %v7050_v10 = vld [vmem:[#allocation128_spill] sm:$0xff]  ;;  %v7052_v28 = vld [vmem:[#allocation129_spill] sm:$0xff]  ;;  %v5946_v61 = vpop.xlane.xlu0 %2048 }
 0x1a1   : > { %v2522_v36 = vadd.f32 %v3774_v53, %v2521_v42  ;;  %v5931_v62 = vmax.f32 %v1835_v56, %v1836_v38  ;;  %v2552_v34 = vmul.f32 1.442695, %v2550_v46  ;;  %v1850_v56 = vmax.f32 %v1848_v50, %v5928_v20  ;;  %7053 = vst [vmem:[#allocation61_spill] sm:$0xff] %v5946_v61  ;;  %v5948_v39 = vpop.xlane.xlu2 %2585 }
 0x1a2   : > { %7048 = vst [vmem:[#allocation68_spill] sm:$0xff] %v5935_v22  ;;  %v2506_v1 = vrot.slane %v2505_v17, 2  ;;  %v2554_v33 = vmul.f32 1.442695, %v2551_v14  ;;  %3779 = vpow2.f32 %v2662_v58  ;;  %v2664_v14 = vmul.f32 1.442695, %v2623_v59 }
 0x1a3   : > { %v2523_v11 = vadd.f32 %v3776_v8, %v2522_v36  ;;  %v1859_v53 = vsub.f32 %v7050_v10, %v5931_v62  ;;  %v1861_v49 = vsub.f32 %v7051_v19, %v5931_v62  ;;  %v1863_v42 = vsub.f32 %v7052_v28, %v5931_v62  ;;  %7054 = vst [vmem:[#allocation81_spill] sm:$0xff] %v5948_v39 }
 0x1a4   : > { %v2507_v38 = vadd.f32 %v2506_v1, %v2505_v17  ;;  %v1852_v8 = vmax.f32 %v1850_v56, %v5935_v22  ;;  %3781 = vpow2.f32 %v2542_v2  ;;  %v1865_v36 = vsub.f32 %v6975_v3, %v5931_v62  ;;  %7058 = vst [vmem:[#allocation13_spill] sm:$0xff] %v5969_v0 }
 0x1a5   : > { %v2524_v43 = vadd.f32 %v3778_v55, %v2523_v11  ;;  %3783 = vpow2.f32 %v2552_v34  ;;  %v1891_v50 = vmul.f32 1.442695, %v1859_v53  ;;  %v1895_v55 = vmul.f32 1.442695, %v1861_v49 }
 0x1a6   : > { %3785 = vpow2.f32 %v2554_v33  ;;  %v1867_v17 = vsub.f32 %v5543_v26, %v5931_v62  ;;  %v1899_v58 = vmul.f32 1.442695, %v1863_v42  ;;  %v2508_v1 = vrot.slane %v2507_v38, 1 }
 0x1a7   : > { %v2525_v46 = vrot.slane %v2524_v43, 4  ;;  %3787 = vpow2.f32 %v1891_v50  ;;  %v1853_v24 = vrot.slane %v1852_v8, 4  ;;  %v1869_v2 = vsub.f32 %v5623_v27, %v5931_v62 }
 0x1a8   : > { %3789 = vpow2.f32 %v1895_v55  ;;  %v1903_v56 = vmul.f32 1.442695, %v1865_v36  ;;  %v3780_v18 = vpop.eup %3779  ;;  %v1871_v59 = vsub.f32 %v5591_v52, %v5931_v62  ;;  %v1907_v49 = vmul.f32 1.442695, %v1867_v17 }
 0x1a9   : > { %v2526_v11 = vadd.f32 %v2525_v46, %v2524_v43  ;;  %3791 = vpow2.f32 %v2664_v14  ;;  %v2509_v33 = vadd.f32 %v2508_v1, %v2507_v38  ;;  %v1873_v42 = vsub.f32 %v5652_v44, %v5931_v62  ;;  %v7055_v14 = vld [vmem:[#allocation140_spill] sm:$0xff]  ;;  %v5965_v52 = vpop.xlane.xlu2 %2060 }
 0x1aa   : > { %v3782_v34 = vpop.eup %3781  ;;  %3793 = vpow2.f32 %v1899_v58  ;;  %v1911_v55 = vmul.f32 1.442695, %v1869_v2  ;;  %v1854_v36 = vmax.f32 %v1852_v8, %v1853_v24  ;;  %7057 = vst [vmem:[#allocation19_spill] sm:$0xff] %v5965_v52  ;;  %v1545_v38 = vmax.f32 %v5806_v32, %v5917_v29 }
 0x1ab   : > { %v2527_v37 = vrot.slane %v2526_v11, 2  ;;  %v3784_v43 = vpop.eup %3783  ;;  %3795 = vpow2.f32 %v1903_v56  ;;  %v1915_v1 = vmul.f32 1.442695, %v1871_v59  ;;  %v2544_v8 = vmul.f32 %v3782_v34, %v2540_v6 }
 0x1ac   : > { %v3786_v46 = vpop.eup %3785  ;;  %3797 = vpow2.f32 %v1907_v49  ;;  %v1855_v27 = vrot.slane %v1854_v36, 2  ;;  %v2556_v24 = vmul.f32 %v3784_v43, %v2509_v33  ;;  %v1877_v56 = vsub.f32 %v5737_v25, %v5931_v62  ;;  %1546 = vmax.xlane.f32.xlu0 %v1545_v38  ;;  %v7059_v38 = vld [vmem:[#allocation138_spill] sm:$0xff] }
 0x1ad   : > { %v2528_v53 = vadd.f32 %v2527_v37, %v2526_v11  ;;  %v3788_v13 = vpop.eup %3787  ;;  %v1875_v37 = vsub.f32 %v7055_v14, %v5931_v62  ;;  %v5963_v11 = vpop.xlane.xlu0 %2582  ;;  %3799 = vpow2.f32 %v1911_v55  ;;  %v1919_v3 = vmul.f32 1.442695, %v1873_v42 }
 0x1ae   : > { %7056 = vst [vmem:[#allocation17_spill] sm:$0xff] %v5963_v11  ;;  %v3790_v17 = vpop.eup %3789  ;;  %v1856_v19 = vmax.f32 %v1854_v36, %v1855_v27  ;;  %v1881_v59 = vsub.f32 %v5840_v48, %v5931_v62  ;;  %3801 = vpow2.f32 %v1915_v1  ;;  %v1927_v42 = vmul.f32 1.442695, %v1877_v56 }
 0x1af   : > { %v2529_v50 = vrot.slane %v2528_v53, 1  ;;  %v3792_v2 = vpop.eup %3791  ;;  %v1955_v26 = vadd.f32 %v3790_v17, %v3788_v13  ;;  %v1923_v49 = vmul.f32 1.442695, %v1875_v37  ;;  %3803 = vpow2.f32 %v1919_v3  ;;  %v5982_v17 = vpop.f32.mrf.mxu2 }
 0x1b0   : > { %v3794_v40 = vpop.eup %3793  ;;  %v1857_v43 = vrot.slane %v1856_v19, 1  ;;  %v2722_v33 = vadd.f32 %v3792_v2, %v3780_v18  ;;  %v1935_v18 = vmul.f32 1.442695, %v1881_v59  ;;  %v1883_v59 = vsub.f32 %v5659_v9, %v5931_v62 }
 0x1b1   : > { %v2530_v58 = vadd.f32 %v2529_v50, %v2528_v53  ;;  %v1879_v53 = vsub.f32 %v5815_v31, %v5931_v62  ;;  %v1956_v50 = vadd.f32 %v3794_v40, %v1955_v26  ;;  %v3796_v6 = vpop.eup %3795  ;;  %3805 = vpow2.f32 %v1923_v49  ;;  %v5998_v49 = vpop.xlane.xlu1 %2588 }
 0x1b2   : > { %v3798_v55 = vpop.eup %3797  ;;  %v5980_v36 = vmax.f32 %v1856_v19, %v1857_v43  ;;  %2723 = vadd.xlane.f32.xlu2 %v2722_v33  ;;  %v7061_v19 = vld [vmem:[#allocation126_spill] sm:$0xff]  ;;  %3807 = vpow2.f32 %v1927_v42  ;;  %v1885_v42 = vsub.f32 %v5677_v51, %v5931_v62  ;;  %vm1773_vm3 = vcmask 7168  }
 0x1b3   : > { %v2557_v12 = vmul.f32 %v3786_v46, %v2530_v58  ;;  %v1957_v13 = vadd.f32 %v3796_v6, %v1956_v50  ;;  %v1521_v46 = vmax.f32 %v5652_v44, %v7059_v38  ;;  %v1931_v40 = vmul.f32 1.442695, %v1879_v53  ;;  %v3800_v37 = vpop.eup %3799  ;;  %v7060_v58 = vld [vmem:[#allocation125_spill] sm:$0xff]  ;;  %v5994_v53 = vpop.xlane.xlu2 %2594 }
 0x1b4   : > { %v1860_v1 = vsub.f32 %v7060_v58, %v5980_v36  ;;  %v1862_v2 = vsub.f32 %v7061_v19, %v5980_v36  ;;  %7064 = vst [vmem:[#allocation49_spill] sm:$0xff] %v5994_v53  ;;  %v3802_v50 = vpop.eup %3801  ;;  %v2000_v44 = vrot.slane %v5980_v36, 7 }
 0x1b5   : > { %v2560_v34 = vrot.slane %v2557_v12, 7  ;;  %v1958_v12 = vadd.f32 %v3798_v55, %v1957_v13  ;;  %1522 = vmax.xlane.f32.xlu1 %v1521_v46  ;;  %3809 = vpow2.f32 %v1931_v40  ;;  %v3804_v43 = vpop.eup %3803  ;;  %v1868_v46 = vsub.f32 %v5547_v54, %v5980_v36 }
 0x1b6   : > { %3811 = vpow2.f32 %v1935_v18  ;;  %v1893_v33 = vmul.f32 1.442695, %v1860_v1  ;;  %v1897_v55 = vmul.f32 1.442695, %v1862_v2  ;;  %v7065_v1 = vld [vmem:[#allocation51_spill] sm:$0xff]  ;;  %v2002_v51 = vsel %vm2001_vm1, %v5931_v62, %v2000_v44 }
 0x1b7   : > { %v2561_v27 = vsel %vm2001_vm1, %v2556_v24, %v2560_v34  ;;  %v1959_v3 = vadd.f32 %v3800_v37, %v1958_v12  ;;  %v7062_v24 = vld [vmem:[#allocation31_spill] sm:$0xff]  ;;  %v1866_v34 = vsub.f32 %v5450_v60, %v5980_v36  ;;  %v1939_v12 = vmul.f32 1.442695, %v1883_v59 }
 0x1b8   : > { %v2563_v26 = vadd.f32 %v2561_v27, %v2544_v8  ;;  %v1864_v56 = vsub.f32 %v7062_v24, %v5980_v36  ;;  %v5992_v8 = vpop.xlane.xlu0 %2057  ;;  %3813 = vpow2.f32 %v1893_v33  ;;  %v1870_v37 = vsub.f32 %v5604_v57, %v5980_v36 }
 0x1b9   : > { %7063 = vst [vmem:[#allocation34_spill] sm:$0xff] %v5992_v8  ;;  %v1960_v6 = vadd.f32 %v3802_v50, %v1959_v3  ;;  %3815 = vpow2.f32 %v1897_v55  ;;  %v1905_v3 = vmul.f32 1.442695, %v1866_v34  ;;  %v2091_v50 = vsub.f32 %v7065_v1, %v5946_v61  ;;  %v6020_v1 = vld [vmem:[#allocation3] sm:$0x3] }
 0x1ba   : > { %2564 = vst.msk [vmem:[#allocation4 + $0x2] sm:$0x3] %vm5527_vm15, %v2563_v26  ;;  %v1901_v27 = vmul.f32 1.442695, %v1864_v56  ;;  %v3806_v26 = vpop.eup %3805  ;;  %v1909_v59 = vmul.f32 1.442695, %v1868_v46  ;;  %v1887_v34 = vsub.f32 %v5716_v30, %v5931_v62  ;;  %v1874_v46 = vsub.f32 %v7059_v38, %v5980_v36 }
 0x1bb   : > { %v1961_v13 = vadd.f32 %v3804_v43, %v1960_v6  ;;  %v3808_v18 = vpop.eup %3807  ;;  %v6010_v6 = vpop.f32.mrf.mxu2  ;;  %v1872_v43 = vsub.f32 %v5639_v41, %v5980_v36  ;;  %v1943_v55 = vmul.f32 1.442695, %v1885_v42  ;;  %v1889_v57 = vsub.f32 %v5806_v32, %v5931_v62  ;;  %v7068_v30 = vld [vmem:[#allocation52_spill] sm:$0xff] }
 0x1bc   : > { %v3810_v2 = vpop.eup %3809  ;;  %3817 = vpow2.f32 %v1901_v27  ;;  %v1913_v27 = vmul.f32 1.442695, %v1870_v37  ;;  %v2131_v42 = vmul.f32 1.442695, %v2091_v50  ;;  %v1947_v37 = vmul.f32 1.442695, %v1887_v34 }
 0x1bd   : > { %v1962_v40 = vadd.f32 %v3806_v26, %v1961_v13  ;;  %v6016_v13 = vpop.xlane.xlu2 %2069  ;;  %v3812_v26 = vpop.eup %3811  ;;  %3819 = vpow2.f32 %v1939_v12  ;;  %v2092_v12 = vsub.f32 %v7068_v30, %v5946_v61  ;;  %v1878_v30 = vsub.f32 %v7040_v47, %v5980_v36 }
 0x1be   : > { %7067 = vst [vmem:[#allocation50_spill] sm:$0xff] %v6016_v13  ;;  %3821 = vpow2.f32 %v1905_v3  ;;  %v3814_v41 = vpop.eup %3813  ;;  %v7069_v13 = vld [vmem:[#allocation139_spill] sm:$0xff]  ;;  %v6036_v3 = vmax.f32 %v6020_v1, %v2002_v51  ;;  %v1921_v50 = vmul.f32 1.442695, %v1874_v46  ;;  %v1880_v34 = vsub.f32 %v5902_v16, %v5980_v36 }
 0x1bf   : > { %v1963_v56 = vadd.f32 %v3808_v18, %v1962_v40  ;;  %v6023_v40 = vpop.xlane.xlu1 %2063  ;;  %v3816_v54 = vpop.eup %3815  ;;  %3823 = vpow2.f32 %v1909_v59 }
 0x1c0   : > { %v6014_v33 = vpop.xlane.xlu0 %2591  ;;  %3825 = vpow2.f32 %v1943_v55  ;;  %v1976_v32 = vadd.f32 %v3816_v54, %v3814_v41  ;;  %2034 = vst.msk [vmem:[#allocation3] sm:$0x3] %vm5527_vm15, %v6036_v3  ;;  %v1951_v55 = vmul.f32 1.442695, %v1889_v57  ;;  %v1886_v57 = vsub.f32 %v5691_v63, %v5980_v36 }
 0x1c1   : > { %7066 = vst [vmem:[#allocation22_spill] sm:$0xff] %v6014_v33  ;;  %v1964_v18 = vadd.f32 %v3810_v2, %v1963_v56  ;;  %v1876_v2 = vsub.f32 %v7069_v13, %v5980_v36  ;;  %v1917_v56 = vmul.f32 1.442695, %v1872_v43  ;;  %3827 = vpow2.f32 %v1913_v27 }
 0x1c2   : > { %v3818_v60 = vpop.eup %3817  ;;  %3829 = vpow2.f32 %v2131_v42  ;;  %v2133_v43 = vmul.f32 1.442695, %v2092_v12 }
 0x1c3   : > { %v1965_v38 = vadd.f32 %v3812_v26, %v1964_v18  ;;  %v3820_v44 = vpop.eup %3819  ;;  %v1977_v59 = vadd.f32 %v3818_v60, %v1976_v32  ;;  %3831 = vpow2.f32 %v1917_v56  ;;  %v1925_v54 = vmul.f32 1.442695, %v1876_v2  ;;  %v1223_v12 = vpop.f32.mrf.mxu2 }
 0x1c4   : > { %v3822_v51 = vpop.eup %3821  ;;  %3833 = vpow2.f32 %v1947_v37  ;;  %v1882_v60 = vsub.f32 %v5928_v20, %v5980_v36  ;;  %v1929_v32 = vmul.f32 1.442695, %v1878_v30  ;;  %v1884_v2 = vsub.f32 %v5935_v22, %v5980_v36 }
 0x1c5   : > { %v6047_v26 = vpop.xlane.xlu2 %2603  ;;  %v1966_v18 = vadd.f32 %v3820_v44, %v1965_v38  ;;  %v1978_v46 = vadd.f32 %v3822_v51, %v1977_v59  ;;  %v3824_v61 = vpop.eup %3823  ;;  %3835 = vpow2.f32 %v1921_v50  ;;  %v1933_v38 = vmul.f32 1.442695, %v1880_v34  ;;  %v7073_v59 = vld [vmem:[#allocation58_spill] sm:$0xff] }
 0x1c6   : > { %7071 = vst [vmem:[#allocation129_spill] sm:$0xff] %v6047_v26  ;;  %v3826_v42 = vpop.eup %3825  ;;  %3837 = vpow2.f32 %v2133_v43  ;;  %v1251_v37 = vmul.f32 %v5982_v17, %v4417_v35  ;;  %v2624_v43 = vsub.f32 %v7073_v59, %v5963_v11  ;;  %v1888_v34 = vsub.f32 %v5894_v15, %v5980_v36 }
 0x1c7   : > { %v6049_v27 = vpop.xlane.xlu1 %2597  ;;  %v1979_v56 = vadd.f32 %v3824_v61, %v1978_v46  ;;  %v3828_v26 = vpop.eup %3827  ;;  %3839 = vpow2.f32 %v1925_v54  ;;  %v1967_v50 = vadd.f32 %v3826_v42, %v1966_v18  ;;  %v7074_v61 = vld [vmem:[#allocation59_spill] sm:$0xff]  ;;  %v1941_v54 = vmul.f32 1.442695, %v1884_v2 }
 0x1c8   : > { %v6045_v41 = vpop.xlane.xlu0 %2066  ;;  %7072 = vst [vmem:[#allocation140_spill] sm:$0xff] %v6049_v27  ;;  %v3830_v44 = vpop.eup %3829  ;;  %3841 = vpow2.f32 %v1951_v55  ;;  %v1937_v27 = vmul.f32 1.442695, %v1882_v60  ;;  %v2625_v46 = vsub.f32 %v7074_v61, %v5963_v11  ;;  %v1524_v17 = vmax.f32 %v7055_v14, %v7069_v13 }
 0x1c9   : > { %7070 = vst [vmem:[#allocation128_spill] sm:$0xff] %v6045_v41  ;;  %v1980_v30 = vadd.f32 %v3828_v26, %v1979_v56  ;;  %v3832_v51 = vpop.eup %3831  ;;  %3843 = vpow2.f32 %v1929_v32  ;;  %v1945_v26 = vmul.f32 1.442695, %v1886_v57  ;;  %v1267_v32 = vsel %vm1106_vm9, %v1251_v37, 0.0 }
 0x1ca   : > { %v3834_v41 = vpop.eup %3833  ;;  %3845 = vpow2.f32 %v1933_v38  ;;  %v1527_v60 = vmax.f32 %v5737_v25, %v7040_v47  ;;  %v2666_v61 = vmul.f32 1.442695, %v2624_v43  ;;  %1525 = vmax.xlane.f32.xlu2 %v1524_v17  ;;  %1290 = vadd.xlane.f32.xlu1 %v1267_v32  ;;  %v1890_v57 = vsub.f32 %v5917_v29, %v5980_v36 }
 0x1cb   : > { %v1981_v63 = vadd.f32 %v3832_v51, %v1980_v30  ;;  %v3836_v55 = vpop.eup %3835  ;;  %v1968_v56 = vadd.f32 %v3834_v41, %v1967_v50  ;;  %3847 = vpow2.f32 %v1937_v27  ;;  %v2668_v38 = vmul.f32 1.442695, %v2625_v46  ;;  %v1226_v18 = vpop.f32.mrf.mxu2 }
 0x1cc   : > { %v3838_v42 = vpop.eup %3837  ;;  %1528 = vmax.xlane.f32.xlu0 %v1527_v60  ;;  %3849 = vpow2.f32 %v1941_v54  ;;  %v1252_v41 = vmul.f32 %v6010_v6, %v4417_v35  ;;  %v1949_v43 = vmul.f32 1.442695, %v1888_v34  ;;  %v1953_v29 = vmul.f32 1.442695, %v1890_v57  ;;  %v7080_v60 = vld [vmem:[#allocation45_spill] sm:$0xff] }
 0x1cd   : > { %v1982_v59 = vadd.f32 %v3836_v55, %v1981_v63  ;;  %v6074_v30 = vpop.xlane.xlu2 %2078  ;;  %v3840_v51 = vpop.eup %3839  ;;  %3851 = vpow2.f32 %v1945_v26  ;;  %v1253_v27 = vmul.f32 %v1223_v12, %v4417_v35 }
 0x1ce   : > { %v3842_v11 = vpop.eup %3841  ;;  %3853 = vpow2.f32 %v2666_v61  ;;  %v1268_v54 = vsel %vm1107_vm8, %v1252_v41, 0.0 }
 0x1cf   : > { %v6078_v37 = vpop.xlane.xlu1 %2072  ;;  %v1983_v63 = vadd.f32 %v3840_v51, %v1982_v59  ;;  %v3844_v50 = vpop.eup %3843  ;;  %v1969_v17 = vadd.f32 %v3842_v11, %v1968_v56  ;;  %3855 = vpow2.f32 %v2668_v38  ;;  %v2191_v59 = vadd.f32 %v3838_v42, %v3830_v44 }
 0x1d0   : > { %v6072_v2 = vpop.xlane.xlu0 %2600  ;;  %v3846_v32 = vpop.eup %3845  ;;  %3857 = vpow2.f32 %v1949_v43  ;;  %v1269_v34 = vsel %vm1108_vm13, %v1253_v27, 0.0 }
 0x1d1   : > { %v1984_v55 = vadd.f32 %v3844_v50, %v1983_v63  ;;  %v3848_v51 = vpop.eup %3847  ;;  %v1970_v26 = vrot.slane %v1969_v17, 4  ;;  %3859 = vpow2.f32 %v1953_v29  ;;  %v7079_v50 = vld [vmem:[#allocation44_spill] sm:$0xff]  ;;  %v2011_v29 = vperm.slane %v6036_v3, 0 }
 0x1d2   : > { %v3850_v11 = vpop.eup %3849  ;;  %1292 = vadd.xlane.f32.xlu2 %v1268_v54  ;;  %2192 = vadd.xlane.f32.xlu1 %v2191_v59  ;;  %v2093_v43 = vsub.f32 %v7079_v50, %v5907_v23  ;;  %v2094_v54 = vsub.f32 %v7080_v60, %v5907_v23  ;;  %v1530_v59 = vmax.f32 %v5815_v31, %v5902_v16 }
 0x1d3   : > { %v1985_v46 = vadd.f32 %v3846_v32, %v1984_v55  ;;  %v3852_v57 = vpop.eup %3851  ;;  %v1229_v44 = vpop.f32.mrf.mxu2  ;;  %v2012_v55 = vperm.slane %v6036_v3, 1  ;;  %v1971_v32 = vadd.f32 %v1970_v26, %v1969_v17  ;;  %v1536_v50 = vmax.f32 %v5659_v9, %v5935_v22  ;;  %v2005_v9 = vld [vmem:[#allocation4] sm:$0x3] }
 0x1d4   : > { %1294 = vadd.xlane.f32.xlu0 %v1269_v34  ;;  %v3854_v42 = vpop.eup %3853  ;;  %v2100_v22 = vsub.f32 %v7011_v7, %v5965_v52 }
 0x1d5   : > { %v1986_v56 = vadd.f32 %v3848_v51, %v1985_v46  ;;  %v6091_v12 = vpop.xlane.xlu2 %2612  ;;  %v3856_v41 = vpop.eup %3855  ;;  %v1972_v17 = vrot.slane %v1971_v32, 2 }
 0x1d6   : > { %7078 = vst [vmem:[#allocation125_spill] sm:$0xff] %v6091_v12  ;;  %v3858_v46 = vpop.eup %3857  ;;  %v2725_v6 = vadd.f32 %v3856_v41, %v3854_v42  ;;  %v2015_v42 = vsub.f32 %v5931_v62, %v2011_v29 }
 0x1d7   : > { %v6093_v38 = vpop.xlane.xlu1 %2606  ;;  %v1987_v63 = vadd.f32 %v3850_v11, %v1986_v56  ;;  %v3860_v34 = vpop.eup %3859  ;;  %v2135_v11 = vmul.f32 1.442695, %v2093_v43  ;;  %v2016_v56 = vsub.f32 %v5980_v36, %v2012_v55  ;;  %v7081_v36 = vld [vmem:[#allocation53_spill] sm:$0xff]  ;;  %v1254_v55 = vmul.f32 %v1226_v18, %v4417_v35  ;;  %v7084_v18 = vld [vmem:[#allocation63_spill] sm:$0xff] }
 0x1d8   : > { %v6089_v61 = vpop.xlane.xlu0 %2075  ;;  %v2626_v41 = vsub.f32 %v7081_v36, %v5948_v39  ;;  %v2017_v36 = vmul.f32 1.442695, %v2015_v42  ;;  %v2096_v23 = vsub.f32 %v7084_v18, %v5969_v0  ;;  %v7088_v18 = vld [vmem:[#allocation71_spill] sm:$0xff] }
 0x1d9   : > { %v1988_v27 = vadd.f32 %v3852_v57, %v1987_v63  ;;  %v2006_v57 = vsub.f32 %v6020_v1, %v6036_v3  ;;  %3861 = vpow2.f32 %v2135_v11  ;;  %v7082_v1 = vld [vmem:[#allocation54_spill] sm:$0xff]  ;;  %v1270_v11 = vsel %vm1109_vm12, %v1254_v55, 0.0 }
 0x1da   : > { %2726 = vadd.xlane.f32.xlu2 %v2725_v6  ;;  %1531 = vmax.xlane.f32.xlu1 %v1530_v59  ;;  %v2627_v3 = vsub.f32 %v7082_v1, %v5948_v39  ;;  %v2019_v59 = vmul.f32 1.442695, %v2016_v56  ;;  %v7083_v6 = vld [vmem:[#allocation62_spill] sm:$0xff]  ;;  %v2670_v1 = vmul.f32 1.442695, %v2626_v41  ;;  %v1255_v55 = vmul.f32 %v1229_v44, %v4417_v35 }
 0x1db   : > { %v1989_v51 = vadd.f32 %v3858_v46, %v1988_v27  ;;  %v2137_v27 = vmul.f32 1.442695, %v2094_v54  ;;  %v2095_v54 = vsub.f32 %v7083_v6, %v5969_v0  ;;  %v2007_v29 = vmul.f32 1.442695, %v2006_v57 }
 0x1dc   : > { %1537 = vmax.xlane.f32.xlu0 %v1536_v50  ;;  %v1533_v50 = vmax.f32 %v5840_v48, %v5928_v20  ;;  %v2672_v39 = vmul.f32 1.442695, %v2627_v3  ;;  %v2141_v41 = vmul.f32 1.442695, %v2096_v23 }
 0x1dd   : > { %v1990_v26 = vadd.f32 %v3860_v34, %v1989_v51  ;;  %v6110_v60 = vpop.xlane.xlu2 %2711  ;;  %v1232_v51 = vpop.f32.mrf.mxu2  ;;  %v1973_v34 = vadd.f32 %v1972_v17, %v1971_v32  ;;  %3863 = vpow2.f32 %v2137_v27  ;;  %v2139_v6 = vmul.f32 1.442695, %v2095_v54 }
 0x1de   : > { %3865 = vpow2.f32 %v2019_v59  ;;  %v7087_v59 = vld [vmem:[#allocation67_spill] sm:$0xff]  ;;  %v1256_v0 = vmul.f32 %v1232_v51, %v4417_v35 }
 0x1df   : > { %v1991_v43 = vrot.slane %v1990_v26, 4  ;;  %v6116_v46 = vpop.xlane.xlu1 %2081  ;;  %v1974_v32 = vrot.slane %v1973_v34, 1  ;;  %3867 = vpow2.f32 %v2007_v29  ;;  %v2097_v54 = vsub.f32 %v7087_v59, %v5992_v8 }
 0x1e0   : > { %v6108_v63 = vpop.xlane.xlu0 %2609  ;;  %3869 = vpow2.f32 %v2017_v36  ;;  %v2628_v36 = vsub.f32 %v7088_v18, %v5998_v49  ;;  %v2098_v18 = vsub.f32 %v7009_v4, %v5992_v8 }
 0x1e1   : > { %v1992_v62 = vadd.f32 %v1991_v43, %v1990_v26  ;;  %v7086_v26 = vld [vmem:[#allocation60_spill] sm:$0xff]  ;;  %v3862_v43 = vpop.eup %3861  ;;  %3871 = vpow2.f32 %v2670_v1  ;;  %v1975_v23 = vadd.f32 %v1974_v32, %v1973_v34 }
 0x1e2   : > { %v2099_v57 = vsub.f32 %v7086_v26, %v5965_v52  ;;  %1534 = vmax.xlane.f32.xlu2 %v1533_v50  ;;  %1296 = vadd.xlane.f32.xlu1 %v1270_v11  ;;  %3873 = vpow2.f32 %v2672_v39  ;;  %v7089_v11 = vld [vmem:[#allocation72_spill] sm:$0xff]  ;;  %v2149_v26 = vmul.f32 1.442695, %v2100_v22  ;;  %v1271_v52 = vsel %vm1110_vm11, %v1255_v55, 0.0 }
 0x1e3   : > { %v1993_v56 = vrot.slane %v1992_v62, 2  ;;  %v3864_v50 = vpop.eup %3863  ;;  %v2629_v7 = vsub.f32 %v7089_v11, %v5998_v49  ;;  %3875 = vpow2.f32 %v2139_v6  ;;  %v2143_v11 = vmul.f32 1.442695, %v2097_v54 }
 0x1e4   : > { %v2147_v44 = vmul.f32 1.442695, %v2099_v57  ;;  %v3866_v1 = vpop.eup %3865  ;;  %3877 = vpow2.f32 %v2141_v41  ;;  %v2194_v34 = vadd.f32 %v3864_v50, %v3862_v43  ;;  %v7091_v57 = vld [vmem:[#allocation76_spill] sm:$0xff] }
 0x1e5   : > { %v1994_v17 = vadd.f32 %v1993_v56, %v1992_v62  ;;  %v6131_v27 = vpop.xlane.xlu2 %2717  ;;  %v6142_v29 = vpop.f32.mrf.mxu2  ;;  %v2676_v6 = vmul.f32 1.442695, %v2629_v7  ;;  %v2630_v22 = vsub.f32 %v7091_v57, %v6014_v33  ;;  %v2145_v7 = vmul.f32 1.442695, %v2098_v18  ;;  %v7093_v18 = vld [vmem:[#allocation77_spill] sm:$0xff]  ;;  %v7096_v57 = vld [vmem:[#allocation47_spill] sm:$0xff] }
 0x1e6   : > { %v3868_v39 = vpop.eup %3867  ;;  %3879 = vpow2.f32 %v2147_v44 }
 0x1e7   : > { %v1995_v3 = vrot.slane %v1994_v17, 1  ;;  %v6140_v62 = vpop.xlane.xlu1 %2183  ;;  %v3870_v32 = vpop.eup %3869  ;;  %v2009_v43 = vmul.f32 %v3868_v39, %v2005_v9  ;;  %3881 = vpow2.f32 %v2149_v26 }
 0x1e8   : > { %v6133_v42 = vpop.xlane.xlu0 %2180  ;;  %v3872_v41 = vpop.eup %3871  ;;  %3883 = vpow2.f32 %v2143_v11  ;;  %v2631_v11 = vsub.f32 %v7093_v18, %v6014_v33 }
 0x1e9   : > { %v1996_v56 = vadd.f32 %v1995_v3, %v1994_v17  ;;  %v2674_v17 = vmul.f32 1.442695, %v2628_v36  ;;  %v2021_v3 = vmul.f32 %v3870_v32, %v1975_v23  ;;  %v3874_v54 = vpop.eup %3873  ;;  %v7094_v32 = vld [vmem:[#allocation46_spill] sm:$0xff] }
 0x1ea   : > { %1298 = vadd.xlane.f32.xlu2 %v1271_v52  ;;  %2195 = vadd.xlane.f32.xlu1 %v2194_v34  ;;  %v3876_v50 = vpop.eup %3875  ;;  %v2678_v52 = vmul.f32 1.442695, %v2630_v22  ;;  %v2728_v9 = vadd.f32 %v3874_v54, %v3872_v41  ;;  %v6182_v22 = vmul.f32 2.0, %v7096_v57  ;;  %v7097_v41 = vld [vmem:[#allocation69_spill] sm:$0xff] }
 0x1eb   : > { %v2022_v20 = vmul.f32 %v3866_v1, %v1996_v56  ;;  %v1272_v56 = vsel %vm1111_vm0, %v1256_v0, 0.0  ;;  %3885 = vpow2.f32 %v2674_v17  ;;  %v6174_v17 = vmul.f32 2.0, %v7094_v32 }
 0x1ec   : > { %1300 = vadd.xlane.f32.xlu0 %v1272_v56  ;;  %3887 = vpow2.f32 %v2676_v6  ;;  %v7098_v56 = vld [vmem:[#allocation48_spill] sm:$0xff] }
 0x1ed   : > { %v2025_v59 = vrot.slane %v2022_v20, 7  ;;  %v2721_v4 = vpop.xlane.xlu2 %2720  ;;  %v3878_v20 = vpop.eup %3877  ;;  %3889 = vlog2.f32 %v6110_v60  ;;  %v6190_v54 = vmul.f32 2.0, %v7098_v56 }
 0x1ee   : > { %v6160_v1 = vpop.f32.mrf.mxu2  ;;  %v6165_v0 = vpop.eup %3879  ;;  %3891 = vpow2.f32 %v2145_v7  ;;  %v2197_v26 = vadd.f32 %v3878_v20, %v3876_v50 }
 0x1ef   : > { %v2026_v36 = vsel %vm2001_vm1, %v2021_v3, %v2025_v59  ;;  %v2187_v23 = vpop.xlane.xlu1 %2186  ;;  %v6167_v39 = vpop.eup %3881  ;;  %3893 = vpow2.f32 %v2678_v52  ;;  %v2632_v3 = vsub.f32 %v7097_v41, %v5994_v53  ;;  %v1257_v59 = vmul.f32 %v6142_v29, %v4417_v35  ;;  %v7103_v41 = vld [vmem:[#allocation102_spill] sm:$0xff] }
 0x1f0   : > { %v2715_v51 = vpop.xlane.xlu0 %2714  ;;  %v2028_v44 = vadd.f32 %v2026_v36, %v2009_v43  ;;  %v6171_v34 = vpop.eup %3883  ;;  %3895 = vlog2.f32 %v6131_v27  ;;  %v7099_v27 = vld [vmem:[#allocation91_spill] sm:$0xff]  ;;  %v6213_v56 = vmul.f32 2.0, %v7103_v41 }
 0x1f1   : > { %v3886_v6 = vpop.eup %3885  ;;  %3897 = vlog2.f32 %v6133_v42  ;;  %v6193_v43 = vmul.f32 2.0, %v7099_v27  ;;  %v7100_v42 = vld [vmem:[#allocation70_spill] sm:$0xff] }
 0x1f2   : > { %2033 = vst.msk [vmem:[#allocation4] sm:$0x3] %vm5527_vm15, %v2028_v44  ;;  %2729 = vadd.xlane.f32.xlu2 %v2728_v9  ;;  %2198 = vadd.xlane.f32.xlu1 %v2197_v26  ;;  %v3888_v55 = vpop.eup %3887  ;;  %3899 = vlog2.f32 %v6140_v62  ;;  %v2633_v20 = vsub.f32 %v7100_v42, %v5994_v53  ;;  %v2680_v44 = vmul.f32 1.442695, %v2631_v11  ;;  %v7101_v26 = vld [vmem:[#allocation92_spill] sm:$0xff]  ;;  %v7102_v62 = vld [vmem:[#allocation101_spill] sm:$0xff] }
 0x1f3   : > { %v3890_v7 = vpop.eup %3889  ;;  %3901 = vlog2.f32 %v2715_v51  ;;  %v6205_v18 = vmul.f32 2.0, %v7101_v26  ;;  %v6208_v32 = vmul.f32 2.0, %v7102_v62  ;;  %v6215_v11 = vmul.f32 1.442695, %v2632_v3  ;;  %v7104_v51 = vld [vmem:[#allocation27_spill] sm:$0xff]  ;;  %v7106_v42 = vld [vmem:[#allocation122_spill] sm:$0xff] }
 0x1f4   : > { %v3892_v9 = vpop.eup %3891  ;;  %v2759_v57 = vmul.f32 0.6931472, %v3890_v7  ;;  %3903 = vlog2.f32 %v2187_v23  ;;  %vm7105_vm2 = vcmp.eq.s32.totalorder %v7104_v51, %v6988_v5  ;;  %v2731_v53 = vadd.f32 %v3888_v55, %v3886_v6 }
 0x1f5   : > { %v6179_v60 = vpop.xlane.xlu2 %1507  ;;  %3905 = vlog2.f32 %v2721_v4 }
 0x1f6   : > { %7095 = vst [vmem:[#allocation126_spill] sm:$0xff] %v6179_v60  ;;  %v1552_v36 = vsub.f32 %v7052_v28, %v6179_v60  ;;  %v1553_v29 = vsub.f32 %v7062_v24, %v6179_v60  ;;  %v1241_v52 = vpop.f32.mrf.mxu2  ;;  %v6210_v28 = vpop.eup %3893  ;;  %v1273_v24 = vsel %vm7105_vm2, %v1257_v59, 0.0  ;;  %v2790_v26 = vadd.f32 %v2759_v57, %v7106_v42  ;;  %v7109_v57 = vld [vmem:[#allocation130_spill] sm:$0xff] }
 0x1f7   : > { %v6196_v50 = vpop.xlane.xlu1 %1504  ;;  %v3896_v27 = vpop.eup %3895  ;;  %v1259_v7 = vmul.f32 %v1241_v52, %v4417_v35  ;;  %v6222_v60 = vmul.f32 1.442695, %v2633_v20  ;;  %3907 = vpow2.f32 %v2680_v44  ;;  %v7108_v20 = vld [vmem:[#allocation127_spill] sm:$0xff] }
 0x1f8   : > { %v6177_v21 = vpop.xlane.xlu0 %1501  ;;  %v1588_v62 = vmul.f32 1.442695, %v1552_v36  ;;  %v3898_v23 = vpop.eup %3897  ;;  %v2763_v41 = vmul.f32 0.6931472, %v3896_v27  ;;  %v1590_v33 = vmul.f32 1.442695, %v1553_v29  ;;  %v2823_v8 = vsub.f32 %v2790_v26, %v6205_v18 }
 0x1f9   : > { %v3900_v3 = vpop.eup %3899  ;;  %v2228_v51 = vmul.f32 0.6931472, %v3898_v23  ;;  %v1275_v6 = vsel %vm1114_vm14, %v1259_v7, 0.0  ;;  %v1258_v29 = vmul.f32 %v6160_v1, %v4417_v35  ;;  %v1548_v18 = vsub.f32 %v7050_v10, %v6177_v21  ;;  %v7111_v10 = vld [vmem:[#allocation36_spill] sm:$0xff] }
 0x1fa   : > { %2732 = vadd.xlane.f32.xlu2 %v2731_v53  ;;  %1302 = vadd.xlane.f32.xlu1 %v1273_v24  ;;  %v3902_v36 = vpop.eup %3901  ;;  %v2792_v44 = vadd.f32 %v2763_v41, %v7108_v20  ;;  %v2230_v52 = vmul.f32 0.6931472, %v3900_v3  ;;  %v1549_v42 = vsub.f32 %v7060_v58, %v6177_v21  ;;  %3909 = vpow2.f32 %v1588_v62  ;;  %v7110_v41 = vld [vmem:[#allocation30_spill] sm:$0xff]  ;;  %v7112_v20 = vld [vmem:[#allocation41_spill] sm:$0xff] }
 0x1fb   : > { %1306 = vadd.xlane.f32.xlu0 %v1275_v6  ;;  %v3904_v53 = vpop.eup %3903  ;;  %v2259_v24 = vadd.f32 %v2228_v51, %v7109_v57  ;;  %v2761_v27 = vmul.f32 0.6931472, %v3902_v36  ;;  %3911 = vpow2.f32 %v1590_v33  ;;  %v7113_v62 = vld [vmem:[#allocation26_spill] sm:$0xff] }
 0x1fc   : > { %v3906_v7 = vpop.eup %3905  ;;  %v2825_v23 = vsub.f32 %v2792_v44, %v6213_v56  ;;  %v2260_v3 = vadd.f32 %v2230_v52, %v7110_v41  ;;  %v2232_v59 = vmul.f32 0.6931472, %v3904_v53  ;;  %vm7114_vm4 = vcmp.eq.s32.totalorder %v7113_v62, %v6988_v5  ;;  %v7115_v52 = vld [vmem:[#allocation37_spill] sm:$0xff] }
 0x1fd   : > { %v6230_v55 = vpop.xlane.xlu2 %1284  ;;  %v2292_v35 = vsub.f32 %v2259_v24, %v6190_v54  ;;  %v2791_v1 = vadd.f32 %v2761_v27, %v7111_v10  ;;  %v2765_v6 = vmul.f32 0.6931472, %v3906_v7  ;;  %v3908_v51 = vpop.eup %3907  ;;  %v1274_v57 = vsel %vm7114_vm4, %v1258_v29, 0.0  ;;  %v7116_v24 = vld [vmem:[#allocation80_spill] sm:$0xff]  ;;  %v7118_v62 = vld [vmem:[#allocation57_spill] sm:$0xff] }
 0x1fe   : > { %v2293_v36 = vsub.f32 %v2260_v3, %v6182_v22  ;;  %v2261_v58 = vadd.f32 %v2232_v59, %v7112_v20  ;;  %v1580_v56 = vmul.f32 1.442695, %v1548_v18  ;;  %v2200_v54 = vadd.f32 %v3892_v9, %v6171_v34  ;;  %v7117_v20 = vld [vmem:[#allocation131_spill] sm:$0xff] }
 0x1ff   : > { %v2190_v26 = vpop.xlane.xlu1 %2189  ;;  %v2308_v44 = vsel %vm1773_vm3, %v2292_v35, 0.0  ;;  %v2824_v33 = vsub.f32 %v2791_v1, %v6193_v43  ;;  %v2793_v53 = vadd.f32 %v2765_v6, %v7115_v52  ;;  %v2101_v27 = vsub.f32 %v7116_v24, %v6023_v40 }
 0x200   : > { %v6225_v4 = vpop.xlane.xlu0 %1276  ;;  %3913 = vlog2.f32 %v2190_v26  ;;  %v2309_v22 = vsel %vm1773_vm3, %v2293_v36, 0.0  ;;  %v2294_v26 = vsub.f32 %v2261_v58, %v6174_v17  ;;  %v1582_v7 = vmul.f32 1.442695, %v1549_v42  ;;  %v3910_v41 = vpop.eup %3909 }
 0x201   : > { %v2839_v5 = vsel %vm1773_vm3, %v2823_v8, 0.0  ;;  %v2310_v29 = vadd.f32 %v2309_v22, %v2308_v44  ;;  %v2840_v18 = vsel %vm1773_vm3, %v2824_v33, 0.0  ;;  %v2826_v34 = vsub.f32 %v2793_v53, %v6208_v32  ;;  %v3912_v9 = vpop.eup %3911  ;;  %v7119_v33 = vld [vmem:[#allocation137_spill] sm:$0xff] }
 0x202   : > { %1304 = vadd.xlane.f32.xlu2 %v1274_v57  ;;  %2201 = vadd.xlane.f32.xlu1 %v2200_v54  ;;  %v2102_v3 = vsub.f32 %v7013_v45, %v6023_v40  ;;  %v2841_v59 = vadd.f32 %v2840_v18, %v2839_v5  ;;  %v2311_v17 = vsel %vm1773_vm3, %v2294_v26, 0.0  ;;  %3915 = vpow2.f32 %v1580_v56 }
 0x203   : > { %v2842_v35 = vsel %vm1773_vm3, %v2825_v23, 0.0  ;;  %v2312_v10 = vadd.f32 %v2311_v17, %v2310_v29  ;;  %v2844_v1 = vsel %vm1773_vm3, %v2826_v34, 0.0  ;;  %v1650_v32 = vadd.f32 %v3912_v9, %v3910_v41  ;;  %v7120_v41 = vld [vmem:[#allocation38_spill] sm:$0xff] }
 0x204   : > { %v2843_v36 = vadd.f32 %v2842_v35, %v2841_v59  ;;  %v1550_v58 = vsub.f32 %v7117_v20, %v6196_v50  ;;  %3917 = vpow2.f32 %v1582_v7  ;;  %v2279_v57 = vmul.f32 2.0, %v7118_v62  ;;  %v7124_v59 = vld [vmem:[#allocation86_spill] sm:$0xff] }
 0x205   : > { %v6265_v42 = vpop.xlane.xlu2 %1516  ;;  %3919 = vpow2.f32 %v6215_v11  ;;  %v1551_v56 = vsub.f32 %v7061_v19, %v6196_v50  ;;  %1651 = vadd.xlane.f32.xlu0 %v1650_v32  ;;  %v2151_v23 = vmul.f32 1.442695, %v2101_v27  ;;  %v2153_v52 = vmul.f32 1.442695, %v2102_v3  ;;  %v7125_v32 = vld [vmem:[#allocation140_spill] sm:$0xff] }
 0x206   : > { %v3914_v8 = vpop.eup %3913  ;;  %3921 = vpow2.f32 %v6222_v60  ;;  %v6278_v44 = vadd.f32 %v2844_v1, %v2843_v36  ;;  %v2734_v53 = vadd.f32 %v3908_v51, %v6210_v28  ;;  %v2203_v24 = vadd.f32 %v6167_v39, %v6165_v0  ;;  %v7121_v28 = vld [vmem:[#allocation39_spill] sm:$0xff]  ;;  %v7122_v0 = vld [vmem:[#allocation128_spill] sm:$0xff]  ;;  %v7123_v39 = vld [vmem:[#allocation85_spill] sm:$0xff] }
 0x207   : > { %v6269_v6 = vpop.xlane.xlu1 %1280  ;;  %v2234_v45 = vmul.f32 0.6931472, %v3914_v8  ;;  %v1584_v26 = vmul.f32 1.442695, %v1550_v58  ;;  %v1586_v7 = vmul.f32 1.442695, %v1551_v56  ;;  %3923 = vpow2.f32 %v2151_v23 }
 0x208   : > { %v6260_v43 = vpop.xlane.xlu0 %1278  ;;  %v3916_v22 = vpop.eup %3915  ;;  %3925 = vpow2.f32 %v2153_v52  ;;  %v2103_v18 = vsub.f32 %v7123_v39, %v7122_v0  ;;  %v2104_v17 = vsub.f32 %v7124_v59, %v7122_v0  ;;  %v7126_v36 = vld [vmem:[#allocation89_spill] sm:$0xff]  ;;  %v7134_v59 = vld [vmem:[#allocation95_spill] sm:$0xff] }
 0x209   : > { %v2262_v54 = vadd.f32 %v2234_v45, %v7119_v33  ;;  %3927 = vpow2.f32 %v1584_v26  ;;  %v2634_v20 = vsub.f32 %v7126_v36, %v7125_v32  ;;  %v7127_v45 = vld [vmem:[#allocation90_spill] sm:$0xff] }
 0x20a   : > { %2735 = vadd.xlane.f32.xlu2 %v2734_v53  ;;  %2204 = vadd.xlane.f32.xlu1 %v2203_v24  ;;  %v3918_v60 = vpop.eup %3917  ;;  %3929 = vpow2.f32 %v1586_v7  ;;  %v2155_v62 = vmul.f32 1.442695, %v2103_v18  ;;  %v2157_v23 = vmul.f32 1.442695, %v2104_v17  ;;  %v7128_v26 = vld [vmem:[#allocation50_spill] sm:$0xff]  ;;  %v2637_v17 = vsub.f32 %v7134_v59, %v6072_v2  ;;  %v7142_v59 = vld [vmem:[#allocation99_spill] sm:$0xff] }
 0x20b   : > { %v2295_v11 = vsub.f32 %v2262_v54, %v2279_v57  ;;  %v3920_v29 = vpop.eup %3919  ;;  %v1644_v58 = vadd.f32 %v3918_v60, %v3916_v22  ;;  %v2686_v54 = vmul.f32 1.442695, %v2634_v20  ;;  %v7133_v18 = vld [vmem:[#allocation94_spill] sm:$0xff] }
 0x20c   : > { %v3922_v3 = vpop.eup %3921 }
 0x20d   : > { %v2313_v27 = vsel %vm1773_vm3, %v2295_v11, 0.0  ;;  %v6299_v1 = vpop.xlane.xlu2 %1286  ;;  %v2737_v57 = vadd.f32 %v3922_v3, %v3920_v29  ;;  %v3924_v56 = vpop.eup %3923  ;;  %v7129_v11 = vld [vmem:[#allocation78_spill] sm:$0xff]  ;;  %v2636_v3 = vsub.f32 %v7133_v18, %v6072_v2 }
 0x20e   : > { %v6293_v34 = vadd.f32 %v2313_v27, %v2312_v10  ;;  %v2635_v10 = vsub.f32 %v7127_v45, %v7125_v32  ;;  %v3926_v33 = vpop.eup %3925  ;;  %v2105_v7 = vsub.f32 %v7129_v11, %v7128_v26  ;;  %v7130_v27 = vld [vmem:[#allocation79_spill] sm:$0xff]  ;;  %v7136_v45 = vld [vmem:[#allocation129_spill] sm:$0xff] }
 0x20f   : > { %v6295_v9 = vpop.xlane.xlu1 %1282  ;;  %v3928_v52 = vpop.eup %3927 }
 0x210   : > { %v6284_v19 = vpop.xlane.xlu0 %1510  ;;  %v2688_v53 = vmul.f32 1.442695, %v2635_v10  ;;  %v3930_v24 = vpop.eup %3929  ;;  %v7137_v10 = vld [vmem:[#allocation87_spill] sm:$0xff] }
 0x211   : > { %v1554_v5 = vsub.f32 %v7120_v41, %v6284_v19  ;;  %v1555_v51 = vsub.f32 %v7121_v28, %v6284_v19  ;;  %v2106_v41 = vsub.f32 %v7130_v27, %v7128_v26  ;;  %v7138_v27 = vld [vmem:[#allocation88_spill] sm:$0xff] }
 0x212   : > { %2738 = vadd.xlane.f32.xlu2 %v2737_v57  ;;  %1645 = vadd.xlane.f32.xlu1 %v1644_v58  ;;  %v2159_v58 = vmul.f32 1.442695, %v2105_v7  ;;  %v1647_v57 = vadd.f32 %v3930_v24, %v3928_v52  ;;  %v7140_v24 = vld [vmem:[#allocation141_spill] sm:$0xff] }
 0x213   : > { %v1592_v8 = vmul.f32 1.442695, %v1554_v5  ;;  %v1594_v35 = vmul.f32 1.442695, %v1555_v51  ;;  %v7131_v5 = vld [vmem:[#allocation132_spill] sm:$0xff]  ;;  %v7132_v51 = vld [vmem:[#allocation133_spill] sm:$0xff] }
 0x214   : > { %v2161_v11 = vmul.f32 1.442695, %v2106_v41 }
 0x215   : > { %3931 = vpow2.f32 %v1592_v8  ;;  %v6319_v20 = vpop.xlane.xlu2 %1543 }
 0x216   : > { %3933 = vpow2.f32 %v1594_v35  ;;  %7135 = vst [vmem:[#allocation31_spill] sm:$0xff] %v6319_v20 }
 0x217   : > { %3935 = vpow2.f32 %v2155_v62  ;;  %v6307_v22 = vpop.xlane.xlu1 %1513  ;;  %v2638_v62 = vsub.f32 %v7137_v10, %v7136_v45 }
 0x218   : > { %3937 = vpow2.f32 %v2157_v23  ;;  %v1556_v28 = vsub.f32 %v7131_v5, %v6307_v22  ;;  %v1557_v29 = vsub.f32 %v7132_v51, %v6307_v22  ;;  %v2206_v23 = vadd.f32 %v3926_v33, %v3924_v56  ;;  %v7139_v56 = vld [vmem:[#allocation98_spill] sm:$0xff] }
 0x219   : > { %3939 = vpow2.f32 %v2686_v54  ;;  %v2639_v5 = vsub.f32 %v7138_v27, %v7136_v45  ;;  %v2690_v51 = vmul.f32 1.442695, %v2636_v3  ;;  %v2694_v7 = vmul.f32 1.442695, %v2638_v62 }
 0x21a   : > { %3941 = vpow2.f32 %v2688_v53  ;;  %v1596_v8 = vmul.f32 1.442695, %v1556_v28  ;;  %v1598_v35 = vmul.f32 1.442695, %v1557_v29  ;;  %1648 = vadd.xlane.f32.xlu2 %v1647_v57  ;;  %2207 = vadd.xlane.f32.xlu1 %v2206_v23  ;;  %v2107_v33 = vsub.f32 %v7139_v56, %v6078_v37  ;;  %v7144_v57 = vld [vmem:[#allocation135_spill] sm:$0xff] }
 0x21b   : > { %v3932_v60 = vpop.eup %3931  ;;  %v2696_v3 = vmul.f32 1.442695, %v2639_v5  ;;  %v1559_v23 = vsub.f32 %v7144_v57, %v6265_v42 }
 0x21c   : > { %v3934_v39 = vpop.eup %3933  ;;  %3943 = vpow2.f32 %v1596_v8  ;;  %v2163_v56 = vmul.f32 1.442695, %v2107_v33 }
 0x21d   : > { %v1653_v36 = vadd.f32 %v3934_v39, %v3932_v60  ;;  %v3936_v54 = vpop.eup %3935  ;;  %3945 = vpow2.f32 %v1598_v35  ;;  %v2692_v60 = vmul.f32 1.442695, %v2637_v17  ;;  %v7141_v39 = vld [vmem:[#allocation14_spill] sm:$0xff]  ;;  %v2108_v17 = vsub.f32 %v7142_v59, %v6078_v37  ;;  %v7143_v35 = vld [vmem:[#allocation136_spill] sm:$0xff] }
 0x21e   : > { %v3938_v53 = vpop.eup %3937  ;;  %3947 = vpow2.f32 %v2159_v58 }
 0x21f   : > { %1654 = vadd.xlane.f32.xlu0 %v1653_v36  ;;  %v3940_v28 = vpop.eup %3939  ;;  %v6325_v29 = vpop.xlane.xlu1 %1540  ;;  %3949 = vpow2.f32 %v2161_v11  ;;  %v1558_v36 = vsub.f32 %v7143_v35, %v6265_v42  ;;  %v2209_v27 = vadd.f32 %v3938_v53, %v3936_v54  ;;  %v1602_v53 = vmul.f32 1.442695, %v1559_v23 }
 0x220   : > { %v3942_v52 = vpop.eup %3941  ;;  %v1574_v41 = vsub.f32 %v7140_v24, %v6325_v29  ;;  %v1575_v18 = vsub.f32 %v7141_v39, %v6325_v29  ;;  %3951 = vpow2.f32 %v2690_v51  ;;  %v2165_v39 = vmul.f32 1.442695, %v2108_v17 }
 0x221   : > { %3953 = vpow2.f32 %v2692_v60  ;;  %v2740_v11 = vadd.f32 %v3942_v52, %v3940_v28  ;;  %v1600_v35 = vmul.f32 1.442695, %v1558_v36  ;;  %v7147_v52 = vld [vmem:[#allocation107_spill] sm:$0xff] }
 0x222   : > { %v3944_v8 = vpop.eup %3943  ;;  %v1632_v58 = vmul.f32 1.442695, %v1574_v41  ;;  %v1634_v10 = vmul.f32 1.442695, %v1575_v18  ;;  %3955 = vpow2.f32 %v2694_v7  ;;  %2210 = vadd.xlane.f32.xlu1 %v2209_v27  ;;  %v7145_v41 = vld [vmem:[#allocation103_spill] sm:$0xff]  ;;  %v7146_v7 = vld [vmem:[#allocation104_spill] sm:$0xff]  ;;  %v2640_v33 = vsub.f32 %v7147_v52, %v6093_v38 }
 0x223   : > { %v3946_v62 = vpop.eup %3945  ;;  %2741 = vadd.xlane.f32.xlu2 %v2740_v11  ;;  %v2109_v18 = vsub.f32 %v7145_v41, %v6089_v61  ;;  %v2110_v59 = vsub.f32 %v7146_v7, %v6089_v61  ;;  %v7149_v11 = vld [vmem:[#allocation16_spill] sm:$0xff] }
 0x224   : > { %3957 = vpow2.f32 %v1632_v58  ;;  %v1656_v5 = vadd.f32 %v3946_v62, %v3944_v8  ;;  %v3948_v24 = vpop.eup %3947  ;;  %v7148_v8 = vld [vmem:[#allocation108_spill] sm:$0xff] }
 0x225   : > { %v2724_v51 = vpop.xlane.xlu2 %2723  ;;  %3959 = vpow2.f32 %v1634_v10  ;;  %v3950_v60 = vpop.eup %3949  ;;  %v2641_v58 = vsub.f32 %v7148_v8, %v6093_v38  ;;  %v2167_v57 = vmul.f32 1.442695, %v2109_v18  ;;  %v2169_v36 = vmul.f32 1.442695, %v2110_v59  ;;  %v7150_v52 = vld [vmem:[#allocation96_spill] sm:$0xff] }
 0x226   : > { %3961 = vlog2.f32 %v2724_v51  ;;  %v3952_v54 = vpop.eup %3951  ;;  %v6347_v10 = vpop.xlane.xlu0 %1519  ;;  %v2111_v8 = vsub.f32 %v7150_v52, %v6074_v30  ;;  %v7155_v52 = vld [vmem:[#allocation113_spill] sm:$0xff] }
 0x227   : > { %1657 = vadd.xlane.f32.xlu0 %v1656_v5  ;;  %3963 = vpow2.f32 %v2696_v3  ;;  %v3954_v28 = vpop.eup %3953  ;;  %v1576_v3 = vsub.f32 %v7149_v11, %v6319_v20  ;;  %v1577_v5 = vsub.f32 %v5894_v15, %v6319_v20  ;;  %v2700_v18 = vmul.f32 1.442695, %v2641_v58  ;;  %v7151_v11 = vld [vmem:[#allocation97_spill] sm:$0xff]  ;;  %v7152_v15 = vld [vmem:[#allocation100_spill] sm:$0xff] }
 0x228   : > { %3965 = vpow2.f32 %v2163_v56  ;;  %v3956_v17 = vpop.eup %3955  ;;  %v2743_v27 = vadd.f32 %v3954_v28, %v3952_v54  ;;  %v2212_v56 = vadd.f32 %v3950_v60, %v3948_v24  ;;  %v2811_v54 = vmul.f32 2.0, %v7152_v15  ;;  %v7154_v58 = vld [vmem:[#allocation112_spill] sm:$0xff] }
 0x229   : > { %3967 = vpow2.f32 %v2165_v39  ;;  %v2698_v39 = vmul.f32 1.442695, %v2640_v33  ;;  %v1636_v24 = vmul.f32 1.442695, %v1576_v3  ;;  %v1638_v28 = vmul.f32 1.442695, %v1577_v5 }
 0x22a   : > { %v3958_v62 = vpop.eup %3957  ;;  %3969 = vpow2.f32 %v1600_v35  ;;  %2213 = vadd.xlane.f32.xlu1 %v2212_v56  ;;  %v7153_v33 = vld [vmem:[#allocation15_spill] sm:$0xff]  ;;  %v7157_v5 = vld [vmem:[#allocation42_spill] sm:$0xff] }
 0x22b   : > { %v3960_v23 = vpop.eup %3959  ;;  %3971 = vpow2.f32 %v1602_v53  ;;  %2744 = vadd.xlane.f32.xlu2 %v2743_v27  ;;  %v2112_v53 = vsub.f32 %v7151_v11, %v6074_v30  ;;  %v2642_v27 = vsub.f32 %v7154_v58, %v6108_v63  ;;  %v7156_v11 = vld [vmem:[#allocation134_spill] sm:$0xff] }
 0x22c   : > { %v3962_v51 = vpop.eup %3961  ;;  %v1683_v41 = vadd.f32 %v3960_v23, %v3958_v62  ;;  %3973 = vpow2.f32 %v2167_v57  ;;  %v2643_v57 = vsub.f32 %v7155_v52, %v6108_v63  ;;  %v1560_v15 = vsub.f32 %v7156_v11, %v6347_v10 }
 0x22d   : > { %v3964_v7 = vpop.eup %3963  ;;  %v2767_v59 = vmul.f32 0.6931472, %v3962_v51  ;;  %3975 = vpow2.f32 %v2169_v36  ;;  %v2171_v51 = vmul.f32 1.442695, %v2111_v8  ;;  %v2702_v58 = vmul.f32 1.442695, %v2642_v27 }
 0x22e   : > { %v3966_v35 = vpop.eup %3965  ;;  %3977 = vpow2.f32 %v2698_v39  ;;  %v6367_v39 = vpop.xlane.xlu0 %1288 }
 0x22f   : > { %1684 = vadd.xlane.f32.xlu0 %v1683_v41  ;;  %v3968_v60 = vpop.eup %3967  ;;  %v2794_v62 = vadd.f32 %v2767_v59, %v7153_v33  ;;  %3979 = vpow2.f32 %v2700_v18  ;;  %v2173_v41 = vmul.f32 1.442695, %v2112_v53  ;;  %v1561_v59 = vsub.f32 %v7157_v5, %v6347_v10 }
 0x230   : > { %v3970_v23 = vpop.eup %3969  ;;  %3981 = vpow2.f32 %v1636_v24  ;;  %v2215_v36 = vadd.f32 %v3968_v60, %v3966_v35  ;;  %v2746_v33 = vadd.f32 %v3964_v7, %v3956_v17  ;;  %v7158_v24 = vld [vmem:[#allocation105_spill] sm:$0xff]  ;;  %v1604_v7 = vmul.f32 1.442695, %v1560_v15  ;;  %v7162_v15 = vld [vmem:[#allocation43_spill] sm:$0xff] }
 0x231   : > { %v3972_v56 = vpop.eup %3971  ;;  %v2827_v3 = vsub.f32 %v2794_v62, %v2811_v54  ;;  %3983 = vpow2.f32 %v1638_v28  ;;  %v2704_v62 = vmul.f32 1.442695, %v2643_v57  ;;  %v2644_v60 = vsub.f32 %v7158_v24, %v6091_v12  ;;  %v7159_v28 = vld [vmem:[#allocation106_spill] sm:$0xff] }
 0x232   : > { %v3974_v18 = vpop.eup %3973  ;;  %v1659_v53 = vadd.f32 %v3972_v56, %v3970_v23  ;;  %2216 = vadd.xlane.f32.xlu1 %v2215_v36  ;;  %3985 = vpow2.f32 %v2171_v51  ;;  %v2645_v17 = vsub.f32 %v7159_v28, %v6091_v12  ;;  %v7160_v56 = vld [vmem:[#allocation117_spill] sm:$0xff]  ;;  %v7161_v51 = vld [vmem:[#allocation118_spill] sm:$0xff] }
 0x233   : > { %v2846_v8 = vsel %vm1773_vm3, %v2827_v3, 0.0  ;;  %v3976_v54 = vpop.eup %3975  ;;  %2747 = vadd.xlane.f32.xlu2 %v2746_v33  ;;  %v6377_v3 = vpop.xlane.xlu1 %1522  ;;  %3987 = vpow2.f32 %v2173_v41  ;;  %v2113_v57 = vsub.f32 %v7160_v56, %v6116_v46  ;;  %v2114_v36 = vsub.f32 %v7161_v51, %v6116_v46  ;;  %v7163_v41 = vld [vmem:[#allocation138_spill] sm:$0xff] }
 0x234   : > { %v6371_v52 = vadd.f32 %v2846_v8, %v6278_v44  ;;  %v3978_v35 = vpop.eup %3977  ;;  %v1606_v44 = vmul.f32 1.442695, %v1561_v59  ;;  %3989 = vpow2.f32 %v2702_v58  ;;  %v2706_v5 = vmul.f32 1.442695, %v2644_v60 }
 0x235   : > { %v3980_v27 = vpop.eup %3979  ;;  %3991 = vpow2.f32 %v2704_v62  ;;  %v2708_v33 = vmul.f32 1.442695, %v2645_v17  ;;  %v1562_v8 = vsub.f32 %v7162_v15, %v6377_v3  ;;  %v1563_v59 = vsub.f32 %v7163_v41, %v6377_v3 }
 0x236   : > { %v3982_v23 = vpop.eup %3981  ;;  %3993 = vpow2.f32 %v1604_v7  ;;  %v2218_v58 = vadd.f32 %v3976_v54, %v3974_v18  ;;  %v2175_v28 = vmul.f32 1.442695, %v2113_v57  ;;  %v2177_v62 = vmul.f32 1.442695, %v2114_v36  ;;  %v6387_v12 = vpop.xlane.xlu0 %1546 }
 0x237   : > { %1660 = vadd.xlane.f32.xlu0 %v1659_v53  ;;  %v3984_v11 = vpop.eup %3983  ;;  %3995 = vpow2.f32 %v1606_v44  ;;  %v2749_v53 = vadd.f32 %v3980_v27, %v3978_v35  ;;  %7164 = vst [vmem:[#allocation51_spill] sm:$0xff] %v6387_v12  ;;  %v1608_v17 = vmul.f32 1.442695, %v1562_v8  ;;  %v1610_v44 = vmul.f32 1.442695, %v1563_v59 }
 0x238   : > { %v3986_v24 = vpop.eup %3985  ;;  %v1686_v56 = vadd.f32 %v3984_v11, %v3982_v23  ;;  %3997 = vpow2.f32 %v2706_v5 }
 0x239   : > { %v3988_v20 = vpop.eup %3987  ;;  %3999 = vpow2.f32 %v2708_v33 }
 0x23a   : > { %2219 = vadd.xlane.f32.xlu1 %v2218_v58  ;;  %v3990_v60 = vpop.eup %3989  ;;  %4001 = vpow2.f32 %v2175_v28  ;;  %v2221_v11 = vadd.f32 %v3988_v20, %v3986_v24 }
 0x23b   : > { %2750 = vadd.xlane.f32.xlu2 %v2749_v53  ;;  %v3992_v7 = vpop.eup %3991  ;;  %4003 = vpow2.f32 %v2177_v62 }
 0x23c   : > { %v3994_v51 = vpop.eup %3993  ;;  %4005 = vpow2.f32 %v1608_v17  ;;  %v2752_v57 = vadd.f32 %v3992_v7, %v3990_v60 }
 0x23d   : > { %v6389_v35 = vpop.xlane.xlu2 %1525  ;;  %v6391_v18 = vpop.xlane.xlu1 %1290  ;;  %4007 = vpow2.f32 %v1610_v44 }
 0x23e   : > { %v3996_v54 = vpop.eup %3995  ;;  %v1564_v27 = vsub.f32 %v7055_v14, %v6389_v35  ;;  %v1565_v23 = vsub.f32 %v7069_v13, %v6389_v35 }
 0x23f   : > { %1687 = vadd.xlane.f32.xlu0 %v1686_v56  ;;  %v3998_v36 = vpop.eup %3997  ;;  %v1662_v5 = vadd.f32 %v3996_v54, %v3994_v51  ;;  %v6397_v53 = vpop.xlane.xlu0 %1528 }
 0x240   : > { %v4000_v33 = vpop.eup %3999  ;;  %v1612_v8 = vmul.f32 1.442695, %v1564_v27  ;;  %v1614_v59 = vmul.f32 1.442695, %v1565_v23  ;;  %v1566_v13 = vsub.f32 %v5737_v25, %v6397_v53  ;;  %v1567_v20 = vsub.f32 %v7040_v47, %v6397_v53  ;;  %v7165_v25 = vld [vmem:[#allocation56_spill] sm:$0xff]  ;;  %v7166_v47 = vld [vmem:[#allocation61_spill] sm:$0xff] }
 0x241   : > { %v4002_v15 = vpop.eup %4001  ;;  %v2755_v24 = vadd.f32 %v4000_v33, %v3998_v36 }
 0x242   : > { %2222 = vadd.xlane.f32.xlu1 %v2221_v11  ;;  %v4004_v41 = vpop.eup %4003  ;;  %v1616_v17 = vmul.f32 1.442695, %v1566_v13  ;;  %v1618_v44 = vmul.f32 1.442695, %v1567_v20  ;;  %v2280_v11 = vmul.f32 2.0, %v7165_v25 }
 0x243   : > { %2753 = vadd.xlane.f32.xlu2 %v2752_v57  ;;  %v4006_v58 = vpop.eup %4005  ;;  %v2224_v62 = vadd.f32 %v4004_v41, %v4002_v15 }
 0x244   : > { %v4008_v56 = vpop.eup %4007 }
 0x245   : > { %v6399_v14 = vpop.xlane.xlu2 %1292  ;;  %v2193_v28 = vpop.xlane.xlu1 %2192  ;;  %v1665_v60 = vadd.f32 %v4008_v56, %v4006_v58 }
 0x246   : > { %4009 = vlog2.f32 %v2193_v28 }
 0x247   : > { %1663 = vadd.xlane.f32.xlu0 %v1662_v5  ;;  %4011 = vpow2.f32 %v1612_v8  ;;  %v6411_v33 = vpop.xlane.xlu0 %1294 }
 0x248   : > { %4013 = vpow2.f32 %v1614_v59 }
 0x24a   : > { %2225 = vadd.xlane.f32.xlu1 %v2224_v62 }
 0x24b   : > { %2756 = vadd.xlane.f32.xlu2 %v2755_v24 }
 0x24c   : > { %v4010_v7 = vpop.eup %4009 }
 0x24d   : > { %v4012_v51 = vpop.eup %4011  ;;  %v2236_v54 = vmul.f32 0.6931472, %v4010_v7  ;;  %v2727_v27 = vpop.xlane.xlu2 %2726 }
 0x24e   : > { %v6405_v23 = vpop.xlane.xlu1 %1531  ;;  %v4014_v57 = vpop.eup %4013  ;;  %4015 = vlog2.f32 %v2727_v27 }
 0x24f   : > { %1666 = vadd.xlane.f32.xlu0 %v1665_v60  ;;  %4017 = vpow2.f32 %v1616_v17  ;;  %v2263_v36 = vadd.f32 %v2236_v54, %v7166_v47  ;;  %v1568_v5 = vsub.f32 %v5815_v31, %v6405_v23  ;;  %v1569_v15 = vsub.f32 %v5902_v16, %v6405_v23  ;;  %v7167_v17 = vld [vmem:[#allocation111_spill] sm:$0xff]  ;;  %v7168_v16 = vld [vmem:[#allocation17_spill] sm:$0xff]  ;;  %v6427_v25 = vpop.xlane.xlu0 %1537 }
 0x250   : > { %4019 = vpow2.f32 %v1618_v44  ;;  %v1668_v41 = vadd.f32 %v4014_v57, %v4012_v51  ;;  %v2812_v7 = vmul.f32 2.0, %v7167_v17  ;;  %v7169_v54 = vld [vmem:[#allocation33_spill] sm:$0xff] }
 0x251   : > { %v2296_v8 = vsub.f32 %v2263_v36, %v2280_v11  ;;  %v1620_v58 = vmul.f32 1.442695, %v1568_v5  ;;  %v1622_v13 = vmul.f32 1.442695, %v1569_v15 }
 0x253   : > { %v2315_v59 = vsel %vm1773_vm3, %v2296_v8, 0.0  ;;  %4021 = vpow2.f32 %v1620_v58  ;;  %v7170_v8 = vld [vmem:[#allocation40_spill] sm:$0xff] }
 0x254   : > { %v4016_v28 = vpop.eup %4015  ;;  %v2316_v56 = vadd.f32 %v2315_v59, %v6293_v34  ;;  %4023 = vpow2.f32 %v1622_v13 }
 0x255   : > { %v4018_v20 = vpop.eup %4017  ;;  %v2769_v24 = vmul.f32 0.6931472, %v4016_v28  ;;  %v6417_v62 = vpop.xlane.xlu2 %1534  ;;  %v7171_v28 = vld [vmem:[#allocation68_spill] sm:$0xff] }
 0x256   : > { %v6419_v31 = vpop.xlane.xlu1 %1296  ;;  %v4020_v60 = vpop.eup %4019  ;;  %v1570_v51 = vsub.f32 %v5840_v48, %v6417_v62  ;;  %v1571_v34 = vsub.f32 %v7169_v54, %v6417_v62  ;;  %v1573_v13 = vsub.f32 %v7171_v28, %v6427_v25  ;;  %v7172_v54 = vld [vmem:[#allocation55_spill] sm:$0xff] }
 0x257   : > { %1669 = vadd.xlane.f32.xlu0 %v1668_v41  ;;  %v2795_v44 = vadd.f32 %v2769_v24, %v7168_v16  ;;  %v1671_v57 = vadd.f32 %v4020_v60, %v4018_v20  ;;  %v1572_v41 = vsub.f32 %v7170_v8, %v6427_v25 }
 0x258   : > { %v1624_v47 = vmul.f32 1.442695, %v1570_v51  ;;  %v1626_v5 = vmul.f32 1.442695, %v1571_v34  ;;  %v2281_v34 = vmul.f32 2.0, %v7172_v54 }
 0x259   : > { %v2828_v27 = vsub.f32 %v2795_v44, %v2812_v7  ;;  %v4022_v15 = vpop.eup %4021  ;;  %v1628_v20 = vmul.f32 1.442695, %v1572_v41 }
 0x25a   : > { %v4024_v58 = vpop.eup %4023 }
 0x25b   : > { %v2848_v11 = vsel %vm1773_vm3, %v2828_v27, 0.0  ;;  %v1674_v24 = vadd.f32 %v4024_v58, %v4022_v15  ;;  %v7173_v27 = vld [vmem:[#allocation32_spill] sm:$0xff] }
 0x25c   : > { %v2849_v36 = vadd.f32 %v2848_v11, %v6371_v52  ;;  %v1630_v52 = vmul.f32 1.442695, %v1573_v13  ;;  %v7174_v11 = vld [vmem:[#allocation18_spill] sm:$0xff] }
 0x25d   : > { %v6433_v48 = vpop.xlane.xlu2 %1298 }
 0x25e   : > { %v2196_v59 = vpop.xlane.xlu1 %2195 }
 0x25f   : > { %1672 = vadd.xlane.f32.xlu0 %v1671_v57  ;;  %4025 = vlog2.f32 %v2196_v59  ;;  %v1578_v57 = vsub.f32 %v7173_v27, %v6387_v12 }
 0x260   : > { %4027 = vpow2.f32 %v1624_v47 }
 0x261   : > { %4029 = vpow2.f32 %v1626_v5  ;;  %v7175_v5 = vld [vmem:[#allocation35_spill] sm:$0xff]  ;;  %v1640_v58 = vmul.f32 1.442695, %v1578_v57  ;;  %v7178_v57 = vld [vmem:[#allocation66_spill] sm:$0xff] }
 0x262   : > { %4031 = vpow2.f32 %v1628_v20  ;;  %v1579_v15 = vsub.f32 %v7175_v5, %v6387_v12  ;;  %v7179_v5 = vld [vmem:[#allocation13_spill] sm:$0xff] }
 0x264   : > { %v1642_v20 = vmul.f32 1.442695, %v1579_v15 }
 0x265   : > { %v4026_v60 = vpop.eup %4025  ;;  %v2730_v16 = vpop.xlane.xlu2 %2729 }
 0x266   : > { %v4028_v17 = vpop.eup %4027  ;;  %v2238_v7 = vmul.f32 0.6931472, %v4026_v60  ;;  %v2199_v44 = vpop.xlane.xlu1 %2198  ;;  %4033 = vlog2.f32 %v2730_v16 }
 0x267   : > { %1675 = vadd.xlane.f32.xlu0 %v1674_v24  ;;  %v4030_v51 = vpop.eup %4029  ;;  %4035 = vlog2.f32 %v2199_v44  ;;  %v6444_v60 = vpop.xlane.xlu0 %1300 }
 0x268   : > { %v2264_v47 = vadd.f32 %v2238_v7, %v7174_v11  ;;  %4037 = vpow2.f32 %v1630_v52  ;;  %v1677_v41 = vadd.f32 %v4030_v51, %v4028_v17  ;;  %v4032_v59 = vpop.eup %4031  ;;  %v7176_v52 = vld [vmem:[#allocation110_spill] sm:$0xff]  ;;  %v7177_v51 = vld [vmem:[#allocation81_spill] sm:$0xff] }
 0x269   : > { %v2813_v17 = vmul.f32 2.0, %v7176_v52 }
 0x26a   : > { %v2297_v8 = vsub.f32 %v2264_v47, %v2281_v34  ;;  %v2282_v47 = vmul.f32 2.0, %v7178_v57 }
 0x26c   : > { %v2317_v28 = vsel %vm1773_vm3, %v2297_v8, 0.0  ;;  %v4034_v13 = vpop.eup %4033 }
 0x26d   : > { %v2318_v24 = vadd.f32 %v2317_v28, %v2316_v56  ;;  %v4036_v16 = vpop.eup %4035  ;;  %v2771_v54 = vmul.f32 0.6931472, %v4034_v13  ;;  %v2733_v7 = vpop.xlane.xlu2 %2732 }
 0x26e   : > { %v6446_v44 = vpop.xlane.xlu1 %1302  ;;  %v4038_v27 = vpop.eup %4037  ;;  %v2240_v11 = vmul.f32 0.6931472, %v4036_v16  ;;  %4039 = vlog2.f32 %v2733_v7 }
 0x26f   : > { %1678 = vadd.xlane.f32.xlu0 %v1677_v41  ;;  %4041 = vpow2.f32 %v1640_v58  ;;  %v2796_v34 = vadd.f32 %v2771_v54, %v7177_v51  ;;  %v1680_v8 = vadd.f32 %v4038_v27, %v4032_v59  ;;  %v6454_v7 = vpop.xlane.xlu0 %1306 }
 0x270   : > { %4043 = vpow2.f32 %v1642_v20  ;;  %v2265_v56 = vadd.f32 %v2240_v11, %v7179_v5  ;;  %7180 = vst [vmem:[#allocation52_spill] sm:$0xff] %v6454_v7  ;;  %v7182_v11 = vld [vmem:[#allocation109_spill] sm:$0xff] }
 0x271   : > { %v2829_v15 = vsub.f32 %v2796_v34, %v2813_v17  ;;  %v2814_v59 = vmul.f32 2.0, %v7182_v11 }
 0x272   : > { %v2298_v41 = vsub.f32 %v2265_v56, %v2282_v47 }
 0x273   : > { %v2850_v28 = vsel %vm1773_vm3, %v2829_v15, 0.0 }
 0x274   : > { %v4040_v13 = vpop.eup %4039  ;;  %v2851_v12 = vadd.f32 %v2850_v28, %v2849_v36  ;;  %v2319_v16 = vsel %vm1773_vm3, %v2298_v41, 0.0  ;;  %v7183_v41 = vld [vmem:[#allocation65_spill] sm:$0xff] }
 0x275   : > { %v4042_v58 = vpop.eup %4041  ;;  %v2320_v52 = vadd.f32 %v2319_v16, %v2318_v24  ;;  %v2773_v54 = vmul.f32 0.6931472, %v4040_v13  ;;  %v6456_v51 = vpop.xlane.xlu2 %1304  ;;  %v2283_v28 = vmul.f32 2.0, %v7183_v41  ;;  %v7184_v13 = vld [vmem:[#allocation34_spill] sm:$0xff]  ;;  %v7188_v41 = vld [vmem:[#allocation19_spill] sm:$0xff] }
 0x276   : > { %7181 = vst [vmem:[#allocation139_spill] sm:$0xff] %v6456_v51  ;;  %v2202_v20 = vpop.xlane.xlu1 %2201  ;;  %v4044_v57 = vpop.eup %4043 }
 0x277   : > { %1681 = vadd.xlane.f32.xlu0 %v1680_v8  ;;  %4045 = vlog2.f32 %v2202_v20  ;;  %v2797_v27 = vadd.f32 %v2773_v54, %v5998_v49  ;;  %v1689_v34 = vadd.f32 %v4044_v57, %v4042_v58 }
 0x278   : > { %v1652_v8 = vpop.xlane.xlu0 %1651 }
 0x279   : > { %v2830_v17 = vsub.f32 %v2797_v27, %v2814_v59 }
 0x27b   : > { %v2852_v36 = vsel %vm1773_vm3, %v2830_v17, 0.0 }
 0x27c   : > { %v2853_v5 = vadd.f32 %v2852_v36, %v2851_v12 }
 0x27d   : > { %v4046_v47 = vpop.eup %4045  ;;  %v2736_v15 = vpop.xlane.xlu2 %2735 }
 0x27e   : > { %v2242_v56 = vmul.f32 0.6931472, %v4046_v47  ;;  %v2205_v24 = vpop.xlane.xlu1 %2204  ;;  %4047 = vlog2.f32 %v2736_v15  ;;  %v7186_v47 = vld [vmem:[#allocation22_spill] sm:$0xff] }
 0x27f   : > { %1690 = vadd.xlane.f32.xlu0 %v1689_v34  ;;  %4049 = vlog2.f32 %v2205_v24  ;;  %v7185_v34 = vld [vmem:[#allocation116_spill] sm:$0xff] }
 0x280   : > { %v2266_v16 = vadd.f32 %v2242_v56, %v7184_v13  ;;  %4051 = vlog2.f32 %v1652_v8  ;;  %v2815_v36 = vmul.f32 2.0, %v7185_v34  ;;  %v7187_v24 = vld [vmem:[#allocation64_spill] sm:$0xff]  ;;  %v1743_v13 = vmul.f32 2.0, %v6269_v6  ;;  %v7190_v6 = vld [vmem:[#allocation115_spill] sm:$0xff] }
 0x281   : > { %v2284_v8 = vmul.f32 2.0, %v7187_v24 }
 0x282   : > { %v2299_v20 = vsub.f32 %v2266_v16, %v2283_v28  ;;  %v7189_v16 = vld [vmem:[#allocation126_spill] sm:$0xff] }
 0x284   : > { %v2321_v49 = vsel %vm1773_vm3, %v2299_v20, 0.0  ;;  %v4048_v58 = vpop.eup %4047 }
 0x285   : > { %v2322_v54 = vadd.f32 %v2321_v49, %v2320_v52  ;;  %v4050_v57 = vpop.eup %4049  ;;  %v2775_v11 = vmul.f32 0.6931472, %v4048_v58  ;;  %v2739_v59 = vpop.xlane.xlu2 %2738 }
 0x286   : > { %v1646_v12 = vpop.xlane.xlu1 %1645  ;;  %v4052_v27 = vpop.eup %4051  ;;  %v2244_v17 = vmul.f32 0.6931472, %v4050_v57  ;;  %4053 = vlog2.f32 %v2739_v59 }
 0x287   : > { %v2798_v15 = vadd.f32 %v2775_v11, %v7186_v47  ;;  %4055 = vlog2.f32 %v1646_v12  ;;  %v1697_v56 = vmul.f32 0.6931472, %v4052_v27 }
 0x288   : > { %v2267_v28 = vadd.f32 %v2244_v17, %v7188_v41 }
 0x289   : > { %v2831_v52 = vsub.f32 %v2798_v15, %v2815_v36  ;;  %v1726_v20 = vadd.f32 %v1697_v56, %v7189_v16  ;;  %v2816_v36 = vmul.f32 2.0, %v7190_v6  ;;  %v7191_v15 = vld [vmem:[#allocation49_spill] sm:$0xff] }
 0x28a   : > { %v2300_v49 = vsub.f32 %v2267_v28, %v2284_v8  ;;  %v1741_v8 = vmul.f32 2.0, %v6225_v4 }
 0x28b   : > { %v2854_v58 = vsel %vm1773_vm3, %v2831_v52, 0.0  ;;  %v1759_v57 = vsub.f32 %v1726_v20, %v1743_v13 }
 0x28c   : > { %v4054_v59 = vpop.eup %4053  ;;  %v2855_v7 = vadd.f32 %v2854_v58, %v2853_v5  ;;  %v2323_v34 = vsel %vm1773_vm3, %v2300_v49, 0.0 }
 0x28d   : > { %v4056_v11 = vpop.eup %4055  ;;  %v2324_v12 = vadd.f32 %v2323_v34, %v2322_v54  ;;  %v2777_v27 = vmul.f32 0.6931472, %v4054_v59  ;;  %v1649_v47 = vpop.xlane.xlu2 %1648 }
 0x28e   : > { %v2208_v24 = vpop.xlane.xlu1 %2207  ;;  %v1693_v51 = vmul.f32 0.6931472, %v4056_v11  ;;  %4057 = vlog2.f32 %v1649_v47 }
 0x28f   : > { %v2799_v56 = vadd.f32 %v2777_v27, %v7191_v15  ;;  %4059 = vlog2.f32 %v2208_v24  ;;  %v1742_v27 = vmul.f32 2.0, %v6260_v43  ;;  %v1777_v43 = vsel %vm1773_vm3, %v1759_v57, 0.0 }
 0x290   : > { %v1724_v41 = vadd.f32 %v1693_v51, %v6177_v21  ;;  %v7192_v51 = vld [vmem:[#allocation75_spill] sm:$0xff] }
 0x291   : > { %v2832_v5 = vsub.f32 %v2799_v56, %v2816_v36  ;;  %v2285_v47 = vmul.f32 2.0, %v7192_v51  ;;  %v1745_v51 = vmul.f32 2.0, %v6230_v55 }
 0x292   : > { %v1655_v17 = vpop.xlane.xlu0 %1654  ;;  %v1757_v28 = vsub.f32 %v1724_v41, %v1741_v8 }
 0x293   : > { %4061 = vlog2.f32 %v1655_v17  ;;  %v2856_v54 = vsel %vm1773_vm3, %v2832_v5, 0.0 }
 0x294   : > { %v4058_v13 = vpop.eup %4057  ;;  %v2857_v52 = vadd.f32 %v2856_v54, %v2855_v7  ;;  %v1744_v7 = vmul.f32 2.0, %v6295_v9  ;;  %v1774_v15 = vsel %vm1773_vm3, %v1757_v28, 0.0 }
 0x295   : > { %v4060_v16 = vpop.eup %4059  ;;  %v1695_v20 = vmul.f32 0.6931472, %v4058_v13 }
 0x296   : > { %v2742_v49 = vpop.xlane.xlu2 %2741  ;;  %v2211_v58 = vpop.xlane.xlu1 %2210  ;;  %v2246_v34 = vmul.f32 0.6931472, %v4060_v16 }
 0x297   : > { %4063 = vlog2.f32 %v2742_v49  ;;  %v1725_v4 = vadd.f32 %v1695_v20, %v6196_v50 }
 0x298   : > { %4065 = vlog2.f32 %v2211_v58  ;;  %v2268_v24 = vadd.f32 %v2246_v34, %v6023_v40 }
 0x299   : > { %v4062_v59 = vpop.eup %4061  ;;  %v1758_v17 = vsub.f32 %v1725_v4, %v1742_v27  ;;  %v7194_v27 = vld [vmem:[#allocation74_spill] sm:$0xff] }
 0x29a   : > { %v1658_v11 = vpop.xlane.xlu0 %1657  ;;  %v1699_v21 = vmul.f32 0.6931472, %v4062_v59  ;;  %v2301_v36 = vsub.f32 %v2268_v24, %v2285_v47  ;;  %v7193_v59 = vld [vmem:[#allocation114_spill] sm:$0xff]  ;;  %v2286_v4 = vmul.f32 2.0, %v7194_v27 }
 0x29b   : > { %4067 = vlog2.f32 %v1658_v11  ;;  %v1775_v56 = vsel %vm1773_vm3, %v1758_v17, 0.0  ;;  %v2817_v34 = vmul.f32 2.0, %v7193_v59 }
 0x29c   : > { %v1727_v6 = vadd.f32 %v1699_v21, %v6284_v19  ;;  %v1776_v41 = vadd.f32 %v1775_v56, %v1774_v15  ;;  %v2325_v5 = vsel %vm1773_vm3, %v2301_v36, 0.0 }
 0x29d   : > { %v4064_v8 = vpop.eup %4063  ;;  %v2326_v40 = vadd.f32 %v2325_v5, %v2324_v12 }
 0x29e   : > { %v1760_v50 = vsub.f32 %v1727_v6, %v1744_v7  ;;  %v4066_v54 = vpop.eup %4065  ;;  %v2779_v13 = vmul.f32 0.6931472, %v4064_v8  ;;  %v2745_v16 = vpop.xlane.xlu2 %2744  ;;  %v1778_v49 = vadd.f32 %v1777_v43, %v1776_v41 }
 0x29f   : > { %v2214_v9 = vpop.xlane.xlu1 %2213  ;;  %v2248_v58 = vmul.f32 0.6931472, %v4066_v54  ;;  %4069 = vlog2.f32 %v2745_v16 }
 0x2a0   : > { %v1779_v20 = vsel %vm1773_vm3, %v1760_v50, 0.0  ;;  %v2800_v57 = vadd.f32 %v2779_v13, %v7125_v32  ;;  %4071 = vlog2.f32 %v2214_v9  ;;  %v7195_v13 = vld [vmem:[#allocation121_spill] sm:$0xff] }
 0x2a1   : > { %v4068_v19 = vpop.eup %4067  ;;  %v2269_v12 = vadd.f32 %v2248_v58, %v7122_v0  ;;  %v1780_v21 = vadd.f32 %v1779_v20, %v1778_v49  ;;  %v2818_v16 = vmul.f32 2.0, %v7195_v13  ;;  %v7196_v20 = vld [vmem:[#allocation73_spill] sm:$0xff]  ;;  %v6502_v49 = vmul.f32 2.0, %v6446_v44 }
 0x2a2   : > { %v1685_v28 = vpop.xlane.xlu0 %1684  ;;  %v1701_v11 = vmul.f32 0.6931472, %v4068_v19  ;;  %v2833_v47 = vsub.f32 %v2800_v57, %v2817_v34  ;;  %v2287_v19 = vmul.f32 2.0, %v7196_v20 }
 0x2a3   : > { %4073 = vlog2.f32 %v1685_v28  ;;  %v2302_v7 = vsub.f32 %v2269_v12, %v2286_v4 }
 0x2a4   : > { %v1728_v24 = vadd.f32 %v1701_v11, %v6307_v22  ;;  %v2858_v17 = vsel %vm1773_vm3, %v2833_v47, 0.0 }
 0x2a5   : > { %v4070_v36 = vpop.eup %4069  ;;  %v2859_v15 = vadd.f32 %v2858_v17, %v2857_v52  ;;  %v2327_v32 = vsel %vm1773_vm3, %v2302_v7, 0.0 }
 0x2a6   : > { %v1761_v6 = vsub.f32 %v1728_v24, %v1745_v51  ;;  %v4072_v56 = vpop.eup %4071  ;;  %v2328_v43 = vadd.f32 %v2327_v32, %v2326_v40  ;;  %v2781_v50 = vmul.f32 0.6931472, %v4070_v36  ;;  %v2748_v8 = vpop.xlane.xlu2 %2747  ;;  %v7197_v24 = vld [vmem:[#allocation120_spill] sm:$0xff] }
 0x2a7   : > { %v2217_v0 = vpop.xlane.xlu1 %2216  ;;  %v2250_v55 = vmul.f32 0.6931472, %v4072_v56  ;;  %4075 = vlog2.f32 %v2748_v8  ;;  %v2819_v7 = vmul.f32 2.0, %v7197_v24  ;;  %v7198_v36 = vld [vmem:[#allocation84_spill] sm:$0xff]  ;;  %v1746_v56 = vmul.f32 2.0, %v6299_v1 }
 0x2a8   : > { %v1781_v41 = vsel %vm1773_vm3, %v1761_v6, 0.0  ;;  %v2801_v9 = vadd.f32 %v2781_v50, %v6072_v2  ;;  %4077 = vlog2.f32 %v2217_v0 }
 0x2a9   : > { %v4074_v5 = vpop.eup %4073  ;;  %v1782_v54 = vadd.f32 %v1781_v41, %v1780_v21  ;;  %v2270_v40 = vadd.f32 %v2250_v55, %v7128_v26 }
 0x2aa   : > { %v1661_v22 = vpop.xlane.xlu0 %1660  ;;  %v1719_v52 = vmul.f32 0.6931472, %v4074_v5  ;;  %v2834_v58 = vsub.f32 %v2801_v9, %v2818_v16 }
 0x2ab   : > { %4079 = vlog2.f32 %v1661_v22  ;;  %v2303_v59 = vsub.f32 %v2270_v40, %v2287_v19 }
 0x2ac   : > { %v6505_v28 = vadd.f32 %v1719_v52, %v6325_v29  ;;  %v2860_v34 = vsel %vm1773_vm3, %v2834_v58, 0.0 }
 0x2ad   : > { %v4076_v57 = vpop.eup %4075  ;;  %v2861_v11 = vadd.f32 %v2860_v34, %v2859_v15  ;;  %v2329_v27 = vsel %vm1773_vm3, %v2303_v59, 0.0  ;;  %v2288_v15 = vmul.f32 2.0, %v7198_v36  ;;  %v7200_v59 = vld [vmem:[#allocation83_spill] sm:$0xff] }
 0x2ae   : > { %v1770_v2 = vsub.f32 %v6505_v28, %v6502_v49  ;;  %v4078_v4 = vpop.eup %4077  ;;  %v2330_v26 = vadd.f32 %v2329_v27, %v2328_v43  ;;  %v2783_v12 = vmul.f32 0.6931472, %v4076_v57  ;;  %v2751_v21 = vpop.xlane.xlu2 %2750  ;;  %v2289_v34 = vmul.f32 2.0, %v7200_v59  ;;  %v7205_v59 = vld [vmem:[#allocation93_spill] sm:$0xff] }
 0x2af   : > { %v2220_v44 = vpop.xlane.xlu1 %2219  ;;  %v2252_v47 = vmul.f32 0.6931472, %v4078_v4  ;;  %4081 = vlog2.f32 %v2751_v21 }
 0x2b0   : > { %v2802_v17 = vadd.f32 %v2783_v12, %v7136_v45  ;;  %4083 = vlog2.f32 %v2220_v44 }
 0x2b1   : > { %v4080_v51 = vpop.eup %4079  ;;  %v2271_v32 = vadd.f32 %v2252_v47, %v6078_v37 }
 0x2b2   : > { %v6511_v29 = vpop.xlane.xlu0 %1687  ;;  %v1703_v6 = vmul.f32 0.6931472, %v4080_v51  ;;  %v2835_v43 = vsub.f32 %v2802_v17, %v2819_v7 }
 0x2b3   : > { %v2304_v8 = vsub.f32 %v2271_v32, %v2288_v15  ;;  %v7202_v32 = vld [vmem:[#allocation82_spill] sm:$0xff] }
 0x2b4   : > { %v1729_v50 = vadd.f32 %v1703_v6, %v6265_v42  ;;  %v2862_v0 = vsel %vm1773_vm3, %v2835_v43, 0.0  ;;  %v7199_v42 = vld [vmem:[#allocation119_spill] sm:$0xff]  ;;  %v7201_v6 = vld [vmem:[#allocation124_spill] sm:$0xff] }
 0x2b5   : > { %v4082_v5 = vpop.eup %4081  ;;  %v2331_v55 = vsel %vm1773_vm3, %v2304_v8, 0.0  ;;  %v2863_v22 = vadd.f32 %v2862_v0, %v2861_v11  ;;  %v2820_v40 = vmul.f32 2.0, %v7199_v42 }
 0x2b6   : > { %v1762_v41 = vsub.f32 %v1729_v50, %v1746_v56  ;;  %v4084_v45 = vpop.eup %4083  ;;  %v2785_v13 = vmul.f32 0.6931472, %v4082_v5  ;;  %v2754_v16 = vpop.xlane.xlu2 %2753  ;;  %v2332_v37 = vadd.f32 %v2331_v55, %v2330_v26  ;;  %v2290_v56 = vmul.f32 2.0, %v7202_v32 }
 0x2b7   : > { %v2223_v9 = vpop.xlane.xlu1 %2222  ;;  %v2254_v20 = vmul.f32 0.6931472, %v4084_v45  ;;  %4085 = vlog2.f32 %v2754_v16  ;;  %v1747_v50 = vmul.f32 2.0, %v6367_v39  ;;  %v1750_v32 = vmul.f32 2.0, %v6411_v33 }
 0x2b8   : > { %v1783_v52 = vsel %vm1773_vm3, %v1762_v41, 0.0  ;;  %v2803_v58 = vadd.f32 %v2785_v13, %v6093_v38  ;;  %4087 = vlog2.f32 %v2223_v9 }
 0x2b9   : > { %v1784_v1 = vadd.f32 %v1783_v52, %v1782_v54  ;;  %v2272_v57 = vadd.f32 %v2254_v20, %v6089_v61  ;;  %v2821_v61 = vmul.f32 2.0, %v7201_v6 }
 0x2ba   : > { %v1664_v19 = vpop.xlane.xlu0 %1663  ;;  %v2836_v11 = vsub.f32 %v2803_v58, %v2820_v40 }
 0x2bb   : > { %4089 = vlog2.f32 %v1664_v19  ;;  %v2305_v27 = vsub.f32 %v2272_v57, %v2289_v34  ;;  %v7203_v19 = vld [vmem:[#allocation123_spill] sm:$0xff]  ;;  %v2291_v34 = vmul.f32 2.0, %v7205_v59 }
 0x2bc   : > { %v2864_v4 = vsel %vm1773_vm3, %v2836_v11, 0.0  ;;  %v2822_v42 = vmul.f32 2.0, %v7203_v19  ;;  %v1748_v11 = vmul.f32 2.0, %v6391_v18  ;;  %v1749_v18 = vmul.f32 2.0, %v6399_v14  ;;  %v7206_v19 = vld [vmem:[#allocation31_spill] sm:$0xff] }
 0x2bd   : > { %v4086_v12 = vpop.eup %4085  ;;  %v2865_v26 = vadd.f32 %v2864_v4, %v2863_v22  ;;  %v2333_v21 = vsel %vm1773_vm3, %v2305_v27, 0.0 }
 0x2be   : > { %v4088_v54 = vpop.eup %4087  ;;  %v2787_v44 = vmul.f32 0.6931472, %v4086_v12  ;;  %v2757_v51 = vpop.xlane.xlu2 %2756  ;;  %v2334_v24 = vadd.f32 %v2333_v21, %v2332_v37 }
 0x2bf   : > { %v2226_v47 = vpop.xlane.xlu1 %2225  ;;  %v2256_v7 = vmul.f32 0.6931472, %v4088_v54  ;;  %4091 = vlog2.f32 %v2757_v51 }
 0x2c0   : > { %v2804_v36 = vadd.f32 %v2787_v44, %v6108_v63  ;;  %4093 = vlog2.f32 %v2226_v47 }
 0x2c1   : > { %v4090_v38 = vpop.eup %4089  ;;  %v2273_v43 = vadd.f32 %v2256_v7, %v6074_v30 }
 0x2c2   : > { %v1667_v17 = vpop.xlane.xlu0 %1666  ;;  %v1705_v15 = vmul.f32 0.6931472, %v4090_v38  ;;  %v2837_v8 = vsub.f32 %v2804_v36, %v2821_v61 }
 0x2c3   : > { %4095 = vlog2.f32 %v1667_v17  ;;  %v2306_v41 = vsub.f32 %v2273_v43, %v2290_v56 }
 0x2c4   : > { %v1730_v0 = vadd.f32 %v1705_v15, %v6347_v10  ;;  %v2866_v55 = vsel %vm1773_vm3, %v2837_v8, 0.0  ;;  %v7204_v10 = vld [vmem:[#allocation125_spill] sm:$0xff] }
 0x2c5   : > { %v4092_v22 = vpop.eup %4091  ;;  %v2867_v45 = vadd.f32 %v2866_v55, %v2865_v26  ;;  %v2335_v63 = vsel %vm1773_vm3, %v2306_v41, 0.0 }
 0x2c6   : > { %v1763_v5 = vsub.f32 %v1730_v0, %v1747_v50  ;;  %v4094_v13 = vpop.eup %4093  ;;  %v2789_v16 = vmul.f32 0.6931472, %v4092_v22  ;;  %v2336_v52 = vadd.f32 %v2335_v63, %v2334_v24 }
 0x2c7   : > { %v2258_v37 = vmul.f32 0.6931472, %v4094_v13  ;;  %v1752_v13 = vmul.f32 2.0, %v6433_v48 }
 0x2c8   : > { %v1785_v9 = vsel %vm1773_vm3, %v1763_v5, 0.0  ;;  %v2805_v40 = vadd.f32 %v2789_v16, %v7204_v10 }
 0x2c9   : > { %v4096_v30 = vpop.eup %4095  ;;  %v1786_v20 = vadd.f32 %v1785_v9, %v1784_v1  ;;  %v2274_v57 = vadd.f32 %v2258_v37, %v6116_v46 }
 0x2ca   : > { %v1670_v39 = vpop.xlane.xlu0 %1669  ;;  %v1707_v58 = vmul.f32 0.6931472, %v4096_v30  ;;  %v2838_v27 = vsub.f32 %v2805_v40, %v2822_v42  ;;  %v7207_v40 = vld [vmem:[#allocation139_spill] sm:$0xff] }
 0x2cb   : > { %4097 = vlog2.f32 %v1670_v39  ;;  %v2307_v12 = vsub.f32 %v2274_v57, %v2291_v34  ;;  %v1753_v39 = vmul.f32 2.0, %v6444_v60  ;;  %v1755_v48 = vmul.f32 2.0, %v7207_v40  ;;  %v7208_v60 = vld [vmem:[#allocation52_spill] sm:$0xff] }
 0x2cc   : > { %v1731_v4 = vadd.f32 %v1707_v58, %v6377_v3  ;;  %v2868_v26 = vsel %vm1773_vm3, %v2838_v27, 0.0  ;;  %v1799_v27 = vsel %vm1773_vm3, %v1770_v2, 0.0 }
 0x2cd   : > { %v2869_v21 = vadd.f32 %v2868_v26, %v2867_v45  ;;  %v2337_v54 = vsel %vm1773_vm3, %v2307_v12, 0.0  ;;  %v1756_v12 = vmul.f32 2.0, %v7208_v60  ;;  %v7209_v26 = vld [vmem:[#allocation51_spill] sm:$0xff] }
 0x2ce   : > { %v1764_v1 = vsub.f32 %v1731_v4, %v1748_v11  ;;  %v2338_v47 = vadd.f32 %v2337_v54, %v2336_v52 }
 0x2cf   : > { %2870 = vadd.xlane.f32.xlu2 %v2869_v21 }
 0x2d0   : > { %v1787_v51 = vsel %vm1773_vm3, %v1764_v1, 0.0  ;;  %2339 = vadd.xlane.f32.xlu1 %v2338_v47 }
 0x2d1   : > { %v4098_v44 = vpop.eup %4097  ;;  %v1788_v24 = vadd.f32 %v1787_v51, %v1786_v20 }
 0x2d2   : > { %v1709_v38 = vmul.f32 0.6931472, %v4098_v44  ;;  %v1673_v46 = vpop.xlane.xlu0 %1672 }
 0x2d3   : > { %4099 = vlog2.f32 %v1673_v46 }
 0x2d4   : > { %v1732_v3 = vadd.f32 %v1709_v38, %v6389_v35  ;;  %v1751_v35 = vmul.f32 2.0, %v6419_v31 }
 0x2d6   : > { %v1765_v7 = vsub.f32 %v1732_v3, %v1749_v18 }
 0x2d8   : > { %v1789_v17 = vsel %vm1773_vm3, %v1765_v7, 0.0 }
 0x2d9   : > { %v4100_v6 = vpop.eup %4099  ;;  %v1790_v61 = vadd.f32 %v1789_v17, %v1788_v24 }
 0x2da   : > { %v1711_v36 = vmul.f32 0.6931472, %v4100_v6  ;;  %v1676_v15 = vpop.xlane.xlu0 %1675 }
 0x2db   : > { %4101 = vlog2.f32 %v1676_v15 }
 0x2dc   : > { %v1733_v56 = vadd.f32 %v1711_v36, %v6397_v53 }
 0x2de   : > { %v1766_v43 = vsub.f32 %v1733_v56, %v1750_v32 }
 0x2e0   : > { %v1791_v50 = vsel %vm1773_vm3, %v1766_v43, 0.0 }
 0x2e1   : > { %v4102_v8 = vpop.eup %4101  ;;  %v1792_v0 = vadd.f32 %v1791_v50, %v1790_v61 }
 0x2e2   : > { %v1713_v14 = vmul.f32 0.6931472, %v4102_v8  ;;  %v1679_v41 = vpop.xlane.xlu0 %1678 }
 0x2e3   : > { %4103 = vlog2.f32 %v1679_v41 }
 0x2e4   : > { %v1734_v5 = vadd.f32 %v1713_v14, %v6405_v23  ;;  %4105 = vlog2.f32 %v6511_v29 }
 0x2e6   : > { %v1767_v55 = vsub.f32 %v1734_v5, %v1751_v35 }
 0x2e8   : > { %v1793_v22 = vsel %vm1773_vm3, %v1767_v55, 0.0 }
 0x2e9   : > { %v4104_v33 = vpop.eup %4103  ;;  %v1794_v45 = vadd.f32 %v1793_v22, %v1792_v0 }
 0x2ea   : > { %v1715_v53 = vmul.f32 0.6931472, %v4104_v33  ;;  %v1682_v63 = vpop.xlane.xlu0 %1681  ;;  %v4106_v9 = vpop.eup %4105 }
 0x2eb   : > { %4107 = vlog2.f32 %v1682_v63  ;;  %v1721_v30 = vmul.f32 0.6931472, %v4106_v9 }
 0x2ec   : > { %v1735_v16 = vadd.f32 %v1715_v53, %v6417_v62 }
 0x2ed   : > { %v1738_v42 = vadd.f32 %v1721_v30, %v7206_v19 }
 0x2ee   : > { %v1768_v52 = vsub.f32 %v1735_v16, %v1752_v13 }
 0x2ef   : > { %v1771_v62 = vsub.f32 %v1738_v42, %v1755_v48 }
 0x2f0   : > { %v1795_v31 = vsel %vm1773_vm3, %v1768_v52, 0.0 }
 0x2f1   : > { %v4108_v23 = vpop.eup %4107  ;;  %v1796_v37 = vadd.f32 %v1795_v31, %v1794_v45 }
 0x2f2   : > { %v1717_v20 = vmul.f32 0.6931472, %v4108_v23  ;;  %v1691_v29 = vpop.xlane.xlu0 %1690 }
 0x2f3   : > { %4109 = vlog2.f32 %v1691_v29 }
 0x2f4   : > { %v1736_v10 = vadd.f32 %v1717_v20, %v6427_v25  ;;  %v1801_v25 = vsel %vm1773_vm3, %v1771_v62, 0.0 }
 0x2f6   : > { %v1769_v58 = vsub.f32 %v1736_v10, %v1753_v39 }
 0x2f8   : > { %v1797_v59 = vsel %vm1773_vm3, %v1769_v58, 0.0 }
 0x2f9   : > { %v4110_v34 = vpop.eup %4109  ;;  %v1798_v57 = vadd.f32 %v1797_v59, %v1796_v37 }
 0x2fa   : > { %v1723_v11 = vmul.f32 0.6931472, %v4110_v34 }
 0x2fb   : > { %v1800_v4 = vadd.f32 %v1799_v27, %v1798_v57 }
 0x2fc   : > { %v1739_v1 = vadd.f32 %v1723_v11, %v7209_v26 }
 0x2fd   : > { %v1802_v21 = vadd.f32 %v1801_v25, %v1800_v4 }
 0x2fe   : > { %v1772_v54 = vsub.f32 %v1739_v1, %v1756_v12 }
 0x300   : > { %v1803_v44 = vsel %vm1773_vm3, %v1772_v54, 0.0 }
 0x301   : > { %v1804_v51 = vadd.f32 %v1803_v44, %v1802_v21 }
 0x303   : > { %1805 = vadd.xlane.f32.xlu0 %v1804_v51 }
 0x342   : > { %v2871_v24 = vpop.xlane.xlu2 %2870 }
 0x343   : > { %v2340_v47 = vpop.xlane.xlu1 %2339  ;;  %v2872_v46 = vrot.slane %v2871_v24, 4 }
 0x344   : > { %v2341_v38 = vrot.slane %v2340_v47, 4 }
 0x345   : > { %v2873_v28 = vadd.f32 %v2872_v46, %v2871_v24 }
 0x346   : > { %v2342_v49 = vadd.f32 %v2341_v38, %v2340_v47 }
 0x347   : > { %v2874_v3 = vrot.slane %v2873_v28, 2 }
 0x348   : > { %v2343_v2 = vrot.slane %v2342_v49, 2 }
 0x349   : > { %v2875_v61 = vadd.f32 %v2874_v3, %v2873_v28 }
 0x34a   : > { %v2344_v6 = vadd.f32 %v2343_v2, %v2342_v49 }
 0x34b   : > { %v2876_v43 = vrot.slane %v2875_v61, 1 }
 0x34c   : > { %v2345_v32 = vrot.slane %v2344_v6, 1 }
 0x34d   : > { %v2877_v0 = vadd.f32 %v2876_v43, %v2875_v61 }
 0x34e   : > { %v2346_v8 = vadd.f32 %v2345_v32, %v2344_v6 }
 0x376   : > { %v1806_v18 = vpop.xlane.xlu0 %1805 }
 0x377   : > { %v1807_v7 = vrot.slane %v1806_v18, 4 }
 0x379   : > { %v1808_v17 = vadd.f32 %v1807_v7, %v1806_v18 }
 0x37b   : > { %v1809_v36 = vrot.slane %v1808_v17, 2 }
 0x37d   : > { %v1810_v15 = vadd.f32 %v1809_v36, %v1808_v17 }
 0x37f   : > { %v1811_v56 = vrot.slane %v1810_v15, 1 }
 0x381   : > { %v1812_v50 = vadd.f32 %v1811_v56, %v1810_v15 }
 0x383   : > { %3554 = vpush %v1812_v50 }
 0x384   : > { %3556 = vpush %v2346_v8 }
 0x385   : > { %3558 = vpush %v2877_v0 }
 0x3b4   : > { %s3555_s17 = spop %3554 }
 0x3b5   : > { %s1814_s20 = sadd.f32 %s3555_s17, %s1740_s26  ;;  %s3557_s10 = spop %3556 }
 0x3b6   : > { %s2348_s18 = sadd.f32 %s3557_s10, %s3431_s23  ;;  %s3559_s22 = spop %3558 }
 0x3b7   : > { %1816 = sst [smem:[#allocation2]] %s1814_s20  ;;  %3100 = sbr.rel (%p3433_p6) target bundleno = 1170 (0x492), region = 105 }
 0x3b8   : > { %2350 = sst [smem:[#allocation2 + $0x1]] %s2348_s18 }
 0x3b9   : > { %s2879_s28 = sadd.f32 %s3559_s22, %s3432_s12 }
 0x3ba   : > { %s3106_s29 = sld [smem:[#allocation2]] (!%p3433_p6) }
 0x3bb   : > { %2881 = sst [smem:[#allocation2 + $0x2]] %s2879_s28 }
 0x3bc   : > { %v3101_v14 = vld [vmem:[#allocation4] sm:$0x3]  ;;  %v3153_v41 = vld [vmem:[#allocation4 + $0x4] sm:$0x3]  ;;  %v3126_v35 = vld [vmem:[#allocation4 + $0x2] sm:$0x3] }
 0x3bd   : > { %4111 = vlog2.f32 %v3101_v14  ;;  %v3104_v55 = vld [vmem:[#allocation3] sm:$0x3]  ;;  %v3156_v45 = vld [vmem:[#allocation3 + $0x4] sm:$0x3]  ;;  %v3129_v13 = vld [vmem:[#allocation3 + $0x2] sm:$0x3] }
 0x3be   : > { %4113 = vlog2.f32 %v3153_v41  ;;  %s3434_s14 = sld [smem:[#allocation2 + $0x1]] }
 0x3bf   : > { %4115 = vlog2.f32 %v3126_v35  ;;  %s3435_s27 = sld [smem:[#allocation2 + $0x2]] }
 0x3c3   : > { %v4112_v5 = vpop.eup %4111 }
 0x3c4   : > { %v4114_v22 = vpop.eup %4113  ;;  %v3103_v33 = vmul.f32 0.6931472, %v4112_v5 }
 0x3c5   : > { %v4116_v53 = vpop.eup %4115  ;;  %v3155_v63 = vmul.f32 0.6931472, %v4114_v22 }
 0x3c6   : > { %v3105_v16 = vadd.f32 %v3104_v55, %v3103_v33  ;;  %v3128_v9 = vmul.f32 0.6931472, %v4116_v53 }
 0x3c7   : > { %v3157_v52 = vadd.f32 %v3156_v45, %v3155_v63 }
 0x3c8   : > { %v3108_v30 = vperm.slane %v3105_v16, 0  ;;  %v3109_v31 = vperm.slane %v3105_v16, 1  ;;  %v3130_v23 = vadd.f32 %v3129_v13, %v3128_v9 }
 0x3c9   : > { %v3160_v37 = vperm.slane %v3157_v52, 0  ;;  %v3161_v20 = vperm.slane %v3157_v52, 1 }
 0x3ca   : > { %v3112_v29 = vsel %vm2001_vm1, %v3108_v30, 0.0  ;;  %v3113_v39 = vsel %vm2001_vm1, %v3109_v31, 0.0  ;;  %v3133_v19 = vperm.slane %v3130_v23, 0  ;;  %v3134_v42 = vperm.slane %v3130_v23, 1 }
 0x3cb   : > { %v3114_v10 = vadd.f32 %v3113_v39, %v3112_v29  ;;  %v3164_v40 = vsel %vm2001_vm1, %v3160_v37, 0.0  ;;  %v3165_v48 = vsel %vm2001_vm1, %v3161_v20, 0.0 }
 0x3cc   : > { %v3166_v58 = vadd.f32 %v3165_v48, %v3164_v40  ;;  %v3137_v62 = vsel %vm2001_vm1, %v3133_v19, 0.0  ;;  %v3138_v59 = vsel %vm2001_vm1, %v3134_v42, 0.0 }
 0x3cd   : > { %3115 = vadd.xlane.f32.xlu0 %v3114_v10  ;;  %v3139_v34 = vadd.f32 %v3138_v59, %v3137_v62 }
 0x3ce   : > { %3167 = vadd.xlane.f32.xlu1 %v3166_v58 }
 0x3d5   : > { %3140 = vadd.xlane.f32.xlu0 %v3139_v34 }
 0x440   : > { %v3116_v57 = vpop.xlane.xlu0 %3115 }
 0x441   : > { %v3117_v11 = vrot.slane %v3116_v57, 4  ;;  %v3168_v27 = vpop.xlane.xlu1 %3167 }
 0x442   : > { %v3169_v4 = vrot.slane %v3168_v27, 4 }
 0x443   : > { %v3118_v60 = vadd.f32 %v3117_v11, %v3116_v57 }
 0x444   : > { %v3170_v12 = vadd.f32 %v3169_v4, %v3168_v27 }
 0x445   : > { %v3119_v26 = vrot.slane %v3118_v60, 2 }
 0x446   : > { %v3171_v25 = vrot.slane %v3170_v12, 2 }
 0x447   : > { %v3120_v1 = vadd.f32 %v3119_v26, %v3118_v60 }
 0x448   : > { %v3141_v21 = vpop.xlane.xlu0 %3140  ;;  %v3172_v24 = vadd.f32 %v3171_v25, %v3170_v12 }
 0x449   : > { %v3142_v54 = vrot.slane %v3141_v21, 4  ;;  %v3121_v44 = vrot.slane %v3120_v1, 1 }
 0x44a   : > { %v3173_v49 = vrot.slane %v3172_v24, 1 }
 0x44b   : > { %v3143_v51 = vadd.f32 %v3142_v54, %v3141_v21  ;;  %v3122_v47 = vadd.f32 %v3121_v44, %v3120_v1 }
 0x44c   : > { %v3174_v18 = vadd.f32 %v3173_v49, %v3172_v24 }
 0x44d   : > { %v3144_v38 = vrot.slane %v3143_v51, 2  ;;  %3560 = vpush %v3122_v47 }
 0x44f   : > { %v3145_v46 = vadd.f32 %v3144_v38, %v3143_v51 }
 0x451   : > { %v3146_v28 = vrot.slane %v3145_v46, 1 }
 0x453   : > { %v3147_v2 = vadd.f32 %v3146_v28, %v3145_v46 }
 0x455   : > { %3562 = vpush %v3147_v2 }
 0x456   : > { %3564 = vpush %v3174_v18 }
 0x47e   : > { %s3561_s13 = spop %3560 }
 0x47f   : > { %s3124_s19 = sadd.f32 %s3561_s13, %s3106_s29 }
 0x481   : > { %s3125_s16 = smul.f32 0.00390625, %s3124_s19 }
 0x486   : > { %s3563_s21 = spop %3562 }
 0x487   : > { %s3149_s25 = sadd.f32 %s3563_s21, %s3434_s14  ;;  %s3565_s24 = spop %3564 }
 0x488   : > { %s3176_s26 = sadd.f32 %s3565_s24, %s3435_s27 }
 0x489   : > { %s3150_s23 = smul.f32 0.00390625, %s3149_s25 }
 0x48a   : > { %s3177_s12 = smul.f32 0.00390625, %s3176_s26 }
 0x48b   : > { %s3151_s17 = smul.f32 0.5, %s3150_s23 }
 0x48c   : > { %s3178_s10 = smul.f32 0.25, %s3177_s12 }
 0x48d   : > { %s3152_s20 = sadd.f32 %s3151_s17, %s3125_s16 }
 0x48f   : > { %s3179_s18 = sadd.f32 %s3178_s10, %s3152_s20 }
 0x491   : > { %3181 = sst [smem:[#allocation10]] %s3179_s18 }
 0x492 PF: > { %p3572_p7 = scmp.eq.s32.totalorder %s4273_s0, 1  ;;  %s3188_s1 = sshll.u32 %s6604_s8, 4  ;;  %s3189_s1 = int_to_ptr.hbm [resolvable:$true] %s3188_s1 }
 0x493   : > { %s4205_s29 = smov [#allocation10]  }
 0x494   : > { %3569 = dma.smem_to_hbm (%p3572_p7), %s4205_s29, 16, %s3189_s1, [#allocation9]  }
 0x495   : > { %4180 = dma.done.wait (%p3572_p7), [#allocation9], 16  }
 0x496   : > { %4182 = vsyncadd (%p3572_p7), [#allocation9], 4294967280 }
 0x497   : > { %3197 = sfence }
 0x498 PF: > { %p20_p8 = scmp.ge.s32.totalorder %s4276_s11, 4   ;;  %s7210_s29 = smov %s4189_s30 }
 0x499   : > { %s7211_s30 = smov %s4193_s9  ;;  %s7212_s9 = smov %s4287_s15 }
 0x49a   : > { %s7213_s10 = smov %s4276_s11  ;;  %22 = sbr.rel (!%p20_p8) target bundleno = 7 (0x7), region = 169 }
 0x49f   :  { %3203 = vsyncpa [#allocation8], 1 }
 0x4a0   :  { %3205 = vsyncpa [#allocation8 + $0x1], 1 }
 0x4a1   :  { %3206 = vsyncpa [#allocation9], 1 }
 0x4a2   :  { %3208 = vsyncpa [#allocation9 + $0x1], 1 }

</bundles_post_ra>
